<compile_context>
chip_gen: v5e
topology: v5e:2x2
jax: 0.10.0
libtpu: 0.0.40
codegen_flags: <defaults>
</compile_context>

<pallas_src>
import math
import jax
import jax.numpy as jnp
from jax import lax
from jax.experimental import pallas as pl
from jax.experimental.pallas import tpu as pltpu

RANDOMSAMPLE = 512        # reparameterlizedRNN.randomsample
G_SCALE = 0.01            # reparameterlizedRNN.g
LANE = 128
SUBLANE = 8
HIGHEST = jax.lax.Precision.HIGHEST


def _round_up(x, m):
    return ((x + m - 1) // m) * m


def _pad_last(x, target):
    pad = target - x.shape[-1]
    if pad == 0:
        return x
    cfg = [(0, 0)] * (x.ndim - 1) + [(0, pad)]
    return jnp.pad(x, cfg)


def make_rnn_kernel(Tc, Bb, N, N_Ip, Op, alpha):
    one_minus_alpha = 1.0 - alpha
    rows = Tc * Bb
    unroll = max(1, min(8, Tc))

    def kernel(u_ref, noise_ref, Iw_ref, Vw_ref, Ua_ref, Ow_ref,
               out_ref, h_ref, a_slab, drive_slab):
        # Hidden state persists in VMEM scratch across time chunks; re-init at
        # the first chunk of every batch block (h0 is a zero, non-trainable
        # parameter).
        @pl.when(pl.program_id(1) == 0)
        def _():
            h_ref[...] = jnp.zeros_like(h_ref)

        # ---- chunk preamble (off the serial per-step chain) ---------------
        # drive[t] = alpha*(u[t] @ In^T + noise[t]).  The external matmul has
        # tiny K (= padded N_I) and runs once per chunk at full f32 accuracy.
        u2 = u_ref[...].reshape(rows, N_Ip)
        ext = jnp.dot(u2, Iw_ref[...], precision=HIGHEST,
                      preferred_element_type=jnp.float32)             # (rows, N)
        drive_slab[...] = ext + alpha * noise_ref[...].reshape(rows, N)

        Vw = Vw_ref[...]        # (N, Rp)  bf16, rows pre-scaled by alpha_p/rs
        Ua = Ua_ref[...]        # (Rp, N)  bf16, pre-scaled by the leak rate

        # ---- serial recurrence: single-pass bf16 MXU dots, f32 state ------
        def step(s, carry):
            h, a = carry                                 # f32 (Bb, N); a==tanh(h)
            row = pl.multiple_of(s * Bb, Bb)             # Bb is a multiple of 8
            sel = jnp.dot(a.astype(jnp.bfloat16), Vw,
                          preferred_element_type=jnp.float32)          # (Bb, Rp)
            rec = jnp.dot(sel.astype(jnp.bfloat16), Ua,
                          preferred_element_type=jnp.float32)          # (Bb, N)
            h = one_minus_alpha * h + rec + drive_slab[pl.ds(row, Bb), :]
            a = jnp.tanh(h)                              # one tanh per step
            a_slab[pl.ds(row, Bb), :] = a                # stash tanh(h_{t+1})
            return h, a

        h0 = h_ref[...]
        h_fin, _ = lax.fori_loop(0, Tc, step, (h0, jnp.tanh(h0)), unroll=unroll)
        h_ref[...] = h_fin

        # ---- deferred readout: one (rows, N) x (N, Op) matmul per chunk,
        # stored as a lane-dense, sublane-aligned block.
        y = jnp.dot(a_slab[...], Ow_ref[...], precision=HIGHEST,
                    preferred_element_type=jnp.float32)
        out_ref[...] = y.reshape(Tc, Bb, Op)

    return kernel


def _get_axes(G, mu, C, noise_loading, N_I, N_R, N_O):
    """Glue: alpha_p / loading-vector construction (masks are all-ones)."""
    alpha_p = jax.nn.softmax(G)
    loading = jnp.einsum('pnr,pkr->pnk', noise_loading, C,
                         precision=HIGHEST) + mu[:, None, :]
    ax_I = loading[..., :N_I]
    ax_U = loading[..., N_I:N_I + N_R]
    ax_V = loading[..., N_I + N_R:N_I + 2 * N_R]
    ax_O = loading[..., N_I + 2 * N_R:]
    return alpha_p, ax_I, ax_U, ax_V, ax_O


def reparam_rnn_forward_pallas(u, G, mu, C, noise_loading, noise_rec,
                               N_I, N_R, N_O, tau, dt,
                               t_chunk=64, batch_blocks=1):
    B, T, _ = u.shape
    N_pop = G.shape[0]
    rs = RANDOMSAMPLE
    N = N_pop * rs
    alpha = float(dt / tau)

    alpha_p, ax_I, ax_U, ax_V, ax_O = _get_axes(G, mu, C, noise_loading,
                                                N_I, N_R, N_O)
    ax_I = ax_I.reshape(N, N_I)
    ax_U = ax_U.reshape(N, N_R)
    ax_V = ax_V.reshape(N, N_R)
    ax_O = ax_O.reshape(N, N_O)

    Rp = _round_up(N_R, LANE)
    Op = _round_up(N_O, LANE)
    N_Ip = _round_up(N_I, SUBLANE)

    # Fold alpha_p[pop(n)], 1/randomsample and alpha into the weights offline.
    w_n = jnp.repeat(alpha_p, rs).astype(jnp.float32)                  # (N,)
    scale = (w_n / rs)[:, None]                                        # (N, 1)
    Vw = _pad_last(ax_V * scale, Rp).astype(jnp.bfloat16)              # (N, Rp)
    Ua = (alpha * _pad_last(ax_U, Rp)).T.astype(jnp.bfloat16)          # (Rp, N)
    Ow = _pad_last(ax_O * scale, Op).astype(jnp.float32)               # (N, Op)
    Iw = (alpha * _pad_last(ax_I, N_Ip)).T.astype(jnp.float32)         # (N_Ip, N)

    # Batch padded to a sublane multiple; optional batch-block split for
    # megacore (v7x: batch_blocks=2 when B>=16).
    nb = max(1, int(batch_blocks))
    Bb = _round_up(max(1, -(-B // nb)), SUBLANE)
    B_pad = Bb * nb

    Tc = max(1, min(int(t_chunk), T))
    T_pad = _round_up(T, Tc)
    n_chunks = T_pad // Tc

    # (T, B)-major streams for contiguous per-step rows inside a chunk.
    # TODO(synk): for very large T, generate the recurrent noise directly in
    # (T, B, N) order (or in-kernel via pltpu.prng_*) to avoid this transpose
    # pass over the dominant HBM stream.
    u_t = jnp.transpose(u.astype(jnp.float32), (1, 0, 2))              # (T, B, N_I)
    u_t = jnp.pad(u_t, ((0, T_pad - T), (0, B_pad - B), (0, N_Ip - N_I)))
    noise_t = jnp.transpose(noise_rec.reshape(B, T, N).astype(jnp.float32),
                            (1, 0, 2))                                 # (T, B, N)
    noise_t = jnp.pad(noise_t, ((0, T_pad - T), (0, B_pad - B), (0, 0)))

    # VMEM budget estimate -> explicit scoped-VMEM limit (clamped to 64 MiB so
    # it is valid on every generation incl. v7x's 64 MiB/TC).
    f32b = 4
    blk_in = Tc * Bb * (N + LANE) * f32b                 # noise + (lane-padded) u
    blk_out = Tc * Bb * Op * f32b
    weights = 2 * (N * Rp * 2) + (N * Op + N_Ip * N) * f32b
    scratch = (Bb * N + 2 * Tc * Bb * N) * f32b
    est = 2 * (blk_in + blk_out) + 2 * weights + scratch
    vmem_limit = int(min(max(est + (8 << 20), 32 << 20), 64 << 20))

    kernel = make_rnn_kernel(Tc, Bb, N, N_Ip, Op, alpha)
    out3 = pl.pallas_call(
        kernel,
        out_shape=jax.ShapeDtypeStruct((T_pad, B_pad, Op), jnp.float32),
        grid_spec=pltpu.PrefetchScalarGridSpec(
            num_scalar_prefetch=0,
            grid=(nb, n_chunks),
            in_specs=[
                pl.BlockSpec((Tc, Bb, N_Ip), lambda b, c: (c, b, 0)),   # u
                pl.BlockSpec((Tc, Bb, N), lambda b, c: (c, b, 0)),      # noise
                pl.BlockSpec((N_Ip, N), lambda b, c: (0, 0)),           # Iw
                pl.BlockSpec((N, Rp), lambda b, c: (0, 0)),             # Vw
                pl.BlockSpec((Rp, N), lambda b, c: (0, 0)),             # Ua
                pl.BlockSpec((N, Op), lambda b, c: (0, 0)),             # Ow
            ],
            out_specs=pl.BlockSpec((Tc, Bb, Op), lambda b, c: (c, b, 0)),
            scratch_shapes=[
                pltpu.VMEM((Bb, N), jnp.float32),          # h carried over chunks
                pltpu.VMEM((Tc * Bb, N), jnp.float32),     # tanh(h) slab (readout)
                pltpu.VMEM((Tc * Bb, N), jnp.float32),     # per-chunk drive slab
            ],
        ),
        compiler_params=pltpu.CompilerParams(
            dimension_semantics=("parallel", "arbitrary"),
            vmem_limit_bytes=vmem_limit,
        ),
    )(u_t, noise_t, Iw, Vw, Ua, Ow)

    # Row t' of out3 holds the readout of tanh(h_{t'+1}).
    out = jnp.transpose(out3[:T, :B, :N_O], (1, 0, 2))                 # (B, T, N_O)
    # Readout at t = 0 uses tanh(h0) = 0 because h0 is a zero non-trainable param.
    # TODO(synk): if h0 ever becomes nonzero/trainable, seed h_ref from it and
    # emit tanh(h0) @ Ow here instead of zeros.
    out0 = jnp.zeros((B, 1, N_O), jnp.float32)
    return jnp.concatenate([out0, out], axis=1)                        # (B, T+1, N_O)


def reparam_rnn_forward_ref(u, G, mu, C, noise_loading, noise_rec,
                            N_I, N_R, N_O, tau, dt):
    """Pure-JAX mirror of the PyTorch forward, for verification."""
    B, T, _ = u.shape
    rs = RANDOMSAMPLE
    alpha = dt / tau
    alpha_p, ax_I, ax_U, ax_V, ax_O = _get_axes(G, mu, C, noise_loading,
                                                N_I, N_R, N_O)
    hidden = jnp.zeros((B, G.shape[0], rs), jnp.float32)
    h_t = [hidden]
    act = jnp.tanh
    for t in range(T):
        External = jnp.einsum('bi,pni->bpn', u[:, t], ax_I, precision=HIGHEST)
        Selection = jnp.einsum('p,pnr,bpn->br', alpha_p, ax_V, act(hidden),
                               precision=HIGHEST) / rs
        Recurrence = jnp.einsum('br,pnr->bpn', Selection, ax_U, precision=HIGHEST)
        hidden = (1 - alpha) * hidden + alpha * (Recurrence + External
                                                 + noise_rec[:, t])
        h_t.append(hidden)
    hidden_t = jnp.stack(h_t, axis=1)                     # (B, T+1, P, rs)
    out_t = jnp.einsum('p,pno,btpn->bto', alpha_p, ax_O, act(hidden_t),
                       precision=HIGHEST) / rs
    return out_t


if __name__ == "__main__":
    # hyper: N_pop, N_I, N_R, N_O, tau, act_func=tanh
    N_pop, N_I, N_R, N_O = 2, 3, 2, 2
    N_F = N_I + 2 * N_R + N_O
    N_sample = N_F
    tau, dt, g_rec = 100.0, 10.0, 0.02
    B, T = 2, 10

    key = jax.random.PRNGKey(0)
    k_g, k_mu, k_c, k_load, k_u, k_noise = jax.random.split(key, 6)

    # Deterministic parameter init (shapes from reparameterlizedRNN.__init__)
    G = 0.1 * jax.random.normal(k_g, (N_pop,), jnp.float32)
    mu = 0.5 * jax.random.normal(k_mu, (N_pop, N_F), jnp.float32)
    C = (G_SCALE * jnp.tile(jnp.eye(N_F, N_sample, dtype=jnp.float32)[None],
                            (N_pop, 1, 1))
         + 0.05 * jax.random.normal(k_c, (N_pop, N_F, N_sample), jnp.float32))
    # reset_noise_loading(): standardized gaussian loading directions
    nl = jax.random.normal(k_load, (N_pop, RANDOMSAMPLE, N_sample), jnp.float32)
    nl = (nl - nl.mean(axis=1, keepdims=True)) / nl.std(axis=1, keepdims=True,
                                                        ddof=1)

    u = jax.random.normal(k_u, (B, T, N_I), jnp.float32)
    alpha = dt / tau
    # In the module Noise_rec is drawn inside forward; passed explicitly here
    # so the Pallas kernel and the reference see identical noise.
    noise_rec = (math.sqrt(2.0 / alpha) * g_rec
                 * jax.random.normal(k_noise, (B, T, N_pop, RANDOMSAMPLE),
                                     jnp.float32))

    # t_chunk=4 -> 3 time chunks with T padded 10 -> 12: exercises the
    # VMEM-carried hidden state, batch padding (2 -> 8) and time padding.
    out = reparam_rnn_forward_pallas(u, G, mu, C, nl, noise_rec,
                                     N_I, N_R, N_O, tau, dt, t_chunk=4)
    out = jax.block_until_ready(out)

    ref = reparam_rnn_forward_ref(u, G, mu, C, nl, noise_rec,
                                  N_I, N_R, N_O, tau, dt)
    assert out.shape == (B, T + 1, N_O), out.shape
    max_err = float(jnp.max(jnp.abs(out - ref)))
    # bf16 single-pass MXU recurrence vs f32 HIGHEST reference: expected error
    # ~1e-4; structural bugs would be O(1e-1).
    assert jnp.allclose(out, ref, rtol=2e-3, atol=5e-4), max_err
    print("KERNEL_OK")
</pallas_src>

<mosaic_0001>
module attributes {stable_mosaic.version = 11 : i64} {
  func.func @kernel(%arg0: i32, %arg1: i32, %arg2: memref<4x8x8xf32, #tpu.memory_space<vmem>>, %arg3: memref<4x8x1024xf32, #tpu.memory_space<vmem>>, %arg4: memref<8x1024xf32, #tpu.memory_space<vmem>>, %arg5: memref<1024x128xbf16, #tpu.memory_space<vmem>>, %arg6: memref<128x1024xbf16, #tpu.memory_space<vmem>>, %arg7: memref<1024x128xf32, #tpu.memory_space<vmem>>, %arg8: memref<4x8x128xf32, #tpu.memory_space<vmem>>, %arg9: memref<8x1024xf32, #tpu.memory_space<vmem>>, %arg10: memref<32x1024xf32, #tpu.memory_space<vmem>>, %arg11: memref<32x1024xf32, #tpu.memory_space<vmem>>) attributes {dimension_semantics = [#tpu.dimension_semantics<parallel>, #tpu.dimension_semantics<arbitrary>], iteration_bounds = array<i64: 1, 3>, scalar_prefetch = 0 : i64, scratch_operands = 3 : i64, tpu.core_type = #tpu.core_type<tc>, window_params = [{transform_indices = @transform_0, window_bounds = array<i64: 4, 8, 8>}, {transform_indices = @transform_1, window_bounds = array<i64: 4, 8, 1024>}, {pipeline_mode = #tpu.pipeline_mode<synchronous>, transform_indices = @transform_2, window_bounds = array<i64: 8, 1024>}, {pipeline_mode = #tpu.pipeline_mode<synchronous>, transform_indices = @transform_3, window_bounds = array<i64: 1024, 128>}, {pipeline_mode = #tpu.pipeline_mode<synchronous>, transform_indices = @transform_4, window_bounds = array<i64: 128, 1024>}, {pipeline_mode = #tpu.pipeline_mode<synchronous>, transform_indices = @transform_5, window_bounds = array<i64: 1024, 128>}, {transform_indices = @transform_6, window_bounds = array<i64: 4, 8, 128>}]} {
    %c0_i32 = arith.constant 0 : i32
    %0 = arith.cmpi eq, %arg1, %c0_i32 : i32
    %1 = arith.extui %0 : i1 to i32
    %c0_i32_0 = arith.constant 0 : i32
    %2 = arith.cmpi ne, %1, %c0_i32_0 : i32
    scf.if %2 {
      %cst_51 = arith.constant 0.000000e+00 : f32
      %83 = vector.broadcast %cst_51 : f32 to vector<8x1024xf32>
      %c0_52 = arith.constant 0 : index
      %c0_53 = arith.constant 0 : index
      %84 = vector.load %arg9[%c0_52, %c0_53] : memref<8x1024xf32, #tpu.memory_space<vmem>>, vector<8x1024xf32>
      tpu.vector_store %arg9[%c0_52, %c0_53], %83 {strides = array<i32>} : memref<8x1024xf32, #tpu.memory_space<vmem>>, vector<8x1024xf32>,
    } else {
    }
    %c0 = arith.constant 0 : index
    %c0_1 = arith.constant 0 : index
    %c0_2 = arith.constant 0 : index
    %3 = vector.load %arg2[%c0, %c0_1, %c0_2] : memref<4x8x8xf32, #tpu.memory_space<vmem>>, vector<4x8x8xf32>
    %4 = vector.shape_cast %3 : vector<4x8x8xf32> to vector<32x8xf32>
    %c0_3 = arith.constant 0 : index
    %c0_4 = arith.constant 0 : index
    %5 = vector.load %arg4[%c0_3, %c0_4] : memref<8x1024xf32, #tpu.memory_space<vmem>>, vector<8x1024xf32>
    %cst = arith.constant dense<0.000000e+00> : vector<32x1024xf32>
    %6 = tpu.matmul %4, %5, %cst {dimension_numbers = #tpu.dot_dimension_numbers<[1], [0], [0], [1], [0, 0, 1, 1], [], []>, precision = #tpu.contract_precision<fp32>} : vector<32x8xf32>, vector<8x1024xf32>, vector<32x1024xf32> -> vector<32x1024xf32>
    %c0_5 = arith.constant 0 : index
    %c0_6 = arith.constant 0 : index
    %c0_7 = arith.constant 0 : index
    %7 = vector.load %arg3[%c0_5, %c0_6, %c0_7] : memref<4x8x1024xf32, #tpu.memory_space<vmem>>, vector<4x8x1024xf32>
    %8 = vector.shape_cast %7 : vector<4x8x1024xf32> to vector<32x1024xf32>
    %cst_8 = arith.constant 1.000000e-01 : f32
    %9 = vector.broadcast %cst_8 : f32 to vector<32x1024xf32>
    %10 = arith.mulf %9, %8 : vector<32x1024xf32>
    %11 = arith.addf %6, %10 : vector<32x1024xf32>
    %c0_9 = arith.constant 0 : index
    %c0_10 = arith.constant 0 : index
    %12 = vector.load %arg11[%c0_9, %c0_10] : memref<32x1024xf32, #tpu.memory_space<vmem>>, vector<32x1024xf32>
    tpu.vector_store %arg11[%c0_9, %c0_10], %11 {strides = array<i32>} : memref<32x1024xf32, #tpu.memory_space<vmem>>, vector<32x1024xf32>,
    %c0_11 = arith.constant 0 : index
    %c0_12 = arith.constant 0 : index
    %13 = vector.load %arg5[%c0_11, %c0_12] : memref<1024x128xbf16, #tpu.memory_space<vmem>>, vector<1024x128xbf16>
    %c0_13 = arith.constant 0 : index
    %c0_14 = arith.constant 0 : index
    %14 = vector.load %arg6[%c0_13, %c0_14] : memref<128x1024xbf16, #tpu.memory_space<vmem>>, vector<128x1024xbf16>
    %c0_15 = arith.constant 0 : index
    %c0_16 = arith.constant 0 : index
    %15 = vector.load %arg9[%c0_15, %c0_16] : memref<8x1024xf32, #tpu.memory_space<vmem>>, vector<8x1024xf32>
    %16 = math.tanh %15 : vector<8x1024xf32>
    %c0_i32_17 = arith.constant 0 : i32
    %c8_i32 = arith.constant 8 : i32
    %17 = arith.muli %c0_i32_17, %c8_i32 : i32
    %18 = tpu.assume_multiple %17, 8 : i32
    %19 = arith.truncf %16 : vector<8x1024xf32> to vector<8x1024xbf16>
    %cst_18 = arith.constant dense<0.000000e+00> : vector<8x128xf32>
    %20 = tpu.matmul %19, %13, %cst_18 {dimension_numbers = #tpu.dot_dimension_numbers<[1], [0], [0], [1], [0, 0, 1, 1], [], []>} : vector<8x1024xbf16>, vector<1024x128xbf16>, vector<8x128xf32> -> vector<8x128xf32>
    %21 = arith.truncf %20 : vector<8x128xf32> to vector<8x128xbf16>
    %cst_19 = arith.constant dense<0.000000e+00> : vector<8x1024xf32>
    %22 = tpu.matmul %21, %14, %cst_19 {dimension_numbers = #tpu.dot_dimension_numbers<[1], [0], [0], [1], [0, 0, 1, 1], [], []>} : vector<8x128xbf16>, vector<128x1024xbf16>, vector<8x1024xf32> -> vector<8x1024xf32>
    %cst_20 = arith.constant 0.899999976 : f32
    %23 = vector.broadcast %cst_20 : f32 to vector<8x1024xf32>
    %24 = arith.mulf %23, %15 : vector<8x1024xf32>
    %25 = arith.addf %24, %22 : vector<8x1024xf32>
    %26 = arith.index_cast %18 : i32 to index
    %c0_21 = arith.constant 0 : index
    %27 = vector.load %arg11[%26, %c0_21] : memref<32x1024xf32, #tpu.memory_space<vmem>>, vector<8x1024xf32>
    %28 = arith.addf %25, %27 : vector<8x1024xf32>
    %29 = math.tanh %28 : vector<8x1024xf32>
    %30 = arith.index_cast %18 : i32 to index
    %c0_22 = arith.constant 0 : index
    %31 = vector.load %arg10[%30, %c0_22] : memref<32x1024xf32, #tpu.memory_space<vmem>>, vector<8x1024xf32>
    tpu.vector_store %arg10[%30, %c0_22], %29 {strides = array<i32>} : memref<32x1024xf32, #tpu.memory_space<vmem>>, vector<8x1024xf32>,
    %c1_i32 = arith.constant 1 : i32
    %c8_i32_23 = arith.constant 8 : i32
    %32 = arith.muli %c1_i32, %c8_i32_23 : i32
    %33 = tpu.assume_multiple %32, 8 : i32
    %34 = arith.truncf %29 : vector<8x1024xf32> to vector<8x1024xbf16>
    %cst_24 = arith.constant dense<0.000000e+00> : vector<8x128xf32>
    %35 = tpu.matmul %34, %13, %cst_24 {dimension_numbers = #tpu.dot_dimension_numbers<[1], [0], [0], [1], [0, 0, 1, 1], [], []>} : vector<8x1024xbf16>, vector<1024x128xbf16>, vector<8x128xf32> -> vector<8x128xf32>
    %36 = arith.truncf %35 : vector<8x128xf32> to vector<8x128xbf16>
    %cst_25 = arith.constant dense<0.000000e+00> : vector<8x1024xf32>
    %37 = tpu.matmul %36, %14, %cst_25 {dimension_numbers = #tpu.dot_dimension_numbers<[1], [0], [0], [1], [0, 0, 1, 1], [], []>} : vector<8x128xbf16>, vector<128x1024xbf16>, vector<8x1024xf32> -> vector<8x1024xf32>
    %cst_26 = arith.constant 0.899999976 : f32
    %38 = vector.broadcast %cst_26 : f32 to vector<8x1024xf32>
    %39 = arith.mulf %38, %28 : vector<8x1024xf32>
    %40 = arith.addf %39, %37 : vector<8x1024xf32>
    %41 = arith.index_cast %33 : i32 to index
    %c0_27 = arith.constant 0 : index
    %42 = vector.load %arg11[%41, %c0_27] : memref<32x1024xf32, #tpu.memory_space<vmem>>, vector<8x1024xf32>
    %43 = arith.addf %40, %42 : vector<8x1024xf32>
    %44 = math.tanh %43 : vector<8x1024xf32>
    %45 = arith.index_cast %33 : i32 to index
    %c0_28 = arith.constant 0 : index
    %46 = vector.load %arg10[%45, %c0_28] : memref<32x1024xf32, #tpu.memory_space<vmem>>, vector<8x1024xf32>
    tpu.vector_store %arg10[%45, %c0_28], %44 {strides = array<i32>} : memref<32x1024xf32, #tpu.memory_space<vmem>>, vector<8x1024xf32>,
    %c2_i32 = arith.constant 2 : i32
    %c8_i32_29 = arith.constant 8 : i32
    %47 = arith.muli %c2_i32, %c8_i32_29 : i32
    %48 = tpu.assume_multiple %47, 8 : i32
    %49 = arith.truncf %44 : vector<8x1024xf32> to vector<8x1024xbf16>
    %cst_30 = arith.constant dense<0.000000e+00> : vector<8x128xf32>
    %50 = tpu.matmul %49, %13, %cst_30 {dimension_numbers = #tpu.dot_dimension_numbers<[1], [0], [0], [1], [0, 0, 1, 1], [], []>} : vector<8x1024xbf16>, vector<1024x128xbf16>, vector<8x128xf32> -> vector<8x128xf32>
    %51 = arith.truncf %50 : vector<8x128xf32> to vector<8x128xbf16>
    %cst_31 = arith.constant dense<0.000000e+00> : vector<8x1024xf32>
    %52 = tpu.matmul %51, %14, %cst_31 {dimension_numbers = #tpu.dot_dimension_numbers<[1], [0], [0], [1], [0, 0, 1, 1], [], []>} : vector<8x128xbf16>, vector<128x1024xbf16>, vector<8x1024xf32> -> vector<8x1024xf32>
    %cst_32 = arith.constant 0.899999976 : f32
    %53 = vector.broadcast %cst_32 : f32 to vector<8x1024xf32>
    %54 = arith.mulf %53, %43 : vector<8x1024xf32>
    %55 = arith.addf %54, %52 : vector<8x1024xf32>
    %56 = arith.index_cast %48 : i32 to index
    %c0_33 = arith.constant 0 : index
    %57 = vector.load %arg11[%56, %c0_33] : memref<32x1024xf32, #tpu.memory_space<vmem>>, vector<8x1024xf32>
    %58 = arith.addf %55, %57 : vector<8x1024xf32>
    %59 = math.tanh %58 : vector<8x1024xf32>
    %60 = arith.index_cast %48 : i32 to index
    %c0_34 = arith.constant 0 : index
    %61 = vector.load %arg10[%60, %c0_34] : memref<32x1024xf32, #tpu.memory_space<vmem>>, vector<8x1024xf32>
    tpu.vector_store %arg10[%60, %c0_34], %59 {strides = array<i32>} : memref<32x1024xf32, #tpu.memory_space<vmem>>, vector<8x1024xf32>,
    %c3_i32 = arith.constant 3 : i32
    %c8_i32_35 = arith.constant 8 : i32
    %62 = arith.muli %c3_i32, %c8_i32_35 : i32
    %63 = tpu.assume_multiple %62, 8 : i32
    %64 = arith.truncf %59 : vector<8x1024xf32> to vector<8x1024xbf16>
    %cst_36 = arith.constant dense<0.000000e+00> : vector<8x128xf32>
    %65 = tpu.matmul %64, %13, %cst_36 {dimension_numbers = #tpu.dot_dimension_numbers<[1], [0], [0], [1], [0, 0, 1, 1], [], []>} : vector<8x1024xbf16>, vector<1024x128xbf16>, vector<8x128xf32> -> vector<8x128xf32>
    %66 = arith.truncf %65 : vector<8x128xf32> to vector<8x128xbf16>
    %cst_37 = arith.constant dense<0.000000e+00> : vector<8x1024xf32>
    %67 = tpu.matmul %66, %14, %cst_37 {dimension_numbers = #tpu.dot_dimension_numbers<[1], [0], [0], [1], [0, 0, 1, 1], [], []>} : vector<8x128xbf16>, vector<128x1024xbf16>, vector<8x1024xf32> -> vector<8x1024xf32>
    %cst_38 = arith.constant 0.899999976 : f32
    %68 = vector.broadcast %cst_38 : f32 to vector<8x1024xf32>
    %69 = arith.mulf %68, %58 : vector<8x1024xf32>
    %70 = arith.addf %69, %67 : vector<8x1024xf32>
    %71 = arith.index_cast %63 : i32 to index
    %c0_39 = arith.constant 0 : index
    %72 = vector.load %arg11[%71, %c0_39] : memref<32x1024xf32, #tpu.memory_space<vmem>>, vector<8x1024xf32>
    %73 = arith.addf %70, %72 : vector<8x1024xf32>
    %74 = math.tanh %73 : vector<8x1024xf32>
    %75 = arith.index_cast %63 : i32 to index
    %c0_40 = arith.constant 0 : index
    %76 = vector.load %arg10[%75, %c0_40] : memref<32x1024xf32, #tpu.memory_space<vmem>>, vector<8x1024xf32>
    tpu.vector_store %arg10[%75, %c0_40], %74 {strides = array<i32>} : memref<32x1024xf32, #tpu.memory_space<vmem>>, vector<8x1024xf32>,
    %c4_i32 = arith.constant 4 : i32
    %c0_41 = arith.constant 0 : index
    %c0_42 = arith.constant 0 : index
    %77 = vector.load %arg9[%c0_41, %c0_42] : memref<8x1024xf32, #tpu.memory_space<vmem>>, vector<8x1024xf32>
    tpu.vector_store %arg9[%c0_41, %c0_42], %73 {strides = array<i32>} : memref<8x1024xf32, #tpu.memory_space<vmem>>, vector<8x1024xf32>,
    %c0_43 = arith.constant 0 : index
    %c0_44 = arith.constant 0 : index
    %78 = vector.load %arg10[%c0_43, %c0_44] : memref<32x1024xf32, #tpu.memory_space<vmem>>, vector<32x1024xf32>
    %c0_45 = arith.constant 0 : index
    %c0_46 = arith.constant 0 : index
    %79 = vector.load %arg7[%c0_45, %c0_46] : memref<1024x128xf32, #tpu.memory_space<vmem>>, vector<1024x128xf32>
    %cst_47 = arith.constant dense<0.000000e+00> : vector<32x128xf32>
    %80 = tpu.matmul %78, %79, %cst_47 {dimension_numbers = #tpu.dot_dimension_numbers<[1], [0], [0], [1], [0, 0, 1, 1], [], []>, precision = #tpu.contract_precision<fp32>} : vector<32x1024xf32>, vector<1024x128xf32>, vector<32x128xf32> -> vector<32x128xf32>
    %81 = vector.shape_cast %80 : vector<32x128xf32> to vector<4x8x128xf32>
    %c0_48 = arith.constant 0 : index
    %c0_49 = arith.constant 0 : index
    %c0_50 = arith.constant 0 : index
    %82 = vector.load %arg8[%c0_48, %c0_49, %c0_50] : memref<4x8x128xf32, #tpu.memory_space<vmem>>, vector<4x8x128xf32>
    tpu.vector_store %arg8[%c0_48, %c0_49, %c0_50], %81 {strides = array<i32>} : memref<4x8x128xf32, #tpu.memory_space<vmem>>, vector<4x8x128xf32>,
    return
  }
  func.func @transform_0(%arg0: i32, %arg1: i32) -> (i32, i32, i32) {
    %c0_i32 = arith.constant 0 : i32
    %c0_i32_0 = arith.constant 0 : i32
    return %arg1, %arg0, %c0_i32 : i32, i32, i32
  }
  func.func @transform_1(%arg0: i32, %arg1: i32) -> (i32, i32, i32) {
    %c0_i32 = arith.constant 0 : i32
    %c0_i32_0 = arith.constant 0 : i32
    return %arg1, %arg0, %c0_i32 : i32, i32, i32
  }
  func.func @transform_2(%arg0: i32, %arg1: i32) -> (i32, i32) {
    %c0_i32 = arith.constant 0 : i32
    %c0_i32_0 = arith.constant 0 : i32
    %c0_i32_1 = arith.constant 0 : i32
    return %c0_i32, %c0_i32_0 : i32, i32
  }
  func.func @transform_3(%arg0: i32, %arg1: i32) -> (i32, i32) {
    %c0_i32 = arith.constant 0 : i32
    %c0_i32_0 = arith.constant 0 : i32
    %c0_i32_1 = arith.constant 0 : i32
    return %c0_i32, %c0_i32_0 : i32, i32
  }
  func.func @transform_4(%arg0: i32, %arg1: i32) -> (i32, i32) {
    %c0_i32 = arith.constant 0 : i32
    %c0_i32_0 = arith.constant 0 : i32
    %c0_i32_1 = arith.constant 0 : i32
    return %c0_i32, %c0_i32_0 : i32, i32
  }
  func.func @transform_5(%arg0: i32, %arg1: i32) -> (i32, i32) {
    %c0_i32 = arith.constant 0 : i32
    %c0_i32_0 = arith.constant 0 : i32
    %c0_i32_1 = arith.constant 0 : i32
    return %c0_i32, %c0_i32_0 : i32, i32
  }
  func.func @transform_6(%arg0: i32, %arg1: i32) -> (i32, i32, i32) {
    %c0_i32 = arith.constant 0 : i32
    %c0_i32_0 = arith.constant 0 : i32
    return %arg1, %arg0, %c0_i32 : i32, i32, i32
  }
}

</mosaic_0001>

<bundles_post_ra>
// kernel: tpu_custom_call.1
= control target key start
LH: loop header
LB: loop body
LE: loop exit
PB: predicated region body
PF: predicated region fallthrough
CT: control target
= control target key end

     0   :  { %s13713_s0 = inlined_call_operand.vmem [shape: f32[12,8,8], index: 0, kind: input, shape index: {}]   ;;  %s13714_s1 = inlined_call_operand.hbm [shape: f32[12,8,1024], index: 1, kind: input, shape index: {}]   ;;  %s13715_s2 = inlined_call_operand.vmem [shape: f32[8,1024], index: 2, kind: input, shape index: {}]   ;;  %s13716_s3 = inlined_call_operand.hbm [shape: bf16[1024,128], index: 3, kind: input, shape index: {}]   ;;  %s13717_s4 = inlined_call_operand.hbm [shape: bf16[128,1024], index: 4, kind: input, shape index: {}]   ;;  %s13718_s5 = inlined_call_operand.hbm [shape: f32[1024,128], index: 5, kind: input, shape index: {}]   ;;  %s13719_s6 = inlined_call_operand.hbm [shape: f32[12,8,128], index: 6, kind: output, shape index: {}]  }
   0x1   :  { %14072 = sst [smem:[#allocation179_spill]] %s13716_s3 }
   0x2   :  { %14073 = sst [smem:[#allocation180_spill]] %s13717_s4 }
   0x3   :  { %14074 = sst [smem:[#allocation181_spill]] %s13718_s5 }
   0x4   :  { %11 = vsyncpa [#allocation6], 0 }
   0x5   :  { %13 = vsyncpa [#allocation6 + $0x1], 0 }
   0x6   :  { %14 = vsyncpa [#allocation9], 0 }
   0x7   :  { %15 = vsyncpa [#allocation12], 0 }
   0x8   :  { %16 = vsyncpa [#allocation7], 0 }
   0x9   :  { %18 = vsyncpa [#allocation7 + $0x1], 0  ;;  %s9395_s21 = smov 0   ;;  %s9397_s22 = smov 0  }
   0xa   :  { %s9399_s23 = smov 0   ;;  %s9401_s24 = smov 0  }
   0xb   :  { %s9403_s25 = smov 0   ;;  %s9405_s26 = smov 0  }
   0xc LB: > { %s8210_s27 = sadd.s32 4294967295, %s9345_s26   ;;  %s8211_s28 = sadd.s32 4294967294, %s9345_s26   ;;  %s9345_s26 = sphi %s9405_s26, %s24_s26   ;;  %s9341_s25 = sphi %s9403_s25, %s14920_s25   ;;  %s9337_s24 = sphi %s9401_s24, %s14919_s24   ;;  %s9333_s23 = sphi %s9399_s23, %s14918_s23   ;;  %s9329_s22 = sphi %s9397_s22, %s14917_s22   ;;  %s9325_s21 = sphi %s9395_s21, %s14916_s21  }
   0xd   : > { %p86_p0 = scmp.ne.s32.totalorder %s9329_s22, %s9325_s21  ;;  %p9429_p1 = scmp.eq.s32.totalorder %s8210_s27, 0 }
   0xe   : > { %p9433_p2 = scmp.eq.s32.totalorder %s8210_s27, 2  ;;  %p202_p3 = scmp.eq.s32.totalorder %s8211_s28, 2 }
   0xf   : > { %p9439_p4 = por %p9429_p1, %p86_p0  ;;  %p8212_p5 = scmp.ge.s32.totalorder %s9345_s26, 1 }
  0x10   : > { %p9444_p6 = por %p202_p3, %p86_p0  ;;  %p209_p7 = scmp.lt.s32.totalorder %s9345_s26, 4 }
  0x11   : > { %s14079_s3 = sld [smem:[#allocation179_spill]]  ;;  %s9347_s13 = smov [#allocation8]  }
  0x12   : > { %p9452_p8 = pnand %p8212_p5, %p209_p7  ;;  %s225_s14 = sshll.u32 %s9347_s13, 4  ;;  %s226_s14 = int_to_ptr.vmem [resolvable:$true] %s225_s14 }
  0x13   : > { %s14082_s4 = sld [smem:[#allocation180_spill]]  ;;  %s13720_s19 = smov 64  }
  0x14   : > { %p8894_p9 = pneg %p9452_p8  ;;  %s9349_s20 = smov 4  }
  0x15   : > { %s9350_s27 = smov [#allocation10]   ;;  %s9351_s9 = smov 512  }
  0x16   : > { %p9460_p10 = pnand %p8894_p9, %p9429_p1  ;;  %s239_s28 = sshll.u32 %s9350_s27, 4  ;;  %s240_s28 = int_to_ptr.vmem [resolvable:$true] %s239_s28 }
  0x17   : > { %s223_s11 = sshll.u32 %s14079_s3, 4  ;;  %s9352_s10 = smov 32   ;;  %s224_s11 = int_to_ptr.hbm [resolvable:$true] %s223_s11 }
  0x18   : > { %8897 = dma.hbm_to_vmem [thread:$0]  (!%p9460_p10), %s224_s11, 8192, %s226_s14, [#allocation9], %s13720_s19, %s13720_s19, %s9349_s20  }
  0x19   : > { %s237_s18 = sshll.u32 %s14082_s4, 4  ;;  %s14083_s5 = sld [smem:[#allocation181_spill]]  ;;  %s238_s18 = int_to_ptr.hbm [resolvable:$true] %s237_s18 }
  0x1a   : > { %8900 = dma.hbm_to_vmem [thread:$0]  (!%p9460_p10), %s238_s18, 8192, %s240_s28, [#allocation9], %s9351_s9, %s9351_s9, %s9352_s10  }
  0x1b   : > { %s9353_s11 = smov [#allocation11]   ;;  %s9354_s20 = smov 128  }
  0x1c   : > { %s253_s14 = sshll.u32 %s9353_s11, 4  ;;  %s9355_s27 = smov 8   ;;  %s254_s14 = int_to_ptr.vmem [resolvable:$true] %s253_s14 }
  0x1d   : > { %s73_s19 = sadd.s32 1, %s9333_s23  ;;  %s33_s3 = sadd.s32 1, %s9341_s25 }
  0x1e   : > { %p80_p11 = scmp.ne.s32.totalorder %s9333_s23, %s9329_s22  ;;  %p34_p12 = scmp.ge.s32.totalorder %s33_s3, 3 }
  0x1f   : > { %s251_s17 = sshll.u32 %s14083_s5, 4  ;;  %p81_p13 = scmp.eq.s32.totalorder %s9345_s26, 0  ;;  %s252_s17 = int_to_ptr.hbm [resolvable:$true] %s251_s17 }
  0x20   : > { %8903 = dma.hbm_to_vmem [thread:$0]  (!%p9460_p10), %s252_s17, 16384, %s254_s14, [#allocation12], %s9354_s20, %s9354_s20, %s9355_s27  }
  0x21   : > { %p9485_p0 = por %p9433_p2, %p80_p11  ;;  %p8915_p3 = scmp.lt.s32.totalorder %s9345_s26, 3 }
  0x22   : > { %s14922_s3 = smov (%p34_p12, %s33_s3), 0  ;;  %p9492_p5 = por %p81_p13, %p80_p11 }
  0x23   : > { %14085 = sst [smem:[#allocation18_spill]] %s14922_s3  ;;  %s279_s15 = sand.u32 1, %s9333_s23  }
  0x24   : > { %s68_s9 = ssub.s32 %s9341_s25, %s14922_s3  ;;  %s8217_s10 = sshll.u32 %s279_s15, 8 }
  0x25   : > { %p71_p7 = scmp.eq.s32.totalorder %s68_s9, 0  ;;  %s8748_s13 = sshll.u32 %s9341_s25, 8 }
  0x26   : > { %s291_s11 = scalar_lea.hbm %s13714_s1, %s8748_s13  ;;  %s283_s14 = scalar_lea.vmem [#allocation5], %s8217_s10 }
  0x27   : > { %s9501_s30 = scalar_select %p71_p7, %s9333_s23, %s73_s19  }
  0x28   : > { %s294_s20 = sshll.u32 %s283_s14, 4  ;;  %s292_s27 = sshll.u32 %s291_s11, 4  ;;  %s295_s20 = int_to_ptr.vmem [resolvable:$true] %s294_s20  ;;  %s293_s27 = int_to_ptr.hbm [resolvable:$true] %s292_s27 }
  0x29   : > { %p8905_p2 = pnand %p8915_p3, %p9492_p5  ;;  %s280_s4 = scalar_lea.sflag [#allocation6], %s279_s15 }
  0x2a   : > { %s9356_s5 = smov 1024   ;;  %s14087_s3 = smov 64  }
  0x2b   : > { %8907 = dma.hbm_to_vmem [thread:$0]  (!%p8905_p2), %s293_s27, 4096, %s295_s20, %s280_s4, %s9356_s5, %s9356_s5, %s14087_s3  }
  0x2c   : > { %306 = sbr.rel (%p9452_p8) target bundleno = 2210 (0x8a2), region = 44 }
  0x31   : > { %s9514_s19 = sand.u32 1, %s9329_s22  }
  0x32   : > { %s8222_s9 = sshll.u32 %s9514_s19, 8  ;;  %s309_s10 = scalar_lea.sflag [#allocation6], %s9514_s19 }
  0x33   : > { %s9518_s13 = scalar_lea.vmem [#allocation5], %s8222_s9 }
  0x34   : > { %9308 = dma.done.wait (%p9439_p4), %s309_s10, 4096  }
  0x35   : > { %9310 = vsyncadd (%p9439_p4), %s309_s10, 4294963200 }
  0x36   : > { %9312 = dma.done.wait (%p9429_p1), [#allocation9], 16384  }
  0x37   : > { %9314 = vsyncadd (%p9429_p1), [#allocation9], 4294950912 }
  0x38   : > { %9316 = dma.done.wait (%p9429_p1), [#allocation12], 16384  }
  0x39   : > { %9318 = vsyncadd (%p9429_p1), [#allocation12], 4294950912  ;;  %s8226_s3 = sshll.u32 %s9514_s19, 5  ;;  %s8227_s4 = sshll.u32 %s9337_s24, 2 }
  0x3a   : > { %p366_p8 = scmp.lt.s32.totalorder %s8227_s4, 11  ;;  %s9539_s15 = scalar_lea.vmem [#allocation13], %s8226_s3 }
  0x3b   : > { %p8229_p4 = scmp.ne.s32.totalorder %s9337_s24, 0 }
  0x3c   : > { %s14924_s4 = smov (!%p366_p8, %s8227_s4), 11 }
  0x3d   : > { %s8228_s5 = sshll.u32 %s14924_s4, 3  ;;  %379 = sbr.rel (%p8229_p4) target bundleno = 75 (0x4b), region = 64 }
  0x3e   : > { %s9537_s28 = scalar_lea.vmem %s13713_s0, %s8228_s5 }
  0x42   : > { %v9357_v0 = vmov 0.0  }
  0x43   : > { %380 = vst [vmem:[#allocation2 + $0x30] sm:$0xff] %v9357_v0 }
  0x44   : > { %381 = vst [vmem:[#allocation2] sm:$0xff] %v9357_v0 }
  0x45   : > { %382 = vst [vmem:[#allocation2 + $0x18] sm:$0xff] %v9357_v0 }
  0x46   : > { %383 = vst [vmem:[#allocation2 + $0x10] sm:$0xff] %v9357_v0 }
  0x47   : > { %384 = vst [vmem:[#allocation2 + $0x8] sm:$0xff] %v9357_v0 }
  0x48   : > { %385 = vst [vmem:[#allocation2 + $0x20] sm:$0xff] %v9357_v0 }
  0x49   : > { %386 = vst [vmem:[#allocation2 + $0x28] sm:$0xff] %v9357_v0 }
  0x4a   : > { %387 = vst [vmem:[#allocation2 + $0x38] sm:$0xff] %v9357_v0 }
  0x4b PF: > { %v392_v1 = vld [vmem:[%s13715_s2] sm:$0xff]  ;;  %vm464_vm0 = vcmask 64512   ;;  %v393_v3 = vld [vmem:[%s13715_s2 + $0x8] sm:$0xff]  ;;  %v390_v10 = vld [vmem:[%s9537_s28 + $0x10] sm:$0xff]  ;;  %s8071_s14 = sshll.u32 %s9539_s15, 4  ;;  %s9275_s4 = scalar_lea.hbm %s13719_s6, 96  ;;  %s8072_s14 = int_to_ptr.vmem [resolvable:$true] %s8071_s14 }
  0x4c   : > { %v388_v2 = vld [vmem:[%s9537_s28] sm:$0xff]  ;;  %v492_v4 = vand.u32 4294901760, %v392_v1  ;;  %v731_v6 = vand.u32 4294901760, %v393_v3  ;;  %v389_v7 = vld [vmem:[%s9537_s28 + $0x8] sm:$0xff]  ;;  %v472_v18 = vsel %vm464_vm0, %v390_v10, 0  ;;  %v391_v28 = vld [vmem:[%s9537_s28 + $0x18] sm:$0xff] }
  0x4d   : > { %v466_v5 = vsel %vm464_vm0, %v388_v2, 0  ;;  %v469_v9 = vsel %vm464_vm0, %v389_v7, 0  ;;  %v9574_v24 = vand.u32 4294901760, %v472_v18  ;;  %v475_v31 = vsel %vm464_vm0, %v391_v28, 0  ;;  %v394_v41 = vld [vmem:[%s13715_s2 + $0x10] sm:$0xff]  ;;  %v395_v47 = vld [vmem:[%s13715_s2 + $0x18] sm:$0xff] }
  0x4e   : > { %v9551_v8 = vand.u32 4294901760, %v466_v5  ;;  %v543_v11 = vsub.f32 %v392_v1, %v492_v4  ;;  %620 = vmatpush.msra.mxu3 %v492_v4  ;;  %493 = vmatpush.msra.mxu0 %v492_v4  ;;  %v782_v12 = vsub.f32 %v393_v3, %v731_v6  ;;  %v9555_v13 = vand.u32 4294901760, %v469_v9  ;;  %v400_v53 = vld [vmem:[%s9518_s13] sm:$0xff] }
  0x4f   : > { %v9584_v30 = vsub.f32 %v472_v18, %v9574_v24  ;;  %v9594_v34 = vand.u32 4294901760, %v475_v31  ;;  %v970_v42 = vand.u32 4294901760, %v394_v41  ;;  %v1209_v48 = vand.u32 4294901760, %v395_v47  ;;  %v408_v60 = vld [vmem:[%s9518_s13 + $0x40] sm:$0xff] }
  0x50   : > { %v9558_v14 = vsub.f32 %v466_v5, %v9551_v8  ;;  %582 = vmatpush.msra.mxu2 %v543_v11  ;;  %v544_v15 = vand.u32 4294901760, %v543_v11  ;;  %v783_v16 = vand.u32 4294901760, %v782_v12  ;;  %v9561_v17 = vsub.f32 %v469_v9, %v9555_v13  ;;  %v396_v62 = vld [vmem:[%s13715_s2 + $0x20] sm:$0xff] }
  0x51   : > { %v9592_v33 = vand.u32 4294901760, %v9584_v30  ;;  %v9601_v36 = vsub.f32 %v475_v31, %v9594_v34  ;;  %v1021_v43 = vsub.f32 %v394_v41, %v970_v42  ;;  %v1260_v49 = vsub.f32 %v395_v47, %v1209_v48  ;;  %v424_v31 = vld [vmem:[%s9518_s13 + $0xc0] sm:$0xff] }
  0x52   : > { %585 = vmatmul.f32.vlgmr.msra.gmra.mxu2 %v9558_v14  ;;  %v9566_v19 = vand.u32 4294901760, %v9558_v14  ;;  %v545_v20 = vsub.f32 %v543_v11, %v544_v15  ;;  %664 = vmatpush.msrb.mxu0 %v544_v15  ;;  %v784_v21 = vsub.f32 %v782_v12, %v783_v16  ;;  %v9572_v23 = vand.u32 4294901760, %v9561_v17  ;;  %v416_v11 = vld [vmem:[%s9518_s13 + $0x80] sm:$0xff] }
  0x53   : > { %732 = vmatpush.msrb.mxu2 %v731_v6  ;;  %v513_v35 = vsub.f32 %v9584_v30, %v9592_v33  ;;  %v9608_v38 = vand.u32 4294901760, %v9601_v36  ;;  %v1022_v44 = vand.u32 4294901760, %v1021_v43  ;;  %v1261_v50 = vand.u32 4294901760, %v1260_v49 }
  0x54   : > { %624 = vmatmul.f32.vlgmr.msra.gmra.mxu3 %v9566_v19  ;;  %v497_v22 = vsub.f32 %v9558_v14, %v9566_v19  ;;  %v546_v25 = vand.u32 4294901760, %v545_v20  ;;  %v785_v26 = vand.u32 4294901760, %v784_v21  ;;  %v505_v29 = vsub.f32 %v9561_v17, %v9572_v23 }
  0x55   : > { %903 = vmatpush.msra.mxu2 %v783_v16  ;;  %v9605_v37 = vand.u32 4294901760, %v513_v35  ;;  %v521_v39 = vsub.f32 %v9601_v36, %v9608_v38  ;;  %v1023_v45 = vsub.f32 %v1021_v43, %v1022_v44  ;;  %v1262_v51 = vsub.f32 %v1260_v49, %v1261_v50 }
  0x56   : > { %v9576_v27 = vand.u32 4294901760, %v497_v22  ;;  %547 = vmatpush.msra.mxu1 %v546_v25  ;;  %786 = vmatpush.msrb.mxu3 %v785_v26  ;;  %v9589_v32 = vand.u32 4294901760, %v505_v29  ;;  %v432_v54 = vmul.f32 0.1, %v400_v53  ;;  %v9683_v63 = vand.u32 4294901760, %v396_v62 }
  0x57   : > { %549 = vmatmul.f32.vlgmr.msra.gmra.mxu1 %v9551_v8  ;;  %v9616_v40 = vand.u32 4294901760, %v521_v39  ;;  %v1024_v46 = vand.u32 4294901760, %v1023_v45  ;;  %v1263_v52 = vand.u32 4294901760, %v1262_v51  ;;  %v440_v1 = vmul.f32 0.1, %v408_v60  ;;  %v409_v60 = vld [vmem:[%s9518_s13 + $0x48] sm:$0xff] }
  0x58   : > { %499 = vmatmul.f32.vlgmr.msra.gmra.mxu0 %v9576_v27  ;;  %698 = vmatpush.msrb.mxu1 %v492_v4  ;;  %v9687_v2 = vsub.f32 %v396_v62, %v9683_v63  ;;  %v448_v20 = vmul.f32 0.1, %v416_v11  ;;  %v456_v41 = vmul.f32 0.1, %v424_v31  ;;  %v397_v62 = vld [vmem:[%s13715_s2 + $0x28] sm:$0xff] }
  0x59   : > { %821 = vmatpush.msra.mxu0 %v782_v12  ;;  %937 = vmatpush.msra.mxu3 %v731_v6  ;;  %v417_v11 = vld [vmem:[%s9518_s13 + $0x88] sm:$0xff] }
  0x5a   : > { %590 = vmatmul.f32.gmra.mxu2 %v9561_v17  ;;  %859 = vmatpush.msra.mxu1 %v731_v6  ;;  %v1500_v6 = vand.u32 4294901760, %v9687_v2  ;;  %v425_v31 = vld [vmem:[%s9518_s13 + $0xc8] sm:$0xff] }
  0x5c   : > { %630 = vmatmul.f32.gmra.mxu3 %v9572_v23  ;;  %v1501_v12 = vsub.f32 %v9687_v2, %v1500_v6 }
  0x5e   : > { %v1502_v16 = vand.u32 4294901760, %v1501_v12 }
  0x5f   : > { %553 = vmatmul.f32.gmra.mxu1 %v9555_v13 }
  0x60   : > { %507 = vmatmul.f32.gmra.mxu0 %v9589_v32 }
  0x62   : > { %595 = vmatmul.f32.gmra.mxu2 %v9584_v30 }
  0x64   : > { %636 = vmatmul.f32.gmra.mxu3 %v9592_v33 }
  0x67   : > { %557 = vmatmul.f32.gmra.mxu1 %v9574_v24 }
  0x68   : > { %515 = vmatmul.f32.gmra.mxu0 %v9605_v37 }
  0x6a   : > { %600 = vmatmul.f32.gmra.mxu2 %v9601_v36 }
  0x6c   : > { %642 = vmatmul.f32.gmra.mxu3 %v9608_v38 }
  0x6f   : > { %561 = vmatmul.f32.gmra.mxu1 %v9594_v34 }
  0x70   : > { %523 = vmatmul.f32.gmra.mxu0 %v9616_v40 }
  0x72   : > { %738 = vmatmul.f32.vlgmr.msrb.gmra.mxu2 %v9576_v27 }
  0x73   : > { %1060 = vmatpush.msrb.mxu2 %v1021_v43 }
  0x74   : > { %788 = vmatmul.f32.vlgmr.msrb.gmra.mxu3 %v9551_v8 }
  0x75   : > { %1098 = vmatpush.msrb.mxu3 %v970_v42 }
  0x77   : > { %700 = vmatmul.f32.vlgmr.msrb.gmra.mxu1 %v9551_v8 }
  0x78   : > { %666 = vmatmul.f32.vlgmr.msrb.gmra.mxu0 %v9551_v8  ;;  %1025 = vmatpush.msrb.mxu1 %v1024_v46 }
  0x79   : > { %971 = vmatpush.msrb.mxu0 %v970_v42 }
  0x7a   : > { %746 = vmatmul.f32.gmra.mxu2 %v9589_v32 }
  0x7c   : > { %792 = vmatmul.f32.gmra.mxu3 %v9555_v13 }
  0x7f   : > { %704 = vmatmul.f32.gmra.mxu1 %v9555_v13 }
  0x80   : > { %670 = vmatmul.f32.gmra.mxu0 %v9555_v13 }
  0x82   : > { %754 = vmatmul.f32.gmra.mxu2 %v9605_v37 }
  0x84   : > { %796 = vmatmul.f32.gmra.mxu3 %v9574_v24 }
  0x87   : > { %708 = vmatmul.f32.gmra.mxu1 %v9574_v24 }
  0x88   : > { %674 = vmatmul.f32.gmra.mxu0 %v9574_v24 }
  0x8a   : > { %762 = vmatmul.f32.gmra.mxu2 %v9616_v40 }
  0x8c   : > { %800 = vmatmul.f32.gmra.mxu3 %v9594_v34 }
  0x8f   : > { %712 = vmatmul.f32.gmra.mxu1 %v9594_v34 }
  0x90   : > { %678 = vmatmul.f32.gmra.mxu0 %v9594_v34 }
  0x92   : > { %905 = vmatmul.f32.vlgmr.msra.gmra.mxu2 %v9551_v8 }
  0x93   : > { %1210 = vmatpush.msra.mxu2 %v1209_v48 }
  0x94   : > { %939 = vmatmul.f32.vlgmr.msra.gmra.mxu3 %v9551_v8 }
  0x95   : > { %1264 = vmatpush.msra.mxu3 %v1263_v52 }
  0x97   : > { %863 = vmatmul.f32.vlgmr.msra.gmra.mxu1 %v9566_v19 }
  0x98   : > { %824 = vmatmul.f32.vlgmr.msra.gmra.mxu0 %v9558_v14  ;;  %1176 = vmatpush.msra.mxu1 %v970_v42 }
  0x99   : > { %1142 = vmatpush.msra.mxu0 %v1022_v44 }
  0x9a   : > { %909 = vmatmul.f32.gmra.mxu2 %v9555_v13 }
  0x9c   : > { %943 = vmatmul.f32.gmra.mxu3 %v9555_v13 }
  0x9f   : > { %869 = vmatmul.f32.gmra.mxu1 %v9572_v23 }
  0xa0   : > { %829 = vmatmul.f32.gmra.mxu0 %v9561_v17 }
  0xa2   : > { %913 = vmatmul.f32.gmra.mxu2 %v9574_v24 }
  0xa4   : > { %947 = vmatmul.f32.gmra.mxu3 %v9574_v24 }
  0xa7   : > { %875 = vmatmul.f32.gmra.mxu1 %v9592_v33 }
  0xa8   : > { %834 = vmatmul.f32.gmra.mxu0 %v9584_v30 }
  0xaa   : > { %917 = vmatmul.f32.gmra.mxu2 %v9594_v34 }
  0xac   : > { %951 = vmatmul.f32.gmra.mxu3 %v9594_v34 }
  0xaf   : > { %881 = vmatmul.f32.gmra.mxu1 %v9608_v38 }
  0xb0   : > { %839 = vmatmul.f32.gmra.mxu0 %v9601_v36 }
  0xb2   : > { %1063 = vmatmul.f32.vlgmr.msrb.gmra.mxu2 %v9558_v14 }
  0xb3   : > { %1381 = vmatpush.msrb.mxu2 %v1261_v50 }
  0xb4   : > { %1102 = vmatmul.f32.vlgmr.msrb.gmra.mxu3 %v9566_v19 }
  0xb5   : > { %1415 = vmatpush.msrb.mxu3 %v1209_v48 }
  0xb7   : > { %1027 = vmatmul.f32.vlgmr.msrb.gmra.mxu1 %v9551_v8 }
  0xb8   : > { %977 = vmatmul.f32.vlgmr.msrb.gmra.mxu0 %v9576_v27  ;;  %1337 = vmatpush.msrb.mxu1 %v1209_v48 }
  0xb9   : > { %1299 = vmatpush.msrb.mxu0 %v1260_v49  ;;  %v401_v49 = vld [vmem:[%s9518_s13 + $0x8] sm:$0xff] }
  0xba   : > { %1068 = vmatmul.f32.gmra.mxu2 %v9561_v17  ;;  %v433_v51 = vmul.f32 0.1, %v401_v49 }
  0xbc   : > { %1108 = vmatmul.f32.gmra.mxu3 %v9572_v23 }
  0xbf   : > { %1031 = vmatmul.f32.gmra.mxu1 %v9555_v13 }
  0xc0   : > { %985 = vmatmul.f32.gmra.mxu0 %v9589_v32 }
  0xc2   : > { %1073 = vmatmul.f32.gmra.mxu2 %v9584_v30 }
  0xc4   : > { %1114 = vmatmul.f32.gmra.mxu3 %v9592_v33 }
  0xc7   : > { %1035 = vmatmul.f32.gmra.mxu1 %v9574_v24 }
  0xc8   : > { %993 = vmatmul.f32.gmra.mxu0 %v9605_v37 }
  0xca   : > { %1078 = vmatmul.f32.gmra.mxu2 %v9601_v36 }
  0xcc   : > { %1120 = vmatmul.f32.gmra.mxu3 %v9608_v38 }
  0xcf   : > { %1039 = vmatmul.f32.gmra.mxu1 %v9594_v34 }
  0xd0   : > { %1001 = vmatmul.f32.gmra.mxu0 %v9616_v40 }
  0xd2   : > { %1216 = vmatmul.f32.vlgmr.msra.gmra.mxu2 %v9576_v27 }
  0xd3   : > { %1538 = vmatpush.msra.mxu2 %v9687_v2 }
  0xd4   : > { %1266 = vmatmul.f32.vlgmr.msra.gmra.mxu3 %v9551_v8  ;;  %v550_v56 = vpop.f32.mrf.mxu1 }
  0xd5   : > { %v500_v55 = vpop.f32.mrf.mxu0  ;;  %v586_v58 = vpop.f32.mrf.mxu2  ;;  %1576 = vmatpush.msra.mxu3 %v9683_v63 }
  0xd6   : > { %v501_v57 = vadd.f32 %v500_v55, %v432_v54 }
  0xd7   : > { %v625_v59 = vpop.f32.mrf.mxu3  ;;  %1178 = vmatmul.f32.vlgmr.msra.gmra.mxu1 %v9551_v8 }
  0xd8   : > { %v551_v61 = vadd.f32 %v550_v56, %v501_v57  ;;  %1144 = vmatmul.f32.vlgmr.msra.gmra.mxu0 %v9551_v8  ;;  %1503 = vmatpush.msra.mxu1 %v1502_v16  ;;  %v449_v16 = vmul.f32 0.1, %v417_v11 }
  0xd9   : > { %1449 = vmatpush.msra.mxu0 %v9683_v63 }
  0xda   : > { %v587_v0 = vadd.f32 %v586_v58, %v551_v61  ;;  %1224 = vmatmul.f32.gmra.mxu2 %v9589_v32 }
  0xdc   : > { %v626_v3 = vadd.f32 %v625_v59, %v587_v0  ;;  %1270 = vmatmul.f32.gmra.mxu3 %v9555_v13  ;;  %v554_v5 = vpop.f32.mrf.mxu1  ;;  %v441_v0 = vmul.f32 0.1, %v409_v60 }
  0xdd   : > { %v508_v4 = vpop.f32.mrf.mxu0  ;;  %v591_v9 = vpop.f32.mrf.mxu2 }
  0xde   : > { %v509_v7 = vadd.f32 %v508_v4, %v440_v1  ;;  %v1687_v1 = vand.u32 4294901760, %v397_v62 }
  0xdf   : > { %v631_v10 = vpop.f32.mrf.mxu3  ;;  %1182 = vmatmul.f32.gmra.mxu1 %v9555_v13 }
  0xe0   : > { %v555_v15 = vadd.f32 %v554_v5, %v509_v7  ;;  %1148 = vmatmul.f32.gmra.mxu0 %v9555_v13  ;;  %v1738_v4 = vsub.f32 %v397_v62, %v1687_v1 }
  0xe2   : > { %v592_v18 = vadd.f32 %v591_v9, %v555_v15  ;;  %1232 = vmatmul.f32.gmra.mxu2 %v9605_v37 }
  0xe4   : > { %v632_v21 = vadd.f32 %v631_v10, %v592_v18  ;;  %1274 = vmatmul.f32.gmra.mxu3 %v9574_v24  ;;  %v558_v25 = vpop.f32.mrf.mxu1 }
  0xe5   : > { %v516_v22 = vpop.f32.mrf.mxu0  ;;  %v596_v28 = vpop.f32.mrf.mxu2 }
  0xe6   : > { %v517_v26 = vadd.f32 %v516_v22, %v448_v20 }
  0xe7   : > { %v637_v29 = vpop.f32.mrf.mxu3  ;;  %1186 = vmatmul.f32.gmra.mxu1 %v9574_v24 }
  0xe8   : > { %v559_v35 = vadd.f32 %v558_v25, %v517_v26  ;;  %1152 = vmatmul.f32.gmra.mxu0 %v9574_v24 }
  0xea   : > { %v597_v39 = vadd.f32 %v596_v28, %v559_v35  ;;  %1240 = vmatmul.f32.gmra.mxu2 %v9616_v40 }
  0xec   : > { %v638_v42 = vadd.f32 %v637_v29, %v597_v39  ;;  %1278 = vmatmul.f32.gmra.mxu3 %v9594_v34  ;;  %v562_v44 = vpop.f32.mrf.mxu1  ;;  %v457_v39 = vmul.f32 0.1, %v425_v31 }
  0xed   : > { %v524_v43 = vpop.f32.mrf.mxu0  ;;  %v601_v46 = vpop.f32.mrf.mxu2 }
  0xee   : > { %v525_v45 = vadd.f32 %v524_v43, %v456_v41 }
  0xef   : > { %v643_v47 = vpop.f32.mrf.mxu3  ;;  %1190 = vmatmul.f32.gmra.mxu1 %v9594_v34 }
  0xf0   : > { %v563_v48 = vadd.f32 %v562_v44, %v525_v45  ;;  %1156 = vmatmul.f32.gmra.mxu0 %v9594_v34 }
  0xf2   : > { %v602_v50 = vadd.f32 %v601_v46, %v563_v48  ;;  %1383 = vmatmul.f32.vlgmr.msrb.gmra.mxu2 %v9551_v8 }
  0xf3   : > { %1688 = vmatpush.msrb.mxu2 %v1687_v1 }
  0xf4   : > { %v644_v52 = vadd.f32 %v643_v47, %v602_v50  ;;  %1417 = vmatmul.f32.vlgmr.msrb.gmra.mxu3 %v9551_v8  ;;  %v701_v54 = vpop.f32.mrf.mxu1 }
  0xf5   : > { %v667_v53 = vpop.f32.mrf.mxu0  ;;  %v739_v56 = vpop.f32.mrf.mxu2 }
  0xf6   : > { %v668_v55 = vadd.f32 %v667_v53, %v626_v3  ;;  %v740_v57 = vadd.f32 %v739_v56, %v433_v51 }
  0xf7   : > { %v789_v58 = vpop.f32.mrf.mxu3  ;;  %1341 = vmatmul.f32.vlgmr.msrb.gmra.mxu1 %v9566_v19 }
  0xf8   : > { %v9710_v59 = vadd.f32 %v701_v54, %v668_v55  ;;  %1302 = vmatmul.f32.vlgmr.msrb.gmra.mxu0 %v9558_v14  ;;  %v790_v61 = vadd.f32 %v789_v58, %v740_v57  ;;  %1654 = vmatpush.msrb.mxu1 %v9683_v63  ;;  %v1739_v63 = vand.u32 4294901760, %v1738_v4 }
  0xf9   : > { %1620 = vmatpush.msrb.mxu0 %v1500_v6 }
  0xfa   : > { %1387 = vmatmul.f32.gmra.mxu2 %v9555_v13  ;;  %v1740_v15 = vsub.f32 %v1738_v4, %v1739_v63 }
  0xfc   : > { %1421 = vmatmul.f32.gmra.mxu3 %v9555_v13  ;;  %v705_v3 = vpop.f32.mrf.mxu1  ;;  %v1741_v18 = vand.u32 4294901760, %v1740_v15 }
  0xfd   : > { %v671_v2 = vpop.f32.mrf.mxu0  ;;  %v747_v7 = vpop.f32.mrf.mxu2 }
  0xfe   : > { %v672_v5 = vadd.f32 %v671_v2, %v632_v21  ;;  %v748_v6 = vadd.f32 %v747_v7, %v441_v0  ;;  %1742 = vmatpush.msrb.mxu3 %v1741_v18 }
  0xff   : > { %v793_v9 = vpop.f32.mrf.mxu3  ;;  %1347 = vmatmul.f32.gmra.mxu1 %v9572_v23 }
 0x100   : > { %v9721_v10 = vadd.f32 %v705_v3, %v672_v5  ;;  %1307 = vmatmul.f32.gmra.mxu0 %v9561_v17  ;;  %v794_v12 = vadd.f32 %v793_v9, %v748_v6 }
 0x102   : > { %14088 = vst [vmem:[#allocation19_spill] sm:$0xff] %v9721_v10  ;;  %1391 = vmatmul.f32.gmra.mxu2 %v9574_v24 }
 0x104   : > { %1425 = vmatmul.f32.gmra.mxu3 %v9574_v24  ;;  %v709_v21 = vpop.f32.mrf.mxu1 }
 0x105   : > { %v675_v20 = vpop.f32.mrf.mxu0  ;;  %v755_v25 = vpop.f32.mrf.mxu2 }
 0x106   : > { %v676_v22 = vadd.f32 %v675_v20, %v638_v42  ;;  %v756_v26 = vadd.f32 %v755_v25, %v449_v16 }
 0x107   : > { %v797_v28 = vpop.f32.mrf.mxu3  ;;  %1353 = vmatmul.f32.gmra.mxu1 %v9592_v33 }
 0x108   : > { %v9728_v29 = vadd.f32 %v709_v21, %v676_v22  ;;  %1312 = vmatmul.f32.gmra.mxu0 %v9584_v30  ;;  %v798_v35 = vadd.f32 %v797_v28, %v756_v26  ;;  %v402_v21 = vld [vmem:[%s9518_s13 + $0x10] sm:$0xff] }
 0x109   : > { %v434_v26 = vmul.f32 0.1, %v402_v21 }
 0x10a   : > { %14089 = vst [vmem:[#allocation20_spill] sm:$0xff] %v9728_v29  ;;  %1395 = vmatmul.f32.gmra.mxu2 %v9594_v34 }
 0x10c   : > { %1429 = vmatmul.f32.gmra.mxu3 %v9594_v34  ;;  %v713_v43 = vpop.f32.mrf.mxu1 }
 0x10d   : > { %v679_v41 = vpop.f32.mrf.mxu0  ;;  %v763_v42 = vpop.f32.mrf.mxu2 }
 0x10e   : > { %v680_v44 = vadd.f32 %v679_v41, %v644_v52  ;;  %v764_v45 = vadd.f32 %v763_v42, %v457_v39 }
 0x10f   : > { %v801_v46 = vpop.f32.mrf.mxu3  ;;  %1359 = vmatmul.f32.gmra.mxu1 %v9608_v38 }
 0x110   : > { %v9735_v47 = vadd.f32 %v713_v43, %v680_v44  ;;  %1317 = vmatmul.f32.gmra.mxu0 %v9601_v36  ;;  %v802_v48 = vadd.f32 %v801_v46, %v764_v45  ;;  %v410_v44 = vld [vmem:[%s9518_s13 + $0x50] sm:$0xff] }
 0x111   : > { %v398_v45 = vld [vmem:[%s13715_s2 + $0x30] sm:$0xff] }
 0x112   : > { %14090 = vst [vmem:[#allocation21_spill] sm:$0xff] %v9735_v47  ;;  %1541 = vmatmul.f32.vlgmr.msra.gmra.mxu2 %v9558_v14  ;;  %v9772_v46 = vand.u32 4294901760, %v398_v45 }
 0x113   : > { %1859 = vmatpush.msra.mxu2 %v1739_v63 }
 0x114   : > { %1580 = vmatmul.f32.vlgmr.msra.gmra.mxu3 %v9566_v19  ;;  %v864_v50 = vpop.f32.mrf.mxu1 }
 0x115   : > { %v825_v49 = vpop.f32.mrf.mxu0  ;;  %1893 = vmatpush.msra.mxu3 %v1687_v1  ;;  %v906_v52 = vpop.f32.mrf.mxu2 }
 0x116   : > { %v826_v51 = vadd.f32 %v825_v49, %v790_v61  ;;  %v442_v49 = vmul.f32 0.1, %v410_v44 }
 0x117   : > { %v940_v53 = vpop.f32.mrf.mxu3  ;;  %1505 = vmatmul.f32.vlgmr.msra.gmra.mxu1 %v9551_v8 }
 0x118   : > { %v865_v54 = vadd.f32 %v864_v50, %v826_v51  ;;  %1455 = vmatmul.f32.vlgmr.msra.gmra.mxu0 %v9576_v27  ;;  %1815 = vmatpush.msra.mxu1 %v1687_v1  ;;  %v9776_v50 = vsub.f32 %v398_v45, %v9772_v46 }
 0x119   : > { %1777 = vmatpush.msra.mxu0 %v1738_v4 }
 0x11a   : > { %v907_v55 = vadd.f32 %v906_v52, %v865_v54  ;;  %1546 = vmatmul.f32.gmra.mxu2 %v9561_v17  ;;  %v1978_v54 = vand.u32 4294901760, %v9776_v50 }
 0x11c   : > { %v9744_v56 = vadd.f32 %v940_v53, %v907_v55  ;;  %1586 = vmatmul.f32.gmra.mxu3 %v9572_v23  ;;  %v870_v58 = vpop.f32.mrf.mxu1 }
 0x11d   : > { %v830_v57 = vpop.f32.mrf.mxu0  ;;  %v910_v61 = vpop.f32.mrf.mxu2 }
 0x11e   : > { %v831_v60 = vadd.f32 %v830_v57, %v794_v12 }
 0x11f   : > { %v944_v62 = vpop.f32.mrf.mxu3  ;;  %1509 = vmatmul.f32.gmra.mxu1 %v9555_v13 }
 0x120   : > { %v871_v0 = vadd.f32 %v870_v58, %v831_v60  ;;  %1463 = vmatmul.f32.gmra.mxu0 %v9589_v32  ;;  %v418_v60 = vld [vmem:[%s9518_s13 + $0x90] sm:$0xff] }
 0x122   : > { %v911_v2 = vadd.f32 %v910_v61, %v871_v0  ;;  %1551 = vmatmul.f32.gmra.mxu2 %v9584_v30  ;;  %v1979_v61 = vsub.f32 %v9776_v50, %v1978_v54 }
 0x124   : > { %v9750_v1 = vadd.f32 %v944_v62, %v911_v2  ;;  %1592 = vmatmul.f32.gmra.mxu3 %v9592_v33  ;;  %v876_v4 = vpop.f32.mrf.mxu1  ;;  %v1980_v0 = vand.u32 4294901760, %v1979_v61 }
 0x125   : > { %v835_v3 = vpop.f32.mrf.mxu0  ;;  %v914_v7 = vpop.f32.mrf.mxu2 }
 0x126   : > { %14091 = vst [vmem:[#allocation22_spill] sm:$0xff] %v9750_v1  ;;  %v836_v5 = vadd.f32 %v835_v3, %v798_v35  ;;  %v450_v3 = vmul.f32 0.1, %v418_v60  ;;  %v8728_v1 = vld [vmem:[#allocation10 + $0x1d0] sm:$0xf] }
 0x127   : > { %v948_v6 = vpop.f32.mrf.mxu3  ;;  %1513 = vmatmul.f32.gmra.mxu1 %v9574_v24 }
 0x128   : > { %v877_v9 = vadd.f32 %v876_v4, %v836_v5  ;;  %1471 = vmatmul.f32.gmra.mxu0 %v9605_v37 }
 0x12a   : > { %v915_v63 = vadd.f32 %v914_v7, %v877_v9  ;;  %1556 = vmatmul.f32.gmra.mxu2 %v9601_v36 }
 0x12c   : > { %v9756_v11 = vadd.f32 %v948_v6, %v915_v63  ;;  %1598 = vmatmul.f32.gmra.mxu3 %v9608_v38  ;;  %v882_v15 = vpop.f32.mrf.mxu1 }
 0x12d   : > { %v840_v12 = vpop.f32.mrf.mxu0  ;;  %v918_v18 = vpop.f32.mrf.mxu2 }
 0x12e   : > { %14092 = vst [vmem:[#allocation23_spill] sm:$0xff] %v9756_v11  ;;  %v841_v16 = vadd.f32 %v840_v12, %v802_v48  ;;  %v426_v12 = vld [vmem:[%s9518_s13 + $0xd0] sm:$0xff] }
 0x12f   : > { %v952_v20 = vpop.f32.mrf.mxu3  ;;  %1517 = vmatmul.f32.gmra.mxu1 %v9594_v34 }
 0x130   : > { %v883_v22 = vadd.f32 %v882_v15, %v841_v16  ;;  %1479 = vmatmul.f32.gmra.mxu0 %v9616_v40 }
 0x132   : > { %v919_v25 = vadd.f32 %v918_v18, %v883_v22  ;;  %1694 = vmatmul.f32.vlgmr.msrb.gmra.mxu2 %v9576_v27  ;;  %v458_v18 = vmul.f32 0.1, %v426_v12 }
 0x133   : > { %2016 = vmatpush.msrb.mxu2 %v9776_v50 }
 0x134   : > { %v9763_v28 = vadd.f32 %v952_v20, %v919_v25  ;;  %1744 = vmatmul.f32.vlgmr.msrb.gmra.mxu3 %v9551_v8  ;;  %v1028_v35 = vpop.f32.mrf.mxu1 }
 0x135   : > { %v978_v31 = vpop.f32.mrf.mxu0  ;;  %v1064_v41 = vpop.f32.mrf.mxu2  ;;  %2054 = vmatpush.msrb.mxu3 %v9772_v46 }
 0x136   : > { %14093 = vst [vmem:[#allocation24_spill] sm:$0xff] %v9763_v28  ;;  %v979_v39 = vadd.f32 %v978_v31, %v434_v26 }
 0x137   : > { %v1103_v43 = vpop.f32.mrf.mxu3  ;;  %1656 = vmatmul.f32.vlgmr.msrb.gmra.mxu1 %v9551_v8 }
 0x138   : > { %v1029_v42 = vadd.f32 %v1028_v35, %v979_v39  ;;  %1622 = vmatmul.f32.vlgmr.msrb.gmra.mxu0 %v9551_v8  ;;  %1981 = vmatpush.msrb.mxu1 %v1980_v0  ;;  %v403_v39 = vld [vmem:[%s9518_s13 + $0x18] sm:$0xff] }
 0x139   : > { %1927 = vmatpush.msrb.mxu0 %v9772_v46 }
 0x13a   : > { %v1065_v48 = vadd.f32 %v1064_v41, %v1029_v42  ;;  %1702 = vmatmul.f32.gmra.mxu2 %v9589_v32 }
 0x13c   : > { %v1104_v51 = vadd.f32 %v1103_v43, %v1065_v48  ;;  %1748 = vmatmul.f32.gmra.mxu3 %v9555_v13  ;;  %v1032_v53 = vpop.f32.mrf.mxu1  ;;  %v435_v43 = vmul.f32 0.1, %v403_v39 }
 0x13d   : > { %v986_v52 = vpop.f32.mrf.mxu0  ;;  %v1069_v57 = vpop.f32.mrf.mxu2 }
 0x13e   : > { %v987_v55 = vadd.f32 %v986_v52, %v442_v49 }
 0x13f   : > { %v1109_v58 = vpop.f32.mrf.mxu3  ;;  %1660 = vmatmul.f32.gmra.mxu1 %v9555_v13 }
 0x140   : > { %v1033_v62 = vadd.f32 %v1032_v53, %v987_v55  ;;  %1626 = vmatmul.f32.gmra.mxu0 %v9555_v13  ;;  %v411_v55 = vld [vmem:[%s9518_s13 + $0x58] sm:$0xff] }
 0x142   : > { %v1070_v2 = vadd.f32 %v1069_v57, %v1033_v62  ;;  %1710 = vmatmul.f32.gmra.mxu2 %v9605_v37 }
 0x144   : > { %v1110_v4 = vadd.f32 %v1109_v58, %v1070_v2  ;;  %1752 = vmatmul.f32.gmra.mxu3 %v9574_v24  ;;  %v1036_v7 = vpop.f32.mrf.mxu1  ;;  %v443_v58 = vmul.f32 0.1, %v411_v55 }
 0x145   : > { %v994_v5 = vpop.f32.mrf.mxu0  ;;  %v1074_v9 = vpop.f32.mrf.mxu2 }
 0x146   : > { %v995_v6 = vadd.f32 %v994_v5, %v450_v3 }
 0x147   : > { %v1115_v63 = vpop.f32.mrf.mxu3  ;;  %1664 = vmatmul.f32.gmra.mxu1 %v9574_v24 }
 0x148   : > { %v1037_v15 = vadd.f32 %v1036_v7, %v995_v6  ;;  %1630 = vmatmul.f32.gmra.mxu0 %v9574_v24  ;;  %v419_v6 = vld [vmem:[%s9518_s13 + $0x98] sm:$0xff] }
 0x149   : > { %v451_v12 = vmul.f32 0.1, %v419_v6 }
 0x14a   : > { %v1075_v16 = vadd.f32 %v1074_v9, %v1037_v15  ;;  %1718 = vmatmul.f32.gmra.mxu2 %v9616_v40 }
 0x14c   : > { %v1116_v20 = vadd.f32 %v1115_v63, %v1075_v16  ;;  %1756 = vmatmul.f32.gmra.mxu3 %v9594_v34  ;;  %v1040_v22 = vpop.f32.mrf.mxu1 }
 0x14d   : > { %v1002_v21 = vpop.f32.mrf.mxu0  ;;  %v1079_v26 = vpop.f32.mrf.mxu2 }
 0x14e   : > { %v1003_v25 = vadd.f32 %v1002_v21, %v458_v18 }
 0x14f   : > { %v1121_v31 = vpop.f32.mrf.mxu3  ;;  %1668 = vmatmul.f32.gmra.mxu1 %v9594_v34 }
 0x150   : > { %v1041_v35 = vadd.f32 %v1040_v22, %v1003_v25  ;;  %1634 = vmatmul.f32.gmra.mxu0 %v9594_v34 }
 0x152   : > { %v1080_v41 = vadd.f32 %v1079_v26, %v1041_v35  ;;  %1861 = vmatmul.f32.vlgmr.msra.gmra.mxu2 %v9551_v8 }
 0x154   : > { %v1122_v44 = vadd.f32 %v1121_v31, %v1080_v41  ;;  %1895 = vmatmul.f32.vlgmr.msra.gmra.mxu3 %v9551_v8  ;;  %v1179_v45 = vpop.f32.mrf.mxu1  ;;  %v427_v31 = vld [vmem:[%s9518_s13 + $0xd8] sm:$0xff] }
 0x155   : > { %v1145_v42 = vpop.f32.mrf.mxu0  ;;  %v1217_v49 = vpop.f32.mrf.mxu2  ;;  %v459_v39 = vmul.f32 0.1, %v427_v31 }
 0x156   : > { %v1146_v48 = vadd.f32 %v1145_v42, %v1104_v51  ;;  %v1218_v50 = vadd.f32 %v1217_v49, %v435_v43  ;;  %v399_v51 = vld [vmem:[%s13715_s2 + $0x38] sm:$0xff] }
 0x157   : > { %v1267_v52 = vpop.f32.mrf.mxu3  ;;  %1819 = vmatmul.f32.vlgmr.msra.gmra.mxu1 %v9566_v19  ;;  %v2165_v60 = vand.u32 4294901760, %v399_v51 }
 0x158   : > { %v9799_v53 = vadd.f32 %v1179_v45, %v1146_v48  ;;  %1780 = vmatmul.f32.vlgmr.msra.gmra.mxu0 %v9558_v14  ;;  %v1268_v57 = vadd.f32 %v1267_v52, %v1218_v50  ;;  %2132 = vmatpush.msra.mxu1 %v9772_v46 }
 0x159   : > { %2098 = vmatpush.msra.mxu0 %v1978_v54  ;;  %2166 = vmatpush.msra.mxu2 %v2165_v60  ;;  %v2216_v0 = vsub.f32 %v399_v51, %v2165_v60 }
 0x15a   : > { %1865 = vmatmul.f32.gmra.mxu2 %v9555_v13 }
 0x15b   : > { %v2217_v46 = vand.u32 4294901760, %v2216_v0 }
 0x15c   : > { %1899 = vmatmul.f32.gmra.mxu3 %v9555_v13  ;;  %v1183_v62 = vpop.f32.mrf.mxu1 }
 0x15d   : > { %v1149_v61 = vpop.f32.mrf.mxu0  ;;  %v1225_v3 = vpop.f32.mrf.mxu2  ;;  %v2218_v63 = vsub.f32 %v2216_v0, %v2217_v46 }
 0x15e   : > { %v1150_v2 = vadd.f32 %v1149_v61, %v1110_v4  ;;  %v1226_v54 = vadd.f32 %v1225_v3, %v443_v58 }
 0x15f   : > { %v1271_v5 = vpop.f32.mrf.mxu3  ;;  %1825 = vmatmul.f32.gmra.mxu1 %v9572_v23  ;;  %v2219_v15 = vand.u32 4294901760, %v2218_v63 }
 0x160   : > { %v9810_v7 = vadd.f32 %v1183_v62, %v1150_v2  ;;  %1785 = vmatmul.f32.gmra.mxu0 %v9561_v17  ;;  %v1272_v9 = vadd.f32 %v1271_v5, %v1226_v54 }
 0x161   : > { %2220 = vmatpush.msra.mxu3 %v2219_v15 }
 0x162   : > { %14094 = vst [vmem:[#allocation25_spill] sm:$0xff] %v9810_v7  ;;  %1869 = vmatmul.f32.gmra.mxu2 %v9574_v24  ;;  %v8834_v7 = vld [vmem:[#allocation10 + $0xa4] sm:$0xf0] }
 0x164   : > { %1903 = vmatmul.f32.gmra.mxu3 %v9574_v24  ;;  %v1187_v16 = vpop.f32.mrf.mxu1 }
 0x165   : > { %v1153_v4 = vpop.f32.mrf.mxu0  ;;  %v1233_v21 = vpop.f32.mrf.mxu2 }
 0x166   : > { %v1154_v18 = vadd.f32 %v1153_v4, %v1116_v20  ;;  %v1234_v22 = vadd.f32 %v1233_v21, %v451_v12 }
 0x167   : > { %v1275_v25 = vpop.f32.mrf.mxu3  ;;  %1831 = vmatmul.f32.gmra.mxu1 %v9592_v33 }
 0x168   : > { %v9817_v26 = vadd.f32 %v1187_v16, %v1154_v18  ;;  %1790 = vmatmul.f32.gmra.mxu0 %v9584_v30  ;;  %v1276_v35 = vadd.f32 %v1275_v25, %v1234_v22 }
 0x16a   : > { %14095 = vst [vmem:[#allocation26_spill] sm:$0xff] %v9817_v26  ;;  %1873 = vmatmul.f32.gmra.mxu2 %v9594_v34  ;;  %v8690_v26 = vld [vmem:[#allocation10 + $0x1a8] sm:$0xf0] }
 0x16c   : > { %1907 = vmatmul.f32.gmra.mxu3 %v9594_v34  ;;  %v1191_v43 = vpop.f32.mrf.mxu1 }
 0x16d   : > { %v1157_v41 = vpop.f32.mrf.mxu0  ;;  %v1241_v20 = vpop.f32.mrf.mxu2 }
 0x16e   : > { %v1158_v42 = vadd.f32 %v1157_v41, %v1122_v44  ;;  %v1242_v45 = vadd.f32 %v1241_v20, %v459_v39  ;;  %v8780_v20 = vld [vmem:[#allocation8 + $0xf8] sm:$0xff] }
 0x16f   : > { %v1279_v48 = vpop.f32.mrf.mxu3  ;;  %1837 = vmatmul.f32.gmra.mxu1 %v9608_v38 }
 0x170   : > { %v9824_v49 = vadd.f32 %v1191_v43, %v1158_v42  ;;  %1795 = vmatmul.f32.gmra.mxu0 %v9601_v36  ;;  %v1280_v50 = vadd.f32 %v1279_v48, %v1242_v45  ;;  %v8772_v43 = vld [vmem:[#allocation8 + $0xb8] sm:$0xff] }
 0x172   : > { %14096 = vst [vmem:[#allocation27_spill] sm:$0xff] %v9824_v49  ;;  %2019 = vmatmul.f32.vlgmr.msrb.gmra.mxu2 %v9558_v14 }
 0x173   : > { %2337 = vmatpush.msrb.mxu2 %v2217_v46 }
 0x174   : > { %2058 = vmatmul.f32.vlgmr.msrb.gmra.mxu3 %v9566_v19  ;;  %v1342_v55 = vpop.f32.mrf.mxu1 }
 0x175   : > { %v1303_v52 = vpop.f32.mrf.mxu0  ;;  %2371 = vmatpush.msrb.mxu3 %v2165_v60  ;;  %v1384_v44 = vpop.f32.mrf.mxu2 }
 0x176   : > { %v1304_v51 = vadd.f32 %v1303_v52, %v1268_v57  ;;  %v8771_v52 = vld [vmem:[#allocation8 + $0xb0] sm:$0xff] }
 0x177   : > { %v1418_v58 = vpop.f32.mrf.mxu3  ;;  %1983 = vmatmul.f32.vlgmr.msrb.gmra.mxu1 %v9551_v8 }
 0x178   : > { %v1343_v61 = vadd.f32 %v1342_v55, %v1304_v51  ;;  %1933 = vmatmul.f32.vlgmr.msrb.gmra.mxu0 %v9576_v27  ;;  %2293 = vmatpush.msrb.mxu1 %v2165_v60 }
 0x179   : > { %2255 = vmatpush.msrb.mxu0 %v2216_v0 }
 0x17a   : > { %v1385_v62 = vadd.f32 %v1384_v44, %v1343_v61  ;;  %2024 = vmatmul.f32.gmra.mxu2 %v9561_v17  ;;  %v8756_v44 = vld [vmem:[#allocation8 + $0x38] sm:$0xff] }
 0x17c   : > { %v9833_v2 = vadd.f32 %v1418_v58, %v1385_v62  ;;  %2064 = vmatmul.f32.gmra.mxu3 %v9572_v23  ;;  %v1348_v54 = vpop.f32.mrf.mxu1  ;;  %v8764_v58 = vld [vmem:[#allocation8 + $0x78] sm:$0xff] }
 0x17d   : > { %v1308_v3 = vpop.f32.mrf.mxu0  ;;  %v1388_v57 = vpop.f32.mrf.mxu2 }
 0x17e   : > { %v1309_v5 = vadd.f32 %v1308_v3, %v1272_v9  ;;  %v8779_v3 = vld [vmem:[#allocation8 + $0xf0] sm:$0xff] }
 0x17f   : > { %v1422_v46 = vpop.f32.mrf.mxu3  ;;  %1987 = vmatmul.f32.gmra.mxu1 %v9555_v13 }
 0x180   : > { %v1349_v6 = vadd.f32 %v1348_v54, %v1309_v5  ;;  %1941 = vmatmul.f32.gmra.mxu0 %v9589_v32  ;;  %v412_v5 = vld [vmem:[%s9518_s13 + $0x60] sm:$0xff] }
 0x182   : > { %v1389_v63 = vadd.f32 %v1388_v57, %v1349_v6  ;;  %2029 = vmatmul.f32.gmra.mxu2 %v9584_v30  ;;  %v8770_v57 = vld [vmem:[#allocation8 + $0xa8] sm:$0xff]  ;;  %v8763_v6 = vld [vmem:[#allocation8 + $0x70] sm:$0xff] }
 0x184   : > { %v9839_v60 = vadd.f32 %v1422_v46, %v1389_v63  ;;  %2070 = vmatmul.f32.gmra.mxu3 %v9592_v33  ;;  %v1354_v12 = vpop.f32.mrf.mxu1  ;;  %v8755_v46 = vld [vmem:[#allocation8 + $0x30] sm:$0xff] }
 0x185   : > { %v1313_v0 = vpop.f32.mrf.mxu0  ;;  %v1392_v4 = vpop.f32.mrf.mxu2 }
 0x186   : > { %14097 = vst [vmem:[#allocation28_spill] sm:$0xff] %v9839_v60  ;;  %v1314_v15 = vadd.f32 %v1313_v0, %v1276_v35  ;;  %v404_v35 = vld [vmem:[%s9518_s13 + $0x20] sm:$0xff]  ;;  %v444_v0 = vmul.f32 0.1, %v412_v5  ;;  %v8560_v60 = vld [vmem:[#allocation10 + $0x88] sm:$0xf] }
 0x187   : > { %v1426_v9 = vpop.f32.mrf.mxu3  ;;  %1991 = vmatmul.f32.gmra.mxu1 %v9574_v24  ;;  %v436_v48 = vmul.f32 0.1, %v404_v35  ;;  %v8768_v35 = vld [vmem:[#allocation8 + $0x98] sm:$0xff] }
 0x188   : > { %v1355_v16 = vadd.f32 %v1354_v12, %v1314_v15  ;;  %1949 = vmatmul.f32.gmra.mxu0 %v9605_v37  ;;  %v8778_v12 = vld [vmem:[#allocation8 + $0xe8] sm:$0xff]  ;;  %v8769_v15 = vld [vmem:[#allocation8 + $0xa0] sm:$0xff] }
 0x18a   : > { %v1393_v18 = vadd.f32 %v1392_v4, %v1355_v16  ;;  %2034 = vmatmul.f32.gmra.mxu2 %v9601_v36 }
 0x18c   : > { %v9845_v21 = vadd.f32 %v1426_v9, %v1393_v18  ;;  %2076 = vmatmul.f32.gmra.mxu3 %v9608_v38  ;;  %v1360_v25 = vpop.f32.mrf.mxu1  ;;  %v8754_v18 = vld [vmem:[#allocation8 + $0x28] sm:$0xff] }
 0x18d   : > { %v1318_v22 = vpop.f32.mrf.mxu0  ;;  %v1396_v39 = vpop.f32.mrf.mxu2 }
 0x18e   : > { %14098 = vst [vmem:[#allocation29_spill] sm:$0xff] %v9845_v21  ;;  %v1319_v31 = vadd.f32 %v1318_v22, %v1280_v50  ;;  %v8762_v22 = vld [vmem:[#allocation8 + $0x68] sm:$0xff] }
 0x18f   : > { %v1430_v41 = vpop.f32.mrf.mxu3  ;;  %1995 = vmatmul.f32.gmra.mxu1 %v9594_v34  ;;  %v8866_v21 = vld [vmem:[#allocation10 + $0x1a4] sm:$0xf0] }
 0x190   : > { %v1361_v42 = vadd.f32 %v1360_v25, %v1319_v31  ;;  %1957 = vmatmul.f32.gmra.mxu0 %v9616_v40 }
 0x192   : > { %v1397_v45 = vadd.f32 %v1396_v39, %v1361_v42  ;;  %2172 = vmatmul.f32.vlgmr.msra.gmra.mxu2 %v9576_v27  ;;  %v8753_v42 = vld [vmem:[#allocation8 + $0x20] sm:$0xff] }
 0x193   : > { %3047 = vmatpush.bf16.msra.mxu2 %v8772_v43 }
 0x194   : > { %v9852_v55 = vadd.f32 %v1430_v41, %v1397_v45  ;;  %2222 = vmatmul.f32.vlgmr.msra.gmra.mxu3 %v9551_v8  ;;  %v1506_v51 = vpop.f32.mrf.mxu1  ;;  %v420_v41 = vld [vmem:[%s9518_s13 + $0xa0] sm:$0xff] }
 0x195   : > { %v1456_v50 = vpop.f32.mrf.mxu0  ;;  %3060 = vmatpush.bf16.msra.mxu3 %v8780_v20  ;;  %v1542_v62 = vpop.f32.mrf.mxu2  ;;  %v8761_v20 = vld [vmem:[#allocation8 + $0x60] sm:$0xff] }
 0x196   : > { %14099 = vst [vmem:[#allocation30_spill] sm:$0xff] %v9852_v55  ;;  %v1457_v61 = vadd.f32 %v1456_v50, %v436_v48  ;;  %v452_v48 = vmul.f32 0.1, %v420_v41  ;;  %v8767_v50 = vld [vmem:[#allocation8 + $0x90] sm:$0xff] }
 0x197   : > { %v1581_v54 = vpop.f32.mrf.mxu3  ;;  %3048 = vmatpush.bf16.msra.mxu2 %v8771_v52  ;;  %2134 = vmatmul.f32.vlgmr.msra.gmra.mxu1 %v9551_v8  ;;  %v8776_v52 = vld [vmem:[#allocation8 + $0xd8] sm:$0xff] }
 0x198   : > { %v1507_v27 = vadd.f32 %v1506_v51, %v1457_v61  ;;  %2100 = vmatmul.f32.vlgmr.msra.gmra.mxu0 %v9551_v8  ;;  %3034 = vmatpush.bf16.msra.mxu1 %v8764_v58  ;;  %v8752_v61 = vld [vmem:[#allocation8 + $0x18] sm:$0xff] }
 0x199   : > { %3021 = vmatpush.bf16.msra.mxu0 %v8756_v44  ;;  %3061 = vmatpush.bf16.msra.mxu3 %v8779_v3 }
 0x19a   : > { %v1543_v63 = vadd.f32 %v1542_v62, %v1507_v27  ;;  %2180 = vmatmul.f32.gmra.mxu2 %v9589_v32  ;;  %v8777_v32 = vld [vmem:[#allocation8 + $0xe0] sm:$0xff]  ;;  %v8760_v62 = vld [vmem:[#allocation8 + $0x58] sm:$0xff]  ;;  %v8766_v27 = vld [vmem:[#allocation8 + $0x88] sm:$0xff] }
 0x19b   : > { %3049 = vmatpush.bf16.msra.mxu2 %v8770_v57  ;;  %v428_v57 = vld [vmem:[%s9518_s13 + $0xe0] sm:$0xff] }
 0x19c   : > { %v9859_v4 = vadd.f32 %v1581_v54, %v1543_v63  ;;  %2226 = vmatmul.f32.gmra.mxu3 %v9555_v13  ;;  %v1510_v16 = vpop.f32.mrf.mxu1  ;;  %3035 = vmatpush.bf16.msra.mxu1 %v8763_v6  ;;  %v8751_v6 = vld [vmem:[#allocation8 + $0x10] sm:$0xff] }
 0x19d   : > { %v1464_v9 = vpop.f32.mrf.mxu0  ;;  %3022 = vmatpush.bf16.msra.mxu0 %v8755_v46  ;;  %v1547_v31 = vpop.f32.mrf.mxu2  ;;  %3062 = vmatpush.bf16.msra.mxu3 %v8778_v12  ;;  %v8759_v63 = vld [vmem:[#allocation8 + $0x50] sm:$0xff]  ;;  %v460_v12 = vmul.f32 0.1, %v428_v57 }
 0x19e   : > { %v1465_v25 = vadd.f32 %v1464_v9, %v444_v0  ;;  %v8765_v9 = vld [vmem:[#allocation8 + $0x80] sm:$0xff]  ;;  %v8811_v57 = vld [vmem:[#allocation8 + $0x1f0] sm:$0xff] }
 0x19f   : > { %v1587_v39 = vpop.f32.mrf.mxu3  ;;  %3050 = vmatpush.bf16.msra.mxu2 %v8769_v15  ;;  %2138 = vmatmul.f32.gmra.mxu1 %v9555_v13  ;;  %v8774_v15 = vld [vmem:[#allocation8 + $0xc8] sm:$0xff] }
 0x1a0   : > { %v1511_v43 = vadd.f32 %v1510_v16, %v1465_v25  ;;  %2104 = vmatmul.f32.gmra.mxu0 %v9555_v13  ;;  %3036 = vmatpush.bf16.msra.mxu1 %v8762_v22  ;;  %v8750_v25 = vld [vmem:[#allocation8 + $0x8] sm:$0xff] }
 0x1a1   : > { %3023 = vmatpush.bf16.msra.mxu0 %v8754_v18  ;;  %3063 = vmatpush.bf16.msra.mxu3 %v8777_v32 }
 0x1a2   : > { %v1548_v45 = vadd.f32 %v1547_v31, %v1511_v43  ;;  %2188 = vmatmul.f32.gmra.mxu2 %v9605_v37  ;;  %v8775_v37 = vld [vmem:[#allocation8 + $0xd0] sm:$0xff]  ;;  %v8758_v31 = vld [vmem:[#allocation8 + $0x48] sm:$0xff] }
 0x1a3   : > { %3051 = vmatpush.bf16.msra.mxu2 %v8768_v35  ;;  %v8804_v35 = vld [vmem:[#allocation8 + $0x1b8] sm:$0xff] }
 0x1a4   : > { %v9866_v51 = vadd.f32 %v1587_v39, %v1548_v45  ;;  %2230 = vmatmul.f32.gmra.mxu3 %v9574_v24  ;;  %v1514_v58 = vpop.f32.mrf.mxu1  ;;  %3037 = vmatpush.bf16.msra.mxu1 %v8761_v20  ;;  %v8812_v20 = vld [vmem:[#allocation8 + $0x1f8] sm:$0xff]  ;;  %v8749_v45 = vld [vmem:[#allocation8] sm:$0xff] }
 0x1a5   : > { %v1472_v44 = vpop.f32.mrf.mxu0  ;;  %3024 = vmatpush.bf16.msra.mxu0 %v8753_v42  ;;  %v1552_v54 = vpop.f32.mrf.mxu2  ;;  %3064 = vmatpush.bf16.msra.mxu3 %v8776_v52  ;;  %v405_v42 = vld [vmem:[%s9518_s13 + $0x28] sm:$0xff]  ;;  %v8757_v52 = vld [vmem:[#allocation8 + $0x40] sm:$0xff] }
 0x1a6   : > { %14100 = vst [vmem:[#allocation31_spill] sm:$0xff] %v9866_v51  ;;  %v1473_v3 = vadd.f32 %v1472_v44, %v452_v48  ;;  %v8803_v44 = vld [vmem:[#allocation8 + $0x1b0] sm:$0xff] }
 0x1a7   : > { %v1593_v5 = vpop.f32.mrf.mxu3  ;;  %3052 = vmatpush.bf16.msra.mxu2 %v8767_v50  ;;  %2142 = vmatmul.f32.gmra.mxu1 %v9574_v24  ;;  %v437_v50 = vmul.f32 0.1, %v405_v42  ;;  %v8799_v42 = vld [vmem:[#allocation8 + $0x190] sm:$0xff] }
 0x1a8   : > { %v1515_v46 = vadd.f32 %v1514_v58, %v1473_v3  ;;  %2108 = vmatmul.f32.gmra.mxu0 %v9574_v24  ;;  %3038 = vmatpush.bf16.msra.mxu1 %v8760_v62  ;;  %v8788_v3 = vld [vmem:[#allocation8 + $0x138] sm:$0xff] }
 0x1a9   : > { %3025 = vmatpush.bf16.msra.mxu0 %v8752_v61  ;;  %3065 = vmatpush.bf16.msra.mxu3 %v8775_v37 }
 0x1aa   : > { %v1553_v0 = vadd.f32 %v1552_v54, %v1515_v46  ;;  %2196 = vmatmul.f32.gmra.mxu2 %v9616_v40  ;;  %v8773_v40 = vld [vmem:[#allocation8 + $0xc0] sm:$0xff]  ;;  %v8796_v54 = vld [vmem:[#allocation8 + $0x178] sm:$0xff] }
 0x1ab   : > { %3053 = vmatpush.bf16.msra.mxu2 %v8766_v27 }
 0x1ac   : > { %v9873_v16 = vadd.f32 %v1593_v5, %v1553_v0  ;;  %2234 = vmatmul.f32.gmra.mxu3 %v9594_v34  ;;  %v1518_v22 = vpop.f32.mrf.mxu1  ;;  %3039 = vmatpush.bf16.msra.mxu1 %v8759_v63  ;;  %v8787_v0 = vld [vmem:[#allocation8 + $0x130] sm:$0xff] }
 0x1ad   : > { %v1480_v18 = vpop.f32.mrf.mxu0  ;;  %3026 = vmatpush.bf16.msra.mxu0 %v8751_v6  ;;  %v1557_v39 = vpop.f32.mrf.mxu2  ;;  %3066 = vmatpush.bf16.msra.mxu3 %v8774_v15  ;;  %v8802_v6 = vld [vmem:[#allocation8 + $0x1a8] sm:$0xff]  ;;  %v8801_v15 = vld [vmem:[#allocation8 + $0x1a0] sm:$0xff] }
 0x1ae   : > { %v1481_v32 = vadd.f32 %v1480_v18, %v460_v12  ;;  %v8795_v12 = vld [vmem:[#allocation8 + $0x170] sm:$0xff]  ;;  %v8794_v18 = vld [vmem:[#allocation8 + $0x168] sm:$0xff] }
 0x1af   : > { %v1599_v41 = vpop.f32.mrf.mxu3  ;;  %3054 = vmatpush.bf16.msra.mxu2 %v8765_v9  ;;  %2146 = vmatmul.f32.gmra.mxu1 %v9594_v34 }
 0x1b0   : > { %v1519_v43 = vadd.f32 %v1518_v22, %v1481_v32  ;;  %2112 = vmatmul.f32.gmra.mxu0 %v9594_v34  ;;  %3040 = vmatpush.bf16.msra.mxu1 %v8758_v31  ;;  %v8800_v32 = vld [vmem:[#allocation8 + $0x198] sm:$0xff] }
 0x1b1   : > { %3027 = vmatpush.bf16.msra.mxu0 %v8750_v25  ;;  %3067 = vmatpush.bf16.msra.mxu3 %v8773_v40  ;;  %v8809_v25 = vld [vmem:[#allocation8 + $0x1e0] sm:$0xff] }
 0x1b2   : > { %v1558_v48 = vadd.f32 %v1557_v39, %v1519_v43  ;;  %2339 = vmatmul.f32.vlgmr.msrb.gmra.mxu2 %v9551_v8  ;;  %v8785_v39 = vld [vmem:[#allocation8 + $0x120] sm:$0xff] }
 0x1b3   : > { %3099 = vmatpush.bf16.msrb.mxu2 %v8804_v35  ;;  %v8793_v40 = vld [vmem:[#allocation8 + $0x160] sm:$0xff]  ;;  %v8808_v35 = vld [vmem:[#allocation8 + $0x1d8] sm:$0xff] }
 0x1b4   : > { %v9880_v58 = vadd.f32 %v1599_v41, %v1558_v48  ;;  %2373 = vmatmul.f32.vlgmr.msrb.gmra.mxu3 %v9551_v8  ;;  %v1657_v62 = vpop.f32.mrf.mxu1  ;;  %3041 = vmatpush.bf16.msra.mxu1 %v8757_v52  ;;  %v2615_v41 = vld [vmem:[#allocation2 + $0x18] sm:$0xff] }
 0x1b5   : > { %v1623_v61 = vpop.f32.mrf.mxu0  ;;  %3112 = vmatpush.bf16.msrb.mxu3 %v8812_v20  ;;  %3028 = vmatpush.bf16.msra.mxu0 %v8749_v45  ;;  %v1695_v5 = vpop.f32.mrf.mxu2  ;;  %v2616_v20 = vld [vmem:[#allocation2 + $0x10] sm:$0xff]  ;;  %8981 = vtanh.f32 %v2615_v41  ;;  %v8792_v48 = vld [vmem:[#allocation8 + $0x158] sm:$0xff]  ;;  %v2619_v41 = vld [vmem:[#allocation2 + $0x28] sm:$0xff] }
 0x1b6   : > { %14101 = vst [vmem:[#allocation32_spill] sm:$0xff] %v9880_v58  ;;  %v1624_v37 = vadd.f32 %v1623_v61, %v9859_v4  ;;  %v1696_v27 = vadd.f32 %v1695_v5, %v437_v50  ;;  %v8810_v4 = vld [vmem:[#allocation8 + $0x1e8] sm:$0xff]  ;;  %8983 = vtanh.f32 %v2616_v20  ;;  %v407_v58 = vld [vmem:[%s9518_s13 + $0x38] sm:$0xff] }
 0x1b7   : > { %v1745_v46 = vpop.f32.mrf.mxu3  ;;  %3100 = vmatpush.bf16.msrb.mxu2 %v8803_v44  ;;  %2297 = vmatmul.f32.vlgmr.msrb.gmra.mxu1 %v9566_v19  ;;  %v8786_v19 = vld [vmem:[#allocation8 + $0x128] sm:$0xff]  ;;  %v8807_v44 = vld [vmem:[#allocation8 + $0x1d0] sm:$0xff]  ;;  %v439_v55 = vmul.f32 0.1, %v407_v58 }
 0x1b8   : > { %v9884_v63 = vadd.f32 %v1657_v62, %v1624_v37  ;;  %2258 = vmatmul.f32.vlgmr.msrb.gmra.mxu0 %v9558_v14  ;;  %v9888_v8 = vadd.f32 %v1745_v46, %v1696_v27  ;;  %3086 = vmatpush.bf16.msrb.mxu1 %v8796_v54  ;;  %v8798_v54 = vld [vmem:[#allocation8 + $0x188] sm:$0xff]  ;;  %v2614_v37 = vld [vmem:[#allocation2] sm:$0xff] }
 0x1b9   : > { %3073 = vmatpush.bf16.msrb.mxu0 %v8788_v3  ;;  %3113 = vmatpush.bf16.msrb.mxu3 %v8811_v57  ;;  %v2613_v3 = vld [vmem:[#allocation2 + $0x30] sm:$0xff]  ;;  %v9917_v27 = vld [vmem:[#allocation8 + $0x1c8] sm:$0xff] }
 0x1ba   : > { %2343 = vmatmul.f32.gmra.mxu2 %v9555_v13  ;;  %v9914_v57 = vld [vmem:[#allocation8 + $0x150] sm:$0xff]  ;;  %8985 = vtanh.f32 %v2613_v3 }
 0x1bb   : > { %3101 = vmatpush.bf16.msrb.mxu2 %v8802_v6  ;;  %v8982_v46 = vpop.eup %8981  ;;  %8987 = vtanh.f32 %v2614_v37 }
 0x1bc   : > { %2377 = vmatmul.f32.gmra.mxu3 %v9555_v13  ;;  %v9894_v14 = vpop.f32.mrf.mxu1  ;;  %3087 = vmatpush.bf16.msrb.mxu1 %v8795_v12  ;;  %v421_v13 = vld [vmem:[%s9518_s13 + $0xa8] sm:$0xff]  ;;  %8989 = vtanh.f32 %v2619_v41 }
 0x1bd   : > { %v9892_v9 = vpop.f32.mrf.mxu0  ;;  %14103 = vst [vmem:[#allocation34_spill] sm:$0xff] %v9894_v14  ;;  %3074 = vmatpush.bf16.msrb.mxu0 %v8787_v0  ;;  %v9896_v22 = vpop.f32.mrf.mxu2  ;;  %3114 = vmatpush.bf16.msrb.mxu3 %v8810_v4  ;;  %v453_v43 = vmul.f32 0.1, %v421_v13  ;;  %v9928_v12 = vld [vmem:[#allocation8 + $0x108] sm:$0xff] }
 0x1be   : > { %14102 = vst [vmem:[#allocation33_spill] sm:$0xff] %v9892_v9  ;;  %v9930_v4 = vld [vmem:[#allocation8 + $0x148] sm:$0xff] }
 0x1bf   : > { %14104 = vst [vmem:[#allocation35_spill] sm:$0xff] %v9896_v22  ;;  %v9898_v31 = vpop.f32.mrf.mxu3  ;;  %3102 = vmatpush.bf16.msrb.mxu2 %v8801_v15  ;;  %2303 = vmatmul.f32.gmra.mxu1 %v9572_v23  ;;  %v8784_v23 = vld [vmem:[#allocation8 + $0x118] sm:$0xff]  ;;  %v8730_v22 = vld [vmem:[#allocation10 + $0x1f0] sm:$0xf0] }
 0x1c0   : > { %14105 = vst [vmem:[#allocation36_spill] sm:$0xff] %v9898_v31  ;;  %2263 = vmatmul.f32.gmra.mxu0 %v9561_v17  ;;  %3088 = vmatpush.bf16.msrb.mxu1 %v8794_v18  ;;  %v9935_v18 = vld [vmem:[#allocation8 + $0x1c0] sm:$0xff]  ;;  %v8875_v31 = vld [vmem:[#allocation10 + $0x1ec] sm:$0xf0] }
 0x1c1   : > { %3075 = vmatpush.bf16.msrb.mxu0 %v8786_v19  ;;  %3115 = vmatpush.bf16.msrb.mxu3 %v8809_v25  ;;  %v2631_v19 = vpack.c.bf16 %v8982_v46, %v8982_v46 }
 0x1c2   : > { %2347 = vmatmul.f32.gmra.mxu2 %v9574_v24 }
 0x1c3   : > { %3103 = vmatpush.bf16.msrb.mxu2 %v8800_v32 }
 0x1c4   : > { %2381 = vmatmul.f32.gmra.mxu3 %v9574_v24  ;;  %v1665_v17 = vpop.f32.mrf.mxu1  ;;  %3089 = vmatpush.bf16.msrb.mxu1 %v8793_v40  ;;  %v9946_v40 = vld [vmem:[#allocation8 + $0x140] sm:$0xff] }
 0x1c5   : > { %v1631_v45 = vpop.f32.mrf.mxu0  ;;  %3076 = vmatpush.bf16.msrb.mxu0 %v8785_v39  ;;  %v1711_v50 = vpop.f32.mrf.mxu2  ;;  %3116 = vmatpush.bf16.msrb.mxu3 %v8808_v35  ;;  %v9944_v39 = vld [vmem:[#allocation8 + $0x100] sm:$0xff] }
 0x1c6   : > { %v1632_v52 = vadd.f32 %v1631_v45, %v9873_v16  ;;  %v1712_v61 = vadd.f32 %v1711_v50, %v453_v43  ;;  %v9912_v16 = vld [vmem:[#allocation8 + $0x110] sm:$0xff] }
 0x1c7   : > { %v1753_v62 = vpop.f32.mrf.mxu3  ;;  %3104 = vmatpush.bf16.msrb.mxu2 %v8799_v42  ;;  %2309 = vmatmul.f32.gmra.mxu1 %v9592_v33  ;;  %v8984_v33 = vpop.eup %8983 }
 0x1c8   : > { %v9906_v24 = vadd.f32 %v1665_v17, %v1632_v52  ;;  %2268 = vmatmul.f32.gmra.mxu0 %v9584_v30  ;;  %v9910_v5 = vadd.f32 %v1753_v62, %v1712_v61  ;;  %3090 = vmatpush.bf16.msrb.mxu1 %v8792_v48  ;;  %v9919_v30 = vld [vmem:[#allocation8 + $0x180] sm:$0xff]  ;;  %v8986_v25 = vpop.eup %8985  ;;  %v2632_v32 = vpack.c.bf16 %v8984_v33, %v8984_v33 }
 0x1c9   : > { %3077 = vmatpush.bf16.msrb.mxu0 %v8784_v23  ;;  %3117 = vmatpush.bf16.msrb.mxu3 %v8807_v44  ;;  %v8988_v13 = vpop.eup %8987  ;;  %v2629_v35 = vpack.c.bf16 %v8986_v25, %v8986_v25  ;;  %v9952_v23 = vld [vmem:[#allocation2 + $0x8] sm:$0xff]  ;;  %v9954_v52 = vld [vmem:[#allocation2 + $0x20] sm:$0xff] }
 0x1ca   : > { %14106 = vst [vmem:[#allocation37_spill] sm:$0xff] %v9906_v24  ;;  %2351 = vmatmul.f32.gmra.mxu2 %v9594_v34  ;;  %v2630_v43 = vpack.c.bf16 %v8988_v13, %v8988_v13  ;;  %v8990_v44 = vpop.eup %8989  ;;  %v8688_v24 = vld [vmem:[#allocation10 + $0x188] sm:$0xf] }
 0x1cb   : > { %3105 = vmatpush.bf16.msrb.mxu2 %v8798_v54  ;;  %v2635_v37 = vpack.c.bf16 %v8990_v44, %v8990_v44 }
 0x1cc   : > { %2385 = vmatmul.f32.gmra.mxu3 %v9594_v34  ;;  %v9924_v0 = vpop.f32.mrf.mxu1  ;;  %3091 = vmatpush.bf16.msrb.mxu1 %v9914_v57 }
 0x1cd   : > { %v9922_v6 = vpop.f32.mrf.mxu0  ;;  %14108 = vst [vmem:[#allocation39_spill] sm:$0xff] %v9924_v0  ;;  %3078 = vmatpush.bf16.msrb.mxu0 %v9912_v16  ;;  %v9932_v15 = vpop.f32.mrf.mxu2  ;;  %3118 = vmatpush.bf16.msrb.mxu3 %v9917_v27 }
 0x1ce   : > { %14107 = vst [vmem:[#allocation38_spill] sm:$0xff] %v9922_v6 }
 0x1cf   : > { %14109 = vst [vmem:[#allocation40_spill] sm:$0xff] %v9932_v15  ;;  %v9937_v34 = vpop.f32.mrf.mxu3  ;;  %3106 = vmatpush.bf16.msrb.mxu2 %v9919_v30  ;;  %2315 = vmatmul.f32.gmra.mxu1 %v9608_v38 }
 0x1d0   : > { %14110 = vst [vmem:[#allocation41_spill] sm:$0xff] %v9937_v34  ;;  %2273 = vmatmul.f32.gmra.mxu0 %v9601_v36  ;;  %3092 = vmatpush.bf16.msrb.mxu1 %v9930_v4  ;;  %v2620_v36 = vld [vmem:[#allocation2 + $0x38] sm:$0xff] }
 0x1d1   : > { %3079 = vmatpush.bf16.msrb.mxu0 %v9928_v12  ;;  %3119 = vmatpush.bf16.msrb.mxu3 %v9935_v18  ;;  %8991 = vtanh.f32 %v2620_v36 }
 0x1d2   : > { %3055 = vmatmul.bf16.vlgmr.msra.gmra.mxu2 %v2631_v19  ;;  %8993 = vtanh.f32 %v9952_v23 }
 0x1d3   : > { %8995 = vtanh.f32 %v9954_v52 }
 0x1d4   : > { %3068 = vmatmul.bf16.vlgmr.msra.gmra.mxu3 %v2632_v32  ;;  %v1820_v38 = vpop.f32.mrf.mxu1  ;;  %3093 = vmatpush.bf16.msrb.mxu1 %v9946_v40 }
 0x1d5   : > { %v1781_v42 = vpop.f32.mrf.mxu0  ;;  %3080 = vmatpush.bf16.msrb.mxu0 %v9944_v39  ;;  %v1862_v45 = vpop.f32.mrf.mxu2 }
 0x1d6   : > { %v1782_v20 = vadd.f32 %v1781_v42, %v9888_v8 }
 0x1d7   : > { %v1896_v17 = vpop.f32.mrf.mxu3  ;;  %3042 = vmatmul.bf16.vlgmr.msra.gmra.mxu1 %v2630_v43  ;;  %v8992_v62 = vpop.eup %8991 }
 0x1d8   : > { %v1821_v48 = vadd.f32 %v1820_v38, %v1782_v20  ;;  %3029 = vmatmul.bf16.vlgmr.msra.gmra.mxu0 %v2629_v35  ;;  %v8994_v33 = vpop.eup %8993  ;;  %v2636_v19 = vpack.c.bf16 %v8992_v62, %v8992_v62  ;;  %v406_v62 = vld [vmem:[%s9518_s13 + $0x30] sm:$0xff] }
 0x1d9   : > { %v8996_v25 = vpop.eup %8995  ;;  %v2633_v32 = vpack.c.bf16 %v8994_v33, %v8994_v33 }
 0x1da   : > { %v1863_v50 = vadd.f32 %v1862_v45, %v1821_v48  ;;  %v2634_v13 = vpack.c.bf16 %v8996_v25, %v8996_v25 }
 0x1dc   : > { %v9958_v61 = vadd.f32 %v1896_v17, %v1863_v50  ;;  %v9962_v3 = vpop.f32.mrf.mxu1 }
 0x1dd   : > { %v9960_v8 = vpop.f32.mrf.mxu0  ;;  %14112 = vst [vmem:[#allocation43_spill] sm:$0xff] %v9962_v3  ;;  %v9964_v54 = vpop.f32.mrf.mxu2 }
 0x1de   : > { %14111 = vst [vmem:[#allocation42_spill] sm:$0xff] %v9960_v8 }
 0x1df   : > { %14113 = vst [vmem:[#allocation44_spill] sm:$0xff] %v9964_v54  ;;  %v9966_v46 = vpop.f32.mrf.mxu3 }
 0x1e0   : > { %14114 = vst [vmem:[#allocation45_spill] sm:$0xff] %v9966_v46 }
 0x1e2   : > { %3107 = vmatmul.bf16.vlgmr.msrb.gmra.mxu2 %v2635_v37  ;;  %v438_v37 = vmul.f32 0.1, %v406_v62 }
 0x1e4   : > { %3120 = vmatmul.bf16.vlgmr.msrb.gmra.mxu3 %v2636_v19  ;;  %v1832_v35 = vpop.f32.mrf.mxu1 }
 0x1e5   : > { %v1791_v41 = vpop.f32.mrf.mxu0  ;;  %v1870_v36 = vpop.f32.mrf.mxu2 }
 0x1e6   : > { %v1792_v43 = vadd.f32 %v1791_v41, %v9910_v5 }
 0x1e7   : > { %v1904_v42 = vpop.f32.mrf.mxu3  ;;  %3094 = vmatmul.bf16.vlgmr.msrb.gmra.mxu1 %v2634_v13 }
 0x1e8   : > { %v1833_v38 = vadd.f32 %v1832_v35, %v1792_v43  ;;  %3081 = vmatmul.bf16.vlgmr.msrb.gmra.mxu0 %v2633_v32 }
 0x1ea   : > { %v1871_v20 = vadd.f32 %v1870_v36, %v1833_v38 }
 0x1ec   : > { %v9969_v45 = vadd.f32 %v1904_v42, %v1871_v20  ;;  %v9973_v48 = vpop.f32.mrf.mxu1  ;;  %v422_v20 = vld [vmem:[%s9518_s13 + $0xb0] sm:$0xff] }
 0x1ed   : > { %v9971_v17 = vpop.f32.mrf.mxu0  ;;  %14117 = vst [vmem:[#allocation48_spill] sm:$0xff] %v9973_v48  ;;  %v9975_v50 = vpop.f32.mrf.mxu2 }
 0x1ee   : > { %14115 = vst [vmem:[#allocation46_spill] sm:$0xff] %v9969_v45  ;;  %v8682_v45 = vld [vmem:[#allocation10 + $0x1a0] sm:$0xf0] }
 0x1ef   : > { %14116 = vst [vmem:[#allocation47_spill] sm:$0xff] %v9971_v17  ;;  %v9977_v44 = vpop.f32.mrf.mxu3 }
 0x1f0   : > { %14118 = vst [vmem:[#allocation49_spill] sm:$0xff] %v9975_v50 }
 0x1f1   : > { %14119 = vst [vmem:[#allocation50_spill] sm:$0xff] %v9977_v44  ;;  %v454_v44 = vmul.f32 0.1, %v422_v20 }
 0x1f4   : > { %v1984_v33 = vpop.f32.mrf.mxu1 }
 0x1f5   : > { %v1934_v5 = vpop.f32.mrf.mxu0  ;;  %v2020_v25 = vpop.f32.mrf.mxu2 }
 0x1f6   : > { %v1935_v19 = vadd.f32 %v1934_v5, %v438_v37 }
 0x1f7   : > { %v2059_v32 = vpop.f32.mrf.mxu3 }
 0x1f8   : > { %v1985_v13 = vadd.f32 %v1984_v33, %v1935_v19 }
 0x1fa   : > { %v2021_v41 = vadd.f32 %v2020_v25, %v1985_v13 }
 0x1fc   : > { %v2060_v35 = vadd.f32 %v2059_v32, %v2021_v41  ;;  %v9982_v36 = vpop.f32.mrf.mxu1 }
 0x1fd   : > { %v9980_v43 = vpop.f32.mrf.mxu0  ;;  %14121 = vst [vmem:[#allocation52_spill] sm:$0xff] %v9982_v36  ;;  %v9984_v42 = vpop.f32.mrf.mxu2 }
 0x1fe   : > { %14120 = vst [vmem:[#allocation51_spill] sm:$0xff] %v9980_v43 }
 0x1ff   : > { %14122 = vst [vmem:[#allocation53_spill] sm:$0xff] %v9984_v42  ;;  %v9986_v38 = vpop.f32.mrf.mxu3 }
 0x200   : > { %14123 = vst [vmem:[#allocation54_spill] sm:$0xff] %v9986_v38 }
 0x204   : > { %v1992_v0 = vpop.f32.mrf.mxu1 }
 0x205   : > { %v1950_v62 = vpop.f32.mrf.mxu0  ;;  %v2030_v37 = vpop.f32.mrf.mxu2 }
 0x206   : > { %v1951_v50 = vadd.f32 %v1950_v62, %v454_v44 }
 0x207   : > { %v2071_v5 = vpop.f32.mrf.mxu3 }
 0x208   : > { %v1993_v6 = vadd.f32 %v1992_v0, %v1951_v50 }
 0x20a   : > { %v2031_v33 = vadd.f32 %v2030_v37, %v1993_v6 }
 0x20c   : > { %v2072_v19 = vadd.f32 %v2071_v5, %v2031_v33  ;;  %v9991_v32 = vpop.f32.mrf.mxu1  ;;  %v423_v33 = vld [vmem:[%s9518_s13 + $0xb8] sm:$0xff] }
 0x20d   : > { %v9989_v25 = vpop.f32.mrf.mxu0  ;;  %14125 = vst [vmem:[#allocation56_spill] sm:$0xff] %v9991_v32  ;;  %v9993_v13 = vpop.f32.mrf.mxu2  ;;  %v455_v58 = vmul.f32 0.1, %v423_v33  ;;  %v8873_v32 = vld [vmem:[#allocation10 + $0x1dc] sm:$0xf0] }
 0x20e   : > { %14124 = vst [vmem:[#allocation55_spill] sm:$0xff] %v9989_v25  ;;  %v8722_v25 = vld [vmem:[#allocation10 + $0x1e8] sm:$0xf0] }
 0x20f   : > { %14126 = vst [vmem:[#allocation57_spill] sm:$0xff] %v9993_v13  ;;  %v9995_v41 = vpop.f32.mrf.mxu3  ;;  %v8712_v13 = vld [vmem:[#allocation10 + $0x1c0] sm:$0xf] }
 0x210   : > { %14127 = vst [vmem:[#allocation58_spill] sm:$0xff] %v9995_v41 }
 0x214   : > { %v2135_v49 = vpop.f32.mrf.mxu1 }
 0x215   : > { %v2101_v20 = vpop.f32.mrf.mxu0  ;;  %v2173_v44 = vpop.f32.mrf.mxu2 }
 0x216   : > { %v2102_v48 = vadd.f32 %v2101_v20, %v2060_v35  ;;  %v2174_v62 = vadd.f32 %v2173_v44, %v439_v55  ;;  %v8869_v35 = vld [vmem:[#allocation10 + $0x1c4] sm:$0xf]  ;;  %v10011_v20 = vor.u32 %v8873_v32, %v8712_v13  ;;  %v8680_v32 = vld [vmem:[#allocation10 + $0x180] sm:$0xf] }
 0x217   : > { %v2223_v17 = vpop.f32.mrf.mxu3  ;;  %v8714_v55 = vld [vmem:[#allocation10 + $0x1e0] sm:$0xf0]  ;;  %v8865_v13 = vld [vmem:[#allocation10 + $0x19c] sm:$0xf0] }
 0x218   : > { %v9998_v0 = vadd.f32 %v2135_v49, %v2102_v48  ;;  %v10000_v6 = vadd.f32 %v2223_v17, %v2174_v62  ;;  %v8720_v49 = vld [vmem:[#allocation10 + $0x1c8] sm:$0xf]  ;;  %v10013_v17 = vor.u32 %v8869_v35, %v8714_v55  ;;  %v8870_v62 = vld [vmem:[#allocation10 + $0x1cc] sm:$0xf]  ;;  %3446 = vmatpush.bf16.msra.mxu0 %v10011_v20  ;;  %v8861_v35 = vld [vmem:[#allocation10 + $0x184] sm:$0xf] }
 0x219   : > { %v8874_v48 = vld [vmem:[#allocation10 + $0x1e4] sm:$0xf0]  ;;  %v10018_v47 = vor.u32 %v8870_v62, %v8722_v25  ;;  %v8862_v62 = vld [vmem:[#allocation10 + $0x18c] sm:$0xf] }
 0x21a   : > { %v10015_v44 = vor.u32 %v8874_v48, %v8720_v49  ;;  %3459 = vmatpush.bf16.msra.mxu1 %v10013_v17  ;;  %v10023_v48 = vor.u32 %v8865_v13, %v8680_v32  ;;  %v8857_v32 = vld [vmem:[#allocation10 + $0x15c] sm:$0xf0] }
 0x21b   : > { %3485 = vmatpush.bf16.msra.mxu3 %v10018_v47 }
 0x21c   : > { %v10004_v37 = vpop.f32.mrf.mxu1  ;;  %3472 = vmatpush.bf16.msra.mxu2 %v10015_v44  ;;  %3447 = vmatpush.bf16.msra.mxu0 %v10023_v48 }
 0x21d   : > { %v10002_v50 = vpop.f32.mrf.mxu0  ;;  %14129 = vst [vmem:[#allocation60_spill] sm:$0xff] %v10004_v37  ;;  %v10006_v5 = vpop.f32.mrf.mxu2  ;;  %v8626_v37 = vld [vmem:[#allocation10 + $0x128] sm:$0xf0] }
 0x21e   : > { %14128 = vst [vmem:[#allocation59_spill] sm:$0xff] %v10002_v50 }
 0x21f   : > { %14130 = vst [vmem:[#allocation61_spill] sm:$0xff] %v10006_v5  ;;  %v10009_v41 = vpop.f32.mrf.mxu3  ;;  %v8821_v5 = vld [vmem:[#allocation10 + $0x44] sm:$0xf] }
 0x220   : > { %14131 = vst [vmem:[#allocation62_spill] sm:$0xff] %v10009_v41  ;;  %v8562_v41 = vld [vmem:[#allocation10 + $0xa8] sm:$0xf0] }
 0x224   : > { %v2143_v28 = vpop.f32.mrf.mxu1 }
 0x225   : > { %v2109_v34 = vpop.f32.mrf.mxu0  ;;  %v2189_v15 = vpop.f32.mrf.mxu2 }
 0x226   : > { %v2110_v33 = vadd.f32 %v2109_v34, %v2072_v19  ;;  %v2190_v55 = vadd.f32 %v2189_v15, %v455_v58  ;;  %v10027_v34 = vor.u32 %v8861_v35, %v8682_v45  ;;  %v10029_v19 = vor.u32 %v8866_v21, %v8688_v24  ;;  %v8648_v58 = vld [vmem:[#allocation10 + $0x140] sm:$0xf]  ;;  %v8650_v21 = vld [vmem:[#allocation10 + $0x160] sm:$0xf0]  ;;  %v8656_v24 = vld [vmem:[#allocation10 + $0x148] sm:$0xf] }
 0x227   : > { %v2231_v49 = vpop.f32.mrf.mxu3  ;;  %v10034_v15 = vor.u32 %v8862_v62, %v8690_v26  ;;  %v10039_v45 = vor.u32 %v8857_v32, %v8648_v58  ;;  %v8854_v26 = vld [vmem:[#allocation10 + $0x14c] sm:$0xf]  ;;  %v8616_v58 = vld [vmem:[#allocation10 + $0x100] sm:$0xf] }
 0x228   : > { %v10025_v25 = vadd.f32 %v2143_v28, %v2110_v33  ;;  %v10031_v11 = vadd.f32 %v2231_v49, %v2190_v55  ;;  %3460 = vmatpush.bf16.msra.mxu1 %v10027_v34  ;;  %3473 = vmatpush.bf16.msra.mxu2 %v10029_v19  ;;  %v8853_v28 = vld [vmem:[#allocation10 + $0x144] sm:$0xf]  ;;  %v8858_v33 = vld [vmem:[#allocation10 + $0x164] sm:$0xf0]  ;;  %v8658_v55 = vld [vmem:[#allocation10 + $0x168] sm:$0xf0] }
 0x229   : > { %3486 = vmatpush.bf16.msra.mxu3 %v10034_v15  ;;  %v10041_v13 = vor.u32 %v8853_v28, %v8650_v21  ;;  %v10043_v35 = vor.u32 %v8858_v33, %v8656_v24  ;;  %3448 = vmatpush.bf16.msra.mxu0 %v10039_v45  ;;  %v8849_v32 = vld [vmem:[#allocation10 + $0x11c] sm:$0xf0]  ;;  %v8845_v28 = vld [vmem:[#allocation10 + $0x104] sm:$0xf] }
 0x22a   : > { %14132 = vst [vmem:[#allocation63_spill] sm:$0xff] %v10025_v25  ;;  %v10050_v25 = vor.u32 %v8854_v26, %v8658_v55  ;;  %v10059_v24 = vor.u32 %v8849_v32, %v8616_v58  ;;  %v8618_v33 = vld [vmem:[#allocation10 + $0x120] sm:$0xf0]  ;;  %v8841_v58 = vld [vmem:[#allocation10 + $0xdc] sm:$0xf0] }
 0x22b   : > { %v10061_v26 = vor.u32 %v8845_v28, %v8618_v33  ;;  %v8837_v32 = vld [vmem:[#allocation10 + $0xc4] sm:$0xf] }
 0x22c   : > { %v10047_v62 = vpop.f32.mrf.mxu1  ;;  %3461 = vmatpush.bf16.msra.mxu1 %v10041_v13  ;;  %3474 = vmatpush.bf16.msra.mxu2 %v10043_v35  ;;  %v8586_v28 = vld [vmem:[#allocation10 + $0xe0] sm:$0xf0] }
 0x22d   : > { %v10045_v49 = vpop.f32.mrf.mxu0  ;;  %14134 = vst [vmem:[#allocation65_spill] sm:$0xff] %v10047_v62  ;;  %v10052_v29 = vpop.f32.mrf.mxu2  ;;  %3487 = vmatpush.bf16.msra.mxu3 %v10050_v25  ;;  %v8624_v62 = vld [vmem:[#allocation10 + $0x108] sm:$0xf]  ;;  %3449 = vmatpush.bf16.msra.mxu0 %v10059_v24  ;;  %v10073_v33 = vor.u32 %v8837_v32, %v8586_v28  ;;  %v8829_v32 = vld [vmem:[#allocation10 + $0x84] sm:$0xf] }
 0x22e   : > { %14133 = vst [vmem:[#allocation64_spill] sm:$0xff] %v10045_v49  ;;  %v8850_v49 = vld [vmem:[#allocation10 + $0x124] sm:$0xf0] }
 0x22f   : > { %14135 = vst [vmem:[#allocation66_spill] sm:$0xff] %v10052_v29  ;;  %v10056_v21 = vpop.f32.mrf.mxu3  ;;  %v10063_v55 = vor.u32 %v8850_v49, %v8624_v62  ;;  %v8846_v29 = vld [vmem:[#allocation10 + $0x10c] sm:$0xf]  ;;  %v8592_v49 = vld [vmem:[#allocation10 + $0xc8] sm:$0xf] }
 0x230   : > { %14136 = vst [vmem:[#allocation67_spill] sm:$0xff] %v10056_v21  ;;  %v10066_v50 = vor.u32 %v8846_v29, %v8626_v37  ;;  %3462 = vmatpush.bf16.msra.mxu1 %v10061_v26  ;;  %v8584_v21 = vld [vmem:[#allocation10 + $0xc0] sm:$0xf]  ;;  %v8842_v62 = vld [vmem:[#allocation10 + $0xe4] sm:$0xf0] }
 0x231   : > { %3475 = vmatpush.bf16.msra.mxu2 %v10063_v55  ;;  %v10071_v38 = vor.u32 %v8841_v58, %v8584_v21  ;;  %v10075_v46 = vor.u32 %v8842_v62, %v8592_v49  ;;  %v8838_v29 = vld [vmem:[#allocation10 + $0xcc] sm:$0xf]  ;;  %v8552_v21 = vld [vmem:[#allocation10 + $0x80] sm:$0xf]  ;;  %v8554_v62 = vld [vmem:[#allocation10 + $0xa0] sm:$0xf0] }
 0x232   : > { %3488 = vmatpush.bf16.msra.mxu3 %v10066_v50  ;;  %v8594_v37 = vld [vmem:[#allocation10 + $0xe8] sm:$0xf0]  ;;  %v8833_v58 = vld [vmem:[#allocation10 + $0x9c] sm:$0xf0] }
 0x233   : > { %14137 = vst [vmem:[#allocation68_spill] sm:$0xff] %v10075_v46  ;;  %3450 = vmatpush.bf16.msra.mxu0 %v10071_v38  ;;  %v10078_v54 = vor.u32 %v8838_v29, %v8594_v37  ;;  %v10084_v49 = vor.u32 %v8833_v58, %v8552_v21  ;;  %v10086_v37 = vor.u32 %v8829_v32, %v8554_v62  ;;  %v8520_v21 = vld [vmem:[#allocation10 + $0x40] sm:$0xf] }
 0x234   : > { %v2298_v42 = vpop.f32.mrf.mxu1  ;;  %3463 = vmatpush.bf16.msra.mxu1 %v10073_v33  ;;  %v8825_v58 = vld [vmem:[#allocation10 + $0x5c] sm:$0xf0] }
 0x235   : > { %v2259_v14 = vpop.f32.mrf.mxu0  ;;  %14138 = vst [vmem:[#allocation69_spill] sm:$0xff] %v10078_v54  ;;  %v2340_v51 = vpop.f32.mrf.mxu2  ;;  %3476 = vmatpush.bf16.msra.mxu2 %v10075_v46  ;;  %v8512_v46 = vld [vmem:[#allocation10 + $0x18] sm:$0xf] }
 0x236   : > { %v2260_v9 = vadd.f32 %v2259_v14, %v10000_v6  ;;  %3489 = vmatpush.bf16.msra.mxu3 %v10078_v54  ;;  %14139 = vst [vmem:[#allocation70_spill] sm:$0xff] %v10086_v37  ;;  %v10088_v14 = vor.u32 %v8834_v7, %v8560_v60  ;;  %v8830_v6 = vld [vmem:[#allocation10 + $0x8c] sm:$0xf]  ;;  %v8522_v7 = vld [vmem:[#allocation10 + $0x60] sm:$0xf0] }
 0x237   : > { %v2374_v28 = vpop.f32.mrf.mxu3  ;;  %3451 = vmatpush.bf16.msra.mxu0 %v10084_v49  ;;  %v10091_v36 = vor.u32 %v8830_v6, %v8562_v41  ;;  %v8528_v60 = vld [vmem:[#allocation10 + $0x48] sm:$0xf]  ;;  %v10100_v62 = vor.u32 %v8821_v5, %v8522_v7  ;;  %v8817_v5 = vld [vmem:[#allocation10 + $0x1c] sm:$0xf0] }
 0x238   : > { %v2299_v29 = vadd.f32 %v2298_v42, %v2260_v9  ;;  %14140 = vst [vmem:[#allocation71_spill] sm:$0xff] %v10088_v14  ;;  %3464 = vmatpush.bf16.msra.mxu1 %v10086_v37  ;;  %v10096_v9 = vor.u32 %v8825_v58, %v8520_v21  ;;  %v8826_v42 = vld [vmem:[#allocation10 + $0x64] sm:$0xf0]  ;;  %v8816_v37 = vld [vmem:[#allocation10 + $0x1c] sm:$0xf] }
 0x239   : > { %14141 = vst [vmem:[#allocation72_spill] sm:$0xff] %v10091_v36  ;;  %3477 = vmatpush.bf16.msra.mxu2 %v10088_v14  ;;  %v10102_v41 = vor.u32 %v8826_v42, %v8528_v60  ;;  %v8490_v60 = vld [vmem:[#allocation10 + $0x20] sm:$0xf0]  ;;  %v8496_v42 = vld [vmem:[#allocation10 + $0x8] sm:$0xf] }
 0x23a   : > { %v2341_v3 = vadd.f32 %v2340_v51, %v2299_v29  ;;  %3490 = vmatpush.bf16.msra.mxu3 %v10091_v36  ;;  %14142 = vst [vmem:[#allocation73_spill] sm:$0xff] %v10096_v9  ;;  %v8822_v51 = vld [vmem:[#allocation10 + $0x4c] sm:$0xf]  ;;  %v8855_v14 = vld [vmem:[#allocation10 + $0x154] sm:$0xf] }
 0x23b   : > { %14143 = vst [vmem:[#allocation74_spill] sm:$0xff] %v10100_v62  ;;  %v8530_v29 = vld [vmem:[#allocation10 + $0x68] sm:$0xf0]  ;;  %3452 = vmatpush.bf16.msra.mxu0 %v10096_v9 }
 0x23c   : > { %v10098_v32 = vadd.f32 %v2374_v28, %v2341_v3  ;;  %14144 = vst [vmem:[#allocation75_spill] sm:$0xff] %v10102_v41  ;;  %v10106_v43 = vpop.f32.mrf.mxu1  ;;  %v10109_v8 = vor.u32 %v8822_v51, %v8530_v29  ;;  %3465 = vmatpush.bf16.msra.mxu1 %v10100_v62  ;;  %v8488_v3 = vld [vmem:[#allocation10] sm:$0xf]  ;;  %v8813_v28 = vld [vmem:[#allocation10 + $0x4] sm:$0xf] }
 0x23d   : > { %v10104_v6 = vpop.f32.mrf.mxu0  ;;  %14146 = vst [vmem:[#allocation77_spill] sm:$0xff] %v10106_v43  ;;  %v10111_v21 = vpop.f32.mrf.mxu2  ;;  %3478 = vmatpush.bf16.msra.mxu2 %v10102_v41  ;;  %v10118_v7 = vor.u32 %v8817_v5, %v8488_v3  ;;  %v8818_v43 = vld [vmem:[#allocation10 + $0x24] sm:$0xf0]  ;;  %v10120_v51 = vor.u32 %v8813_v28, %v8490_v60  ;;  %v10129_v3 = vor.u32 %v8875_v31, %v8728_v1  ;;  %v8876_v28 = vld [vmem:[#allocation10 + $0x1f4] sm:$0xf0] }
 0x23e   : > { %14145 = vst [vmem:[#allocation76_spill] sm:$0xff] %v10104_v6  ;;  %3491 = vmatpush.bf16.msra.mxu3 %v10109_v8  ;;  %v10122_v29 = vor.u32 %v8818_v43, %v8496_v42  ;;  %v8498_v6 = vld [vmem:[#allocation10 + $0x28] sm:$0xf0]  ;;  %v8736_v43 = vld [vmem:[#allocation10 + $0x1d8] sm:$0xf] }
 0x23f   : > { %14147 = vst [vmem:[#allocation78_spill] sm:$0xff] %v10109_v8  ;;  %v10115_v58 = vpop.f32.mrf.mxu3  ;;  %3453 = vmatpush.bf16.msra.mxu0 %v10118_v7  ;;  %v8872_v60 = vld [vmem:[#allocation10 + $0x1dc] sm:$0xf]  ;;  %v10134_v42 = vor.u32 %v8876_v28, %v8736_v43  ;;  %v8867_v8 = vld [vmem:[#allocation10 + $0x1ac] sm:$0xf0] }
 0x240   : > { %14148 = vst [vmem:[#allocation79_spill] sm:$0xff] %v10111_v21  ;;  %v8814_v21 = vld [vmem:[#allocation10 + $0xc] sm:$0xf]  ;;  %3466 = vmatpush.bf16.msra.mxu1 %v10120_v51  ;;  %v8698_v31 = vld [vmem:[#allocation10 + $0x1b0] sm:$0xf0] }
 0x241   : > { %14149 = vst [vmem:[#allocation80_spill] sm:$0xff] %v10115_v58  ;;  %v10125_v10 = vor.u32 %v8814_v21, %v8498_v6  ;;  %v8871_v58 = vld [vmem:[#allocation10 + $0x1d4] sm:$0xf]  ;;  %3479 = vmatpush.bf16.msra.mxu2 %v10122_v29  ;;  %v8738_v6 = vld [vmem:[#allocation10 + $0x1f8] sm:$0xf0] }
 0x242   : > { %14150 = vst [vmem:[#allocation81_spill] sm:$0xff] %v10118_v7  ;;  %v10131_v5 = vor.u32 %v8871_v58, %v8730_v22  ;;  %v8696_v21 = vld [vmem:[#allocation10 + $0x190] sm:$0xf]  ;;  %v10138_v41 = vor.u32 %v8872_v60, %v8738_v6  ;;  %v8863_v22 = vld [vmem:[#allocation10 + $0x194] sm:$0xf] }
 0x243   : > { %14151 = vst [vmem:[#allocation82_spill] sm:$0xff] %v10120_v51  ;;  %3492 = vmatpush.bf16.msra.mxu3 %v10125_v10  ;;  %3498 = vmatpush.bf16.msrb.mxu0 %v10129_v3  ;;  %v10140_v1 = vor.u32 %v8867_v8, %v8696_v21  ;;  %v8704_v58 = vld [vmem:[#allocation10 + $0x198] sm:$0xf]  ;;  %v10143_v43 = vor.u32 %v8863_v22, %v8698_v31  ;;  %v8706_v7 = vld [vmem:[#allocation10 + $0x1b8] sm:$0xf0] }
 0x244   : > { %14152 = vst [vmem:[#allocation83_spill] sm:$0xff] %v10122_v29  ;;  %3511 = vmatpush.bf16.msrb.mxu1 %v10131_v5  ;;  %v2310_v51 = vpop.f32.mrf.mxu1  ;;  %v8868_v28 = vld [vmem:[#allocation10 + $0x1b4] sm:$0xf0]  ;;  %v8664_v21 = vld [vmem:[#allocation10 + $0x150] sm:$0xf] }
 0x245   : > { %14153 = vst [vmem:[#allocation84_spill] sm:$0xff] %v10125_v10  ;;  %v2269_v29 = vpop.f32.mrf.mxu0  ;;  %3524 = vmatpush.bf16.msrb.mxu2 %v10134_v42  ;;  %v8864_v10 = vld [vmem:[#allocation10 + $0x19c] sm:$0xf]  ;;  %v2348_v36 = vpop.f32.mrf.mxu2  ;;  %v10147_v60 = vor.u32 %v8868_v28, %v8704_v58  ;;  %v8666_v31 = vld [vmem:[#allocation10 + $0x170] sm:$0xf0] }
 0x246   : > { %14154 = vst [vmem:[#allocation85_spill] sm:$0xff] %v10129_v3  ;;  %v2270_v3 = vadd.f32 %v2269_v29, %v10031_v11  ;;  %v10149_v8 = vor.u32 %v8864_v10, %v8706_v7  ;;  %v8672_v11 = vld [vmem:[#allocation10 + $0x158] sm:$0xf]  ;;  %v10156_v58 = vor.u32 %v8855_v14, %v8666_v31  ;;  %v8856_v7 = vld [vmem:[#allocation10 + $0x15c] sm:$0xf] }
 0x247   : > { %14155 = vst [vmem:[#allocation86_spill] sm:$0xff] %v10131_v5  ;;  %3537 = vmatpush.bf16.msrb.mxu3 %v10138_v41  ;;  %v2382_v6 = vpop.f32.mrf.mxu3  ;;  %v8859_v5 = vld [vmem:[#allocation10 + $0x16c] sm:$0xf0]  ;;  %3499 = vmatpush.bf16.msrb.mxu0 %v10140_v1  ;;  %v8860_v29 = vld [vmem:[#allocation10 + $0x174] sm:$0xf0] }
 0x248   : > { %14156 = vst [vmem:[#allocation87_spill] sm:$0xff] %v10134_v42  ;;  %v2311_v62 = vadd.f32 %v2310_v51, %v2270_v3  ;;  %3512 = vmatpush.bf16.msrb.mxu1 %v10143_v43  ;;  %v10153_v22 = vor.u32 %v8859_v5, %v8664_v21  ;;  %v10158_v10 = vor.u32 %v8860_v29, %v8672_v11  ;;  %v8674_v28 = vld [vmem:[#allocation10 + $0x178] sm:$0xf0]  ;;  %v8632_v3 = vld [vmem:[#allocation10 + $0x110] sm:$0xf] }
 0x249   : > { %14157 = vst [vmem:[#allocation88_spill] sm:$0xff] %v10138_v41  ;;  %3525 = vmatpush.bf16.msrb.mxu2 %v10147_v60  ;;  %v10161_v51 = vor.u32 %v8856_v7, %v8674_v28  ;;  %v8851_v42 = vld [vmem:[#allocation10 + $0x12c] sm:$0xf0]  ;;  %v8847_v5 = vld [vmem:[#allocation10 + $0x114] sm:$0xf] }
 0x24a   : > { %14158 = vst [vmem:[#allocation89_spill] sm:$0xff] %v10140_v1  ;;  %v2349_v41 = vadd.f32 %v2348_v36, %v2311_v62  ;;  %v10167_v14 = vor.u32 %v8851_v42, %v8632_v3  ;;  %v8634_v31 = vld [vmem:[#allocation10 + $0x130] sm:$0xf0]  ;;  %v8640_v11 = vld [vmem:[#allocation10 + $0x118] sm:$0xf] }
 0x24b   : > { %14159 = vst [vmem:[#allocation90_spill] sm:$0xff] %v10143_v43  ;;  %3538 = vmatpush.bf16.msrb.mxu3 %v10149_v8  ;;  %3500 = vmatpush.bf16.msrb.mxu0 %v10153_v22  ;;  %v8852_v29 = vld [vmem:[#allocation10 + $0x134] sm:$0xf0]  ;;  %v10174_v62 = vor.u32 %v8847_v5, %v8634_v31  ;;  %v8602_v31 = vld [vmem:[#allocation10 + $0xf0] sm:$0xf0] }
 0x24c   : > { %14160 = vst [vmem:[#allocation91_spill] sm:$0xff] %v10147_v60  ;;  %v10163_v21 = vadd.f32 %v2382_v6, %v2349_v41  ;;  %3513 = vmatpush.bf16.msrb.mxu1 %v10156_v58  ;;  %v10171_v36 = vpop.f32.mrf.mxu1  ;;  %v10176_v7 = vor.u32 %v8852_v29, %v8640_v11  ;;  %v8848_v41 = vld [vmem:[#allocation10 + $0x11c] sm:$0xf]  ;;  %v8608_v11 = vld [vmem:[#allocation10 + $0xd8] sm:$0xf] }
 0x24d   : > { %14161 = vst [vmem:[#allocation92_spill] sm:$0xff] %v10149_v8  ;;  %v10169_v60 = vpop.f32.mrf.mxu0  ;;  %3526 = vmatpush.bf16.msrb.mxu2 %v10158_v10  ;;  %v8642_v6 = vld [vmem:[#allocation10 + $0x138] sm:$0xf0]  ;;  %v10178_v28 = vpop.f32.mrf.mxu2  ;;  %v8839_v8 = vld [vmem:[#allocation10 + $0xd4] sm:$0xf] }
 0x24e   : > { %14162 = vst [vmem:[#allocation93_spill] sm:$0xff] %v10153_v22  ;;  %v10181_v42 = vor.u32 %v8848_v41, %v8642_v6  ;;  %v8844_v29 = vld [vmem:[#allocation10 + $0xf4] sm:$0xf0]  ;;  %v8840_v6 = vld [vmem:[#allocation10 + $0xdc] sm:$0xf] }
 0x24f   : > { %14163 = vst [vmem:[#allocation94_spill] sm:$0xff] %v10156_v58  ;;  %3539 = vmatpush.bf16.msrb.mxu3 %v10161_v51  ;;  %v10183_v3 = vpop.f32.mrf.mxu3  ;;  %3501 = vmatpush.bf16.msrb.mxu0 %v10167_v14  ;;  %v10192_v41 = vor.u32 %v8844_v29, %v8608_v11  ;;  %v8832_v58 = vld [vmem:[#allocation10 + $0x9c] sm:$0xf]  ;;  %v8536_v29 = vld [vmem:[#allocation10 + $0x50] sm:$0xf] }
 0x250   : > { %14164 = vst [vmem:[#allocation95_spill] sm:$0xff] %v10158_v10  ;;  %3514 = vmatpush.bf16.msrb.mxu1 %v10174_v62  ;;  %v8835_v10 = vld [vmem:[#allocation10 + $0xac] sm:$0xf0]  ;;  %v8578_v11 = vld [vmem:[#allocation10 + $0xb8] sm:$0xf0] }
 0x251   : > { %14165 = vst [vmem:[#allocation96_spill] sm:$0xff] %v10161_v51  ;;  %3527 = vmatpush.bf16.msrb.mxu2 %v10176_v7  ;;  %v8823_v22 = vld [vmem:[#allocation10 + $0x54] sm:$0xf] }
 0x252   : > { %14166 = vst [vmem:[#allocation97_spill] sm:$0xff] %v10163_v21  ;;  %v8600_v21 = vld [vmem:[#allocation10 + $0xd0] sm:$0xf]  ;;  %v8538_v43 = vld [vmem:[#allocation10 + $0x70] sm:$0xf0] }
 0x253   : > { %14167 = vst [vmem:[#allocation98_spill] sm:$0xff] %v10167_v14  ;;  %3540 = vmatpush.bf16.msrb.mxu3 %v10181_v42  ;;  %v8836_v14 = vld [vmem:[#allocation10 + $0xb4] sm:$0xf0] }
 0x254   : > { %14168 = vst [vmem:[#allocation99_spill] sm:$0xff] %v10169_v60  ;;  %v8843_v60 = vld [vmem:[#allocation10 + $0xec] sm:$0xf0] }
 0x255   : > { %14169 = vst [vmem:[#allocation100_spill] sm:$0xff] %v10171_v36  ;;  %v10187_v5 = vor.u32 %v8843_v60, %v8600_v21  ;;  %v8568_v36 = vld [vmem:[#allocation10 + $0x90] sm:$0xf]  ;;  %v8570_v60 = vld [vmem:[#allocation10 + $0xb0] sm:$0xf0]  ;;  %3528 = vmatpush.bf16.msrb.mxu2 %v10192_v41  ;;  %v3056_v1 = vpop.f32.mrf.mxu2 }
 0x256   : > { %14170 = vst [vmem:[#allocation101_spill] sm:$0xff] %v10174_v62  ;;  %v8831_v62 = vld [vmem:[#allocation10 + $0x94] sm:$0xf]  ;;  %v8576_v21 = vld [vmem:[#allocation10 + $0x98] sm:$0xf] }
 0x257   : > { %14171 = vst [vmem:[#allocation102_spill] sm:$0xff] %v10176_v7  ;;  %3502 = vmatpush.bf16.msrb.mxu0 %v10187_v5  ;;  %v3030_v7 = vpop.f32.mrf.mxu0 }
 0x258   : > { %14172 = vst [vmem:[#allocation103_spill] sm:$0xff] %v10178_v28  ;;  %v10190_v28 = vor.u32 %v8839_v8, %v8602_v31  ;;  %v10199_v8 = vor.u32 %v8835_v10, %v8568_v36  ;;  %v10201_v31 = vor.u32 %v8831_v62, %v8570_v60  ;;  %v8544_v10 = vld [vmem:[#allocation10 + $0x58] sm:$0xf]  ;;  %v3069_v62 = vpop.f32.mrf.mxu3  ;;  %v8824_v60 = vld [vmem:[#allocation10 + $0x5c] sm:$0xf] }
 0x259   : > { %14173 = vst [vmem:[#allocation104_spill] sm:$0xff] %v10181_v42  ;;  %v3043_v42 = vpop.f32.mrf.mxu1  ;;  %v8828_v36 = vld [vmem:[#allocation10 + $0x74] sm:$0xf0] }
 0x25a   : > { %14174 = vst [vmem:[#allocation105_spill] sm:$0xff] %v10183_v3  ;;  %v8610_v3 = vld [vmem:[#allocation10 + $0xf8] sm:$0xf0]  ;;  %3515 = vmatpush.bf16.msrb.mxu1 %v10190_v28  ;;  %v10216_v9 = vor.u32 %v8828_v36, %v8544_v10 }
 0x25b   : > { %14175 = vst [vmem:[#allocation106_spill] sm:$0xff] %v10187_v5  ;;  %v10195_v51 = vor.u32 %v8840_v6, %v8610_v3  ;;  %v10204_v3 = vor.u32 %v8836_v14, %v8576_v21  ;;  %v8827_v6 = vld [vmem:[#allocation10 + $0x6c] sm:$0xf0]  ;;  %v10207_v5 = vor.u32 %v8832_v58, %v8578_v11  ;;  %3503 = vmatpush.bf16.msrb.mxu0 %v10199_v8  ;;  %v8815_v11 = vld [vmem:[#allocation10 + $0x14] sm:$0xf] }
 0x25c   : > { %14176 = vst [vmem:[#allocation107_spill] sm:$0xff] %v10190_v28  ;;  %v8546_v28 = vld [vmem:[#allocation10 + $0x78] sm:$0xf0]  ;;  %v10213_v14 = vor.u32 %v8823_v22, %v8538_v43  ;;  %v8504_v21 = vld [vmem:[#allocation10 + $0x10] sm:$0xf] }
 0x25d   : > { %14177 = vst [vmem:[#allocation108_spill] sm:$0xff] %v10192_v41  ;;  %3541 = vmatpush.bf16.msrb.mxu3 %v10195_v51  ;;  %v10211_v41 = vor.u32 %v8827_v6, %v8536_v29  ;;  %3529 = vmatpush.bf16.msrb.mxu2 %v10204_v3  ;;  %v8819_v58 = vld [vmem:[#allocation10 + $0x2c] sm:$0xf0]  ;;  %v10219_v54 = vor.u32 %v8824_v60, %v8546_v28  ;;  %v3058_v28 = vpop.f32.mrf.mxu2 }
 0x25e   : > { %14178 = vst [vmem:[#allocation109_spill] sm:$0xff] %v10195_v51  ;;  %3516 = vmatpush.bf16.msrb.mxu1 %v10201_v31  ;;  %v8506_v51 = vld [vmem:[#allocation10 + $0x30] sm:$0xf0]  ;;  %v3044_v29 = vadd.f32 %v3043_v42, %v3030_v7  ;;  %v10223_v43 = vor.u32 %v8819_v58, %v8504_v21 }
 0x25f   : > { %14179 = vst [vmem:[#allocation110_spill] sm:$0xff] %v10199_v8  ;;  %v8820_v8 = vld [vmem:[#allocation10 + $0x34] sm:$0xf0]  ;;  %3504 = vmatpush.bf16.msrb.mxu0 %v10211_v41  ;;  %v10225_v22 = vor.u32 %v8815_v11, %v8506_v51  ;;  %v3032_v6 = vpop.f32.mrf.mxu0 }
 0x260   : > { %14180 = vst [vmem:[#allocation111_spill] sm:$0xff] %v10201_v31  ;;  %v8514_v31 = vld [vmem:[#allocation10 + $0x38] sm:$0xf0]  ;;  %v10228_v36 = vor.u32 %v8820_v8, %v8512_v46  ;;  %v3071_v7 = vpop.f32.mrf.mxu3  ;;  %v3057_v42 = vadd.f32 %v3056_v1, %v3044_v29 }
 0x261   : > { %14181 = vst [vmem:[#allocation112_spill] sm:$0xff] %v10204_v3  ;;  %3542 = vmatpush.bf16.msrb.mxu3 %v10207_v5  ;;  %v3045_v10 = vpop.f32.mrf.mxu1  ;;  %3530 = vmatpush.bf16.msrb.mxu2 %v10216_v9  ;;  %v10231_v60 = vor.u32 %v8816_v37, %v8514_v31 }
 0x262   : > { %14182 = vst [vmem:[#allocation113_spill] sm:$0xff] %v10207_v5  ;;  %3517 = vmatpush.bf16.msrb.mxu1 %v10213_v14  ;;  %v3070_v51 = vadd.f32 %v3069_v62, %v3057_v42  ;;  %v10240_v62 = vld [vmem:[#allocation8 + $0x78] sm:$0xff] }
 0x263   : > { %14183 = vst [vmem:[#allocation114_spill] sm:$0xff] %v10211_v41  ;;  %3505 = vmatpush.bf16.msrb.mxu0 %v10223_v43  ;;  %v10243_v42 = vld [vmem:[#allocation8 + $0xb8] sm:$0xff] }
 0x264   : > { %14184 = vst [vmem:[#allocation115_spill] sm:$0xff] %v10213_v14 }
 0x265   : > { %14185 = vst [vmem:[#allocation116_spill] sm:$0xff] %v10216_v9  ;;  %3543 = vmatpush.bf16.msrb.mxu3 %v10219_v54  ;;  %3531 = vmatpush.bf16.msrb.mxu2 %v10228_v36  ;;  %v3108_v8 = vpop.f32.mrf.mxu2 }
 0x266   : > { %14186 = vst [vmem:[#allocation117_spill] sm:$0xff] %v10219_v54  ;;  %3518 = vmatpush.bf16.msrb.mxu1 %v10225_v22 }
 0x267   : > { %14187 = vst [vmem:[#allocation118_spill] sm:$0xff] %v10223_v43  ;;  %v3082_v21 = vpop.f32.mrf.mxu0 }
 0x268   : > { %14188 = vst [vmem:[#allocation119_spill] sm:$0xff] %v10225_v22  ;;  %v3083_v46 = vadd.f32 %v3082_v21, %v3070_v51  ;;  %v3121_v11 = vpop.f32.mrf.mxu3  ;;  %v10246_v51 = vld [vmem:[#allocation8 + $0xf8] sm:$0xff]  ;;  %v10249_v21 = vld [vmem:[#allocation8 + $0x30] sm:$0xff] }
 0x269   : > { %14189 = vst [vmem:[#allocation120_spill] sm:$0xff] %v10228_v36  ;;  %3544 = vmatpush.bf16.msrb.mxu3 %v10231_v60  ;;  %v3095_v58 = vpop.f32.mrf.mxu1  ;;  %v10237_v36 = vld [vmem:[#allocation8 + $0x38] sm:$0xff] }
 0x26a   : > { %14190 = vst [vmem:[#allocation121_spill] sm:$0xff] %v10231_v60  ;;  %v3096_v6 = vadd.f32 %v3095_v58, %v3083_v46  ;;  %v10252_v58 = vld [vmem:[#allocation8 + $0x70] sm:$0xff] }
 0x26b   : > { %v10255_v46 = vld [vmem:[#allocation8 + $0xb0] sm:$0xff] }
 0x26c   : > { %v3109_v10 = vadd.f32 %v3108_v8, %v3096_v6  ;;  %v10258_v8 = vld [vmem:[#allocation8 + $0xf0] sm:$0xff]  ;;  %v10264_v6 = vld [vmem:[#allocation8 + $0x68] sm:$0xff] }
 0x26d   : > { %v3110_v29 = vpop.f32.mrf.mxu2 }
 0x26e   : > { %v3122_v37 = vadd.f32 %v3121_v11, %v3109_v10  ;;  %v10261_v11 = vld [vmem:[#allocation8 + $0x28] sm:$0xff]  ;;  %v10279_v29 = vld [vmem:[#allocation8 + $0xa0] sm:$0xff] }
 0x26f   : > { %v3084_v31 = vpop.f32.mrf.mxu0  ;;  %v10267_v10 = vld [vmem:[#allocation8 + $0xa8] sm:$0xff]  ;;  %14195 = vst [vmem:[#allocation126_spill] sm:$0xff] %v10279_v29 }
 0x270   : > { %v3125_v1 = vpack.c.bf16 %v3122_v37, %v3122_v37  ;;  %v3123_v7 = vpop.f32.mrf.mxu3  ;;  %14191 = vst [vmem:[#allocation122_spill] sm:$0xff] %v10267_v10  ;;  %v10270_v37 = vld [vmem:[#allocation8 + $0xe8] sm:$0xff]  ;;  %v10273_v31 = vld [vmem:[#allocation8 + $0x20] sm:$0xff] }
 0x271   : > { %v3097_v28 = vpop.f32.mrf.mxu1  ;;  %14192 = vst [vmem:[#allocation123_spill] sm:$0xff] %v10270_v37  ;;  %v10282_v7 = vld [vmem:[#allocation8 + $0xe0] sm:$0xff] }
 0x272   : > { %3454 = vmatmul.bf16.vlgmr.msra.gmra.mxu0 %v3125_v1  ;;  %3467 = vmatmul.bf16.vlgmr.msra.gmra.mxu1 %v3125_v1  ;;  %14193 = vst [vmem:[#allocation124_spill] sm:$0xff] %v10273_v31  ;;  %v10276_v28 = vld [vmem:[#allocation8 + $0x60] sm:$0xff] }
 0x273   : > { %3480 = vmatmul.bf16.vlgmr.msra.gmra.mxu2 %v3125_v1  ;;  %3493 = vmatmul.bf16.vlgmr.msra.gmra.mxu3 %v3125_v1  ;;  %14194 = vst [vmem:[#allocation125_spill] sm:$0xff] %v10276_v28 }
 0x274   : > { %3611 = vmatpush.bf16.msra.mxu0 %v10237_v36  ;;  %3624 = vmatpush.bf16.msra.mxu1 %v10240_v62  ;;  %14196 = vst [vmem:[#allocation127_spill] sm:$0xff] %v10282_v7 }
 0x275   : > { %3637 = vmatpush.bf16.msra.mxu2 %v10243_v42  ;;  %3650 = vmatpush.bf16.msra.mxu3 %v10246_v51 }
 0x278   : > { %3612 = vmatpush.bf16.msra.mxu0 %v10249_v21  ;;  %3625 = vmatpush.bf16.msra.mxu1 %v10252_v58 }
 0x279   : > { %3638 = vmatpush.bf16.msra.mxu2 %v10255_v46  ;;  %3651 = vmatpush.bf16.msra.mxu3 %v10258_v8 }
 0x27c   : > { %3613 = vmatpush.bf16.msra.mxu0 %v10261_v11  ;;  %3626 = vmatpush.bf16.msra.mxu1 %v10264_v6 }
 0x27d   : > { %3639 = vmatpush.bf16.msra.mxu2 %v10267_v10  ;;  %3652 = vmatpush.bf16.msra.mxu3 %v10270_v37  ;;  %v10285_v37 = vld [vmem:[#allocation8 + $0x18] sm:$0xff] }
 0x27e   : > { %14197 = vst [vmem:[#allocation128_spill] sm:$0xff] %v10285_v37 }
 0x280   : > { %3614 = vmatpush.bf16.msra.mxu0 %v10273_v31  ;;  %3627 = vmatpush.bf16.msra.mxu1 %v10276_v28  ;;  %v10288_v31 = vld [vmem:[#allocation8 + $0x58] sm:$0xff] }
 0x281   : > { %3640 = vmatpush.bf16.msra.mxu2 %v10279_v29  ;;  %3653 = vmatpush.bf16.msra.mxu3 %v10282_v7  ;;  %14198 = vst [vmem:[#allocation129_spill] sm:$0xff] %v10288_v31  ;;  %v10291_v28 = vld [vmem:[#allocation8 + $0x98] sm:$0xff]  ;;  %v10297_v7 = vld [vmem:[#allocation8 + $0x10] sm:$0xff] }
 0x282   : > { %3506 = vmatmul.bf16.vlgmr.msrb.gmra.mxu0 %v3125_v1  ;;  %3519 = vmatmul.bf16.vlgmr.msrb.gmra.mxu1 %v3125_v1  ;;  %14199 = vst [vmem:[#allocation130_spill] sm:$0xff] %v10291_v28  ;;  %v10294_v29 = vld [vmem:[#allocation8 + $0xd8] sm:$0xff] }
 0x283   : > { %3532 = vmatmul.bf16.vlgmr.msrb.gmra.mxu2 %v3125_v1  ;;  %3545 = vmatmul.bf16.vlgmr.msrb.gmra.mxu3 %v3125_v1  ;;  %14200 = vst [vmem:[#allocation131_spill] sm:$0xff] %v10294_v29  ;;  %v10300_v1 = vld [vmem:[#allocation8 + $0x50] sm:$0xff] }
 0x284   : > { %3615 = vmatpush.bf16.msra.mxu0 %v10285_v37  ;;  %3628 = vmatpush.bf16.msra.mxu1 %v10288_v31  ;;  %14201 = vst [vmem:[#allocation132_spill] sm:$0xff] %v10297_v7  ;;  %v10303_v37 = vld [vmem:[#allocation8 + $0x90] sm:$0xff] }
 0x285   : > { %3641 = vmatpush.bf16.msra.mxu2 %v10291_v28  ;;  %3654 = vmatpush.bf16.msra.mxu3 %v10294_v29  ;;  %14202 = vst [vmem:[#allocation133_spill] sm:$0xff] %v10300_v1  ;;  %v10306_v31 = vld [vmem:[#allocation8 + $0xd0] sm:$0xff]  ;;  %v10309_v28 = vld [vmem:[#allocation8 + $0x8] sm:$0xff] }
 0x286   : > { %14203 = vst [vmem:[#allocation134_spill] sm:$0xff] %v10303_v37  ;;  %v10312_v29 = vld [vmem:[#allocation8 + $0x48] sm:$0xff] }
 0x287   : > { %14204 = vst [vmem:[#allocation135_spill] sm:$0xff] %v10306_v31 }
 0x288   : > { %3616 = vmatpush.bf16.msra.mxu0 %v10297_v7  ;;  %3629 = vmatpush.bf16.msra.mxu1 %v10300_v1  ;;  %14205 = vst [vmem:[#allocation136_spill] sm:$0xff] %v10309_v28  ;;  %v10315_v7 = vld [vmem:[#allocation8 + $0x88] sm:$0xff] }
 0x289   : > { %3642 = vmatpush.bf16.msra.mxu2 %v10303_v37  ;;  %3655 = vmatpush.bf16.msra.mxu3 %v10306_v31  ;;  %14206 = vst [vmem:[#allocation137_spill] sm:$0xff] %v10312_v29  ;;  %v10318_v1 = vld [vmem:[#allocation8 + $0xc8] sm:$0xff]  ;;  %v10321_v37 = vld [vmem:[#allocation8] sm:$0xff] }
 0x28a   : > { %14207 = vst [vmem:[#allocation138_spill] sm:$0xff] %v10315_v7  ;;  %v10324_v31 = vld [vmem:[#allocation8 + $0x40] sm:$0xff] }
 0x28b   : > { %14208 = vst [vmem:[#allocation139_spill] sm:$0xff] %v10318_v1 }
 0x28c   : > { %3617 = vmatpush.bf16.msra.mxu0 %v10309_v28  ;;  %3630 = vmatpush.bf16.msra.mxu1 %v10312_v29  ;;  %14209 = vst [vmem:[#allocation140_spill] sm:$0xff] %v10321_v37  ;;  %v10327_v28 = vld [vmem:[#allocation8 + $0x138] sm:$0xff] }
 0x28d   : > { %3643 = vmatpush.bf16.msra.mxu2 %v10315_v7  ;;  %3656 = vmatpush.bf16.msra.mxu3 %v10318_v1  ;;  %14210 = vst [vmem:[#allocation141_spill] sm:$0xff] %v10324_v31  ;;  %v10330_v29 = vld [vmem:[#allocation8 + $0x178] sm:$0xff]  ;;  %v10333_v7 = vld [vmem:[#allocation8 + $0x80] sm:$0xff] }
 0x28e   : > { %14211 = vst [vmem:[#allocation142_spill] sm:$0xff] %v10327_v28  ;;  %v10336_v1 = vld [vmem:[#allocation8 + $0xc0] sm:$0xff] }
 0x28f   : > { %14212 = vst [vmem:[#allocation143_spill] sm:$0xff] %v10330_v29 }
 0x290   : > { %3618 = vmatpush.bf16.msra.mxu0 %v10321_v37  ;;  %3631 = vmatpush.bf16.msra.mxu1 %v10324_v31  ;;  %14213 = vst [vmem:[#allocation144_spill] sm:$0xff] %v10333_v7  ;;  %v10339_v37 = vld [vmem:[#allocation8 + $0x1b8] sm:$0xff] }
 0x291   : > { %3644 = vmatpush.bf16.msra.mxu2 %v10333_v7  ;;  %14214 = vst [vmem:[#allocation145_spill] sm:$0xff] %v10336_v1  ;;  %3657 = vmatpush.bf16.msra.mxu3 %v10336_v1  ;;  %v10342_v31 = vld [vmem:[#allocation8 + $0x1f8] sm:$0xff]  ;;  %v10351_v7 = vld [vmem:[#allocation8 + $0x1b0] sm:$0xff] }
 0x292   : > { %14215 = vst [vmem:[#allocation146_spill] sm:$0xff] %v10339_v37  ;;  %v10354_v1 = vld [vmem:[#allocation8 + $0x1f0] sm:$0xff] }
 0x293   : > { %14216 = vst [vmem:[#allocation147_spill] sm:$0xff] %v10342_v31 }
 0x294   : > { %3663 = vmatpush.bf16.msrb.mxu0 %v10327_v28  ;;  %3676 = vmatpush.bf16.msrb.mxu1 %v10330_v29  ;;  %v10345_v28 = vld [vmem:[#allocation8 + $0x130] sm:$0xff]  ;;  %14219 = vst [vmem:[#allocation150_spill] sm:$0xff] %v10351_v7 }
 0x295   : > { %3689 = vmatpush.bf16.msrb.mxu2 %v10339_v37  ;;  %3702 = vmatpush.bf16.msrb.mxu3 %v10342_v31  ;;  %14217 = vst [vmem:[#allocation148_spill] sm:$0xff] %v10345_v28  ;;  %v10348_v29 = vld [vmem:[#allocation8 + $0x170] sm:$0xff]  ;;  %v10357_v37 = vld [vmem:[#allocation8 + $0x128] sm:$0xff] }
 0x296   : > { %14218 = vst [vmem:[#allocation149_spill] sm:$0xff] %v10348_v29  ;;  %v10360_v31 = vld [vmem:[#allocation8 + $0x168] sm:$0xff] }
 0x297   : > { %14220 = vst [vmem:[#allocation151_spill] sm:$0xff] %v10354_v1 }
 0x298   : > { %3664 = vmatpush.bf16.msrb.mxu0 %v10345_v28  ;;  %3677 = vmatpush.bf16.msrb.mxu1 %v10348_v29  ;;  %14221 = vst [vmem:[#allocation152_spill] sm:$0xff] %v10357_v37  ;;  %v10363_v28 = vld [vmem:[#allocation8 + $0x1a8] sm:$0xff] }
 0x299   : > { %3690 = vmatpush.bf16.msrb.mxu2 %v10351_v7  ;;  %3703 = vmatpush.bf16.msrb.mxu3 %v10354_v1  ;;  %14222 = vst [vmem:[#allocation153_spill] sm:$0xff] %v10360_v31  ;;  %v10366_v29 = vld [vmem:[#allocation8 + $0x1e8] sm:$0xff]  ;;  %v10369_v7 = vld [vmem:[#allocation8 + $0x120] sm:$0xff] }
 0x29a   : > { %14223 = vst [vmem:[#allocation154_spill] sm:$0xff] %v10363_v28  ;;  %v10372_v1 = vld [vmem:[#allocation8 + $0x160] sm:$0xff] }
 0x29b   : > { %14224 = vst [vmem:[#allocation155_spill] sm:$0xff] %v10366_v29 }
 0x29c   : > { %3665 = vmatpush.bf16.msrb.mxu0 %v10357_v37  ;;  %3678 = vmatpush.bf16.msrb.mxu1 %v10360_v31  ;;  %14225 = vst [vmem:[#allocation156_spill] sm:$0xff] %v10369_v7  ;;  %v10375_v37 = vld [vmem:[#allocation8 + $0x1a0] sm:$0xff] }
 0x29d   : > { %3691 = vmatpush.bf16.msrb.mxu2 %v10363_v28  ;;  %3704 = vmatpush.bf16.msrb.mxu3 %v10366_v29  ;;  %14226 = vst [vmem:[#allocation157_spill] sm:$0xff] %v10372_v1  ;;  %v10378_v31 = vld [vmem:[#allocation8 + $0x1e0] sm:$0xff]  ;;  %v10381_v28 = vld [vmem:[#allocation8 + $0x118] sm:$0xff] }
 0x29e   : > { %14227 = vst [vmem:[#allocation158_spill] sm:$0xff] %v10375_v37  ;;  %v10384_v29 = vld [vmem:[#allocation8 + $0x158] sm:$0xff] }
 0x29f   : > { %14228 = vst [vmem:[#allocation159_spill] sm:$0xff] %v10378_v31 }
 0x2a0   : > { %3666 = vmatpush.bf16.msrb.mxu0 %v10369_v7  ;;  %3679 = vmatpush.bf16.msrb.mxu1 %v10372_v1  ;;  %14229 = vst [vmem:[#allocation160_spill] sm:$0xff] %v10381_v28  ;;  %v10387_v7 = vld [vmem:[#allocation8 + $0x198] sm:$0xff] }
 0x2a1   : > { %3692 = vmatpush.bf16.msrb.mxu2 %v10375_v37  ;;  %3705 = vmatpush.bf16.msrb.mxu3 %v10378_v31  ;;  %14230 = vst [vmem:[#allocation161_spill] sm:$0xff] %v10384_v29  ;;  %v10390_v1 = vld [vmem:[#allocation8 + $0x1d8] sm:$0xff]  ;;  %v10395_v31 = vld [vmem:[#allocation8 + $0x190] sm:$0xff] }
 0x2a2   : > { %14231 = vst [vmem:[#allocation162_spill] sm:$0xff] %v10387_v7  ;;  %v9119_v37 = vld [vmem:[#allocation2 + $0x10] sm:$0xff] }
 0x2a3   : > { %14232 = vst [vmem:[#allocation163_spill] sm:$0xff] %v10390_v1 }
 0x2a4   : > { %3667 = vmatpush.bf16.msrb.mxu0 %v10381_v28  ;;  %3680 = vmatpush.bf16.msrb.mxu1 %v10384_v29  ;;  %14233 = vst [vmem:[#allocation164_spill] sm:$0xff] %v10395_v31  ;;  %v10398_v28 = vld [vmem:[#allocation8 + $0x1d0] sm:$0xff] }
 0x2a5   : > { %3693 = vmatpush.bf16.msrb.mxu2 %v10387_v7  ;;  %3706 = vmatpush.bf16.msrb.mxu3 %v10390_v1  ;;  %14234 = vst [vmem:[#allocation165_spill] sm:$0xff] %v10398_v28  ;;  %v10403_v7 = vld [vmem:[#allocation8 + $0x188] sm:$0xff] }
 0x2a6   : > { %14235 = vst [vmem:[#allocation166_spill] sm:$0xff] %v10403_v7 }
 0x2a8   : > { %3668 = vmatpush.bf16.msrb.mxu0 %v9912_v16  ;;  %3681 = vmatpush.bf16.msrb.mxu1 %v9914_v57  ;;  %v9116_v16 = vld [vmem:[#allocation2 + $0x30] sm:$0xff] }
 0x2a9   : > { %3694 = vmatpush.bf16.msrb.mxu2 %v10395_v31  ;;  %3707 = vmatpush.bf16.msrb.mxu3 %v10398_v28  ;;  %v3550_v57 = vmul.f32 0.9, %v9116_v16  ;;  %v9117_v28 = vld [vmem:[#allocation2] sm:$0xff] }
 0x2ac   : > { %3669 = vmatpush.bf16.msrb.mxu0 %v9928_v12  ;;  %3682 = vmatpush.bf16.msrb.mxu1 %v9930_v4  ;;  %v3551_v12 = vmul.f32 0.9, %v9117_v28 }
 0x2ad   : > { %3695 = vmatpush.bf16.msrb.mxu2 %v10403_v7  ;;  %3708 = vmatpush.bf16.msrb.mxu3 %v9917_v27 }
 0x2b0   : > { %3670 = vmatpush.bf16.msrb.mxu0 %v9944_v39  ;;  %3683 = vmatpush.bf16.msrb.mxu1 %v9946_v40  ;;  %v9118_v39 = vld [vmem:[#allocation2 + $0x18] sm:$0xff] }
 0x2b1   : > { %3696 = vmatpush.bf16.msrb.mxu2 %v9919_v30  ;;  %3709 = vmatpush.bf16.msrb.mxu3 %v9935_v18  ;;  %v3552_v40 = vmul.f32 0.9, %v9118_v39  ;;  %v3553_v30 = vmul.f32 0.9, %v9119_v37 }
 0x2ef   : > { %v3455_v31 = vpop.f32.mrf.mxu0  ;;  %v3468_v4 = vpop.f32.mrf.mxu1 }
 0x2f0   : > { %v3558_v1 = vadd.f32 %v3550_v57, %v3455_v31  ;;  %v3559_v29 = vadd.f32 %v3551_v12, %v3468_v4  ;;  %v3555_v4 = vmul.f32 0.9, %v9954_v52 }
 0x2f2   : > { %v10412_v7 = vadd.f32 %v3558_v1, %v9710_v59  ;;  %v10415_v27 = vadd.f32 %v3559_v29, %v9744_v56 }
 0x2f4   : > { %8997 = vtanh.f32 %v10412_v7 }
 0x2f5   : > { %8999 = vtanh.f32 %v10415_v27 }
 0x2f6   : > { %v3481_v18 = vpop.f32.mrf.mxu2  ;;  %v3494_v28 = vpop.f32.mrf.mxu3 }
 0x2f7   : > { %v3560_v16 = vadd.f32 %v3552_v40, %v3481_v18  ;;  %v3561_v10 = vadd.f32 %v3553_v30, %v3494_v28  ;;  %v3457_v31 = vpop.f32.mrf.mxu0  ;;  %v3470_v57 = vpop.f32.mrf.mxu1 }
 0x2f9   : > { %v10420_v59 = vadd.f32 %v3560_v16, %v9799_v53  ;;  %v10423_v56 = vadd.f32 %v3561_v10, %v9833_v2  ;;  %v3554_v53 = vmul.f32 0.9, %v9952_v23 }
 0x2fa   : > { %v10425_v29 = vpop.eup %8997 }
 0x2fb   : > { %14236 = vst [vmem:[#allocation167_spill] sm:$0xff] %v10425_v29  ;;  %v10427_v1 = vpop.eup %8999  ;;  %9001 = vtanh.f32 %v10420_v59  ;;  %v3603_v37 = vpack.c.bf16 %v10425_v29, %v10425_v29  ;;  %v14261_v29 = vld [vmem:[#allocation87_spill] sm:$0xff] }
 0x2fc   : > { %14237 = vst [vmem:[#allocation168_spill] sm:$0xff] %v10427_v1  ;;  %9003 = vtanh.f32 %v10423_v56  ;;  %v3604_v12 = vpack.c.bf16 %v10427_v1, %v10427_v1  ;;  %v14260_v1 = vld [vmem:[#allocation84_spill] sm:$0xff] }
 0x2fd   : > { %3619 = vmatmul.bf16.vlgmr.msra.gmra.mxu0 %v3603_v37  ;;  %v9120_v37 = vld [vmem:[#allocation2 + $0x28] sm:$0xff] }
 0x2fe   : > { %v3483_v2 = vpop.f32.mrf.mxu2  ;;  %v3496_v10 = vpop.f32.mrf.mxu3  ;;  %3632 = vmatmul.bf16.vlgmr.msra.gmra.mxu1 %v3604_v12  ;;  %3716 = vmatpush.bf16.msra.mxu0 %v10011_v20  ;;  %v3556_v12 = vmul.f32 0.9, %v9120_v37 }
 0x2ff   : > { %v3507_v39 = vpop.f32.mrf.mxu0  ;;  %v3520_v40 = vpop.f32.mrf.mxu1  ;;  %3729 = vmatpush.bf16.msra.mxu1 %v10013_v17 }
 0x300   : > { %v3562_v30 = vadd.f32 %v3554_v53, %v3507_v39  ;;  %v3563_v18 = vadd.f32 %v3555_v4, %v3520_v40  ;;  %v9121_v53 = vld [vmem:[#allocation2 + $0x38] sm:$0xff] }
 0x301   : > { %v10439_v28 = vpop.eup %9001  ;;  %v3557_v4 = vmul.f32 0.9, %v9121_v53 }
 0x302   : > { %14238 = vst [vmem:[#allocation169_spill] sm:$0xff] %v10439_v28  ;;  %v10441_v16 = vpop.eup %9003  ;;  %v10444_v23 = vadd.f32 %v3562_v30, %v9884_v63  ;;  %v10447_v52 = vadd.f32 %v3563_v18, %v9958_v61  ;;  %v3605_v31 = vpack.c.bf16 %v10439_v28, %v10439_v28  ;;  %3717 = vmatpush.bf16.msra.mxu0 %v10023_v48  ;;  %v14259_v28 = vld [vmem:[#allocation83_spill] sm:$0xff] }
 0x303   : > { %14239 = vst [vmem:[#allocation170_spill] sm:$0xff] %v10441_v16  ;;  %v3606_v57 = vpack.c.bf16 %v10441_v16, %v10441_v16  ;;  %3730 = vmatpush.bf16.msra.mxu1 %v10027_v34  ;;  %v14258_v16 = vld [vmem:[#allocation90_spill] sm:$0xff] }
 0x304   : > { %9005 = vtanh.f32 %v10444_v23  ;;  %3645 = vmatmul.bf16.vlgmr.msra.gmra.mxu2 %v3605_v31 }
 0x305   : > { %9007 = vtanh.f32 %v10447_v52  ;;  %3658 = vmatmul.bf16.vlgmr.msra.gmra.mxu3 %v3606_v57  ;;  %3742 = vmatpush.bf16.msra.mxu2 %v10015_v44 }
 0x306   : > { %v3533_v63 = vpop.f32.mrf.mxu2  ;;  %v3546_v61 = vpop.f32.mrf.mxu3  ;;  %3755 = vmatpush.bf16.msra.mxu3 %v10018_v47  ;;  %3718 = vmatpush.bf16.msra.mxu0 %v10039_v45 }
 0x307   : > { %v3564_v2 = vadd.f32 %v3556_v12, %v3533_v63  ;;  %v3565_v10 = vadd.f32 %v3557_v4, %v3546_v61  ;;  %v3509_v39 = vpop.f32.mrf.mxu0  ;;  %v3522_v40 = vpop.f32.mrf.mxu1  ;;  %3731 = vmatpush.bf16.msra.mxu1 %v10041_v13 }
 0x308   : > { %v14246_v39 = vld [vmem:[#allocation69_spill] sm:$0xff] }
 0x309   : > { %v10462_v30 = vadd.f32 %v3564_v2, %v9998_v0  ;;  %v10465_v18 = vadd.f32 %v3565_v10, %v10098_v32  ;;  %3743 = vmatpush.bf16.msra.mxu2 %v10029_v19  ;;  %v14244_v2 = vld [vmem:[#allocation70_spill] sm:$0xff]  ;;  %v14245_v10 = vld [vmem:[#allocation68_spill] sm:$0xff]  ;;  %v14247_v40 = vld [vmem:[#allocation73_spill] sm:$0xff] }
 0x30a   : > { %v10468_v31 = vpop.eup %9005  ;;  %3756 = vmatpush.bf16.msra.mxu3 %v10034_v15  ;;  %3719 = vmatpush.bf16.msra.mxu0 %v10059_v24 }
 0x30b   : > { %14240 = vst [vmem:[#allocation171_spill] sm:$0xff] %v10468_v31  ;;  %v10472_v57 = vpop.eup %9007  ;;  %9009 = vtanh.f32 %v10462_v30  ;;  %v3607_v37 = vpack.c.bf16 %v10468_v31, %v10468_v31  ;;  %3732 = vmatpush.bf16.msra.mxu1 %v10061_v26  ;;  %v14257_v31 = vld [vmem:[#allocation89_spill] sm:$0xff] }
 0x30c   : > { %14241 = vst [vmem:[#allocation172_spill] sm:$0xff] %v10472_v57  ;;  %9011 = vtanh.f32 %v10465_v18  ;;  %v3608_v0 = vpack.c.bf16 %v10472_v57, %v10472_v57  ;;  %v14256_v57 = vld [vmem:[#allocation78_spill] sm:$0xff] }
 0x30d   : > { %3671 = vmatmul.bf16.vlgmr.msrb.gmra.mxu0 %v3607_v37  ;;  %3744 = vmatpush.bf16.msra.mxu2 %v10043_v35  ;;  %v14248_v37 = vld [vmem:[#allocation74_spill] sm:$0xff] }
 0x30e   : > { %v3535_v32 = vpop.f32.mrf.mxu2  ;;  %v3548_v12 = vpop.f32.mrf.mxu3  ;;  %3684 = vmatmul.bf16.vlgmr.msrb.gmra.mxu1 %v3608_v0  ;;  %3757 = vmatpush.bf16.msra.mxu3 %v10050_v25  ;;  %v14249_v0 = vld [vmem:[#allocation71_spill] sm:$0xff] }
 0x30f   : > { %3720 = vmatpush.bf16.msra.mxu0 %v10071_v38  ;;  %3733 = vmatpush.bf16.msra.mxu1 %v10073_v33  ;;  %v14250_v32 = vld [vmem:[#allocation72_spill] sm:$0xff]  ;;  %v14251_v12 = vld [vmem:[#allocation81_spill] sm:$0xff] }
 0x311   : > { %v10485_v53 = vpop.eup %9009  ;;  %3745 = vmatpush.bf16.msra.mxu2 %v10063_v55 }
 0x312   : > { %14242 = vst [vmem:[#allocation173_spill] sm:$0xff] %v10485_v53  ;;  %v10488_v4 = vpop.eup %9011  ;;  %v3609_v63 = vpack.c.bf16 %v10485_v53, %v10485_v53  ;;  %3758 = vmatpush.bf16.msra.mxu3 %v10066_v50  ;;  %v14253_v53 = vld [vmem:[#allocation85_spill] sm:$0xff] }
 0x313   : > { %14243 = vst [vmem:[#allocation174_spill] sm:$0xff] %v10488_v4  ;;  %v3610_v61 = vpack.c.bf16 %v10488_v4, %v10488_v4  ;;  %3721 = vmatpush.bf16.msra.mxu0 %v10084_v49  ;;  %3734 = vmatpush.bf16.msra.mxu1 %v14244_v2  ;;  %v14252_v4 = vld [vmem:[#allocation82_spill] sm:$0xff] }
 0x314   : > { %3697 = vmatmul.bf16.vlgmr.msrb.gmra.mxu2 %v3609_v63  ;;  %v14254_v63 = vld [vmem:[#allocation86_spill] sm:$0xff] }
 0x315   : > { %3710 = vmatmul.bf16.vlgmr.msrb.gmra.mxu3 %v3610_v61  ;;  %3746 = vmatpush.bf16.msra.mxu2 %v14245_v10  ;;  %v14255_v61 = vld [vmem:[#allocation75_spill] sm:$0xff] }
 0x316   : > { %3759 = vmatpush.bf16.msra.mxu3 %v14246_v39 }
 0x317   : > { %3722 = vmatpush.bf16.msra.mxu0 %v14247_v40  ;;  %3735 = vmatpush.bf16.msra.mxu1 %v14248_v37 }
 0x319   : > { %3747 = vmatpush.bf16.msra.mxu2 %v14249_v0 }
 0x31a   : > { %3760 = vmatpush.bf16.msra.mxu3 %v14250_v32 }
 0x31b   : > { %3723 = vmatpush.bf16.msra.mxu0 %v14251_v12  ;;  %3736 = vmatpush.bf16.msra.mxu1 %v14252_v4  ;;  %v14262_v12 = vld [vmem:[#allocation88_spill] sm:$0xff]  ;;  %v14263_v4 = vld [vmem:[#allocation93_spill] sm:$0xff] }
 0x31d   : > { %3748 = vmatpush.bf16.msra.mxu2 %v14255_v61  ;;  %v14266_v61 = vld [vmem:[#allocation92_spill] sm:$0xff] }
 0x31e   : > { %3761 = vmatpush.bf16.msra.mxu3 %v14256_v57  ;;  %v14267_v57 = vld [vmem:[#allocation98_spill] sm:$0xff] }
 0x31f   : > { %3768 = vmatpush.bf16.msrb.mxu0 %v14253_v53  ;;  %3781 = vmatpush.bf16.msrb.mxu1 %v14254_v63  ;;  %v14264_v53 = vld [vmem:[#allocation94_spill] sm:$0xff]  ;;  %v14265_v63 = vld [vmem:[#allocation91_spill] sm:$0xff] }
 0x321   : > { %3749 = vmatpush.bf16.msra.mxu2 %v14259_v28  ;;  %v14270_v28 = vld [vmem:[#allocation96_spill] sm:$0xff] }
 0x322   : > { %3762 = vmatpush.bf16.msra.mxu3 %v14260_v1  ;;  %v14271_v1 = vld [vmem:[#allocation106_spill] sm:$0xff] }
 0x323   : > { %3769 = vmatpush.bf16.msrb.mxu0 %v14257_v31  ;;  %3782 = vmatpush.bf16.msrb.mxu1 %v14258_v16  ;;  %v14268_v31 = vld [vmem:[#allocation101_spill] sm:$0xff]  ;;  %v14269_v16 = vld [vmem:[#allocation95_spill] sm:$0xff] }
 0x325   : > { %3794 = vmatpush.bf16.msrb.mxu2 %v14261_v29  ;;  %v14272_v29 = vld [vmem:[#allocation107_spill] sm:$0xff] }
 0x326   : > { %3807 = vmatpush.bf16.msrb.mxu3 %v14262_v12  ;;  %v14273_v12 = vld [vmem:[#allocation102_spill] sm:$0xff] }
 0x327   : > { %3770 = vmatpush.bf16.msrb.mxu0 %v14263_v4  ;;  %3783 = vmatpush.bf16.msrb.mxu1 %v14264_v53  ;;  %v14274_v4 = vld [vmem:[#allocation104_spill] sm:$0xff]  ;;  %v14275_v53 = vld [vmem:[#allocation110_spill] sm:$0xff] }
 0x329   : > { %3795 = vmatpush.bf16.msrb.mxu2 %v14265_v63  ;;  %v14276_v63 = vld [vmem:[#allocation111_spill] sm:$0xff] }
 0x32a   : > { %3808 = vmatpush.bf16.msrb.mxu3 %v14266_v61  ;;  %v14277_v61 = vld [vmem:[#allocation108_spill] sm:$0xff] }
 0x32b   : > { %3771 = vmatpush.bf16.msrb.mxu0 %v14267_v57  ;;  %3784 = vmatpush.bf16.msrb.mxu1 %v14268_v31  ;;  %v14278_v57 = vld [vmem:[#allocation109_spill] sm:$0xff] }
 0x32d   : > { %3796 = vmatpush.bf16.msrb.mxu2 %v14269_v16 }
 0x32e   : > { %3809 = vmatpush.bf16.msrb.mxu3 %v14270_v28 }
 0x32f   : > { %3772 = vmatpush.bf16.msrb.mxu0 %v14271_v1  ;;  %3785 = vmatpush.bf16.msrb.mxu1 %v14272_v29 }
 0x331   : > { %3797 = vmatpush.bf16.msrb.mxu2 %v14273_v12 }
 0x332   : > { %3810 = vmatpush.bf16.msrb.mxu3 %v14274_v4 }
 0x333   : > { %3773 = vmatpush.bf16.msrb.mxu0 %v14275_v53  ;;  %3786 = vmatpush.bf16.msrb.mxu1 %v14276_v63  ;;  %v14279_v63 = vld [vmem:[#allocation120_spill] sm:$0xff] }
 0x335   : > { %3798 = vmatpush.bf16.msrb.mxu2 %v14277_v61 }
 0x336   : > { %3811 = vmatpush.bf16.msrb.mxu3 %v14278_v57 }
 0x337   : > { %3774 = vmatpush.bf16.msrb.mxu0 %v10211_v41  ;;  %3787 = vmatpush.bf16.msrb.mxu1 %v10213_v14 }
 0x339   : > { %3799 = vmatpush.bf16.msrb.mxu2 %v10204_v3 }
 0x33a   : > { %3812 = vmatpush.bf16.msrb.mxu3 %v10207_v5 }
 0x33b   : > { %3775 = vmatpush.bf16.msrb.mxu0 %v10223_v43  ;;  %3788 = vmatpush.bf16.msrb.mxu1 %v10225_v22 }
 0x33d   : > { %3800 = vmatpush.bf16.msrb.mxu2 %v10216_v9 }
 0x33e   : > { %3813 = vmatpush.bf16.msrb.mxu3 %v10219_v54 }
 0x341   : > { %3801 = vmatpush.bf16.msrb.mxu2 %v14279_v63 }
 0x342   : > { %3814 = vmatpush.bf16.msrb.mxu3 %v10231_v60 }
 0x37a   : > { %v3620_v57 = vpop.f32.mrf.mxu0 }
 0x37b   : > { %v3633_v41 = vpop.f32.mrf.mxu1 }
 0x37c   : > { %v3634_v3 = vadd.f32 %v3633_v41, %v3620_v57  ;;  %v14292_v57 = vld [vmem:[#allocation134_spill] sm:$0xff] }
 0x382   : > { %v3622_v61 = vpop.f32.mrf.mxu0 }
 0x383   : > { %v3635_v14 = vpop.f32.mrf.mxu1  ;;  %v14299_v61 = vld [vmem:[#allocation141_spill] sm:$0xff] }
 0x384   : > { %v14283_v14 = vld [vmem:[#allocation125_spill] sm:$0xff] }
 0x387   : > { %v3646_v53 = vpop.f32.mrf.mxu2 }
 0x388   : > { %v3659_v4 = vpop.f32.mrf.mxu3  ;;  %v3647_v5 = vadd.f32 %v3646_v53, %v3634_v3  ;;  %v14293_v53 = vld [vmem:[#allocation135_spill] sm:$0xff] }
 0x38a   : > { %v3672_v12 = vpop.f32.mrf.mxu0  ;;  %v3660_v29 = vadd.f32 %v3659_v4, %v3647_v5  ;;  %v14282_v5 = vld [vmem:[#allocation124_spill] sm:$0xff] }
 0x38b   : > { %v3685_v43 = vpop.f32.mrf.mxu1  ;;  %v14294_v4 = vld [vmem:[#allocation136_spill] sm:$0xff] }
 0x38c   : > { %v3673_v9 = vadd.f32 %v3672_v12, %v3660_v29  ;;  %v14287_v29 = vld [vmem:[#allocation129_spill] sm:$0xff]  ;;  %v14297_v12 = vld [vmem:[#allocation139_spill] sm:$0xff] }
 0x38e   : > { %v3686_v16 = vadd.f32 %v3685_v43, %v3673_v9  ;;  %v14281_v9 = vld [vmem:[#allocation123_spill] sm:$0xff]  ;;  %v14284_v43 = vld [vmem:[#allocation126_spill] sm:$0xff] }
 0x38f   : > { %v3648_v22 = vpop.f32.mrf.mxu2 }
 0x390   : > { %v3661_v1 = vpop.f32.mrf.mxu3  ;;  %v14285_v22 = vld [vmem:[#allocation127_spill] sm:$0xff] }
 0x391   : > { %v14288_v1 = vld [vmem:[#allocation130_spill] sm:$0xff] }
 0x392   : > { %v3674_v28 = vpop.f32.mrf.mxu0 }
 0x393   : > { %v3687_v54 = vpop.f32.mrf.mxu1  ;;  %v14289_v28 = vld [vmem:[#allocation131_spill] sm:$0xff] }
 0x394   : > { %v14280_v54 = vld [vmem:[#allocation122_spill] sm:$0xff] }
 0x397   : > { %v3698_v63 = vpop.f32.mrf.mxu2 }
 0x398   : > { %v3699_v31 = vadd.f32 %v3698_v63, %v3686_v16  ;;  %v3711_v60 = vpop.f32.mrf.mxu3  ;;  %v14290_v16 = vld [vmem:[#allocation132_spill] sm:$0xff] }
 0x399   : > { %v14298_v63 = vld [vmem:[#allocation140_spill] sm:$0xff] }
 0x39a   : > { %v3712_v32 = vadd.f32 %v3711_v60, %v3699_v31  ;;  %v14286_v60 = vld [vmem:[#allocation128_spill] sm:$0xff]  ;;  %v14291_v31 = vld [vmem:[#allocation133_spill] sm:$0xff] }
 0x39c   : > { %v3715_v0 = vpack.c.bf16 %v3712_v32, %v3712_v32  ;;  %v14295_v32 = vld [vmem:[#allocation137_spill] sm:$0xff] }
 0x39e   : > { %3724 = vmatmul.bf16.vlgmr.msra.gmra.mxu0 %v3715_v0  ;;  %3737 = vmatmul.bf16.vlgmr.msra.gmra.mxu1 %v3715_v0 }
 0x39f   : > { %3750 = vmatmul.bf16.vlgmr.msra.gmra.mxu2 %v3715_v0  ;;  %3763 = vmatmul.bf16.vlgmr.msra.gmra.mxu3 %v3715_v0  ;;  %v3700_v41 = vpop.f32.mrf.mxu2 }
 0x3a0   : > { %v3713_v3 = vpop.f32.mrf.mxu3  ;;  %3881 = vmatpush.bf16.msra.mxu0 %v10237_v36  ;;  %3894 = vmatpush.bf16.msra.mxu1 %v10240_v62  ;;  %v14300_v41 = vld [vmem:[#allocation142_spill] sm:$0xff] }
 0x3a1   : > { %3907 = vmatpush.bf16.msra.mxu2 %v10243_v42  ;;  %3920 = vmatpush.bf16.msra.mxu3 %v10246_v51  ;;  %v14301_v3 = vld [vmem:[#allocation143_spill] sm:$0xff] }
 0x3a4   : > { %3882 = vmatpush.bf16.msra.mxu0 %v10249_v21  ;;  %3895 = vmatpush.bf16.msra.mxu1 %v10252_v58 }
 0x3a5   : > { %3908 = vmatpush.bf16.msra.mxu2 %v10255_v46  ;;  %3921 = vmatpush.bf16.msra.mxu3 %v10258_v8 }
 0x3a8   : > { %3883 = vmatpush.bf16.msra.mxu0 %v10261_v11  ;;  %3896 = vmatpush.bf16.msra.mxu1 %v10264_v6 }
 0x3a9   : > { %3909 = vmatpush.bf16.msra.mxu2 %v14280_v54  ;;  %3922 = vmatpush.bf16.msra.mxu3 %v14281_v9 }
 0x3ac   : > { %3884 = vmatpush.bf16.msra.mxu0 %v14282_v5  ;;  %3897 = vmatpush.bf16.msra.mxu1 %v14283_v14  ;;  %v14339_v5 = vld [vmem:[#allocation51_spill] sm:$0xff] }
 0x3ad   : > { %3910 = vmatpush.bf16.msra.mxu2 %v14284_v43  ;;  %3923 = vmatpush.bf16.msra.mxu3 %v14285_v22  ;;  %v14336_v43 = vld [vmem:[#allocation19_spill] sm:$0xff] }
 0x3ae   : > { %3776 = vmatmul.bf16.vlgmr.msrb.gmra.mxu0 %v3715_v0  ;;  %3789 = vmatmul.bf16.vlgmr.msrb.gmra.mxu1 %v3715_v0 }
 0x3af   : > { %3802 = vmatmul.bf16.vlgmr.msrb.gmra.mxu2 %v3715_v0  ;;  %3815 = vmatmul.bf16.vlgmr.msrb.gmra.mxu3 %v3715_v0  ;;  %v14296_v0 = vld [vmem:[#allocation138_spill] sm:$0xff] }
 0x3b0   : > { %3885 = vmatpush.bf16.msra.mxu0 %v14286_v60  ;;  %3898 = vmatpush.bf16.msra.mxu1 %v14287_v29  ;;  %v14335_v60 = vld [vmem:[#allocation36_spill] sm:$0xff] }
 0x3b1   : > { %3911 = vmatpush.bf16.msra.mxu2 %v14288_v1  ;;  %3924 = vmatpush.bf16.msra.mxu3 %v14289_v28 }
 0x3b4   : > { %3886 = vmatpush.bf16.msra.mxu0 %v14290_v16  ;;  %3899 = vmatpush.bf16.msra.mxu1 %v14291_v31  ;;  %v14302_v31 = vld [vmem:[#allocation144_spill] sm:$0xff] }
 0x3b5   : > { %3912 = vmatpush.bf16.msra.mxu2 %v14292_v57  ;;  %3925 = vmatpush.bf16.msra.mxu3 %v14293_v53  ;;  %v14303_v57 = vld [vmem:[#allocation145_spill] sm:$0xff]  ;;  %v14304_v53 = vld [vmem:[#allocation146_spill] sm:$0xff] }
 0x3b8   : > { %3887 = vmatpush.bf16.msra.mxu0 %v14294_v4  ;;  %3900 = vmatpush.bf16.msra.mxu1 %v14295_v32  ;;  %v14305_v4 = vld [vmem:[#allocation147_spill] sm:$0xff]  ;;  %v14306_v32 = vld [vmem:[#allocation148_spill] sm:$0xff] }
 0x3b9   : > { %3913 = vmatpush.bf16.msra.mxu2 %v14296_v0  ;;  %3926 = vmatpush.bf16.msra.mxu3 %v14297_v12  ;;  %v14307_v0 = vld [vmem:[#allocation149_spill] sm:$0xff]  ;;  %v14308_v12 = vld [vmem:[#allocation150_spill] sm:$0xff] }
 0x3bc   : > { %3888 = vmatpush.bf16.msra.mxu0 %v14298_v63  ;;  %3901 = vmatpush.bf16.msra.mxu1 %v14299_v61  ;;  %v14309_v63 = vld [vmem:[#allocation151_spill] sm:$0xff]  ;;  %v14310_v61 = vld [vmem:[#allocation152_spill] sm:$0xff] }
 0x3bd   : > { %3914 = vmatpush.bf16.msra.mxu2 %v14302_v31  ;;  %3927 = vmatpush.bf16.msra.mxu3 %v14303_v57  ;;  %v14313_v31 = vld [vmem:[#allocation155_spill] sm:$0xff]  ;;  %v14314_v57 = vld [vmem:[#allocation156_spill] sm:$0xff] }
 0x3c0   : > { %3933 = vmatpush.bf16.msrb.mxu0 %v14300_v41  ;;  %3946 = vmatpush.bf16.msrb.mxu1 %v14301_v3  ;;  %v14311_v41 = vld [vmem:[#allocation153_spill] sm:$0xff]  ;;  %v14312_v3 = vld [vmem:[#allocation154_spill] sm:$0xff] }
 0x3c1   : > { %3959 = vmatpush.bf16.msrb.mxu2 %v14304_v53  ;;  %3972 = vmatpush.bf16.msrb.mxu3 %v14305_v4  ;;  %v14315_v53 = vld [vmem:[#allocation157_spill] sm:$0xff]  ;;  %v14316_v4 = vld [vmem:[#allocation158_spill] sm:$0xff] }
 0x3c4   : > { %3934 = vmatpush.bf16.msrb.mxu0 %v14306_v32  ;;  %3947 = vmatpush.bf16.msrb.mxu1 %v14307_v0  ;;  %v14317_v32 = vld [vmem:[#allocation159_spill] sm:$0xff]  ;;  %v14318_v0 = vld [vmem:[#allocation160_spill] sm:$0xff] }
 0x3c5   : > { %3960 = vmatpush.bf16.msrb.mxu2 %v14308_v12  ;;  %3973 = vmatpush.bf16.msrb.mxu3 %v14309_v63  ;;  %v14319_v12 = vld [vmem:[#allocation161_spill] sm:$0xff]  ;;  %v14320_v63 = vld [vmem:[#allocation162_spill] sm:$0xff] }
 0x3c8   : > { %3935 = vmatpush.bf16.msrb.mxu0 %v14310_v61  ;;  %3948 = vmatpush.bf16.msrb.mxu1 %v14311_v41  ;;  %v14321_v61 = vld [vmem:[#allocation163_spill] sm:$0xff]  ;;  %v10593_v41 = vld [vmem:[#allocation8 + $0x110] sm:$0xff] }
 0x3c9   : > { %3961 = vmatpush.bf16.msrb.mxu2 %v14312_v3  ;;  %3974 = vmatpush.bf16.msrb.mxu3 %v14313_v31  ;;  %14322 = vst [vmem:[#allocation70_spill] sm:$0xff] %v10593_v41  ;;  %v10596_v31 = vld [vmem:[#allocation8 + $0x150] sm:$0xff]  ;;  %v3821_v3 = vmul.f32 0.9, %v10415_v27 }
 0x3ca   : > { %14323 = vst [vmem:[#allocation68_spill] sm:$0xff] %v10596_v31  ;;  %v14340_v27 = vld [vmem:[#allocation61_spill] sm:$0xff] }
 0x3cc   : > { %3936 = vmatpush.bf16.msrb.mxu0 %v14314_v57  ;;  %3949 = vmatpush.bf16.msrb.mxu1 %v14315_v53  ;;  %v14324_v53 = vld [vmem:[#allocation164_spill] sm:$0xff]  ;;  %v415_v57 = vld [vmem:[%s9518_s13 + $0x78] sm:$0xff] }
 0x3cd   : > { %3962 = vmatpush.bf16.msrb.mxu2 %v14316_v4  ;;  %3975 = vmatpush.bf16.msrb.mxu3 %v14317_v32  ;;  %v14325_v4 = vld [vmem:[#allocation165_spill] sm:$0xff] }
 0x3d0   : > { %3937 = vmatpush.bf16.msrb.mxu0 %v14318_v0  ;;  %3950 = vmatpush.bf16.msrb.mxu1 %v14319_v12  ;;  %v10601_v0 = vld [vmem:[#allocation8 + $0x108] sm:$0xff]  ;;  %v414_v12 = vld [vmem:[%s9518_s13 + $0x70] sm:$0xff] }
 0x3d1   : > { %3963 = vmatpush.bf16.msrb.mxu2 %v14320_v63  ;;  %3976 = vmatpush.bf16.msrb.mxu3 %v14321_v61  ;;  %14326 = vst [vmem:[#allocation69_spill] sm:$0xff] %v10601_v0  ;;  %v10604_v63 = vld [vmem:[#allocation8 + $0x148] sm:$0xff]  ;;  %v14328_v61 = vld [vmem:[#allocation166_spill] sm:$0xff]  ;;  %v446_v28 = vmul.f32 0.1, %v414_v12 }
 0x3d2   : > { %14327 = vst [vmem:[#allocation73_spill] sm:$0xff] %v10604_v63  ;;  %v14342_v12 = vld [vmem:[#allocation52_spill] sm:$0xff] }
 0x3d4   : > { %3938 = vmatpush.bf16.msrb.mxu0 %v10593_v41  ;;  %3951 = vmatpush.bf16.msrb.mxu1 %v10596_v31  ;;  %v10608_v41 = vld [vmem:[#allocation8 + $0x1c8] sm:$0xff] }
 0x3d5   : > { %3964 = vmatpush.bf16.msrb.mxu2 %v14324_v53  ;;  %3977 = vmatpush.bf16.msrb.mxu3 %v14325_v4  ;;  %14329 = vst [vmem:[#allocation122_spill] sm:$0xff] %v10608_v41  ;;  %v10611_v53 = vld [vmem:[#allocation8 + $0x100] sm:$0xff] }
 0x3d6   : > { %14330 = vst [vmem:[#allocation175_spill] sm:$0xff] %v10611_v53  ;;  %v10614_v4 = vld [vmem:[#allocation8 + $0x140] sm:$0xff] }
 0x3d7   : > { %14331 = vst [vmem:[#allocation176_spill] sm:$0xff] %v10614_v4 }
 0x3d8   : > { %3939 = vmatpush.bf16.msrb.mxu0 %v10601_v0  ;;  %3952 = vmatpush.bf16.msrb.mxu1 %v10604_v63  ;;  %v10617_v0 = vld [vmem:[#allocation8 + $0x180] sm:$0xff] }
 0x3d9   : > { %3965 = vmatpush.bf16.msrb.mxu2 %v14328_v61  ;;  %3978 = vmatpush.bf16.msrb.mxu3 %v10608_v41  ;;  %14332 = vst [vmem:[#allocation177_spill] sm:$0xff] %v10617_v0  ;;  %v10620_v63 = vld [vmem:[#allocation8 + $0x1c0] sm:$0xff]  ;;  %v413_v61 = vld [vmem:[%s9518_s13 + $0x68] sm:$0xff] }
 0x3da   : > { %14333 = vst [vmem:[#allocation178_spill] sm:$0xff] %v10620_v63  ;;  %v445_v31 = vmul.f32 0.1, %v413_v61  ;;  %v14334_v41 = vld [vmem:[#allocation35_spill] sm:$0xff]  ;;  %v14337_v61 = vld [vmem:[#allocation22_spill] sm:$0xff] }
 0x3dc   : > { %3940 = vmatpush.bf16.msrb.mxu0 %v10611_v53  ;;  %3953 = vmatpush.bf16.msrb.mxu1 %v10614_v4  ;;  %v1704_v32 = vadd.f32 %v14334_v41, %v445_v31  ;;  %v3820_v53 = vmul.f32 0.9, %v10412_v7  ;;  %v14338_v31 = vld [vmem:[#allocation42_spill] sm:$0xff]  ;;  %v1943_v7 = vadd.f32 %v14339_v5, %v446_v28 }
 0x3dd   : > { %3966 = vmatpush.bf16.msrb.mxu2 %v10617_v0  ;;  %3979 = vmatpush.bf16.msrb.mxu3 %v10620_v63  ;;  %v447_v0 = vmul.f32 0.1, %v415_v57  ;;  %v14343_v28 = vld [vmem:[#allocation62_spill] sm:$0xff] }
 0x3de   : > { %v1750_v22 = vadd.f32 %v14335_v60, %v1704_v32  ;;  %v3823_v60 = vmul.f32 0.9, %v10423_v56  ;;  %v14341_v32 = vld [vmem:[#allocation43_spill] sm:$0xff]  ;;  %v1989_v5 = vadd.f32 %v14342_v12, %v1943_v7 }
 0x3df   : > { %v2182_v9 = vadd.f32 %v14340_v27, %v447_v0  ;;  %v14349_v7 = vld [vmem:[#allocation31_spill] sm:$0xff] }
 0x3e0   : > { %v1787_v41 = vadd.f32 %v14338_v31, %v1750_v22  ;;  %v14345_v31 = vld [vmem:[#allocation28_spill] sm:$0xff] }
 0x3e2   : > { %v1827_v22 = vadd.f32 %v14341_v32, %v1787_v41 }
 0x41b   : > { %v3725_v16 = vpop.f32.mrf.mxu0  ;;  %v3738_v4 = vpop.f32.mrf.mxu1 }
 0x41c   : > { %v3828_v1 = vadd.f32 %v3820_v53, %v3725_v16  ;;  %v3829_v29 = vadd.f32 %v3821_v3, %v3738_v4  ;;  %v3822_v16 = vmul.f32 0.9, %v10420_v59  ;;  %v2228_v3 = vadd.f32 %v14343_v28, %v2182_v9 }
 0x41d   : > { %v3824_v28 = vmul.f32 0.9, %v10444_v23 }
 0x41e   : > { %v10631_v63 = vadd.f32 %v3828_v1, %v14336_v43  ;;  %v10634_v14 = vadd.f32 %v3829_v29, %v14337_v61  ;;  %v14344_v61 = vld [vmem:[#allocation25_spill] sm:$0xff] }
 0x420   : > { %9013 = vtanh.f32 %v10631_v63 }
 0x421   : > { %9015 = vtanh.f32 %v10634_v14 }
 0x422   : > { %v3751_v57 = vpop.f32.mrf.mxu2  ;;  %v3764_v43 = vpop.f32.mrf.mxu3 }
 0x423   : > { %v3830_v1 = vadd.f32 %v3822_v16, %v3751_v57  ;;  %v3831_v53 = vadd.f32 %v3823_v60, %v3764_v43  ;;  %v3727_v29 = vpop.f32.mrf.mxu0  ;;  %v3740_v4 = vpop.f32.mrf.mxu1  ;;  %v14348_v16 = vld [vmem:[#allocation76_spill] sm:$0xff]  ;;  %v14350_v57 = vld [vmem:[#allocation33_spill] sm:$0xff] }
 0x424   : > { %v2265_v60 = vadd.f32 %v14348_v16, %v2228_v3  ;;  %v1628_v9 = vadd.f32 %v14350_v57, %v14349_v7  ;;  %v14351_v43 = vld [vmem:[#allocation44_spill] sm:$0xff]  ;;  %v14352_v29 = vld [vmem:[#allocation53_spill] sm:$0xff]  ;;  %v3825_v3 = vmul.f32 0.9, %v10447_v52  ;;  %v14354_v7 = vld [vmem:[#allocation34_spill] sm:$0xff] }
 0x425   : > { %v10647_v0 = vadd.f32 %v3830_v1, %v14344_v61  ;;  %v10650_v27 = vadd.f32 %v3831_v53, %v14345_v31  ;;  %v1867_v1 = vadd.f32 %v14351_v43, %v1827_v22  ;;  %v2026_v4 = vadd.f32 %v14352_v29, %v1989_v5  ;;  %v14353_v61 = vld [vmem:[#allocation77_spill] sm:$0xff] }
 0x426   : > { %v10652_v59 = vpop.eup %9013  ;;  %v2305_v31 = vadd.f32 %v14353_v61, %v2265_v60  ;;  %v1662_v57 = vadd.f32 %v14354_v7, %v1628_v9  ;;  %v14355_v43 = vld [vmem:[#allocation45_spill] sm:$0xff]  ;;  %v14359_v9 = vld [vmem:[#allocation59_spill] sm:$0xff] }
 0x427   : > { %14346 = vst [vmem:[#allocation35_spill] sm:$0xff] %v10652_v59  ;;  %v10654_v56 = vpop.eup %9015  ;;  %9017 = vtanh.f32 %v10647_v0  ;;  %v3873_v41 = vpack.c.bf16 %v10652_v59, %v10652_v59  ;;  %v1901_v5 = vadd.f32 %v14355_v43, %v1867_v1  ;;  %v14360_v1 = vld [vmem:[#allocation79_spill] sm:$0xff]  ;;  %v14362_v43 = vld [vmem:[#allocation80_spill] sm:$0xff] }
 0x428   : > { %14347 = vst [vmem:[#allocation36_spill] sm:$0xff] %v10654_v56  ;;  %9019 = vtanh.f32 %v10650_v27  ;;  %v3874_v53 = vpack.c.bf16 %v10654_v56, %v10654_v56  ;;  %v14387_v59 = vld [vmem:[#allocation95_spill] sm:$0xff] }
 0x429   : > { %3889 = vmatmul.bf16.vlgmr.msra.gmra.mxu0 %v3873_v41 }
 0x42a   : > { %v3753_v32 = vpop.f32.mrf.mxu2  ;;  %v3766_v12 = vpop.f32.mrf.mxu3  ;;  %3902 = vmatmul.bf16.vlgmr.msra.gmra.mxu1 %v3874_v53  ;;  %3986 = vmatpush.bf16.msra.mxu0 %v10011_v20  ;;  %v14357_v53 = vld [vmem:[#allocation54_spill] sm:$0xff] }
 0x42b   : > { %v3777_v22 = vpop.f32.mrf.mxu0  ;;  %v3790_v16 = vpop.f32.mrf.mxu1  ;;  %3999 = vmatpush.bf16.msra.mxu1 %v10013_v17  ;;  %v2066_v23 = vadd.f32 %v14357_v53, %v2026_v4  ;;  %v3826_v4 = vmul.f32 0.9, %v10462_v30 }
 0x42c   : > { %v3832_v41 = vadd.f32 %v3824_v28, %v3777_v22  ;;  %v3833_v29 = vadd.f32 %v3825_v3, %v3790_v16  ;;  %v2345_v28 = vadd.f32 %v14360_v1, %v2305_v31  ;;  %v3827_v22 = vmul.f32 0.9, %v10465_v18  ;;  %v14361_v31 = vld [vmem:[#allocation60_spill] sm:$0xff] }
 0x42d   : > { %v10674_v32 = vpop.eup %9017  ;;  %v2106_v61 = vadd.f32 %v14359_v9, %v2066_v23 }
 0x42e   : > { %14356 = vst [vmem:[#allocation19_spill] sm:$0xff] %v10674_v32  ;;  %v10677_v12 = vpop.eup %9019  ;;  %v10679_v52 = vadd.f32 %v3832_v41, %v1662_v57  ;;  %v10681_v56 = vadd.f32 %v3833_v29, %v1901_v5  ;;  %v3875_v60 = vpack.c.bf16 %v10674_v32, %v10674_v32  ;;  %3987 = vmatpush.bf16.msra.mxu0 %v10023_v48  ;;  %v14386_v32 = vld [vmem:[#allocation101_spill] sm:$0xff] }
 0x42f   : > { %14358 = vst [vmem:[#allocation22_spill] sm:$0xff] %v10677_v12  ;;  %v3876_v3 = vpack.c.bf16 %v10677_v12, %v10677_v12  ;;  %4000 = vmatpush.bf16.msra.mxu1 %v10027_v34  ;;  %v2140_v57 = vadd.f32 %v14361_v31, %v2106_v61  ;;  %v2379_v5 = vadd.f32 %v14362_v43, %v2345_v28  ;;  %v14367_v31 = vld [vmem:[#allocation71_spill] sm:$0xff]  ;;  %v14369_v43 = vld [vmem:[#allocation81_spill] sm:$0xff]  ;;  %v14385_v12 = vld [vmem:[#allocation98_spill] sm:$0xff] }
 0x430   : > { %9021 = vtanh.f32 %v10679_v52  ;;  %3915 = vmatmul.bf16.vlgmr.msra.gmra.mxu2 %v3875_v60 }
 0x431   : > { %9023 = vtanh.f32 %v10681_v56  ;;  %3928 = vmatmul.bf16.vlgmr.msra.gmra.mxu3 %v3876_v3  ;;  %4012 = vmatpush.bf16.msra.mxu2 %v10015_v44 }
 0x432   : > { %v3803_v16 = vpop.f32.mrf.mxu2  ;;  %v3816_v7 = vpop.f32.mrf.mxu3  ;;  %4025 = vmatpush.bf16.msra.mxu3 %v10018_v47  ;;  %3988 = vmatpush.bf16.msra.mxu0 %v10039_v45 }
 0x433   : > { %v3834_v41 = vadd.f32 %v3826_v4, %v3803_v16  ;;  %v3835_v29 = vadd.f32 %v3827_v22, %v3816_v7  ;;  %v3779_v53 = vpop.f32.mrf.mxu0  ;;  %v3792_v23 = vpop.f32.mrf.mxu1  ;;  %4001 = vmatpush.bf16.msra.mxu1 %v10041_v13 }
 0x434   : > { %v14373_v53 = vld [vmem:[#allocation75_spill] sm:$0xff]  ;;  %v14374_v23 = vld [vmem:[#allocation78_spill] sm:$0xff] }
 0x435   : > { %v10701_v30 = vadd.f32 %v3834_v41, %v2140_v57  ;;  %v10703_v18 = vadd.f32 %v3835_v29, %v2379_v5  ;;  %4013 = vmatpush.bf16.msra.mxu2 %v10029_v19  ;;  %v14368_v57 = vld [vmem:[#allocation72_spill] sm:$0xff]  ;;  %v14370_v5 = vld [vmem:[#allocation82_spill] sm:$0xff]  ;;  %v14371_v41 = vld [vmem:[#allocation85_spill] sm:$0xff] }
 0x436   : > { %v10706_v60 = vpop.eup %9021  ;;  %4026 = vmatpush.bf16.msra.mxu3 %v10034_v15  ;;  %3989 = vmatpush.bf16.msra.mxu0 %v10059_v24  ;;  %v14372_v29 = vld [vmem:[#allocation86_spill] sm:$0xff] }
 0x437   : > { %14363 = vst [vmem:[#allocation42_spill] sm:$0xff] %v10706_v60  ;;  %v10710_v9 = vpop.eup %9023  ;;  %9025 = vtanh.f32 %v10701_v30  ;;  %v3877_v61 = vpack.c.bf16 %v10706_v60, %v10706_v60  ;;  %4002 = vmatpush.bf16.msra.mxu1 %v10061_v26  ;;  %v14384_v60 = vld [vmem:[#allocation92_spill] sm:$0xff] }
 0x438   : > { %14364 = vst [vmem:[#allocation51_spill] sm:$0xff] %v10710_v9  ;;  %9027 = vtanh.f32 %v10703_v18  ;;  %v3878_v1 = vpack.c.bf16 %v10710_v9, %v10710_v9  ;;  %v14383_v9 = vld [vmem:[#allocation91_spill] sm:$0xff] }
 0x439   : > { %3941 = vmatmul.bf16.vlgmr.msrb.gmra.mxu0 %v3877_v61  ;;  %4014 = vmatpush.bf16.msra.mxu2 %v10043_v35  ;;  %v14375_v61 = vld [vmem:[#allocation89_spill] sm:$0xff] }
 0x43a   : > { %v3805_v28 = vpop.f32.mrf.mxu2  ;;  %v3818_v3 = vpop.f32.mrf.mxu3  ;;  %3954 = vmatmul.bf16.vlgmr.msrb.gmra.mxu1 %v3878_v1  ;;  %4027 = vmatpush.bf16.msra.mxu3 %v10050_v25  ;;  %v14376_v1 = vld [vmem:[#allocation90_spill] sm:$0xff] }
 0x43b   : > { %3990 = vmatpush.bf16.msra.mxu0 %v10071_v38  ;;  %4003 = vmatpush.bf16.msra.mxu1 %v10073_v33  ;;  %v14377_v28 = vld [vmem:[#allocation83_spill] sm:$0xff]  ;;  %v14378_v3 = vld [vmem:[#allocation84_spill] sm:$0xff] }
 0x43d   : > { %v10723_v4 = vpop.eup %9025  ;;  %4015 = vmatpush.bf16.msra.mxu2 %v10063_v55 }
 0x43e   : > { %14365 = vst [vmem:[#allocation61_spill] sm:$0xff] %v10723_v4  ;;  %v10726_v22 = vpop.eup %9027  ;;  %v3879_v16 = vpack.c.bf16 %v10723_v4, %v10723_v4  ;;  %4028 = vmatpush.bf16.msra.mxu3 %v10066_v50  ;;  %v14382_v4 = vld [vmem:[#allocation94_spill] sm:$0xff] }
 0x43f   : > { %14366 = vst [vmem:[#allocation43_spill] sm:$0xff] %v10726_v22  ;;  %v3880_v7 = vpack.c.bf16 %v10726_v22, %v10726_v22  ;;  %3991 = vmatpush.bf16.msra.mxu0 %v10084_v49  ;;  %4004 = vmatpush.bf16.msra.mxu1 %v14244_v2  ;;  %v14381_v22 = vld [vmem:[#allocation93_spill] sm:$0xff] }
 0x440   : > { %3967 = vmatmul.bf16.vlgmr.msrb.gmra.mxu2 %v3879_v16  ;;  %v14379_v16 = vld [vmem:[#allocation87_spill] sm:$0xff] }
 0x441   : > { %3980 = vmatmul.bf16.vlgmr.msrb.gmra.mxu3 %v3880_v7  ;;  %4016 = vmatpush.bf16.msra.mxu2 %v14245_v10  ;;  %v14380_v7 = vld [vmem:[#allocation88_spill] sm:$0xff] }
 0x442   : > { %4029 = vmatpush.bf16.msra.mxu3 %v14246_v39 }
 0x443   : > { %3992 = vmatpush.bf16.msra.mxu0 %v14247_v40  ;;  %4005 = vmatpush.bf16.msra.mxu1 %v14248_v37 }
 0x445   : > { %4017 = vmatpush.bf16.msra.mxu2 %v14367_v31 }
 0x446   : > { %4030 = vmatpush.bf16.msra.mxu3 %v14368_v57 }
 0x447   : > { %3993 = vmatpush.bf16.msra.mxu0 %v14369_v43  ;;  %4006 = vmatpush.bf16.msra.mxu1 %v14370_v5 }
 0x449   : > { %4018 = vmatpush.bf16.msra.mxu2 %v14373_v53 }
 0x44a   : > { %4031 = vmatpush.bf16.msra.mxu3 %v14374_v23 }
 0x44b   : > { %4038 = vmatpush.bf16.msrb.mxu0 %v14371_v41  ;;  %4051 = vmatpush.bf16.msrb.mxu1 %v14372_v29 }
 0x44d   : > { %4019 = vmatpush.bf16.msra.mxu2 %v14377_v28  ;;  %v14388_v28 = vld [vmem:[#allocation96_spill] sm:$0xff] }
 0x44e   : > { %4032 = vmatpush.bf16.msra.mxu3 %v14378_v3  ;;  %v14389_v3 = vld [vmem:[#allocation106_spill] sm:$0xff] }
 0x44f   : > { %4039 = vmatpush.bf16.msrb.mxu0 %v14375_v61  ;;  %4052 = vmatpush.bf16.msrb.mxu1 %v14376_v1 }
 0x451   : > { %4064 = vmatpush.bf16.msrb.mxu2 %v14379_v16  ;;  %v14390_v16 = vld [vmem:[#allocation107_spill] sm:$0xff] }
 0x452   : > { %4077 = vmatpush.bf16.msrb.mxu3 %v14380_v7  ;;  %v14391_v7 = vld [vmem:[#allocation102_spill] sm:$0xff] }
 0x453   : > { %4040 = vmatpush.bf16.msrb.mxu0 %v14381_v22  ;;  %4053 = vmatpush.bf16.msrb.mxu1 %v14382_v4  ;;  %v14392_v22 = vld [vmem:[#allocation104_spill] sm:$0xff]  ;;  %v14393_v4 = vld [vmem:[#allocation110_spill] sm:$0xff] }
 0x455   : > { %4065 = vmatpush.bf16.msrb.mxu2 %v14383_v9  ;;  %v14394_v9 = vld [vmem:[#allocation111_spill] sm:$0xff] }
 0x456   : > { %4078 = vmatpush.bf16.msrb.mxu3 %v14384_v60  ;;  %v14395_v60 = vld [vmem:[#allocation108_spill] sm:$0xff] }
 0x457   : > { %4041 = vmatpush.bf16.msrb.mxu0 %v14385_v12  ;;  %4054 = vmatpush.bf16.msrb.mxu1 %v14386_v32  ;;  %v14396_v12 = vld [vmem:[#allocation109_spill] sm:$0xff]  ;;  %v14397_v32 = vld [vmem:[#allocation114_spill] sm:$0xff] }
 0x459   : > { %4066 = vmatpush.bf16.msrb.mxu2 %v14387_v59  ;;  %v14398_v59 = vld [vmem:[#allocation115_spill] sm:$0xff] }
 0x45a   : > { %4079 = vmatpush.bf16.msrb.mxu3 %v14388_v28  ;;  %v14399_v28 = vld [vmem:[#allocation112_spill] sm:$0xff] }
 0x45b   : > { %4042 = vmatpush.bf16.msrb.mxu0 %v14389_v3  ;;  %4055 = vmatpush.bf16.msrb.mxu1 %v14390_v16  ;;  %v14400_v3 = vld [vmem:[#allocation113_spill] sm:$0xff]  ;;  %v14401_v16 = vld [vmem:[#allocation118_spill] sm:$0xff] }
 0x45d   : > { %4067 = vmatpush.bf16.msrb.mxu2 %v14391_v7  ;;  %v14402_v7 = vld [vmem:[#allocation119_spill] sm:$0xff] }
 0x45e   : > { %4080 = vmatpush.bf16.msrb.mxu3 %v14392_v22  ;;  %v14403_v22 = vld [vmem:[#allocation116_spill] sm:$0xff] }
 0x45f   : > { %4043 = vmatpush.bf16.msrb.mxu0 %v14393_v4  ;;  %4056 = vmatpush.bf16.msrb.mxu1 %v14394_v9  ;;  %v14404_v4 = vld [vmem:[#allocation117_spill] sm:$0xff]  ;;  %v14405_v9 = vld [vmem:[#allocation120_spill] sm:$0xff] }
 0x461   : > { %4068 = vmatpush.bf16.msrb.mxu2 %v14395_v60  ;;  %v14406_v60 = vld [vmem:[#allocation121_spill] sm:$0xff] }
 0x462   : > { %4081 = vmatpush.bf16.msrb.mxu3 %v14396_v12 }
 0x463   : > { %4044 = vmatpush.bf16.msrb.mxu0 %v14397_v32  ;;  %4057 = vmatpush.bf16.msrb.mxu1 %v14398_v59 }
 0x465   : > { %4069 = vmatpush.bf16.msrb.mxu2 %v14399_v28 }
 0x466   : > { %4082 = vmatpush.bf16.msrb.mxu3 %v14400_v3 }
 0x467   : > { %4045 = vmatpush.bf16.msrb.mxu0 %v14401_v16  ;;  %4058 = vmatpush.bf16.msrb.mxu1 %v14402_v7 }
 0x469   : > { %4070 = vmatpush.bf16.msrb.mxu2 %v14403_v22 }
 0x46a   : > { %4083 = vmatpush.bf16.msrb.mxu3 %v14404_v4 }
 0x46d   : > { %4071 = vmatpush.bf16.msrb.mxu2 %v14405_v9 }
 0x46e   : > { %4084 = vmatpush.bf16.msrb.mxu3 %v14406_v60 }
 0x4a6   : > { %v3890_v12 = vpop.f32.mrf.mxu0 }
 0x4a7   : > { %v3903_v32 = vpop.f32.mrf.mxu1 }
 0x4a8   : > { %v3904_v28 = vadd.f32 %v3903_v32, %v3890_v12  ;;  %v14418_v12 = vld [vmem:[#allocation134_spill] sm:$0xff] }
 0x4ae   : > { %v3892_v1 = vpop.f32.mrf.mxu0 }
 0x4af   : > { %v3905_v59 = vpop.f32.mrf.mxu1  ;;  %v14433_v1 = vld [vmem:[#allocation149_spill] sm:$0xff] }
 0x4b3   : > { %v3916_v61 = vpop.f32.mrf.mxu2 }
 0x4b4   : > { %v3929_v23 = vpop.f32.mrf.mxu3  ;;  %v3917_v3 = vadd.f32 %v3916_v61, %v3904_v28  ;;  %v14432_v61 = vld [vmem:[#allocation148_spill] sm:$0xff]  ;;  %v14434_v28 = vld [vmem:[#allocation150_spill] sm:$0xff] }
 0x4b6   : > { %v3942_v53 = vpop.f32.mrf.mxu0  ;;  %v3930_v29 = vadd.f32 %v3929_v23, %v3917_v3  ;;  %v14431_v23 = vld [vmem:[#allocation147_spill] sm:$0xff] }
 0x4b7   : > { %v3955_v16 = vpop.f32.mrf.mxu1  ;;  %v14435_v3 = vld [vmem:[#allocation151_spill] sm:$0xff] }
 0x4b8   : > { %v3943_v22 = vadd.f32 %v3942_v53, %v3930_v29  ;;  %v14429_v29 = vld [vmem:[#allocation145_spill] sm:$0xff]  ;;  %v14430_v53 = vld [vmem:[#allocation146_spill] sm:$0xff] }
 0x4ba   : > { %v3956_v43 = vadd.f32 %v3955_v16, %v3943_v22  ;;  %v14423_v22 = vld [vmem:[#allocation139_spill] sm:$0xff]  ;;  %v14436_v16 = vld [vmem:[#allocation152_spill] sm:$0xff] }
 0x4bb   : > { %v3918_v7 = vpop.f32.mrf.mxu2 }
 0x4bc   : > { %v3931_v41 = vpop.f32.mrf.mxu3  ;;  %v14437_v7 = vld [vmem:[#allocation153_spill] sm:$0xff] }
 0x4bd   : > { %v14428_v41 = vld [vmem:[#allocation144_spill] sm:$0xff] }
 0x4be   : > { %v3944_v5 = vpop.f32.mrf.mxu0 }
 0x4bf   : > { %v3957_v4 = vpop.f32.mrf.mxu1  ;;  %v14427_v5 = vld [vmem:[#allocation143_spill] sm:$0xff] }
 0x4c0   : > { %v14421_v4 = vld [vmem:[#allocation137_spill] sm:$0xff] }
 0x4c3   : > { %v3968_v9 = vpop.f32.mrf.mxu2 }
 0x4c4   : > { %v3969_v57 = vadd.f32 %v3968_v9, %v3956_v43  ;;  %v3981_v60 = vpop.f32.mrf.mxu3  ;;  %v14420_v9 = vld [vmem:[#allocation136_spill] sm:$0xff]  ;;  %v14426_v43 = vld [vmem:[#allocation142_spill] sm:$0xff] }
 0x4c6   : > { %v3982_v31 = vadd.f32 %v3981_v60, %v3969_v57  ;;  %v14419_v60 = vld [vmem:[#allocation135_spill] sm:$0xff]  ;;  %v14425_v57 = vld [vmem:[#allocation141_spill] sm:$0xff] }
 0x4c8   : > { %v3985_v37 = vpack.c.bf16 %v3982_v31, %v3982_v31  ;;  %v14424_v31 = vld [vmem:[#allocation140_spill] sm:$0xff] }
 0x4ca   : > { %3994 = vmatmul.bf16.vlgmr.msra.gmra.mxu0 %v3985_v37  ;;  %4007 = vmatmul.bf16.vlgmr.msra.gmra.mxu1 %v3985_v37 }
 0x4cb   : > { %4020 = vmatmul.bf16.vlgmr.msra.gmra.mxu2 %v3985_v37  ;;  %4033 = vmatmul.bf16.vlgmr.msra.gmra.mxu3 %v3985_v37  ;;  %v3970_v59 = vpop.f32.mrf.mxu2 }
 0x4cc   : > { %v3983_v32 = vpop.f32.mrf.mxu3  ;;  %4151 = vmatpush.bf16.msra.mxu0 %v10237_v36  ;;  %4164 = vmatpush.bf16.msra.mxu1 %v10240_v62  ;;  %v14407_v36 = vld [vmem:[#allocation123_spill] sm:$0xff]  ;;  %v14408_v62 = vld [vmem:[#allocation124_spill] sm:$0xff]  ;;  %v14438_v59 = vld [vmem:[#allocation154_spill] sm:$0xff] }
 0x4cd   : > { %4177 = vmatpush.bf16.msra.mxu2 %v10243_v42  ;;  %4190 = vmatpush.bf16.msra.mxu3 %v10246_v51  ;;  %v14409_v42 = vld [vmem:[#allocation125_spill] sm:$0xff]  ;;  %v14410_v51 = vld [vmem:[#allocation126_spill] sm:$0xff]  ;;  %v14439_v32 = vld [vmem:[#allocation155_spill] sm:$0xff] }
 0x4d0   : > { %4152 = vmatpush.bf16.msra.mxu0 %v10249_v21  ;;  %4165 = vmatpush.bf16.msra.mxu1 %v10252_v58  ;;  %v14411_v21 = vld [vmem:[#allocation127_spill] sm:$0xff]  ;;  %v14412_v58 = vld [vmem:[#allocation128_spill] sm:$0xff] }
 0x4d1   : > { %4178 = vmatpush.bf16.msra.mxu2 %v10255_v46  ;;  %4191 = vmatpush.bf16.msra.mxu3 %v10258_v8  ;;  %v14413_v46 = vld [vmem:[#allocation129_spill] sm:$0xff]  ;;  %v14414_v8 = vld [vmem:[#allocation130_spill] sm:$0xff] }
 0x4d4   : > { %4153 = vmatpush.bf16.msra.mxu0 %v10261_v11  ;;  %4166 = vmatpush.bf16.msra.mxu1 %v10264_v6  ;;  %v14415_v11 = vld [vmem:[#allocation131_spill] sm:$0xff]  ;;  %v14416_v6 = vld [vmem:[#allocation132_spill] sm:$0xff] }
 0x4d5   : > { %4179 = vmatpush.bf16.msra.mxu2 %v14280_v54  ;;  %4192 = vmatpush.bf16.msra.mxu3 %v14407_v36  ;;  %v14417_v54 = vld [vmem:[#allocation133_spill] sm:$0xff]  ;;  %v14440_v36 = vld [vmem:[#allocation156_spill] sm:$0xff] }
 0x4d8   : > { %4154 = vmatpush.bf16.msra.mxu0 %v14408_v62  ;;  %4167 = vmatpush.bf16.msra.mxu1 %v14409_v42  ;;  %v14441_v62 = vld [vmem:[#allocation157_spill] sm:$0xff]  ;;  %v14442_v42 = vld [vmem:[#allocation158_spill] sm:$0xff] }
 0x4d9   : > { %4180 = vmatpush.bf16.msra.mxu2 %v14410_v51  ;;  %4193 = vmatpush.bf16.msra.mxu3 %v14411_v21  ;;  %v14443_v51 = vld [vmem:[#allocation159_spill] sm:$0xff]  ;;  %v14444_v21 = vld [vmem:[#allocation160_spill] sm:$0xff] }
 0x4da   : > { %4046 = vmatmul.bf16.vlgmr.msrb.gmra.mxu0 %v3985_v37  ;;  %4059 = vmatmul.bf16.vlgmr.msrb.gmra.mxu1 %v3985_v37 }
 0x4db   : > { %4072 = vmatmul.bf16.vlgmr.msrb.gmra.mxu2 %v3985_v37  ;;  %4085 = vmatmul.bf16.vlgmr.msrb.gmra.mxu3 %v3985_v37  ;;  %v14422_v37 = vld [vmem:[#allocation138_spill] sm:$0xff] }
 0x4dc   : > { %4155 = vmatpush.bf16.msra.mxu0 %v14412_v58  ;;  %4168 = vmatpush.bf16.msra.mxu1 %v14413_v46  ;;  %v14445_v58 = vld [vmem:[#allocation161_spill] sm:$0xff]  ;;  %v14446_v46 = vld [vmem:[#allocation162_spill] sm:$0xff] }
 0x4dd   : > { %4181 = vmatpush.bf16.msra.mxu2 %v14414_v8  ;;  %4194 = vmatpush.bf16.msra.mxu3 %v14415_v11  ;;  %v14447_v8 = vld [vmem:[#allocation163_spill] sm:$0xff]  ;;  %v14448_v11 = vld [vmem:[#allocation70_spill] sm:$0xff] }
 0x4e0   : > { %4156 = vmatpush.bf16.msra.mxu0 %v14416_v6  ;;  %4169 = vmatpush.bf16.msra.mxu1 %v14417_v54  ;;  %v14449_v6 = vld [vmem:[#allocation68_spill] sm:$0xff] }
 0x4e1   : > { %4182 = vmatpush.bf16.msra.mxu2 %v14418_v12  ;;  %4195 = vmatpush.bf16.msra.mxu3 %v14419_v60  ;;  %v14450_v54 = vld [vmem:[#allocation164_spill] sm:$0xff]  ;;  %v14451_v12 = vld [vmem:[#allocation165_spill] sm:$0xff] }
 0x4e2   : > { %v14452_v60 = vld [vmem:[#allocation69_spill] sm:$0xff] }
 0x4e4   : > { %4157 = vmatpush.bf16.msra.mxu0 %v14420_v9  ;;  %4170 = vmatpush.bf16.msra.mxu1 %v14421_v4  ;;  %v14453_v9 = vld [vmem:[#allocation73_spill] sm:$0xff]  ;;  %v14454_v4 = vld [vmem:[#allocation166_spill] sm:$0xff] }
 0x4e5   : > { %4183 = vmatpush.bf16.msra.mxu2 %v14422_v37  ;;  %4196 = vmatpush.bf16.msra.mxu3 %v14423_v22  ;;  %v14455_v37 = vld [vmem:[#allocation122_spill] sm:$0xff]  ;;  %v14456_v22 = vld [vmem:[#allocation175_spill] sm:$0xff] }
 0x4e8   : > { %4158 = vmatpush.bf16.msra.mxu0 %v14424_v31  ;;  %4171 = vmatpush.bf16.msra.mxu1 %v14425_v57  ;;  %v14457_v31 = vld [vmem:[#allocation176_spill] sm:$0xff]  ;;  %v14458_v57 = vld [vmem:[#allocation177_spill] sm:$0xff] }
 0x4e9   : > { %4184 = vmatpush.bf16.msra.mxu2 %v14428_v41  ;;  %4197 = vmatpush.bf16.msra.mxu3 %v14429_v29  ;;  %v4091_v41 = vmul.f32 0.9, %v10634_v14 }
 0x4ec   : > { %4203 = vmatpush.bf16.msrb.mxu0 %v14426_v43  ;;  %4216 = vmatpush.bf16.msrb.mxu1 %v14427_v5  ;;  %v14459_v43 = vld [vmem:[#allocation178_spill] sm:$0xff]  ;;  %v4090_v5 = vmul.f32 0.9, %v10631_v63  ;;  %v4093_v63 = vmul.f32 0.9, %v10650_v27 }
 0x4ed   : > { %4229 = vmatpush.bf16.msrb.mxu2 %v14430_v53  ;;  %4242 = vmatpush.bf16.msrb.mxu3 %v14431_v23 }
 0x4f0   : > { %4204 = vmatpush.bf16.msrb.mxu0 %v14432_v61  ;;  %4217 = vmatpush.bf16.msrb.mxu1 %v14433_v1  ;;  %v14460_v1 = vld [vmem:[#allocation20_spill] sm:$0xff] }
 0x4f1   : > { %4230 = vmatpush.bf16.msrb.mxu2 %v14434_v28  ;;  %4243 = vmatpush.bf16.msrb.mxu3 %v14435_v3  ;;  %v14461_v3 = vld [vmem:[#allocation23_spill] sm:$0xff] }
 0x4f4   : > { %4205 = vmatpush.bf16.msrb.mxu0 %v14436_v16  ;;  %4218 = vmatpush.bf16.msrb.mxu1 %v14437_v7  ;;  %v4092_v7 = vmul.f32 0.9, %v10647_v0 }
 0x4f5   : > { %4231 = vmatpush.bf16.msrb.mxu2 %v14438_v59  ;;  %4244 = vmatpush.bf16.msrb.mxu3 %v14439_v32 }
 0x4f8   : > { %4206 = vmatpush.bf16.msrb.mxu0 %v14440_v36  ;;  %4219 = vmatpush.bf16.msrb.mxu1 %v14441_v62 }
 0x4f9   : > { %4232 = vmatpush.bf16.msrb.mxu2 %v14442_v42  ;;  %4245 = vmatpush.bf16.msrb.mxu3 %v14443_v51  ;;  %v14462_v51 = vld [vmem:[#allocation26_spill] sm:$0xff] }
 0x4fc   : > { %4207 = vmatpush.bf16.msrb.mxu0 %v14444_v21  ;;  %4220 = vmatpush.bf16.msrb.mxu1 %v14445_v58  ;;  %v14463_v58 = vld [vmem:[#allocation29_spill] sm:$0xff] }
 0x4fd   : > { %4233 = vmatpush.bf16.msrb.mxu2 %v14446_v46  ;;  %4246 = vmatpush.bf16.msrb.mxu3 %v14447_v8 }
 0x500   : > { %4208 = vmatpush.bf16.msrb.mxu0 %v14448_v11  ;;  %4221 = vmatpush.bf16.msrb.mxu1 %v14449_v6 }
 0x501   : > { %4234 = vmatpush.bf16.msrb.mxu2 %v14450_v54  ;;  %4247 = vmatpush.bf16.msrb.mxu3 %v14451_v12  ;;  %v4094_v12 = vmul.f32 0.9, %v10679_v52  ;;  %v4097_v52 = vmul.f32 0.9, %v10703_v18 }
 0x504   : > { %4209 = vmatpush.bf16.msrb.mxu0 %v14452_v60  ;;  %4222 = vmatpush.bf16.msrb.mxu1 %v14453_v9  ;;  %v4095_v60 = vmul.f32 0.9, %v10681_v56 }
 0x505   : > { %4235 = vmatpush.bf16.msrb.mxu2 %v14454_v4  ;;  %4248 = vmatpush.bf16.msrb.mxu3 %v14455_v37 }
 0x508   : > { %4210 = vmatpush.bf16.msrb.mxu0 %v14456_v22  ;;  %4223 = vmatpush.bf16.msrb.mxu1 %v14457_v31 }
 0x509   : > { %4236 = vmatpush.bf16.msrb.mxu2 %v14458_v57  ;;  %4249 = vmatpush.bf16.msrb.mxu3 %v14459_v43  ;;  %v14466_v43 = vld [vmem:[#allocation37_spill] sm:$0xff] }
 0x547   : > { %v3995_v29 = vpop.f32.mrf.mxu0  ;;  %v4008_v53 = vpop.f32.mrf.mxu1 }
 0x548   : > { %v4098_v23 = vadd.f32 %v4090_v5, %v3995_v29  ;;  %v4099_v61 = vadd.f32 %v4091_v41, %v4008_v53  ;;  %v14467_v41 = vld [vmem:[#allocation46_spill] sm:$0xff] }
 0x54a   : > { %v10846_v28 = vadd.f32 %v4098_v23, %v14460_v1  ;;  %v10849_v16 = vadd.f32 %v4099_v61, %v14461_v3  ;;  %v14468_v3 = vld [vmem:[#allocation63_spill] sm:$0xff] }
 0x54c   : > { %9029 = vtanh.f32 %v10846_v28 }
 0x54d   : > { %9031 = vtanh.f32 %v10849_v16 }
 0x54e   : > { %v4021_v59 = vpop.f32.mrf.mxu2  ;;  %v4034_v14 = vpop.f32.mrf.mxu3 }
 0x54f   : > { %v4100_v32 = vadd.f32 %v4092_v7, %v4021_v59  ;;  %v4101_v36 = vadd.f32 %v4093_v63, %v4034_v14  ;;  %v3997_v62 = vpop.f32.mrf.mxu0  ;;  %v4010_v42 = vpop.f32.mrf.mxu1  ;;  %v14481_v59 = vld [vmem:[#allocation75_spill] sm:$0xff] }
 0x550   : > { %v14485_v14 = vld [vmem:[#allocation83_spill] sm:$0xff]  ;;  %v14488_v62 = vld [vmem:[#allocation88_spill] sm:$0xff]  ;;  %v14489_v42 = vld [vmem:[#allocation93_spill] sm:$0xff] }
 0x551   : > { %v10856_v21 = vadd.f32 %v4100_v32, %v14462_v51  ;;  %v10859_v46 = vadd.f32 %v4101_v36, %v14463_v58  ;;  %v14486_v32 = vld [vmem:[#allocation84_spill] sm:$0xff]  ;;  %v14487_v36 = vld [vmem:[#allocation87_spill] sm:$0xff]  ;;  %v14490_v51 = vld [vmem:[#allocation94_spill] sm:$0xff] }
 0x552   : > { %v10861_v8 = vpop.eup %9029  ;;  %v14491_v58 = vld [vmem:[#allocation91_spill] sm:$0xff] }
 0x553   : > { %v10863_v11 = vpop.eup %9031  ;;  %9033 = vtanh.f32 %v10856_v21  ;;  %v4143_v0 = vpack.c.bf16 %v10861_v8, %v10861_v8 }
 0x554   : > { %9035 = vtanh.f32 %v10859_v46  ;;  %v4144_v27 = vpack.c.bf16 %v10863_v11, %v10863_v11 }
 0x555   : > { %4159 = vmatmul.bf16.vlgmr.msra.gmra.mxu0 %v4143_v0  ;;  %v14492_v0 = vld [vmem:[#allocation92_spill] sm:$0xff] }
 0x556   : > { %v4023_v6 = vpop.f32.mrf.mxu2  ;;  %v4036_v54 = vpop.f32.mrf.mxu3  ;;  %4172 = vmatmul.bf16.vlgmr.msra.gmra.mxu1 %v4144_v27  ;;  %4256 = vmatpush.bf16.msra.mxu0 %v10011_v20  ;;  %v14493_v27 = vld [vmem:[#allocation98_spill] sm:$0xff] }
 0x557   : > { %v4047_v9 = vpop.f32.mrf.mxu0  ;;  %v4060_v4 = vpop.f32.mrf.mxu1  ;;  %4269 = vmatpush.bf16.msra.mxu1 %v10013_v17  ;;  %v4096_v17 = vmul.f32 0.9, %v10701_v30  ;;  %v14469_v30 = vld [vmem:[#allocation97_spill] sm:$0xff]  ;;  %v14495_v54 = vld [vmem:[#allocation95_spill] sm:$0xff] }
 0x558   : > { %v4102_v37 = vadd.f32 %v4094_v12, %v4047_v9  ;;  %v4103_v22 = vadd.f32 %v4095_v60, %v4060_v4  ;;  %v14494_v6 = vld [vmem:[#allocation101_spill] sm:$0xff]  ;;  %v14496_v12 = vld [vmem:[#allocation96_spill] sm:$0xff]  ;;  %v14497_v60 = vld [vmem:[#allocation106_spill] sm:$0xff] }
 0x559   : > { %v10875_v31 = vpop.eup %9033  ;;  %v14498_v9 = vld [vmem:[#allocation107_spill] sm:$0xff]  ;;  %v14499_v4 = vld [vmem:[#allocation102_spill] sm:$0xff] }
 0x55a   : > { %14464 = vst [vmem:[#allocation52_spill] sm:$0xff] %v10875_v31  ;;  %v10877_v57 = vpop.eup %9035  ;;  %v10880_v5 = vadd.f32 %v4102_v37, %v14466_v43  ;;  %v10883_v29 = vadd.f32 %v4103_v22, %v14467_v41  ;;  %v4145_v56 = vpack.c.bf16 %v10875_v31, %v10875_v31  ;;  %4257 = vmatpush.bf16.msra.mxu0 %v10023_v48  ;;  %v14500_v37 = vld [vmem:[#allocation104_spill] sm:$0xff]  ;;  %v14501_v22 = vld [vmem:[#allocation110_spill] sm:$0xff]  ;;  %v14502_v43 = vld [vmem:[#allocation111_spill] sm:$0xff] }
 0x55b   : > { %14465 = vst [vmem:[#allocation62_spill] sm:$0xff] %v10877_v57  ;;  %v4146_v20 = vpack.c.bf16 %v10877_v57, %v10877_v57  ;;  %4270 = vmatpush.bf16.msra.mxu1 %v10027_v34  ;;  %v14503_v41 = vld [vmem:[#allocation108_spill] sm:$0xff] }
 0x55c   : > { %9037 = vtanh.f32 %v10880_v5  ;;  %4185 = vmatmul.bf16.vlgmr.msra.gmra.mxu2 %v4145_v56  ;;  %v14504_v56 = vld [vmem:[#allocation109_spill] sm:$0xff] }
 0x55d   : > { %9039 = vtanh.f32 %v10883_v29  ;;  %4198 = vmatmul.bf16.vlgmr.msra.gmra.mxu3 %v4146_v20  ;;  %4282 = vmatpush.bf16.msra.mxu2 %v10015_v44  ;;  %v14505_v20 = vld [vmem:[#allocation114_spill] sm:$0xff] }
 0x55e   : > { %v4073_v53 = vpop.f32.mrf.mxu2  ;;  %v4086_v23 = vpop.f32.mrf.mxu3  ;;  %4295 = vmatpush.bf16.msra.mxu3 %v10018_v47  ;;  %4258 = vmatpush.bf16.msra.mxu0 %v10039_v45 }
 0x55f   : > { %v4104_v48 = vadd.f32 %v4096_v17, %v4073_v53  ;;  %v4105_v34 = vadd.f32 %v4097_v52, %v4086_v23  ;;  %v4049_v61 = vpop.f32.mrf.mxu0  ;;  %v4062_v1 = vpop.f32.mrf.mxu1  ;;  %4271 = vmatpush.bf16.msra.mxu1 %v10041_v13  ;;  %v14506_v17 = vld [vmem:[#allocation115_spill] sm:$0xff]  ;;  %v14507_v52 = vld [vmem:[#allocation112_spill] sm:$0xff]  ;;  %v14508_v53 = vld [vmem:[#allocation113_spill] sm:$0xff] }
 0x560   : > { %v14509_v23 = vld [vmem:[#allocation118_spill] sm:$0xff]  ;;  %v14512_v61 = vld [vmem:[#allocation117_spill] sm:$0xff]  ;;  %v14513_v1 = vld [vmem:[#allocation120_spill] sm:$0xff] }
 0x561   : > { %v10900_v7 = vadd.f32 %v4104_v48, %v14468_v3  ;;  %v10903_v63 = vadd.f32 %v4105_v34, %v14469_v30  ;;  %4283 = vmatpush.bf16.msra.mxu2 %v10029_v19  ;;  %v14510_v48 = vld [vmem:[#allocation119_spill] sm:$0xff]  ;;  %v14511_v34 = vld [vmem:[#allocation116_spill] sm:$0xff]  ;;  %v14514_v3 = vld [vmem:[#allocation121_spill] sm:$0xff] }
 0x562   : > { %v10906_v44 = vpop.eup %9037  ;;  %4296 = vmatpush.bf16.msra.mxu3 %v10034_v15  ;;  %4259 = vmatpush.bf16.msra.mxu0 %v10059_v24 }
 0x563   : > { %14470 = vst [vmem:[#allocation25_spill] sm:$0xff] %v10906_v44  ;;  %v10910_v47 = vpop.eup %9039  ;;  %9041 = vtanh.f32 %v10900_v7  ;;  %v4147_v45 = vpack.c.bf16 %v10906_v44, %v10906_v44  ;;  %4272 = vmatpush.bf16.msra.mxu1 %v10061_v26 }
 0x564   : > { %14471 = vst [vmem:[#allocation28_spill] sm:$0xff] %v10910_v47  ;;  %9043 = vtanh.f32 %v10903_v63  ;;  %v4148_v19 = vpack.c.bf16 %v10910_v47, %v10910_v47  ;;  %v14518_v47 = vld [vmem:[#allocation35_spill] sm:$0xff] }
 0x565   : > { %4211 = vmatmul.bf16.vlgmr.msrb.gmra.mxu0 %v4147_v45  ;;  %4284 = vmatpush.bf16.msra.mxu2 %v10043_v35 }
 0x566   : > { %v4075_v15 = vpop.f32.mrf.mxu2  ;;  %v4088_v13 = vpop.f32.mrf.mxu3  ;;  %4224 = vmatmul.bf16.vlgmr.msrb.gmra.mxu1 %v4148_v19  ;;  %4297 = vmatpush.bf16.msra.mxu3 %v10050_v25  ;;  %v14475_v25 = vld [vmem:[#allocation71_spill] sm:$0xff] }
 0x567   : > { %4260 = vmatpush.bf16.msra.mxu0 %v10071_v38  ;;  %4273 = vmatpush.bf16.msra.mxu1 %v10073_v33  ;;  %v14474_v38 = vld [vmem:[#allocation74_spill] sm:$0xff] }
 0x568   : > { %v14478_v33 = vld [vmem:[#allocation82_spill] sm:$0xff] }
 0x569   : > { %v10923_v24 = vpop.eup %9041  ;;  %4285 = vmatpush.bf16.msra.mxu2 %v10063_v55  ;;  %v14477_v55 = vld [vmem:[#allocation81_spill] sm:$0xff] }
 0x56a   : > { %14472 = vst [vmem:[#allocation76_spill] sm:$0xff] %v10923_v24  ;;  %v10926_v26 = vpop.eup %9043  ;;  %v4149_v18 = vpack.c.bf16 %v10923_v24, %v10923_v24  ;;  %4298 = vmatpush.bf16.msra.mxu3 %v10066_v50  ;;  %v14476_v50 = vld [vmem:[#allocation72_spill] sm:$0xff] }
 0x56b   : > { %14473 = vst [vmem:[#allocation31_spill] sm:$0xff] %v10926_v26  ;;  %v4150_v35 = vpack.c.bf16 %v10926_v26, %v10926_v26  ;;  %4261 = vmatpush.bf16.msra.mxu0 %v10084_v49  ;;  %4274 = vmatpush.bf16.msra.mxu1 %v14244_v2  ;;  %v14479_v49 = vld [vmem:[#allocation85_spill] sm:$0xff]  ;;  %v14480_v2 = vld [vmem:[#allocation86_spill] sm:$0xff] }
 0x56c   : > { %4237 = vmatmul.bf16.vlgmr.msrb.gmra.mxu2 %v4149_v18 }
 0x56d   : > { %4250 = vmatmul.bf16.vlgmr.msrb.gmra.mxu3 %v4150_v35  ;;  %4286 = vmatpush.bf16.msra.mxu2 %v14245_v10  ;;  %v14482_v10 = vld [vmem:[#allocation78_spill] sm:$0xff] }
 0x56e   : > { %4299 = vmatpush.bf16.msra.mxu3 %v14246_v39  ;;  %v14483_v39 = vld [vmem:[#allocation89_spill] sm:$0xff] }
 0x56f   : > { %4262 = vmatpush.bf16.msra.mxu0 %v14247_v40  ;;  %4275 = vmatpush.bf16.msra.mxu1 %v14474_v38  ;;  %v14484_v40 = vld [vmem:[#allocation90_spill] sm:$0xff] }
 0x570   : > { %v4468_v38 = vld [vmem:[#allocation11 + $0x78] sm:$0xff] }
 0x571   : > { %4287 = vmatpush.bf16.msra.mxu2 %v14475_v25 }
 0x572   : > { %4300 = vmatpush.bf16.msra.mxu3 %v14476_v50 }
 0x573   : > { %4263 = vmatpush.bf16.msra.mxu0 %v14477_v55  ;;  %4276 = vmatpush.bf16.msra.mxu1 %v14478_v33  ;;  %v10979_v33 = vand.u32 4294901760, %v4468_v38 }
 0x575   : > { %4288 = vmatpush.bf16.msra.mxu2 %v14481_v59 }
 0x576   : > { %4301 = vmatpush.bf16.msra.mxu3 %v14482_v10 }
 0x577   : > { %4308 = vmatpush.bf16.msrb.mxu0 %v14479_v49  ;;  %4321 = vmatpush.bf16.msrb.mxu1 %v14480_v2  ;;  %v4467_v49 = vld [vmem:[#allocation11 + $0x70] sm:$0xff]  ;;  %v4466_v2 = vld [vmem:[#allocation11 + $0x68] sm:$0xff] }
 0x578   : > { %v10981_v10 = vand.u32 4294901760, %v4467_v49 }
 0x579   : > { %4289 = vmatpush.bf16.msra.mxu2 %v14485_v14  ;;  %v4465_v14 = vld [vmem:[#allocation11 + $0x60] sm:$0xff] }
 0x57a   : > { %4302 = vmatpush.bf16.msra.mxu3 %v14486_v32 }
 0x57b   : > { %4309 = vmatpush.bf16.msrb.mxu0 %v14483_v39  ;;  %4322 = vmatpush.bf16.msrb.mxu1 %v14484_v40  ;;  %v10984_v40 = vsub.f32 %v4468_v38, %v10979_v33 }
 0x57d   : > { %4334 = vmatpush.bf16.msrb.mxu2 %v14487_v36  ;;  %v10986_v36 = vand.u32 4294901760, %v4466_v2 }
 0x57e   : > { %4347 = vmatpush.bf16.msrb.mxu3 %v14488_v62  ;;  %v4464_v62 = vld [vmem:[#allocation11 + $0x58] sm:$0xff] }
 0x57f   : > { %4310 = vmatpush.bf16.msrb.mxu0 %v14489_v42  ;;  %4323 = vmatpush.bf16.msrb.mxu1 %v14490_v51 }
 0x581   : > { %4335 = vmatpush.bf16.msrb.mxu2 %v14491_v58  ;;  %v10989_v58 = vsub.f32 %v4467_v49, %v10981_v10 }
 0x582   : > { %4348 = vmatpush.bf16.msrb.mxu3 %v14492_v0  ;;  %v10991_v0 = vand.u32 4294901760, %v4465_v14 }
 0x583   : > { %4311 = vmatpush.bf16.msrb.mxu0 %v14493_v27  ;;  %4324 = vmatpush.bf16.msrb.mxu1 %v14494_v6  ;;  %v13955_v6 = vand.u32 4294901760, %v10984_v40 }
 0x585   : > { %4336 = vmatpush.bf16.msrb.mxu2 %v14495_v54  ;;  %v4463_v54 = vld [vmem:[#allocation11 + $0x50] sm:$0xff] }
 0x586   : > { %4349 = vmatpush.bf16.msrb.mxu3 %v14496_v12  ;;  %v10995_v12 = vsub.f32 %v4466_v2, %v10986_v36 }
 0x587   : > { %4312 = vmatpush.bf16.msrb.mxu0 %v14497_v60  ;;  %4325 = vmatpush.bf16.msrb.mxu1 %v14498_v9  ;;  %v10997_v60 = vand.u32 4294901760, %v4464_v62  ;;  %v4462_v9 = vld [vmem:[#allocation11 + $0x48] sm:$0xff] }
 0x589   : > { %4337 = vmatpush.bf16.msrb.mxu2 %v14499_v4 }
 0x58a   : > { %4350 = vmatpush.bf16.msrb.mxu3 %v14500_v37  ;;  %v13954_v37 = vand.u32 4294901760, %v10989_v58 }
 0x58b   : > { %4313 = vmatpush.bf16.msrb.mxu0 %v14501_v22  ;;  %4326 = vmatpush.bf16.msrb.mxu1 %v14502_v43  ;;  %v11001_v22 = vsub.f32 %v4465_v14, %v10991_v0  ;;  %v11003_v43 = vand.u32 4294901760, %v4463_v54 }
 0x58d   : > { %4338 = vmatpush.bf16.msrb.mxu2 %v14503_v41  ;;  %v4461_v41 = vld [vmem:[#allocation11 + $0x40] sm:$0xff] }
 0x58e   : > { %4351 = vmatpush.bf16.msrb.mxu3 %v14504_v56 }
 0x58f   : > { %4314 = vmatpush.bf16.msrb.mxu0 %v14505_v20  ;;  %4327 = vmatpush.bf16.msrb.mxu1 %v14506_v17  ;;  %v4649_v20 = vsub.f32 %v10984_v40, %v13955_v6  ;;  %v4482_v6 = vld [vmem:[#allocation11 + $0xe8] sm:$0xff] }
 0x591   : > { %4339 = vmatpush.bf16.msrb.mxu2 %v14507_v52 }
 0x592   : > { %4352 = vmatpush.bf16.msrb.mxu3 %v14508_v53  ;;  %v13953_v53 = vand.u32 4294901760, %v10995_v12 }
 0x593   : > { %4315 = vmatpush.bf16.msrb.mxu0 %v14509_v23  ;;  %4328 = vmatpush.bf16.msrb.mxu1 %v14510_v48  ;;  %v11010_v23 = vsub.f32 %v4464_v62, %v10997_v60  ;;  %v11012_v48 = vand.u32 4294901760, %v4462_v9 }
 0x595   : > { %4340 = vmatpush.bf16.msrb.mxu2 %v14511_v34  ;;  %v11014_v34 = vand.u32 4294901760, %v4461_v41 }
 0x596   : > { %4353 = vmatpush.bf16.msrb.mxu3 %v14512_v61 }
 0x597   : > { %v11033_v38 = vsub.f32 %v4461_v41, %v11014_v34 }
 0x599   : > { %4341 = vmatpush.bf16.msrb.mxu2 %v14513_v1  ;;  %v4655_v1 = vsub.f32 %v10989_v58, %v13954_v37  ;;  %v4483_v37 = vld [vmem:[#allocation11 + $0xf0] sm:$0xff] }
 0x59a   : > { %4354 = vmatpush.bf16.msrb.mxu3 %v14514_v3  ;;  %v13951_v3 = vand.u32 4294901760, %v11001_v22 }
 0x5d2   : > { %v4160_v30 = vpop.f32.mrf.mxu0 }
 0x5d3   : > { %v4173_v45 = vpop.f32.mrf.mxu1 }
 0x5d4   : > { %v4174_v18 = vadd.f32 %v4173_v45, %v4160_v30  ;;  %v11021_v30 = vsub.f32 %v4463_v54, %v11003_v43  ;;  %v4650_v45 = vand.u32 4294901760, %v4649_v20  ;;  %v13944_v54 = vand.u32 4294901760, %v11033_v38 }
 0x5d6   : > { %v13947_v49 = vand.u32 4294901760, %v11021_v30 }
 0x5da   : > { %v4162_v19 = vpop.f32.mrf.mxu0 }
 0x5db   : > { %v4175_v15 = vpop.f32.mrf.mxu1  ;;  %v4460_v19 = vld [vmem:[#allocation11 + $0x38] sm:$0xff] }
 0x5dc   : > { %v11041_v2 = vand.u32 4294901760, %v4460_v19 }
 0x5de   : > { %v11060_v41 = vsub.f32 %v4460_v19, %v11041_v2  ;;  %v4455_v19 = vld [vmem:[#allocation11 + $0x10] sm:$0xff] }
 0x5df   : > { %v4186_v13 = vpop.f32.mrf.mxu2 }
 0x5e0   : > { %v4199_v35 = vpop.f32.mrf.mxu3  ;;  %v4187_v25 = vadd.f32 %v4186_v13, %v4174_v18  ;;  %v4661_v13 = vsub.f32 %v10995_v12, %v13953_v53  ;;  %v13949_v18 = vand.u32 4294901760, %v11010_v23  ;;  %v11164_v53 = vand.u32 4294901760, %v4483_v37 }
 0x5e2   : > { %v4212_v50 = vpop.f32.mrf.mxu0  ;;  %v4200_v59 = vadd.f32 %v4199_v35, %v4187_v25  ;;  %v11030_v35 = vsub.f32 %v4462_v9, %v11012_v48  ;;  %v4459_v25 = vld [vmem:[#allocation11 + $0x30] sm:$0xff]  ;;  %v4673_v62 = vsub.f32 %v11010_v23, %v13949_v18  ;;  %v11180_v26 = vsub.f32 %v4483_v37, %v11164_v53 }
 0x5e3   : > { %v4225_v55 = vpop.f32.mrf.mxu1 }
 0x5e4   : > { %v4213_v42 = vadd.f32 %v4212_v50, %v4200_v59  ;;  %v4656_v50 = vand.u32 4294901760, %v4655_v1 }
 0x5e6   : > { %v4226_v4 = vadd.f32 %v4225_v55, %v4213_v42  ;;  %v4667_v55 = vsub.f32 %v11001_v22, %v13951_v3  ;;  %v13946_v42 = vand.u32 4294901760, %v11030_v35 }
 0x5e7   : > { %v4188_v39 = vpop.f32.mrf.mxu2 }
 0x5e8   : > { %v4201_v32 = vpop.f32.mrf.mxu3  ;;  %v4458_v39 = vld [vmem:[#allocation11 + $0x28] sm:$0xff]  ;;  %v4668_v9 = vand.u32 4294901760, %v4667_v55 }
 0x5e9   : > { %v4662_v32 = vand.u32 4294901760, %v4661_v13 }
 0x5ea   : > { %v4214_v51 = vpop.f32.mrf.mxu0 }
 0x5eb   : > { %v4227_v27 = vpop.f32.mrf.mxu1  ;;  %v11050_v51 = vand.u32 4294901760, %v4459_v25 }
 0x5ec   : > { %v4457_v27 = vld [vmem:[#allocation11 + $0x20] sm:$0xff] }
 0x5ed   : > { %v11066_v20 = vand.u32 4294901760, %v4457_v27  ;;  %v11073_v1 = vsub.f32 %v4459_v25, %v11050_v51 }
 0x5ef   : > { %v4238_v56 = vpop.f32.mrf.mxu2 }
 0x5f0   : > { %v4239_v17 = vadd.f32 %v4238_v56, %v4226_v4  ;;  %v4251_v52 = vpop.f32.mrf.mxu3  ;;  %v4679_v4 = vsub.f32 %v11021_v30, %v13947_v49  ;;  %v11062_v56 = vand.u32 4294901760, %v4458_v39 }
 0x5f2   : > { %v4252_v61 = vadd.f32 %v4251_v52, %v4239_v17  ;;  %v4456_v17 = vld [vmem:[#allocation11 + $0x18] sm:$0xff]  ;;  %v4674_v52 = vand.u32 4294901760, %v4673_v62  ;;  %v4680_v13 = vand.u32 4294901760, %v4679_v4  ;;  %v11083_v55 = vsub.f32 %v4458_v39, %v11062_v56  ;;  %v4453_v4 = vld [vmem:[#allocation11] sm:$0xff] }
 0x5f3   : > { %v11085_v25 = vand.u32 4294901760, %v4456_v17  ;;  %v13948_v62 = vand.u32 4294901760, %v11073_v1 }
 0x5f4   : > { %v11023_v15 = vpack.c.bf16 %v4252_v61, %v4252_v61  ;;  %v4685_v61 = vsub.f32 %v11030_v35, %v13946_v42 }
 0x5f6   : > { %4264 = vmatmul.bf16.vlgmr.msra.gmra.mxu0 %v11023_v15  ;;  %4277 = vmatmul.bf16.vlgmr.msra.gmra.mxu1 %v11023_v15 }
 0x5f7   : > { %4290 = vmatmul.bf16.vlgmr.msra.gmra.mxu2 %v11023_v15  ;;  %4303 = vmatmul.bf16.vlgmr.msra.gmra.mxu3 %v11023_v15  ;;  %v4240_v59 = vpop.f32.mrf.mxu2 }
 0x5f8   : > { %v4253_v14 = vpop.f32.mrf.mxu3  ;;  %4582 = vmatpush.msra.mxu0 %v10979_v33  ;;  %4651 = vmatpush.msra.mxu1 %v4650_v45  ;;  %v4691_v45 = vsub.f32 %v11033_v38, %v13944_v54  ;;  %v11090_v59 = vsub.f32 %v4457_v27, %v11066_v20 }
 0x5f9   : > { %4761 = vmatpush.msra.mxu2 %v10984_v40  ;;  %4829 = vmatpush.msra.mxu3 %v10979_v33  ;;  %v4454_v14 = vld [vmem:[#allocation11 + $0x8] sm:$0xff] }
 0x5fa   : > { %4584 = vmatpush.msra.mxu0 %v10981_v10  ;;  %4657 = vmatpush.msra.mxu1 %v4656_v50  ;;  %v13945_v50 = vand.u32 4294901760, %v11060_v41  ;;  %v4692_v39 = vand.u32 4294901760, %v4691_v45  ;;  %v11106_v54 = vand.u32 4294901760, %v4454_v14  ;;  %v13952_v45 = vand.u32 4294901760, %v11090_v59 }
 0x5fb   : > { %4764 = vmatpush.msra.mxu2 %v10989_v58  ;;  %4831 = vmatpush.msra.mxu3 %v10981_v10 }
 0x5fc   : > { %4586 = vmatpush.msra.mxu0 %v10986_v36  ;;  %4663 = vmatpush.msra.mxu1 %v4662_v32  ;;  %v4686_v32 = vand.u32 4294901760, %v4685_v61  ;;  %v4697_v27 = vsub.f32 %v11060_v41, %v13945_v50  ;;  %v11104_v61 = vsub.f32 %v4456_v17, %v11085_v25  ;;  %v11118_v17 = vand.u32 4294901760, %v4453_v4 }
 0x5fd   : > { %4767 = vmatpush.msra.mxu2 %v10995_v12  ;;  %4833 = vmatpush.msra.mxu3 %v10986_v36 }
 0x5fe   : > { %4588 = vmatpush.msra.mxu0 %v10991_v0  ;;  %4669 = vmatpush.msra.mxu1 %v4668_v9  ;;  %v11094_v9 = vand.u32 4294901760, %v4455_v19  ;;  %v4698_v42 = vand.u32 4294901760, %v4697_v27  ;;  %v13956_v49 = vand.u32 4294901760, %v11104_v61 }
 0x5ff   : > { %4770 = vmatpush.msra.mxu2 %v11001_v22  ;;  %4835 = vmatpush.msra.mxu3 %v10991_v0 }
 0x600   : > { %4590 = vmatpush.msra.mxu0 %v10997_v60  ;;  %4675 = vmatpush.msra.mxu1 %v4674_v52  ;;  %v13950_v52 = vand.u32 4294901760, %v11083_v55  ;;  %v11116_v50 = vsub.f32 %v4455_v19, %v11094_v9  ;;  %v14515_v19 = vld [vmem:[#allocation167_spill] sm:$0xff] }
 0x601   : > { %4773 = vmatpush.msra.mxu2 %v11010_v23  ;;  %4837 = vmatpush.msra.mxu3 %v10997_v60  ;;  %v11131_v18 = vand.u32 4294901760, %v14515_v19 }
 0x602   : > { %4592 = vmatpush.msra.mxu0 %v11003_v43  ;;  %4681 = vmatpush.msra.mxu1 %v4680_v13  ;;  %v4703_v13 = vsub.f32 %v11073_v1, %v13948_v62  ;;  %v11128_v62 = vsub.f32 %v4454_v14, %v11106_v54  ;;  %v11142_v14 = vsub.f32 %v4453_v4, %v11118_v17 }
 0x603   : > { %4776 = vmatpush.msra.mxu2 %v11021_v30  ;;  %4839 = vmatpush.msra.mxu3 %v11003_v43 }
 0x604   : > { %4594 = vmatpush.msra.mxu0 %v11012_v48  ;;  %4687 = vmatpush.msra.mxu1 %v4686_v32  ;;  %v4709_v32 = vsub.f32 %v11083_v55, %v13950_v52  ;;  %v4704_v27 = vand.u32 4294901760, %v4703_v13  ;;  %v13957_v52 = vand.u32 4294901760, %v11116_v50  ;;  %v11155_v13 = vsub.f32 %v14515_v19, %v11131_v18 }
 0x605   : > { %4779 = vmatpush.msra.mxu2 %v11030_v35  ;;  %4841 = vmatpush.msra.mxu3 %v11012_v48  ;;  %v11168_v19 = vand.u32 4294901760, %v4482_v6 }
 0x606   : > { %4596 = vmatpush.msra.mxu0 %v11014_v34  ;;  %4693 = vmatpush.msra.mxu1 %v4692_v39  ;;  %v4715_v39 = vsub.f32 %v11090_v59, %v13952_v45  ;;  %v4710_v3 = vand.u32 4294901760, %v4709_v32  ;;  %v4721_v45 = vsub.f32 %v11104_v61, %v13956_v49 }
 0x607   : > { %4782 = vmatpush.msra.mxu2 %v11033_v38  ;;  %4843 = vmatpush.msra.mxu3 %v11014_v34  ;;  %v11194_v44 = vsub.f32 %v4482_v6, %v11168_v19 }
 0x608   : > { %4316 = vmatmul.bf16.vlgmr.msrb.gmra.mxu0 %v11023_v15  ;;  %4329 = vmatmul.bf16.vlgmr.msrb.gmra.mxu1 %v11023_v15  ;;  %v4716_v4 = vand.u32 4294901760, %v4715_v39  ;;  %v4722_v39 = vand.u32 4294901760, %v4721_v45 }
 0x609   : > { %4342 = vmatmul.bf16.vlgmr.msrb.gmra.mxu2 %v11023_v15  ;;  %4355 = vmatmul.bf16.vlgmr.msrb.gmra.mxu3 %v11023_v15  ;;  %v4484_v15 = vld [vmem:[#allocation11 + $0xf8] sm:$0xff] }
 0x60a   : > { %4598 = vmatpush.msra.mxu0 %v11041_v2  ;;  %4699 = vmatpush.msra.mxu1 %v4698_v42  ;;  %v4727_v42 = vsub.f32 %v11116_v50, %v13957_v52  ;;  %v11162_v49 = vand.u32 4294901760, %v4484_v15 }
 0x60b   : > { %4785 = vmatpush.msra.mxu2 %v11060_v41  ;;  %4845 = vmatpush.msra.mxu3 %v11041_v2 }
 0x60c   : > { %4600 = vmatpush.msra.mxu0 %v11050_v51  ;;  %4705 = vmatpush.msra.mxu1 %v4704_v27  ;;  %v14516_v27 = vand.u32 4294901760, %v11128_v62  ;;  %v11175_v32 = vsub.f32 %v4484_v15, %v11162_v49  ;;  %v4728_v24 = vand.u32 4294901760, %v4727_v42  ;;  %v11188_v15 = vand.u32 4294901760, %v14518_v47 }
 0x60d   : > { %4788 = vmatpush.msra.mxu2 %v11073_v1  ;;  %4847 = vmatpush.msra.mxu3 %v11050_v51  ;;  %v13971_v42 = vand.u32 4294901760, %v11180_v26 }
 0x60e   : > { %4602 = vmatpush.msra.mxu0 %v11062_v56  ;;  %4711 = vmatpush.msra.mxu1 %v4710_v3  ;;  %v4733_v52 = vsub.f32 %v11128_v62, %v14516_v27  ;;  %v14517_v3 = vand.u32 4294901760, %v11142_v14  ;;  %v4615_v27 = vand.u32 4294901760, %v11155_v13  ;;  %v13968_v37 = vand.u32 4294901760, %v11175_v32 }
 0x60f   : > { %4791 = vmatpush.msra.mxu2 %v11083_v55  ;;  %4849 = vmatpush.msra.mxu3 %v11062_v56  ;;  %v4622_v6 = vsub.f32 %v14518_v47, %v11188_v15  ;;  %v5089_v47 = vsub.f32 %v11180_v26, %v13971_v42 }
 0x610   : > { %4604 = vmatpush.msra.mxu0 %v11066_v20  ;;  %4717 = vmatpush.msra.mxu1 %v4716_v4  ;;  %v4739_v45 = vsub.f32 %v11142_v14, %v14517_v3  ;;  %v4734_v4 = vand.u32 4294901760, %v4733_v52  ;;  %v4616_v57 = vsub.f32 %v11155_v13, %v4615_v27  ;;  %v5083_v52 = vsub.f32 %v11175_v32, %v13968_v37 }
 0x611   : > { %4794 = vmatpush.msra.mxu2 %v11090_v59  ;;  %4851 = vmatpush.msra.mxu3 %v11066_v20  ;;  %v11218_v37 = vand.u32 4294901760, %v10861_v8 }
 0x612   : > { %4606 = vmatpush.msra.mxu0 %v11085_v25  ;;  %4723 = vmatpush.msra.mxu1 %v4722_v39  ;;  %v4740_v3 = vand.u32 4294901760, %v4739_v45  ;;  %v13972_v39 = vand.u32 4294901760, %v11194_v44  ;;  %v4623_v45 = vand.u32 4294901760, %v4622_v6 }
 0x613   : > { %4797 = vmatpush.msra.mxu2 %v11104_v61  ;;  %4853 = vmatpush.msra.mxu3 %v11085_v25  ;;  %v4630_v42 = vsub.f32 %v10861_v8, %v11218_v37 }
 0x614   : > { %4608 = vmatpush.msra.mxu0 %v11094_v9  ;;  %4729 = vmatpush.msra.mxu1 %v4728_v24  ;;  %v4617_v24 = vand.u32 4294901760, %v4616_v57  ;;  %v5095_v31 = vsub.f32 %v11194_v44, %v13972_v39  ;;  %v5090_v57 = vand.u32 4294901760, %v5089_v47 }
 0x615   : > { %4800 = vmatpush.msra.mxu2 %v11116_v50  ;;  %4855 = vmatpush.msra.mxu3 %v11094_v9  ;;  %v4631_v8 = vand.u32 4294901760, %v4630_v42 }
 0x616   : > { %4610 = vmatpush.msra.mxu0 %v11106_v54  ;;  %4735 = vmatpush.msra.mxu1 %v4734_v4  ;;  %v5084_v4 = vand.u32 4294901760, %v5083_v52  ;;  %v14519_v52 = vand.u32 4294901760, %v10984_v40  ;;  %v5096_v39 = vand.u32 4294901760, %v5095_v31  ;;  %v14522_v40 = vand.u32 4294901760, %v11001_v22 }
 0x617   : > { %4803 = vmatpush.msra.mxu2 %v11128_v62  ;;  %4857 = vmatpush.msra.mxu3 %v11106_v54  ;;  %v14527_v22 = vand.u32 4294901760, %v11060_v41  ;;  %v4479_v41 = vld [vmem:[#allocation11 + $0xd0] sm:$0xff] }
 0x618   : > { %4612 = vmatpush.msra.mxu0 %v11118_v17  ;;  %4741 = vmatpush.msra.mxu1 %v4740_v3  ;;  %v4624_v3 = vsub.f32 %v4622_v6, %v4623_v45 }
 0x619   : > { %4806 = vmatpush.msra.mxu2 %v11142_v14  ;;  %4859 = vmatpush.msra.mxu3 %v11118_v17 }
 0x61a   : > { %4618 = vmatmul.f32.vlgmr.msra.gmra.mxu0 %v4617_v24  ;;  %4743 = vmatmul.f32.vlgmr.msra.gmra.mxu1 %v11131_v18  ;;  %v4625_v47 = vand.u32 4294901760, %v4624_v3 }
 0x61b   : > { %4809 = vmatmul.f32.vlgmr.msra.gmra.mxu2 %v11155_v13  ;;  %4863 = vmatmul.f32.vlgmr.msra.gmra.mxu3 %v4615_v27  ;;  %v4481_v13 = vld [vmem:[#allocation11 + $0xe0] sm:$0xff]  ;;  %v14520_v27 = vand.u32 4294901760, %v10989_v58 }
 0x61c   : > { %4967 = vmatpush.msrb.mxu1 %v10979_v33  ;;  %5016 = vmatpush.msrb.mxu2 %v11162_v49  ;;  %v14521_v33 = vand.u32 4294901760, %v10995_v12  ;;  %v11242_v31 = vand.u32 4294901760, %v4481_v13  ;;  %v14524_v12 = vand.u32 4294901760, %v11021_v30  ;;  %v14532_v30 = vand.u32 4294901760, %v11116_v50  ;;  %v4478_v50 = vld [vmem:[#allocation11 + $0xc8] sm:$0xff] }
 0x61d   : > { %5085 = vmatpush.msrb.mxu3 %v5084_v4  ;;  %4888 = vmatpush.msrb.mxu0 %v14519_v52  ;;  %v4475_v52 = vld [vmem:[#allocation11 + $0xb0] sm:$0xff] }
 0x61e   : > { %4969 = vmatpush.msrb.mxu1 %v10981_v10  ;;  %5018 = vmatpush.msrb.mxu2 %v11164_v53  ;;  %v4632_v10 = vsub.f32 %v4630_v42, %v4631_v8 }
 0x61f   : > { %5091 = vmatpush.msrb.mxu3 %v5090_v57  ;;  %4892 = vmatpush.msrb.mxu0 %v14520_v27 }
 0x620   : > { %4971 = vmatpush.msrb.mxu1 %v10986_v36  ;;  %5020 = vmatpush.msrb.mxu2 %v11168_v19  ;;  %v14523_v36 = vand.u32 4294901760, %v11010_v23  ;;  %v4633_v58 = vand.u32 4294901760, %v4632_v10  ;;  %v14529_v23 = vand.u32 4294901760, %v11083_v55  ;;  %v4474_v10 = vld [vmem:[#allocation11 + $0xa8] sm:$0xff] }
 0x621   : > { %5097 = vmatpush.msrb.mxu3 %v5096_v39  ;;  %4896 = vmatpush.msrb.mxu0 %v14521_v33  ;;  %v4476_v39 = vld [vmem:[#allocation11 + $0xb8] sm:$0xff] }
 0x622   : > { %4626 = vmatmul.f32.gmra.mxu0 %v4625_v47  ;;  %4747 = vmatmul.f32.gmra.mxu1 %v11188_v15  ;;  %v11334_v4 = vand.u32 4294901760, %v4476_v39  ;;  %v11344_v47 = vand.u32 4294901760, %v4475_v52 }
 0x623   : > { %4814 = vmatmul.f32.gmra.mxu2 %v4622_v6  ;;  %4869 = vmatmul.f32.gmra.mxu3 %v4623_v45 }
 0x624   : > { %4973 = vmatpush.msrb.mxu1 %v10991_v0  ;;  %5022 = vmatpush.msrb.mxu2 %v11242_v31  ;;  %v14525_v0 = vand.u32 4294901760, %v11030_v35  ;;  %v14533_v35 = vand.u32 4294901760, %v11128_v62 }
 0x625   : > { %4900 = vmatpush.msrb.mxu0 %v14522_v40 }
 0x626   : > { %4975 = vmatpush.msrb.mxu1 %v10997_v60  ;;  %v14526_v60 = vand.u32 4294901760, %v11033_v38  ;;  %v14534_v38 = vand.u32 4294901760, %v11142_v14 }
 0x627   : > { %4904 = vmatpush.msrb.mxu0 %v14523_v36 }
 0x628   : > { %4977 = vmatpush.msrb.mxu1 %v11003_v43  ;;  %v14528_v43 = vand.u32 4294901760, %v11073_v1 }
 0x629   : > { %4908 = vmatpush.msrb.mxu0 %v14524_v12  ;;  %v11362_v12 = vsub.f32 %v4475_v52, %v11344_v47 }
 0x62a   : > { %4634 = vmatmul.f32.gmra.mxu0 %v4633_v58  ;;  %4751 = vmatmul.f32.gmra.mxu1 %v11218_v37  ;;  %v11359_v58 = vand.u32 4294901760, %v4474_v10 }
 0x62b   : > { %4819 = vmatmul.f32.gmra.mxu2 %v4630_v42  ;;  %4875 = vmatmul.f32.gmra.mxu3 %v4631_v8  ;;  %v11347_v8 = vsub.f32 %v4476_v39, %v11334_v4 }
 0x62c   : > { %4979 = vmatpush.msrb.mxu1 %v11012_v48  ;;  %4912 = vmatpush.msrb.mxu0 %v14525_v0  ;;  %v14530_v48 = vand.u32 4294901760, %v11090_v59  ;;  %v11311_v59 = vand.u32 4294901760, %v4478_v50 }
 0x62d   : > { %v5130_v36 = vand.u32 4294901760, %v11347_v8 }
 0x62e   : > { %4981 = vmatpush.msrb.mxu1 %v11014_v34  ;;  %4916 = vmatpush.msrb.mxu0 %v14526_v60  ;;  %v14531_v34 = vand.u32 4294901760, %v11104_v61  ;;  %v11327_v6 = vsub.f32 %v4478_v50, %v11311_v59  ;;  %v4473_v60 = vld [vmem:[#allocation11 + $0xa0] sm:$0xff] }
 0x630   : > { %4983 = vmatpush.msrb.mxu1 %v11041_v2  ;;  %4920 = vmatpush.msrb.mxu0 %v14527_v22  ;;  %v4480_v2 = vld [vmem:[#allocation11 + $0xd8] sm:$0xff]  ;;  %v5118_v3 = vand.u32 4294901760, %v11327_v6 }
 0x632   : > { %4985 = vmatpush.msrb.mxu1 %v11050_v51  ;;  %4924 = vmatpush.msrb.mxu0 %v14528_v43  ;;  %v11292_v51 = vand.u32 4294901760, %v4480_v2  ;;  %v5119_v33 = vsub.f32 %v11327_v6, %v5118_v3  ;;  %v5131_v43 = vsub.f32 %v11347_v8, %v5130_v36 }
 0x634   : > { %4987 = vmatpush.msrb.mxu1 %v11062_v56  ;;  %4928 = vmatpush.msrb.mxu0 %v14529_v23  ;;  %v11302_v1 = vsub.f32 %v4480_v2, %v11292_v51  ;;  %v5120_v0 = vand.u32 4294901760, %v5119_v33  ;;  %v5136_v23 = vand.u32 4294901760, %v11362_v12 }
 0x635   : > { %5024 = vmatpush.msrb.mxu2 %v11292_v51 }
 0x636   : > { %4989 = vmatpush.msrb.mxu1 %v11066_v20  ;;  %4932 = vmatpush.msrb.mxu0 %v14530_v48  ;;  %v11299_v20 = vand.u32 4294901760, %v4479_v41  ;;  %v11371_v48 = vand.u32 4294901760, %v4473_v60 }
 0x638   : > { %4991 = vmatpush.msrb.mxu1 %v11085_v25  ;;  %4936 = vmatpush.msrb.mxu0 %v14531_v34  ;;  %v5106_v25 = vand.u32 4294901760, %v11302_v1  ;;  %v11314_v62 = vsub.f32 %v4479_v41, %v11299_v20  ;;  %v11374_v34 = vsub.f32 %v4474_v10, %v11359_v58  ;;  %v11384_v41 = vsub.f32 %v4473_v60, %v11371_v48 }
 0x639   : > { %5026 = vmatpush.msrb.mxu2 %v11299_v20 }
 0x63a   : > { %4993 = vmatpush.msrb.mxu1 %v11094_v9  ;;  %4940 = vmatpush.msrb.mxu0 %v14532_v30  ;;  %v4477_v9 = vld [vmem:[#allocation11 + $0xc0] sm:$0xff]  ;;  %v5112_v14 = vand.u32 4294901760, %v11314_v62  ;;  %v4472_v30 = vld [vmem:[#allocation11 + $0x98] sm:$0xff]  ;;  %v5142_v50 = vand.u32 4294901760, %v11374_v34 }
 0x63b   : > { %5028 = vmatpush.msrb.mxu2 %v11311_v59  ;;  %v11323_v42 = vand.u32 4294901760, %v4477_v9  ;;  %v11381_v2 = vand.u32 4294901760, %v4472_v30 }
 0x63c   : > { %4995 = vmatpush.msrb.mxu1 %v11106_v54  ;;  %4944 = vmatpush.msrb.mxu0 %v14533_v35  ;;  %v11295_v54 = vsub.f32 %v4481_v13, %v11242_v31  ;;  %v5113_v45 = vsub.f32 %v11314_v62, %v5112_v14  ;;  %v5132_v35 = vand.u32 4294901760, %v5131_v43 }
 0x63d   : > { %5030 = vmatpush.msrb.mxu2 %v11323_v42  ;;  %v11337_v57 = vsub.f32 %v4477_v9, %v11323_v42  ;;  %v11394_v39 = vsub.f32 %v4472_v30, %v11381_v2 }
 0x63e   : > { %4997 = vmatpush.msrb.mxu1 %v11118_v17  ;;  %4948 = vmatpush.msrb.mxu0 %v14534_v38  ;;  %v5100_v56 = vand.u32 4294901760, %v11295_v54  ;;  %v5107_v17 = vsub.f32 %v11302_v1, %v5106_v25  ;;  %v5114_v13 = vand.u32 4294901760, %v5113_v45  ;;  %v5137_v38 = vsub.f32 %v11362_v12, %v5136_v23  ;;  %v4470_v45 = vld [vmem:[#allocation11 + $0x88] sm:$0xff] }
 0x63f   : > { %5032 = vmatpush.msrb.mxu2 %v11334_v4  ;;  %v5124_v27 = vand.u32 4294901760, %v11337_v57  ;;  %v11406_v33 = vand.u32 4294901760, %v4470_v45 }
 0x640   : > { %5263 = vmatpush.msra.mxu1 %v11162_v49  ;;  %5195 = vmatpush.msra.mxu0 %v11175_v32  ;;  %v5101_v55 = vsub.f32 %v11295_v54, %v5100_v56  ;;  %v5108_v24 = vand.u32 4294901760, %v5107_v17  ;;  %v5138_v9 = vand.u32 4294901760, %v5137_v38 }
 0x641   : > { %v5125_v40 = vsub.f32 %v11337_v57, %v5124_v27  ;;  %5034 = vmatpush.msrb.mxu2 %v11344_v47 }
 0x642   : > { %5265 = vmatpush.msra.mxu1 %v11164_v53  ;;  %5198 = vmatpush.msra.mxu0 %v11180_v26  ;;  %v5102_v61 = vand.u32 4294901760, %v5101_v55  ;;  %v4471_v55 = vld [vmem:[#allocation11 + $0x90] sm:$0xff] }
 0x643   : > { %v5126_v22 = vand.u32 4294901760, %v5125_v40  ;;  %5036 = vmatpush.msrb.mxu2 %v11359_v58  ;;  %v11391_v17 = vand.u32 4294901760, %v4471_v55 }
 0x644   : > { %5267 = vmatpush.msra.mxu1 %v11168_v19  ;;  %5201 = vmatpush.msra.mxu0 %v11194_v44 }
 0x645   : > { %5103 = vmatpush.msrb.mxu3 %v5102_v61  ;;  %5038 = vmatpush.msrb.mxu2 %v11371_v48  ;;  %v5148_v61 = vand.u32 4294901760, %v11384_v41  ;;  %v11409_v10 = vsub.f32 %v4471_v55, %v11391_v17 }
 0x646   : > { %5269 = vmatpush.msra.mxu1 %v11242_v31  ;;  %5204 = vmatpush.msra.mxu0 %v11295_v54 }
 0x647   : > { %5109 = vmatpush.msrb.mxu3 %v5108_v24  ;;  %5040 = vmatpush.msrb.mxu2 %v11381_v2  ;;  %v5143_v24 = vsub.f32 %v11374_v34, %v5142_v50  ;;  %v5149_v52 = vsub.f32 %v11384_v41, %v5148_v61  ;;  %v13973_v43 = vand.u32 4294901760, %v11409_v10 }
 0x648   : > { %5271 = vmatpush.msra.mxu1 %v11292_v51  ;;  %5207 = vmatpush.msra.mxu0 %v11302_v1 }
 0x649   : > { %5115 = vmatpush.msrb.mxu3 %v5114_v13  ;;  %5042 = vmatpush.msrb.mxu2 %v11391_v17  ;;  %v13974_v13 = vand.u32 4294901760, %v11394_v39  ;;  %v5144_v40 = vand.u32 4294901760, %v5143_v24  ;;  %v5150_v60 = vand.u32 4294901760, %v5149_v52  ;;  %v5161_v55 = vsub.f32 %v11409_v10, %v13973_v43 }
 0x64a   : > { %5273 = vmatpush.msra.mxu1 %v11299_v20  ;;  %5210 = vmatpush.msra.mxu0 %v11314_v62 }
 0x64b   : > { %5121 = vmatpush.msrb.mxu3 %v5120_v0  ;;  %v4469_v0 = vld [vmem:[#allocation11 + $0x80] sm:$0xff]  ;;  %5044 = vmatpush.msrb.mxu2 %v11406_v33  ;;  %v5162_v52 = vand.u32 4294901760, %v5161_v55 }
 0x64c   : > { %5275 = vmatpush.msra.mxu1 %v11311_v59  ;;  %5213 = vmatpush.msra.mxu0 %v11327_v6  ;;  %v11418_v30 = vand.u32 4294901760, %v4469_v0  ;;  %v4362_v6 = vmul.f32 0.9, %v10856_v21  ;;  %v14547_v21 = vld [vmem:[#allocation48_spill] sm:$0xff] }
 0x64d   : > { %5127 = vmatpush.msrb.mxu3 %v5126_v22  ;;  %v5155_v22 = vsub.f32 %v11394_v39, %v13974_v13  ;;  %v430_v13 = vld [vmem:[%s9518_s13 + $0xf0] sm:$0xff] }
 0x64e   : > { %5277 = vmatpush.msra.mxu1 %v11323_v42  ;;  %5216 = vmatpush.msra.mxu0 %v11337_v57  ;;  %v14546_v57 = vld [vmem:[#allocation56_spill] sm:$0xff] }
 0x64f   : > { %5133 = vmatpush.msrb.mxu3 %v5132_v35  ;;  %v11422_v35 = vsub.f32 %v4470_v45, %v11406_v33  ;;  %v5156_v38 = vand.u32 4294901760, %v5155_v22  ;;  %5046 = vmatpush.msrb.mxu2 %v11418_v30  ;;  %v14535_v45 = vand.u32 4294901760, %v11175_v32  ;;  %v429_v22 = vld [vmem:[%s9518_s13 + $0xe8] sm:$0xff] }
 0x650   : > { %5279 = vmatpush.msra.mxu1 %v11334_v4  ;;  %5219 = vmatpush.msra.mxu0 %v11347_v8 }
 0x651   : > { %5139 = vmatpush.msrb.mxu3 %v5138_v9  ;;  %v11430_v9 = vsub.f32 %v4469_v0, %v11418_v30  ;;  %v5166_v24 = vand.u32 4294901760, %v11422_v35  ;;  %5322 = vmatpush.msra.mxu2 %v14535_v45  ;;  %v14537_v45 = vand.u32 4294901760, %v11194_v44  ;;  %v431_v44 = vld [vmem:[%s9518_s13 + $0xf8] sm:$0xff]  ;;  %s8877_s13 = sshll.u32 %s9337_s24, 5  ;;  %s8058_s24 = scalar_lea.sflag [#allocation7], %s9514_s19 }
 0x652   : > { %5281 = vmatpush.msra.mxu1 %v11344_v47  ;;  %5222 = vmatpush.msra.mxu0 %v11362_v12  ;;  %v14551_v12 = vld [vmem:[#allocation32_spill] sm:$0xff]  ;;  %s8070_s11 = scalar_lea.hbm %s13719_s6, %s8877_s13 }
 0x653   : > { %5145 = vmatpush.msrb.mxu3 %v5144_v40  ;;  %v13975_v40 = vand.u32 4294901760, %v11430_v9  ;;  %v5167_v0 = vsub.f32 %v11422_v35, %v5166_v24  ;;  %s8073_s20 = sshll.u32 %s8070_s11, 4  ;;  %s8074_s20 = int_to_ptr.hbm [resolvable:$true] %s8073_s20 }
 0x654   : > { %5283 = vmatpush.msra.mxu1 %v11359_v58  ;;  %5225 = vmatpush.msra.mxu0 %v11374_v34  ;;  %v14556_v34 = vld [vmem:[#allocation49_spill] sm:$0xff]  ;;  %s9269_s27 = sshra.s32 %s8074_s20, 4  ;;  %s9270_s27 = int_to_ptr.hbm [resolvable:$true] %s9269_s27 }
 0x655   : > { %5151 = vmatpush.msrb.mxu3 %v5150_v60  ;;  %v14536_v60 = vand.u32 4294901760, %v11180_v26  ;;  %v5173_v32 = vsub.f32 %v11430_v9, %v13975_v40  ;;  %v5168_v55 = vand.u32 4294901760, %v5167_v0  ;;  %v4360_v26 = vmul.f32 0.9, %v10846_v28  ;;  %s9271_s9 = scalar_lea.hbm %s9270_s27, 32  ;;  %p9276_p11 = scmp.lt.s32.totalorder %s9270_s27, %s13719_s6 }
 0x656   : > { %5285 = vmatpush.msra.mxu1 %v11371_v48  ;;  %5228 = vmatpush.msra.mxu0 %v11384_v41  ;;  %v462_v40 = vmul.f32 0.1, %v430_v13  ;;  %v463_v28 = vmul.f32 0.1, %v431_v44  ;;  %p9272_p1 = scmp.ne.s32.totalorder %s9270_s27, %s9271_s9  ;;  %p9277_p12 = scmp.lt.s32.totalorder %s9275_s4, %s9271_s9 }
 0x657   : > { %5157 = vmatpush.msrb.mxu3 %v5156_v38  ;;  %5326 = vmatpush.msra.mxu2 %v14536_v60  ;;  %v461_v38 = vmul.f32 0.1, %v429_v22  ;;  %v5174_v43 = vand.u32 4294901760, %v5173_v32  ;;  %v4361_v60 = vmul.f32 0.9, %v10849_v16  ;;  %v14539_v16 = vld [vmem:[#allocation21_spill] sm:$0xff] }
 0x658   : > { %5287 = vmatpush.msra.mxu1 %v11381_v2  ;;  %5231 = vmatpush.msra.mxu0 %v11394_v39  ;;  %p9273_p9 = pnand %p9272_p1, %p9485_p0  ;;  %p9278_p13 = por %p9277_p12, %p9276_p11 }
 0x659   : > { %5163 = vmatpush.msrb.mxu3 %v5162_v52  ;;  %5330 = vmatpush.msra.mxu2 %v14537_v45  ;;  %v14538_v52 = vld [vmem:[#allocation40_spill] sm:$0xff] }
 0x65a   : > { %5289 = vmatpush.msra.mxu1 %v11391_v17  ;;  %5234 = vmatpush.msra.mxu0 %v11409_v10  ;;  %v1720_v0 = vadd.f32 %v14538_v52, %v461_v38  ;;  %p9274_p10 = pneg %p9273_p9 }
 0x65b   : > { %5169 = vmatpush.msrb.mxu3 %v5168_v55  ;;  %5334 = vmatpush.msra.mxu2 %v5100_v56  ;;  %v14540_v56 = vld [vmem:[#allocation24_spill] sm:$0xff] }
 0x65c   : > { %5291 = vmatpush.msra.mxu1 %v11406_v33  ;;  %5237 = vmatpush.msra.mxu0 %v11422_v35  ;;  %v4498_v35 = vld [vmem:[#allocation11 + $0x168] sm:$0xff]  ;;  %p9279_p3 = pnand %p9278_p13, %p9274_p10 }
 0x65d   : > { %5175 = vmatpush.msrb.mxu3 %v5174_v43  ;;  %5338 = vmatpush.msra.mxu2 %v5106_v25  ;;  %v14541_v25 = vld [vmem:[#allocation41_spill] sm:$0xff]  ;;  %v14542_v43 = vld [vmem:[#allocation55_spill] sm:$0xff] }
 0x65e   : > { %5293 = vmatpush.msra.mxu1 %v11418_v30  ;;  %5240 = vmatpush.msra.mxu0 %v11430_v9  ;;  %v1758_v13 = vadd.f32 %v14541_v25, %v1720_v0 }
 0x65f   : > { %5401 = vmatpush.msra.mxu3 %v11162_v49  ;;  %5342 = vmatpush.msra.mxu2 %v5112_v14  ;;  %v1959_v49 = vadd.f32 %v14542_v43, %v462_v40  ;;  %v14544_v14 = vld [vmem:[#allocation168_spill] sm:$0xff]  ;;  %v14545_v40 = vld [vmem:[#allocation66_spill] sm:$0xff] }
 0x660   : > { %v11477_v38 = vand.u32 4294901760, %v14544_v14 }
 0x661   : > { %5403 = vmatpush.msra.mxu3 %v11164_v53  ;;  %5346 = vmatpush.msra.mxu2 %v5118_v3  ;;  %v14543_v53 = vld [vmem:[#allocation47_spill] sm:$0xff]  ;;  %v4363_v3 = vmul.f32 0.9, %v10859_v46 }
 0x662   : > { %v1797_v62 = vadd.f32 %v14543_v53, %v1758_v13  ;;  %v11499_v8 = vsub.f32 %v14544_v14, %v11477_v38  ;;  %v14554_v13 = vld [vmem:[#allocation99_spill] sm:$0xff] }
 0x663   : > { %5405 = vmatpush.msra.mxu3 %v11168_v19  ;;  %5350 = vmatpush.msra.mxu2 %v5124_v27  ;;  %v2198_v19 = vadd.f32 %v14545_v40, %v463_v28  ;;  %v1997_v27 = vadd.f32 %v14546_v57, %v1959_v49  ;;  %v14550_v28 = vld [vmem:[#allocation67_spill] sm:$0xff]  ;;  %v4364_v57 = vmul.f32 0.9, %v10880_v5 }
 0x664   : > { %v1839_v46 = vadd.f32 %v14547_v21, %v1797_v62  ;;  %v5049_v62 = vand.u32 4294901760, %v11499_v8 }
 0x665   : > { %5407 = vmatpush.msra.mxu3 %v11242_v31  ;;  %5354 = vmatpush.msra.mxu2 %v5130_v36  ;;  %v14548_v31 = vld [vmem:[#allocation27_spill] sm:$0xff] }
 0x666   : > { %v5050_v5 = vsub.f32 %v11499_v8, %v5049_v62 }
 0x667   : > { %5409 = vmatpush.msra.mxu3 %v11292_v51  ;;  %5358 = vmatpush.msra.mxu2 %v5136_v23  ;;  %v2236_v51 = vadd.f32 %v14550_v28, %v2198_v19  ;;  %v14552_v23 = vld [vmem:[#allocation38_spill] sm:$0xff]  ;;  %v4499_v28 = vld [vmem:[#allocation11 + $0x170] sm:$0xff] }
 0x668   : > { %v14559_v19 = vld [vmem:[#allocation58_spill] sm:$0xff] }
 0x669   : > { %5411 = vmatpush.msra.mxu3 %v11299_v20  ;;  %5362 = vmatpush.msra.mxu2 %v5142_v50  ;;  %v2275_v43 = vadd.f32 %v14554_v13, %v2236_v51  ;;  %v14555_v20 = vld [vmem:[#allocation36_spill] sm:$0xff]  ;;  %v1875_v50 = vadd.f32 %v14556_v34, %v1839_v46  ;;  %v11567_v34 = vand.u32 4294901760, %v4498_v35 }
 0x66a   : > { %v11515_v49 = vand.u32 4294901760, %v14555_v20 }
 0x66b   : > { %5413 = vmatpush.msra.mxu3 %v11311_v59  ;;  %5366 = vmatpush.msra.mxu2 %v5148_v61 }
 0x66d   : > { %5415 = vmatpush.msra.mxu3 %v11323_v42  ;;  %v11534_v42 = vsub.f32 %v14555_v20, %v11515_v49 }
 0x66f   : > { %5417 = vmatpush.msra.mxu3 %v11334_v4 }
 0x671   : > { %5419 = vmatpush.msra.mxu3 %v11344_v47  ;;  %v14565_v47 = vand.u32 4294901760, %v11430_v9  ;;  %v4497_v9 = vld [vmem:[#allocation11 + $0x160] sm:$0xff] }
 0x673   : > { %v4265_v45 = vpop.f32.mrf.mxu0  ;;  %v4278_v22 = vpop.f32.mrf.mxu1  ;;  %5421 = vmatpush.msra.mxu3 %v11359_v58 }
 0x674   : > { %v4368_v32 = vadd.f32 %v4360_v26, %v4265_v45  ;;  %v4369_v55 = vadd.f32 %v4361_v60, %v4278_v22 }
 0x675   : > { %5423 = vmatpush.msra.mxu3 %v11371_v48 }
 0x676   : > { %v4387_v54 = vadd.f32 %v4368_v32, %v14539_v16  ;;  %v11466_v1 = vadd.f32 %v4369_v55, %v14540_v56  ;;  %v14549_v32 = vld [vmem:[#allocation30_spill] sm:$0xff]  ;;  %v1636_v16 = vadd.f32 %v14552_v23, %v14551_v12  ;;  %v11555_v23 = vand.u32 4294901760, %v4499_v28 }
 0x677   : > { %5425 = vmatpush.msra.mxu3 %v11381_v2 }
 0x678   : > { %9045 = vtanh.f32 %v4387_v54  ;;  %4413 = vst [vmem:[#allocation2 + $0x30] sm:$0xff] %v4387_v54  ;;  %v14553_v54 = vld [vmem:[#allocation57_spill] sm:$0xff]  ;;  %v11565_v20 = vsub.f32 %v4499_v28, %v11555_v23 }
 0x679   : > { %4414 = vst [vmem:[#allocation2] sm:$0xff] %v11466_v1  ;;  %v2036_v56 = vadd.f32 %v14553_v54, %v1997_v27  ;;  %v4365_v27 = vmul.f32 0.9, %v10883_v29  ;;  %v14563_v29 = vld [vmem:[#allocation64_spill] sm:$0xff]  ;;  %9047 = vtanh.f32 %v11466_v1  ;;  %5427 = vmatpush.msra.mxu3 %v11391_v17 }
 0x67a   : > { %v4291_v26 = vpop.f32.mrf.mxu2  ;;  %v4304_v60 = vpop.f32.mrf.mxu3 }
 0x67b   : > { %v4370_v52 = vadd.f32 %v4362_v6, %v4291_v26  ;;  %v4371_v0 = vadd.f32 %v4363_v3, %v4304_v60  ;;  %v4267_v44 = vpop.f32.mrf.mxu0  ;;  %v4280_v45 = vpop.f32.mrf.mxu1  ;;  %v14557_v6 = vand.u32 4294901760, %v11394_v39  ;;  %v14558_v3 = vld [vmem:[#allocation39_spill] sm:$0xff]  ;;  %v2078_v41 = vadd.f32 %v14559_v19, %v2036_v56  ;;  %v14560_v26 = vld [vmem:[#allocation100_spill] sm:$0xff]  ;;  %5429 = vmatpush.msra.mxu3 %v11406_v33 }
 0x67c   : > { %v1670_v40 = vadd.f32 %v14558_v3, %v1636_v16  ;;  %v2317_v60 = vadd.f32 %v14560_v26, %v2275_v43  ;;  %v14561_v39 = vand.u32 4294901760, %v11409_v10  ;;  %v11546_v10 = vand.u32 4294901760, %v10863_v11  ;;  %v14564_v16 = vld [vmem:[#allocation103_spill] sm:$0xff] }
 0x67d   : > { %v11492_v22 = vadd.f32 %v4370_v52, %v14548_v31  ;;  %v11495_v55 = vadd.f32 %v4371_v0, %v14549_v32  ;;  %5370 = vmatpush.msra.mxu2 %v14557_v6  ;;  %v4500_v52 = vld [vmem:[#allocation11 + $0x178] sm:$0xff]  ;;  %v2114_v31 = vadd.f32 %v14563_v29, %v2078_v41  ;;  %v5057_v43 = vand.u32 4294901760, %v11534_v42  ;;  %5431 = vmatpush.msra.mxu3 %v11418_v30 }
 0x67e   : > { %v9046_v36 = vpop.eup %9045  ;;  %v14562_v0 = vld [vmem:[#allocation50_spill] sm:$0xff]  ;;  %v11542_v46 = vand.u32 4294901760, %v4500_v52  ;;  %v2353_v54 = vadd.f32 %v14564_v16, %v2317_v60  ;;  %v11572_v58 = vsub.f32 %v10863_v11, %v11546_v10  ;;  %v11581_v6 = vsub.f32 %v4498_v35, %v11567_v34  ;;  %v14567_v11 = vld [vmem:[#allocation105_spill] sm:$0xff]  ;;  %v4494_v16 = vld [vmem:[#allocation11 + $0x148] sm:$0xff] }
 0x67f   : > { %4415 = vst [vmem:[#allocation2 + $0x18] sm:$0xff] %v11492_v22  ;;  %v11509_v25 = vand.u32 4294901760, %v9046_v36  ;;  %5374 = vmatpush.msra.mxu2 %v14561_v39  ;;  %v1909_v44 = vadd.f32 %v14562_v0, %v1875_v50  ;;  %v4366_v50 = vmul.f32 0.9, %v10900_v7  ;;  %v14566_v7 = vld [vmem:[#allocation65_spill] sm:$0xff]  ;;  %v11590_v41 = vand.u32 4294901760, %v4497_v9  ;;  %v9048_v26 = vpop.eup %9047 }
 0x680   : > { %4416 = vst [vmem:[#allocation2 + $0x10] sm:$0xff] %v11495_v55  ;;  %v11553_v12 = vsub.f32 %v4500_v52, %v11542_v46  ;;  %v2148_v3 = vadd.f32 %v14566_v7, %v2114_v31  ;;  %v13990_v2 = vand.u32 4294901760, %v11581_v6  ;;  %v4493_v35 = vld [vmem:[#allocation11 + $0x140] sm:$0xff]  ;;  %9049 = vtanh.f32 %v11492_v22 }
 0x681   : > { %4755 = vmatmul.f32.gmra.mxu1 %v11509_v25  ;;  %v4638_v53 = vsub.f32 %v9046_v36, %v11509_v25  ;;  %5378 = vmatpush.msra.mxu2 %v5166_v24  ;;  %v5051_v24 = vand.u32 4294901760, %v5050_v5  ;;  %9051 = vtanh.f32 %v11495_v55 }
 0x682   : > { %v4293_v59 = vpop.f32.mrf.mxu2  ;;  %v4306_v14 = vpop.f32.mrf.mxu3  ;;  %v5516_v1 = vand.u32 4294901760, %v11553_v12  ;;  %v5529_v17 = vsub.f32 %v11581_v6, %v13990_v2 }
 0x683   : > { %4824 = vmatmul.f32.gmra.mxu2 %v4638_v53  ;;  %v4639_v61 = vand.u32 4294901760, %v4638_v53  ;;  %v13992_v14 = vand.u32 4294901760, %v11565_v20 }
 0x684   : > { %5382 = vmatpush.msra.mxu2 %v14565_v47  ;;  %v5517_v59 = vsub.f32 %v11553_v12, %v5516_v1 }
 0x685   : > { %v4317_v45 = vpop.f32.mrf.mxu0  ;;  %v4330_v21 = vpop.f32.mrf.mxu1  ;;  %4881 = vmatmul.f32.gmra.mxu3 %v4639_v61  ;;  %v4640_v4 = vsub.f32 %v4638_v53, %v4639_v61  ;;  %v4367_v53 = vmul.f32 0.9, %v10903_v63  ;;  %v5058_v63 = vsub.f32 %v11534_v42, %v5057_v43  ;;  %v4496_v61 = vld [vmem:[#allocation11 + $0x158] sm:$0xff]  ;;  %v5523_v0 = vsub.f32 %v11565_v20, %v13992_v14  ;;  %v14568_v14 = vld [vmem:[#allocation169_spill] sm:$0xff] }
 0x686   : > { %v4372_v32 = vadd.f32 %v4364_v57, %v4317_v45  ;;  %v4373_v36 = vadd.f32 %v4365_v27, %v4330_v21  ;;  %v5518_v52 = vand.u32 4294901760, %v5517_v59  ;;  %v11601_v45 = vsub.f32 %v4497_v9, %v11590_v41 }
 0x687   : > { %v4641_v51 = vand.u32 4294901760, %v4640_v4  ;;  %v11603_v21 = vand.u32 4294901760, %v4496_v61  ;;  %v4495_v4 = vld [vmem:[#allocation11 + $0x150] sm:$0xff]  ;;  %v5524_v31 = vand.u32 4294901760, %v5523_v0  ;;  %v11635_v9 = vand.u32 4294901760, %v4493_v35 }
 0x688   : > { %v4391_v56 = vadd.f32 %v4372_v32, %v1670_v40  ;;  %v4392_v13 = vadd.f32 %v4373_v36, %v1909_v44  ;;  %v2387_v40 = vadd.f32 %v14567_v11, %v2353_v54  ;;  %v5065_v44 = vand.u32 4294901760, %v11572_v58  ;;  %v4492_v11 = vld [vmem:[#allocation11 + $0x138] sm:$0xff] }
 0x689   : > { %4642 = vmatmul.f32.gmra.mxu0 %v4641_v51  ;;  %4999 = vmatmul.f32.vlgmr.msrb.gmra.mxu1 %v11131_v18  ;;  %v11605_v32 = vand.u32 4294901760, %v4495_v4  ;;  %v11607_v36 = vand.u32 4294901760, %v9048_v26  ;;  %v13989_v28 = vand.u32 4294901760, %v11601_v45  ;;  %v11616_v51 = vsub.f32 %v4496_v61, %v11603_v21 }
 0x68a   : > { %4417 = vst [vmem:[#allocation2 + $0x8] sm:$0xff] %v4391_v56  ;;  %5519 = vmatpush.msrb.mxu1 %v5518_v52  ;;  %v5059_v54 = vand.u32 4294901760, %v5058_v63  ;;  %v11623_v56 = vand.u32 4294901760, %v4494_v16  ;;  %v5066_v59 = vsub.f32 %v11572_v58, %v5065_v44  ;;  %v11654_v63 = vsub.f32 %v4493_v35, %v11635_v9 }
 0x68b   : > { %4418 = vst [vmem:[#allocation2 + $0x20] sm:$0xff] %v4392_v13  ;;  %5052 = vmatmul.f32.vlgmr.msrb.gmra.mxu2 %v5051_v24  ;;  %v11621_v33 = vsub.f32 %v4495_v4, %v11605_v32  ;;  %v5530_v13 = vand.u32 4294901760, %v5529_v17  ;;  %v5535_v47 = vsub.f32 %v11601_v45, %v13989_v28  ;;  %v11641_v7 = vsub.f32 %v9048_v26, %v11607_v36  ;;  %v4491_v26 = vld [vmem:[#allocation11 + $0x130] sm:$0xff]  ;;  %v4490_v4 = vld [vmem:[#allocation11 + $0x128] sm:$0xff] }
 0x68c   : > { %v4343_v19 = vpop.f32.mrf.mxu2  ;;  %v4356_v48 = vpop.f32.mrf.mxu3  ;;  %5629 = vmatpush.msrb.mxu2 %v11553_v12  ;;  %5525 = vmatpush.msrb.mxu1 %v5524_v31  ;;  %v11657_v61 = vand.u32 4294901760, %v4492_v11  ;;  %v11669_v0 = vand.u32 4294901760, %v4491_v26  ;;  %v11677_v17 = vand.u32 4294901760, %v4490_v4 }
 0x68d   : > { %v4374_v60 = vadd.f32 %v4366_v50, %v4343_v19  ;;  %v4375_v57 = vadd.f32 %v4367_v53, %v4356_v48  ;;  %v4319_v27 = vpop.f32.mrf.mxu0  ;;  %v4332_v39 = vpop.f32.mrf.mxu1  ;;  %5177 = vmatmul.f32.vlgmr.msrb.gmra.mxu3 %v11477_v38  ;;  %v13986_v24 = vand.u32 4294901760, %v11621_v33  ;;  %v11633_v50 = vsub.f32 %v4494_v16, %v11623_v56 }
 0x68e   : > { %5632 = vmatpush.msrb.mxu2 %v11565_v20  ;;  %5697 = vmatpush.msrb.mxu3 %v11542_v46  ;;  %v13981_v27 = vand.u32 4294901760, %v11654_v63  ;;  %v11667_v52 = vsub.f32 %v4492_v11, %v11657_v61  ;;  %v14572_v12 = vand.u32 4294901760, %v11641_v7 }
 0x68f   : > { %v4393_v5 = vadd.f32 %v4374_v60, %v2148_v3  ;;  %v4394_v29 = vadd.f32 %v4375_v57, %v2387_v40  ;;  %5531 = vmatpush.msrb.mxu1 %v5530_v13  ;;  %v5536_v3 = vand.u32 4294901760, %v5535_v47  ;;  %v5547_v19 = vsub.f32 %v11621_v33, %v13986_v24  ;;  %v4510_v24 = vld [vmem:[#allocation11 + $0x1c8] sm:$0xff] }
 0x690   : > { %5635 = vmatpush.msrb.mxu2 %v11581_v6  ;;  %v13985_v48 = vand.u32 4294901760, %v11633_v50  ;;  %5699 = vmatpush.msrb.mxu3 %v11555_v23  ;;  %v5559_v31 = vsub.f32 %v11654_v63, %v13981_v27  ;;  %v11682_v13 = vsub.f32 %v4491_v26, %v11669_v0  ;;  %v11686_v47 = vsub.f32 %v4490_v4, %v11677_v17  ;;  %v4516_v27 = vld [vmem:[#allocation11 + $0x1f8] sm:$0xff] }
 0x691   : > { %4419 = vst [vmem:[#allocation2 + $0x28] sm:$0xff] %v4393_v5  ;;  %4950 = vmatmul.f32.vlgmr.msrb.gmra.mxu0 %v11131_v18  ;;  %5003 = vmatmul.f32.gmra.mxu1 %v11188_v15  ;;  %v13988_v18 = vand.u32 4294901760, %v11616_v51  ;;  %v5548_v39 = vand.u32 4294901760, %v5547_v19  ;;  %v5067_v5 = vand.u32 4294901760, %v5066_v59  ;;  %v11837_v2 = vand.u32 4294901760, %v4510_v24 }
 0x692   : > { %4420 = vst [vmem:[#allocation2 + $0x38] sm:$0xff] %v4394_v29  ;;  %5450 = vmatpush.msrb.mxu0 %v11542_v46  ;;  %5638 = vmatpush.msrb.mxu2 %v11601_v45  ;;  %v5553_v57 = vsub.f32 %v11633_v50, %v13985_v48  ;;  %v13993_v29 = vand.u32 4294901760, %v11641_v7  ;;  %v13976_v59 = vand.u32 4294901760, %v11682_v13 }
 0x693   : > { %5060 = vmatmul.f32.gmra.mxu2 %v5059_v54  ;;  %v5541_v40 = vsub.f32 %v11616_v51, %v13988_v18  ;;  %5537 = vmatpush.msrb.mxu1 %v5536_v3  ;;  %v13977_v54 = vand.u32 4294901760, %v11667_v52  ;;  %v4488_v3 = vld [vmem:[#allocation11 + $0x118] sm:$0xff] }
 0x694   : > { %v4345_v30 = vpop.f32.mrf.mxu2  ;;  %v4358_v53 = vpop.f32.mrf.mxu3  ;;  %5452 = vmatpush.msrb.mxu0 %v11555_v23  ;;  %5641 = vmatpush.msrb.mxu2 %v11616_v51  ;;  %v5554_v16 = vand.u32 4294901760, %v5553_v57  ;;  %v5074_v11 = vsub.f32 %v11641_v7, %v13993_v29  ;;  %v11704_v26 = vand.u32 4294901760, %v4488_v3  ;;  %v5571_v57 = vsub.f32 %v11682_v13, %v13976_v59 }
 0x695   : > { %5181 = vmatmul.f32.gmra.mxu3 %v11515_v49  ;;  %v5542_v60 = vand.u32 4294901760, %v5541_v40  ;;  %v5560_v30 = vand.u32 4294901760, %v5559_v31  ;;  %v5565_v53 = vsub.f32 %v11667_v52, %v13977_v54  ;;  %v13978_v40 = vand.u32 4294901760, %v11686_v47 }
 0x696   : > { %5701 = vmatpush.msrb.mxu3 %v11567_v34  ;;  %5454 = vmatpush.msrb.mxu0 %v11567_v34  ;;  %v11717_v31 = vsub.f32 %v4488_v3, %v11704_v26  ;;  %v5075_v59 = vand.u32 4294901760, %v5074_v11  ;;  %v11854_v29 = vand.u32 4294901760, %v14568_v14 }
 0x697   : > { %5543 = vmatpush.msrb.mxu1 %v5542_v60  ;;  %5644 = vmatpush.msrb.mxu2 %v11621_v33  ;;  %v5566_v60 = vand.u32 4294901760, %v5565_v53  ;;  %v5577_v4 = vsub.f32 %v11686_v47, %v13978_v40  ;;  %v4486_v53 = vld [vmem:[#allocation11 + $0x108] sm:$0xff]  ;;  %v4485_v40 = vld [vmem:[#allocation11 + $0x100] sm:$0xff] }
 0x698   : > { %5703 = vmatpush.msrb.mxu3 %v11590_v41  ;;  %5456 = vmatpush.msrb.mxu0 %v11590_v41  ;;  %v13980_v54 = vand.u32 4294901760, %v11717_v31  ;;  %v11735_v11 = vand.u32 4294901760, %v4485_v40 }
 0x699   : > { %4954 = vmatmul.f32.gmra.mxu0 %v11188_v15  ;;  %5007 = vmatmul.f32.gmra.mxu1 %v11218_v37  ;;  %v4489_v15 = vld [vmem:[#allocation11 + $0x120] sm:$0xff] }
 0x69a   : > { %v11688_v35 = vand.u32 4294901760, %v4489_v15  ;;  %5549 = vmatpush.msrb.mxu1 %v5548_v39  ;;  %5705 = vmatpush.msrb.mxu3 %v11603_v21  ;;  %v4487_v39 = vld [vmem:[#allocation11 + $0x110] sm:$0xff] }
 0x69b   : > { %5068 = vmatmul.f32.gmra.mxu2 %v5067_v5  ;;  %5458 = vmatpush.msrb.mxu0 %v11603_v21 }
 0x69c   : > { %v11702_v19 = vsub.f32 %v4489_v15, %v11688_v35  ;;  %5555 = vmatpush.msrb.mxu1 %v5554_v16  ;;  %5647 = vmatpush.msrb.mxu2 %v11633_v50  ;;  %v5572_v16 = vand.u32 4294901760, %v5571_v57  ;;  %v11720_v15 = vand.u32 4294901760, %v4487_v39  ;;  %v11732_v57 = vand.u32 4294901760, %v4486_v53 }
 0x69d   : > { %5185 = vmatmul.f32.gmra.mxu3 %v11546_v10  ;;  %5460 = vmatpush.msrb.mxu0 %v11605_v32 }
 0x69e   : > { %v13979_v5 = vand.u32 4294901760, %v11702_v19  ;;  %5561 = vmatpush.msrb.mxu1 %v5560_v30  ;;  %5707 = vmatpush.msrb.mxu3 %v11605_v32  ;;  %v11730_v3 = vsub.f32 %v4487_v39, %v11720_v15  ;;  %v11743_v39 = vsub.f32 %v4486_v53, %v11732_v57 }
 0x69f   : > { %5650 = vmatpush.msrb.mxu2 %v11654_v63  ;;  %5462 = vmatpush.msrb.mxu0 %v11623_v56 }
 0x6a0   : > { %5567 = vmatpush.msrb.mxu1 %v5566_v60  ;;  %v5583_v30 = vsub.f32 %v11702_v19, %v13979_v5  ;;  %5709 = vmatpush.msrb.mxu3 %v11623_v56  ;;  %v5589_v60 = vsub.f32 %v11717_v31, %v13980_v54  ;;  %v13982_v5 = vand.u32 4294901760, %v11730_v3 }
 0x6a1   : > { %4958 = vmatmul.f32.gmra.mxu0 %v11218_v37  ;;  %5011 = vmatmul.f32.gmra.mxu1 %v11509_v25  ;;  %v5578_v37 = vand.u32 4294901760, %v5577_v4 }
 0x6a2   : > { %5573 = vmatpush.msrb.mxu1 %v5572_v16  ;;  %5653 = vmatpush.msrb.mxu2 %v11667_v52  ;;  %v5584_v4 = vand.u32 4294901760, %v5583_v30  ;;  %v13983_v16 = vand.u32 4294901760, %v11743_v39  ;;  %v5595_v53 = vsub.f32 %v11730_v3, %v13982_v5  ;;  %v4515_v5 = vld [vmem:[#allocation11 + $0x1f0] sm:$0xff] }
 0x6a3   : > { %5076 = vmatmul.f32.gmra.mxu2 %v5075_v59  ;;  %v11748_v59 = vsub.f32 %v4485_v40, %v11735_v11  ;;  %5711 = vmatpush.msrb.mxu3 %v11635_v9  ;;  %v5590_v40 = vand.u32 4294901760, %v5589_v60 }
 0x6a4   : > { %5579 = vmatpush.msrb.mxu1 %v5578_v37  ;;  %5656 = vmatpush.msrb.mxu2 %v11682_v13  ;;  %v5601_v30 = vsub.f32 %v11743_v39, %v13983_v16  ;;  %v11767_v37 = vand.u32 4294901760, %v4516_v27  ;;  %v5596_v60 = vand.u32 4294901760, %v5595_v53 }
 0x6a5   : > { %5189 = vmatmul.f32.gmra.mxu3 %v11607_v36  ;;  %5464 = vmatpush.msrb.mxu0 %v11635_v9  ;;  %v13984_v54 = vand.u32 4294901760, %v11748_v59 }
 0x6a6   : > { %5713 = vmatpush.msrb.mxu3 %v11657_v61  ;;  %5585 = vmatpush.msrb.mxu1 %v5584_v4  ;;  %v4514_v4 = vld [vmem:[#allocation11 + $0x1e8] sm:$0xff]  ;;  %v5602_v16 = vand.u32 4294901760, %v5601_v30  ;;  %v11782_v53 = vsub.f32 %v4516_v27, %v11767_v37  ;;  %v4512_v27 = vld [vmem:[#allocation11 + $0x1d8] sm:$0xff] }
 0x6a7   : > { %5659 = vmatpush.msrb.mxu2 %v11686_v47  ;;  %5466 = vmatpush.msrb.mxu0 %v11657_v61 }
 0x6a8   : > { %5715 = vmatpush.msrb.mxu3 %v11669_v0  ;;  %5591 = vmatpush.msrb.mxu1 %v5590_v40  ;;  %v11785_v40 = vand.u32 4294901760, %v4514_v4  ;;  %v13987_v30 = vand.u32 4294901760, %v11782_v53 }
 0x6a9   : > { %4962 = vmatmul.f32.gmra.mxu0 %v11509_v25  ;;  %5297 = vmatmul.f32.vlgmr.msra.gmra.mxu1 %v5049_v62  ;;  %v5607_v25 = vsub.f32 %v11748_v59, %v13984_v54  ;;  %v11775_v62 = vand.u32 4294901760, %v4515_v5  ;;  %v4513_v54 = vld [vmem:[#allocation11 + $0x1e0] sm:$0xff] }
 0x6aa   : > { %5662 = vmatpush.msrb.mxu2 %v11702_v19  ;;  %5717 = vmatpush.msrb.mxu3 %v11677_v17 }
 0x6ab   : > { %5384 = vmatmul.f32.vlgmr.msra.gmra.mxu2 %v11477_v38  ;;  %5468 = vmatpush.msrb.mxu0 %v11669_v0  ;;  %v11790_v48 = vsub.f32 %v4515_v5, %v11775_v62  ;;  %v11802_v5 = vsub.f32 %v4514_v4, %v11785_v40 }
 0x6ac   : > { %5597 = vmatpush.msrb.mxu1 %v5596_v60  ;;  %5665 = vmatpush.msrb.mxu2 %v11717_v31  ;;  %v11797_v60 = vand.u32 4294901760, %v4513_v54 }
 0x6ad   : > { %5433 = vmatmul.f32.vlgmr.msra.gmra.mxu3 %v11477_v38  ;;  %5470 = vmatpush.msrb.mxu0 %v11677_v17  ;;  %v5608_v38 = vand.u32 4294901760, %v5607_v25  ;;  %v5951_v25 = vsub.f32 %v11782_v53, %v13987_v30  ;;  %v14601_v55 = vand.u32 4294901760, %v11802_v5 }
 0x6ae   : > { %5719 = vmatpush.msrb.mxu3 %v11688_v35  ;;  %5603 = vmatpush.msrb.mxu1 %v5602_v16  ;;  %v4511_v16 = vld [vmem:[#allocation11 + $0x1d0] sm:$0xff]  ;;  %v11816_v4 = vsub.f32 %v4513_v54, %v11797_v60 }
 0x6af   : > { %5668 = vmatpush.msrb.mxu2 %v11730_v3  ;;  %5472 = vmatpush.msrb.mxu0 %v11688_v35  ;;  %v5952_v18 = vand.u32 4294901760, %v5951_v25 }
 0x6b0   : > { %5721 = vmatpush.msrb.mxu3 %v11704_v26  ;;  %5609 = vmatpush.msrb.mxu1 %v5608_v38  ;;  %v13994_v38 = vand.u32 4294901760, %v11802_v5  ;;  %v13995_v28 = vand.u32 4294901760, %v11816_v4 }
 0x6b1   : > { %5243 = vmatmul.f32.vlgmr.msra.gmra.mxu0 %v11499_v8  ;;  %5303 = vmatmul.f32.gmra.mxu1 %v5057_v43  ;;  %v13991_v8 = vand.u32 4294901760, %v11790_v48  ;;  %v11806_v43 = vand.u32 4294901760, %v4512_v27 }
 0x6b2   : > { %5671 = vmatpush.msrb.mxu2 %v11743_v39  ;;  %5723 = vmatpush.msrb.mxu3 %v11720_v15 }
 0x6b3   : > { %5388 = vmatmul.f32.gmra.mxu2 %v11515_v49  ;;  %5474 = vmatpush.msrb.mxu0 %v11704_v26  ;;  %v5957_v30 = vsub.f32 %v11790_v48, %v13991_v8  ;;  %v11829_v54 = vsub.f32 %v4512_v27, %v11806_v43  ;;  %v4508_v8 = vld [vmem:[#allocation11 + $0x1b8] sm:$0xff]  ;;  %v4507_v27 = vld [vmem:[#allocation11 + $0x1b0] sm:$0xff] }
 0x6b4   : > { %5674 = vmatpush.msrb.mxu2 %v11748_v59  ;;  %5835 = vmatpush.msra.mxu1 %v11542_v46  ;;  %v4509_v46 = vld [vmem:[#allocation11 + $0x1c0] sm:$0xff] }
 0x6b5   : > { %5437 = vmatmul.f32.gmra.mxu3 %v11515_v49  ;;  %v11821_v49 = vand.u32 4294901760, %v4511_v16  ;;  %5476 = vmatpush.msrb.mxu0 %v11720_v15  ;;  %v11850_v25 = vand.u32 4294901760, %v4509_v46 }
 0x6b6   : > { %5725 = vmatpush.msrb.mxu3 %v11732_v57  ;;  %5837 = vmatpush.msra.mxu1 %v11555_v23  ;;  %v5958_v23 = vand.u32 4294901760, %v5957_v30  ;;  %v11862_v30 = vsub.f32 %v4510_v24, %v11837_v2 }
 0x6b7   : > { %5478 = vmatpush.msrb.mxu0 %v11732_v57  ;;  %5884 = vmatpush.msra.mxu2 %v11767_v37  ;;  %v11875_v24 = vsub.f32 %v4509_v46, %v11850_v25 }
 0x6b8   : > { %5727 = vmatpush.msrb.mxu3 %v11735_v11  ;;  %5839 = vmatpush.msra.mxu1 %v11567_v34  ;;  %v5969_v34 = vsub.f32 %v11816_v4, %v13995_v28  ;;  %14569 = vst [vmem:[#allocation33_spill] sm:$0xff] %v11862_v30 }
 0x6b9   : > { %5248 = vmatmul.f32.gmra.mxu0 %v11534_v42  ;;  %5309 = vmatmul.f32.gmra.mxu1 %v5065_v44  ;;  %v5963_v42 = vsub.f32 %v11802_v5, %v13994_v38  ;;  %v11845_v44 = vsub.f32 %v4511_v16, %v11821_v49  ;;  %v11868_v38 = vand.u32 4294901760, %v4508_v8  ;;  %14571 = vst [vmem:[#allocation44_spill] sm:$0xff] %v11875_v24 }
 0x6ba   : > { %5480 = vmatpush.msrb.mxu0 %v11735_v11  ;;  %5886 = vmatpush.msra.mxu2 %v11775_v62 }
 0x6bb   : > { %5392 = vmatmul.f32.gmra.mxu2 %v11546_v10  ;;  %5953 = vmatpush.msra.mxu3 %v5952_v18  ;;  %v13996_v16 = vand.u32 4294901760, %v11845_v44  ;;  %v14570_v18 = vand.u32 4294901760, %v11829_v54  ;;  %v11892_v46 = vsub.f32 %v4508_v8, %v11868_v38  ;;  %v14574_v8 = vand.u32 4294901760, %v11581_v6  ;;  %v4504_v6 = vld [vmem:[#allocation11 + $0x198] sm:$0xff] }
 0x6bc   : > { %5841 = vmatpush.msra.mxu1 %v11590_v41  ;;  %5756 = vmatpush.msra.mxu0 %v5516_v1  ;;  %v5482_v1 = vsub.f32 %v14568_v14, %v11854_v29  ;;  %v4506_v41 = vld [vmem:[#allocation11 + $0x1a8] sm:$0xff]  ;;  %v14573_v14 = vand.u32 4294901760, %v11565_v20  ;;  %v14575_v20 = vand.u32 4294901760, %v11862_v30 }
 0x6bd   : > { %5441 = vmatmul.f32.gmra.mxu3 %v11546_v10  ;;  %v5964_v10 = vand.u32 4294901760, %v5963_v42  ;;  %5888 = vmatpush.msra.mxu2 %v11785_v40  ;;  %v5975_v28 = vsub.f32 %v11829_v54, %v14570_v18  ;;  %v5970_v42 = vand.u32 4294901760, %v5969_v34  ;;  %v11885_v18 = vand.u32 4294901760, %v4507_v27 }
 0x6be   : > { %5959 = vmatpush.msra.mxu3 %v5958_v23  ;;  %5843 = vmatpush.msra.mxu1 %v11603_v21  ;;  %v4505_v23 = vld [vmem:[#allocation11 + $0x1a0] sm:$0xff] }
 0x6bf   : > { %5890 = vmatpush.msra.mxu2 %v11797_v60  ;;  %5760 = vmatpush.msra.mxu0 %v14573_v14  ;;  %v5976_v21 = vand.u32 4294901760, %v5975_v28  ;;  %v5987_v14 = vsub.f32 %v11862_v30, %v14575_v20  ;;  %v14576_v28 = vld [vmem:[#allocation19_spill] sm:$0xff]  ;;  %v11916_v34 = vand.u32 4294901760, %v4505_v23 }
 0x6c0   : > { %5965 = vmatpush.msra.mxu3 %v5964_v10  ;;  %5845 = vmatpush.msra.mxu1 %v11605_v32  ;;  %v5483_v10 = vand.u32 4294901760, %v5482_v1  ;;  %v11908_v32 = vsub.f32 %v4507_v27, %v11885_v18  ;;  %v14578_v27 = vand.u32 4294901760, %v11875_v24 }
 0x6c1   : > { %5253 = vmatmul.f32.gmra.mxu0 %v11572_v58  ;;  %5315 = vmatmul.f32.gmra.mxu1 %v14572_v12  ;;  %v5981_v58 = vsub.f32 %v11845_v44, %v13996_v16  ;;  %v11898_v12 = vand.u32 4294901760, %v4506_v41  ;;  %v11911_v16 = vand.u32 4294901760, %v14576_v28 }
 0x6c2   : > { %5892 = vmatpush.msra.mxu2 %v11806_v43  ;;  %5971 = vmatpush.msra.mxu3 %v5970_v42  ;;  %v14001_v42 = vand.u32 4294901760, %v11892_v46  ;;  %v5993_v20 = vsub.f32 %v11875_v24, %v14578_v27  ;;  %v11939_v27 = vsub.f32 %v4505_v23, %v11916_v34  ;;  %v14579_v24 = vand.u32 4294901760, %v11616_v51 }
 0x6c3   : > { %5396 = vmatmul.f32.gmra.mxu2 %v11607_v36  ;;  %5764 = vmatpush.msra.mxu0 %v14574_v8  ;;  %v14577_v8 = vand.u32 4294901760, %v11601_v45  ;;  %v11924_v30 = vsub.f32 %v4506_v41, %v11898_v12  ;;  %v5490_v41 = vsub.f32 %v14576_v28, %v11911_v16  ;;  %v14580_v23 = vand.u32 4294901760, %v11621_v33 }
 0x6c4   : > { %5847 = vmatpush.msra.mxu1 %v11623_v56  ;;  %5894 = vmatpush.msra.mxu2 %v11821_v49  ;;  %v5484_v56 = vsub.f32 %v5482_v1, %v5483_v10  ;;  %v14581_v51 = vand.u32 4294901760, %v11908_v32  ;;  %v6016_v33 = vand.u32 4294901760, %v11939_v27 }
 0x6c5   : > { %5445 = vmatmul.f32.gmra.mxu3 %v11607_v36  ;;  %v5982_v36 = vand.u32 4294901760, %v5981_v58  ;;  %5768 = vmatpush.msra.mxu0 %v14577_v8  ;;  %v4503_v58 = vld [vmem:[#allocation11 + $0x190] sm:$0xff]  ;;  %v11931_v8 = vand.u32 4294901760, %v4504_v6 }
 0x6c6   : > { %5977 = vmatpush.msra.mxu3 %v5976_v21  ;;  %5849 = vmatpush.msra.mxu1 %v11635_v9  ;;  %v5988_v21 = vand.u32 4294901760, %v5987_v14  ;;  %v4502_v9 = vld [vmem:[#allocation11 + $0x188] sm:$0xff]  ;;  %v5994_v14 = vand.u32 4294901760, %v5993_v20  ;;  %v11945_v45 = vand.u32 4294901760, %v4503_v58  ;;  %v5485_v28 = vand.u32 4294901760, %v5484_v56 }
 0x6c7   : > { %5896 = vmatpush.msra.mxu2 %v11837_v2  ;;  %5772 = vmatpush.msra.mxu0 %v14579_v24  ;;  %v11955_v24 = vsub.f32 %v4504_v6, %v11931_v8  ;;  %v11957_v20 = vand.u32 4294901760, %v4502_v9  ;;  %v14582_v56 = vld [vmem:[#allocation52_spill] sm:$0xff] }
 0x6c8   : > { %5983 = vmatpush.msra.mxu3 %v5982_v36  ;;  %5851 = vmatpush.msra.mxu1 %v11657_v61  ;;  %v4501_v36 = vld [vmem:[#allocation11 + $0x180] sm:$0xff]  ;;  %v6005_v61 = vsub.f32 %v11908_v32, %v14581_v51 }
 0x6c9   : > { %5258 = vmatmul.f32.gmra.mxu0 %v11641_v7  ;;  %5611 = vmatmul.f32.vlgmr.msrb.gmra.mxu1 %v11854_v29  ;;  %v5999_v7 = vsub.f32 %v11892_v46, %v14001_v42  ;;  %v11960_v42 = vand.u32 4294901760, %v14582_v56  ;;  %v11973_v51 = vand.u32 4294901760, %v4501_v36 }
 0x6ca   : > { %5898 = vmatpush.msra.mxu2 %v11850_v25  ;;  %5989 = vmatpush.msra.mxu3 %v5988_v21  ;;  %v14583_v21 = vand.u32 4294901760, %v11633_v50  ;;  %v6022_v50 = vand.u32 4294901760, %v11955_v24 }
 0x6cb   : > { %5677 = vmatmul.f32.vlgmr.msrb.gmra.mxu2 %v5482_v1  ;;  %v14002_v1 = vand.u32 4294901760, %v11924_v30  ;;  %5776 = vmatpush.msra.mxu0 %v14580_v23  ;;  %v6000_v22 = vand.u32 4294901760, %v5999_v7  ;;  %v11971_v23 = vsub.f32 %v4503_v58, %v11945_v45  ;;  %v11980_v7 = vsub.f32 %v4502_v9, %v11957_v20 }
 0x6cc   : > { %5853 = vmatpush.msra.mxu1 %v11669_v0  ;;  %5900 = vmatpush.msra.mxu2 %v11868_v38  ;;  %v6006_v0 = vand.u32 4294901760, %v6005_v61  ;;  %v5498_v58 = vsub.f32 %v14582_v56, %v11960_v42 }
 0x6cd   : > { %5731 = vmatmul.f32.vlgmr.msrb.gmra.mxu3 %v5483_v10  ;;  %v5491_v10 = vand.u32 4294901760, %v5490_v41  ;;  %5780 = vmatpush.msra.mxu0 %v14583_v21  ;;  %v6011_v6 = vsub.f32 %v11924_v30, %v14002_v1  ;;  %v9050_v21 = vpop.eup %9049  ;;  %v6028_v9 = vand.u32 4294901760, %v11971_v23  ;;  %v11992_v1 = vsub.f32 %v4501_v36, %v11973_v51 }
 0x6ce   : > { %5995 = vmatpush.msra.mxu3 %v5994_v14  ;;  %5855 = vmatpush.msra.mxu1 %v11677_v17  ;;  %v14584_v17 = vand.u32 4294901760, %v11654_v63  ;;  %v6023_v63 = vsub.f32 %v11955_v24, %v6022_v50  ;;  %v6034_v56 = vand.u32 4294901760, %v11980_v7 }
 0x6cf   : > { %5902 = vmatpush.msra.mxu2 %v11885_v18  ;;  %v5492_v14 = vsub.f32 %v5490_v41, %v5491_v10  ;;  %v6012_v61 = vand.u32 4294901760, %v6011_v6  ;;  %v12001_v6 = vand.u32 4294901760, %v9050_v21 }
 0x6d0   : > { %6001 = vmatpush.msra.mxu3 %v6000_v22  ;;  %5784 = vmatpush.msra.mxu0 %v14584_v17  ;;  %v5499_v22 = vand.u32 4294901760, %v5498_v58  ;;  %v14587_v17 = vld [vmem:[#allocation170_spill] sm:$0xff] }
 0x6d1   : > { %5486 = vmatmul.f32.vlgmr.msrb.gmra.mxu0 %v5485_v28  ;;  %5615 = vmatmul.f32.gmra.mxu1 %v11911_v16  ;;  %v6017_v28 = vsub.f32 %v11939_v27, %v6016_v33 }
 0x6d2   : > { %5857 = vmatpush.msra.mxu1 %v11688_v35  ;;  %5904 = vmatpush.msra.mxu2 %v11898_v12  ;;  %v5493_v35 = vand.u32 4294901760, %v5492_v14  ;;  %v12012_v14 = vand.u32 4294901760, %v14587_v17 }
 0x6d3   : > { %5682 = vmatmul.f32.gmra.mxu2 %v5490_v41  ;;  %6007 = vmatpush.msra.mxu3 %v6006_v0  ;;  %v14585_v41 = vand.u32 4294901760, %v11667_v52  ;;  %v6018_v36 = vand.u32 4294901760, %v6017_v28  ;;  %v6029_v52 = vsub.f32 %v11971_v23, %v6028_v9  ;;  %v6040_v0 = vand.u32 4294901760, %v11992_v1 }
 0x6d4   : > { %5859 = vmatpush.msra.mxu1 %v11704_v26  ;;  %5906 = vmatpush.msra.mxu2 %v11916_v34  ;;  %v6024_v26 = vand.u32 4294901760, %v6023_v63  ;;  %v5500_v28 = vsub.f32 %v5498_v58, %v5499_v22  ;;  %v12030_v63 = vsub.f32 %v14587_v17, %v12012_v14  ;;  %v12043_v17 = vpop.f32.mrf.mxu1 }
 0x6d5   : > { %5737 = vmatmul.f32.gmra.mxu3 %v5491_v10  ;;  %5788 = vmatpush.msra.mxu0 %v14585_v41  ;;  %v14586_v10 = vand.u32 4294901760, %v11682_v13  ;;  %v6035_v13 = vsub.f32 %v11980_v7, %v6034_v56  ;;  %v14588_v41 = vand.u32 4294901760, %v11686_v47  ;;  %14592 = vst [vmem:[#allocation53_spill] sm:$0xff] %v12043_v17 }
 0x6d6   : > { %6013 = vmatpush.msra.mxu3 %v6012_v61  ;;  %5861 = vmatpush.msra.mxu1 %v11720_v15  ;;  %v5506_v61 = vsub.f32 %v9050_v21, %v12001_v6  ;;  %v6041_v15 = vsub.f32 %v11992_v1, %v6040_v0  ;;  %v5501_v21 = vand.u32 4294901760, %v5500_v28  ;;  %v14594_v28 = vand.u32 4294901760, %v11782_v53 }
 0x6d7   : > { %5792 = vmatpush.msra.mxu0 %v14586_v10  ;;  %5908 = vmatpush.msra.mxu2 %v11931_v8  ;;  %v6036_v47 = vand.u32 4294901760, %v6035_v13  ;;  %v5917_v10 = vand.u32 4294901760, %v12030_v63 }
 0x6d8   : > { %6019 = vmatpush.msra.mxu3 %v6018_v36  ;;  %5863 = vmatpush.msra.mxu1 %v11732_v57  ;;  %v5507_v36 = vand.u32 4294901760, %v5506_v61  ;;  %v14590_v57 = vand.u32 4294901760, %v11717_v31  ;;  %v14593_v31 = vand.u32 4294901760, %v11730_v3 }
 0x6d9   : > { %5494 = vmatmul.f32.gmra.mxu0 %v5493_v35  ;;  %5619 = vmatmul.f32.gmra.mxu1 %v11960_v42  ;;  %v6030_v35 = vand.u32 4294901760, %v6029_v52  ;;  %v14591_v52 = vld [vmem:[#allocation22_spill] sm:$0xff] }
 0x6da   : > { %5796 = vmatpush.msra.mxu0 %v14588_v41  ;;  %5910 = vmatpush.msra.mxu2 %v11945_v45  ;;  %v14596_v41 = vand.u32 4294901760, %v11790_v48 }
 0x6db   : > { %5687 = vmatmul.f32.gmra.mxu2 %v5498_v58  ;;  %6025 = vmatpush.msra.mxu3 %v6024_v26  ;;  %v14589_v58 = vand.u32 4294901760, %v11702_v19  ;;  %v12041_v19 = vand.u32 4294901760, %v14591_v52  ;;  %v5918_v26 = vsub.f32 %v12030_v63, %v5917_v10 }
 0x6dc   : > { %5865 = vmatpush.msra.mxu1 %v11735_v11  ;;  %5912 = vmatpush.msra.mxu2 %v11957_v20  ;;  %v5508_v11 = vsub.f32 %v5506_v61, %v5507_v36 }
 0x6dd   : > { %5743 = vmatmul.f32.gmra.mxu3 %v5499_v22  ;;  %5800 = vmatpush.msra.mxu0 %v14589_v58  ;;  %v6042_v22 = vand.u32 4294901760, %v6041_v15  ;;  %v12055_v13 = vsub.f32 %v14591_v52, %v12041_v19  ;;  %v12068_v15 = vpop.f32.mrf.mxu0  ;;  %v9052_v52 = vpop.eup %9051 }
 0x6de   : > { %6031 = vmatpush.msra.mxu3 %v6030_v35  ;;  %5914 = vmatpush.msra.mxu2 %v11973_v51  ;;  %v5509_v3 = vand.u32 4294901760, %v5508_v11  ;;  %v14597_v35 = vand.u32 4294901760, %v11748_v59  ;;  %14598 = vst [vmem:[#allocation77_spill] sm:$0xff] %v12068_v15  ;;  %v12081_v59 = vpop.f32.mrf.mxu3  ;;  %v12104_v11 = vand.u32 4294901760, %v9052_v52 }
 0x6df   : > { %5804 = vmatpush.msra.mxu0 %v14590_v57  ;;  %6131 = vmatpush.msrb.mxu1 %v11767_v37  ;;  %v5925_v58 = vand.u32 4294901760, %v12055_v13  ;;  %14602 = vst [vmem:[#allocation45_spill] sm:$0xff] %v12081_v59  ;;  %v14604_v57 = vand.u32 4294901760, %v11816_v4 }
 0x6e0   : > { %6037 = vmatpush.msra.mxu3 %v6036_v47  ;;  %6190 = vmatpush.msrb.mxu2 %v14594_v28  ;;  %v14599_v47 = vld [vmem:[#allocation62_spill] sm:$0xff] }
 0x6e1   : > { %5502 = vmatmul.f32.gmra.mxu0 %v5501_v21  ;;  %5623 = vmatmul.f32.gmra.mxu1 %v12001_v6  ;;  %v12073_v21 = vand.u32 4294901760, %v14599_v47 }
 0x6e2   : > { %5808 = vmatpush.msra.mxu0 %v14593_v31  ;;  %6043 = vmatpush.msra.mxu3 %v6042_v22  ;;  %v5926_v22 = vsub.f32 %v12055_v13, %v5925_v58 }
 0x6e3   : > { %5692 = vmatmul.f32.gmra.mxu2 %v5506_v61  ;;  %6133 = vmatpush.msrb.mxu1 %v11775_v62  ;;  %v14595_v61 = vand.u32 4294901760, %v11743_v39  ;;  %v5919_v39 = vand.u32 4294901760, %v5918_v26 }
 0x6e4   : > { %6269 = vmatpush.msrb.mxu3 %v11767_v37  ;;  %6194 = vmatpush.msrb.mxu2 %v14596_v41  ;;  %v12075_v37 = vpop.f32.mrf.mxu2  ;;  %v5927_v31 = vand.u32 4294901760, %v5926_v22  ;;  %v14613_v41 = vld [vmem:[#allocation44_spill] sm:$0xff]  ;;  %v14617_v22 = vand.u32 4294901760, %v11908_v32 }
 0x6e5   : > { %5749 = vmatmul.f32.gmra.mxu3 %v5507_v36  ;;  %5812 = vmatpush.msra.mxu0 %v14595_v61  ;;  %14600 = vst [vmem:[#allocation34_spill] sm:$0xff] %v12075_v37  ;;  %v12083_v36 = vpop.f32.mrf.mxu1  ;;  %v12112_v26 = vpop.f32.mrf.mxu0  ;;  %v12126_v61 = vsub.f32 %v9052_v52, %v12104_v11 }
 0x6e6   : > { %6135 = vmatpush.msrb.mxu1 %v11785_v40  ;;  %6198 = vmatpush.msrb.mxu2 %v14601_v55  ;;  %14603 = vst [vmem:[#allocation54_spill] sm:$0xff] %v12083_v36 }
 0x6e7   : > { %5816 = vmatpush.msra.mxu0 %v14597_v35  ;;  %6271 = vmatpush.msrb.mxu3 %v11775_v62  ;;  %v12095_v62 = vsub.f32 %v14599_v47, %v12073_v21  ;;  %14607 = vst [vmem:[#allocation59_spill] sm:$0xff] %v12112_v26  ;;  %v14614_v35 = vand.u32 4294901760, %v14613_v41 }
 0x6e8   : > { %6137 = vmatpush.msrb.mxu1 %v11797_v60  ;;  %6202 = vmatpush.msrb.mxu2 %v14604_v57  ;;  %v4530_v57 = vld [vmem:[#allocation11 + $0x268] sm:$0xff] }
 0x6e9   : > { %5510 = vmatmul.f32.gmra.mxu0 %v5509_v3  ;;  %5867 = vmatmul.f32.vlgmr.msra.gmra.mxu1 %v11854_v29  ;;  %v12128_v3 = vpop.f32.mrf.mxu3 }
 0x6ea   : > { %6063 = vmatpush.msrb.mxu0 %v11782_v53  ;;  %6139 = vmatpush.msrb.mxu1 %v11806_v43  ;;  %v14605_v53 = vand.u32 4294901760, %v11829_v54  ;;  %14611 = vst [vmem:[#allocation60_spill] sm:$0xff] %v12128_v3 }
 0x6eb   : > { %5920 = vmatmul.f32.vlgmr.msra.gmra.mxu2 %v5919_v39  ;;  %6273 = vmatpush.msrb.mxu3 %v11785_v40  ;;  %v14010_v40 = vand.u32 4294901760, %v12095_v62  ;;  %v4531_v39 = vld [vmem:[#allocation11 + $0x270] sm:$0xff] }
 0x6ec   : > { %6066 = vmatpush.msrb.mxu0 %v11790_v48  ;;  %6141 = vmatpush.msrb.mxu1 %v11821_v49  ;;  %v14606_v48 = vand.u32 4294901760, %v11845_v44 }
 0x6ed   : > { %6045 = vmatmul.f32.vlgmr.msra.gmra.mxu3 %v12012_v14  ;;  %6206 = vmatpush.msrb.mxu2 %v14605_v53  ;;  %v5934_v28 = vsub.f32 %v12095_v62, %v14010_v40  ;;  %v12163_v53 = vand.u32 4294901760, %v4530_v57 }
 0x6ee   : > { %6275 = vmatpush.msrb.mxu3 %v11797_v60  ;;  %6069 = vmatpush.msrb.mxu0 %v11802_v5  ;;  %v12115_v60 = vpop.f32.mrf.mxu2 }
 0x6ef   : > { %6143 = vmatpush.msrb.mxu1 %v11837_v2  ;;  %6210 = vmatpush.msrb.mxu2 %v14606_v48  ;;  %14608 = vst [vmem:[#allocation79_spill] sm:$0xff] %v12115_v60  ;;  %v5935_v47 = vand.u32 4294901760, %v5934_v28 }
 0x6f0   : > { %6277 = vmatpush.msrb.mxu3 %v11806_v43  ;;  %6072 = vmatpush.msrb.mxu0 %v11816_v4  ;;  %v12130_v43 = vpop.f32.mrf.mxu1  ;;  %v4532_v4 = vld [vmem:[#allocation11 + $0x278] sm:$0xff] }
 0x6f1   : > { %5818 = vmatmul.f32.vlgmr.msra.gmra.mxu0 %v11854_v29  ;;  %5871 = vmatmul.f32.gmra.mxu1 %v11911_v16  ;;  %v14609_v29 = vld [vmem:[#allocation33_spill] sm:$0xff]  ;;  %14612 = vst [vmem:[#allocation80_spill] sm:$0xff] %v12130_v43  ;;  %v12142_v55 = vand.u32 4294901760, %v4532_v4 }
 0x6f2   : > { %6145 = vmatpush.msrb.mxu1 %v11850_v25  ;;  %v14610_v5 = vand.u32 4294901760, %v14609_v29  ;;  %6279 = vmatpush.msrb.mxu3 %v11821_v49  ;;  %v14008_v49 = vand.u32 4294901760, %v12126_v61 }
 0x6f3   : > { %5928 = vmatmul.f32.gmra.mxu2 %v5927_v31  ;;  %6075 = vmatpush.msrb.mxu0 %v11829_v54  ;;  %v14615_v54 = vand.u32 4294901760, %v11892_v46 }
 0x6f4   : > { %6214 = vmatpush.msrb.mxu2 %v14610_v5  ;;  %6147 = vmatpush.msrb.mxu1 %v11868_v38  ;;  %v5942_v52 = vsub.f32 %v12126_v61, %v14008_v49 }
 0x6f5   : > { %6049 = vmatmul.f32.gmra.mxu3 %v12041_v19  ;;  %6078 = vmatpush.msrb.mxu0 %v11845_v44  ;;  %v4529_v44 = vld [vmem:[#allocation11 + $0x260] sm:$0xff] }
 0x6f6   : > { %6218 = vmatpush.msrb.mxu2 %v14614_v35  ;;  %6281 = vmatpush.msrb.mxu3 %v11837_v2  ;;  %v12148_v2 = vand.u32 4294901760, %v4531_v39  ;;  %v12165_v31 = vpop.f32.mrf.mxu2  ;;  %v12177_v28 = vand.u32 4294901760, %v4529_v44  ;;  %v12179_v35 = vpop.f32.mrf.mxu3 }
 0x6f7   : > { %6149 = vmatpush.msrb.mxu1 %v11885_v18  ;;  %6081 = vmatpush.msrb.mxu0 %v14609_v29  ;;  %14618 = vst [vmem:[#allocation124_spill] sm:$0xff] %v12165_v31  ;;  %v14620_v29 = vand.u32 4294901760, %v11924_v30 }
 0x6f8   : > { %6222 = vmatpush.msrb.mxu2 %v14615_v54  ;;  %6283 = vmatpush.msrb.mxu3 %v11850_v25  ;;  %v12161_v25 = vsub.f32 %v4532_v4, %v12142_v55  ;;  %v12175_v5 = vsub.f32 %v4531_v39, %v12148_v2  ;;  %v4528_v4 = vld [vmem:[#allocation11 + $0x258] sm:$0xff]  ;;  %14621 = vst [vmem:[#allocation126_spill] sm:$0xff] %v12179_v35  ;;  %v4527_v39 = vld [vmem:[#allocation11 + $0x250] sm:$0xff] }
 0x6f9   : > { %5822 = vmatmul.f32.gmra.mxu0 %v11911_v16  ;;  %5875 = vmatmul.f32.gmra.mxu1 %v11960_v42  ;;  %v12152_v16 = vpop.f32.mrf.mxu0  ;;  %v12192_v54 = vand.u32 4294901760, %v4528_v4 }
 0x6fa   : > { %6151 = vmatpush.msrb.mxu1 %v11898_v12  ;;  %14616 = vst [vmem:[#allocation123_spill] sm:$0xff] %v12152_v16  ;;  %6226 = vmatpush.msrb.mxu2 %v14617_v22 }
 0x6fb   : > { %5936 = vmatmul.f32.gmra.mxu2 %v5935_v47  ;;  %6285 = vmatpush.msrb.mxu3 %v11868_v38  ;;  %v5943_v38 = vand.u32 4294901760, %v5942_v52  ;;  %v12187_v47 = vsub.f32 %v4530_v57, %v12163_v53  ;;  %v4526_v57 = vld [vmem:[#allocation11 + $0x248] sm:$0xff]  ;;  %v12217_v22 = vsub.f32 %v4528_v4, %v12192_v54 }
 0x6fc   : > { %6084 = vmatpush.msrb.mxu0 %v14613_v41  ;;  %6153 = vmatpush.msrb.mxu1 %v11916_v34  ;;  %v14004_v41 = vand.u32 4294901760, %v12161_v25 }
 0x6fd   : > { %6053 = vmatmul.f32.gmra.mxu3 %v12073_v21  ;;  %6230 = vmatpush.msrb.mxu2 %v14620_v29  ;;  %v12228_v29 = vand.u32 4294901760, %v4526_v57 }
 0x6fe   : > { %v12167_v48 = vpop.f32.mrf.mxu1  ;;  %6287 = vmatpush.msrb.mxu3 %v11885_v18  ;;  %6087 = vmatpush.msrb.mxu0 %v11892_v46  ;;  %v14003_v18 = vand.u32 4294901760, %v12175_v5  ;;  %v12197_v46 = vsub.f32 %v4529_v44, %v12177_v28 }
 0x6ff   : > { %14619 = vst [vmem:[#allocation125_spill] sm:$0xff] %v12167_v48  ;;  %6155 = vmatpush.msrb.mxu1 %v11931_v8  ;;  %6234 = vmatpush.msrb.mxu2 %v6016_v33  ;;  %v14005_v33 = vand.u32 4294901760, %v12187_v47 }
 0x700   : > { %6289 = vmatpush.msrb.mxu3 %v11898_v12  ;;  %6090 = vmatpush.msrb.mxu0 %v11908_v32  ;;  %v6385_v12 = vsub.f32 %v12161_v25, %v14004_v41 }
 0x701   : > { %5826 = vmatmul.f32.gmra.mxu0 %v11960_v42  ;;  %5879 = vmatmul.f32.gmra.mxu1 %v12001_v6  ;;  %v12201_v42 = vand.u32 4294901760, %v4527_v39 }
 0x702   : > { %6157 = vmatpush.msrb.mxu1 %v11945_v45  ;;  %6238 = vmatpush.msrb.mxu2 %v6022_v50  ;;  %v4525_v50 = vld [vmem:[#allocation11 + $0x240] sm:$0xff] }
 0x703   : > { %5944 = vmatmul.f32.gmra.mxu2 %v5943_v38  ;;  %6291 = vmatpush.msrb.mxu3 %v11916_v34  ;;  %v6391_v34 = vsub.f32 %v12175_v5, %v14003_v18  ;;  %v12235_v38 = vsub.f32 %v4527_v39, %v12201_v42  ;;  %v6397_v18 = vsub.f32 %v12187_v47, %v14005_v33  ;;  %v12243_v41 = vand.u32 4294901760, %v4525_v50  ;;  %v4523_v33 = vld [vmem:[#allocation11 + $0x230] sm:$0xff] }
 0x704   : > { %6093 = vmatpush.msrb.mxu0 %v11924_v30  ;;  %6159 = vmatpush.msrb.mxu1 %v11957_v20  ;;  %v14007_v30 = vand.u32 4294901760, %v12197_v46 }
 0x705   : > { %6057 = vmatmul.f32.gmra.mxu3 %v12104_v11  ;;  %6242 = vmatpush.msrb.mxu2 %v6028_v9  ;;  %v6386_v9 = vand.u32 4294901760, %v6385_v12  ;;  %v12255_v12 = vsub.f32 %v4526_v57, %v12228_v29 }
 0x706   : > { %v12212_v32 = vpop.f32.mrf.mxu0  ;;  %v12214_v44 = vpop.f32.mrf.mxu2  ;;  %6293 = vmatpush.msrb.mxu3 %v11931_v8  ;;  %6096 = vmatpush.msrb.mxu0 %v11939_v27  ;;  %v4524_v8 = vld [vmem:[#allocation11 + $0x238] sm:$0xff]  ;;  %v14006_v27 = vand.u32 4294901760, %v12217_v22  ;;  %v6403_v39 = vsub.f32 %v12197_v46, %v14007_v30 }
 0x707   : > { %14622 = vst [vmem:[#allocation127_spill] sm:$0xff] %v12212_v32  ;;  %v12219_v52 = vpop.f32.mrf.mxu1  ;;  %6161 = vmatpush.msrb.mxu1 %v11973_v51  ;;  %6246 = vmatpush.msrb.mxu2 %v6034_v56  ;;  %v6392_v56 = vand.u32 4294901760, %v6391_v34  ;;  %v12276_v34 = vand.u32 4294901760, %v4523_v33 }
 0x708   : > { %14623 = vst [vmem:[#allocation128_spill] sm:$0xff] %v12214_v44  ;;  %v12232_v4 = vpop.f32.mrf.mxu3  ;;  %6295 = vmatpush.msrb.mxu3 %v11945_v45  ;;  %6099 = vmatpush.msrb.mxu0 %v11955_v24  ;;  %v14009_v45 = vand.u32 4294901760, %v12235_v38  ;;  %v12261_v24 = vand.u32 4294901760, %v4524_v8 }
 0x709   : > { %14624 = vst [vmem:[#allocation129_spill] sm:$0xff] %v12219_v52  ;;  %5830 = vmatmul.f32.gmra.mxu0 %v12001_v6  ;;  %6165 = vmatmul.f32.vlgmr.msrb.gmra.mxu1 %v5917_v10  ;;  %v6398_v6 = vand.u32 4294901760, %v6397_v18  ;;  %v12265_v10 = vsub.f32 %v4525_v50, %v12243_v41  ;;  %v6404_v18 = vand.u32 4294901760, %v6403_v39  ;;  %v14011_v50 = vand.u32 4294901760, %v12255_v12  ;;  %v4541_v52 = vld [vmem:[#allocation11 + $0x2c0] sm:$0xff] }
 0x70a   : > { %14625 = vst [vmem:[#allocation130_spill] sm:$0xff] %v12232_v4  ;;  %6250 = vmatpush.msrb.mxu2 %v6040_v0  ;;  %6297 = vmatpush.msrb.mxu3 %v11957_v20  ;;  %v6409_v20 = vsub.f32 %v12217_v22, %v14006_v27  ;;  %v6415_v27 = vsub.f32 %v12235_v38, %v14009_v45  ;;  %v4520_v45 = vld [vmem:[#allocation11 + $0x218] sm:$0xff]  ;;  %v12521_v37 = vand.u32 4294901760, %v4541_v52 }
 0x70b   : > { %6387 = vmatpush.msra.mxu1 %v6386_v9  ;;  %6102 = vmatpush.msrb.mxu0 %v11971_v23  ;;  %v4522_v9 = vld [vmem:[#allocation11 + $0x228] sm:$0xff]  ;;  %v12290_v30 = vsub.f32 %v4524_v8, %v12261_v24  ;;  %v14012_v39 = vand.u32 4294901760, %v12265_v10  ;;  %v6421_v8 = vsub.f32 %v12255_v12, %v14011_v50 }
 0x70c   : > { %6252 = vmatmul.f32.vlgmr.msrb.gmra.mxu2 %v12012_v14  ;;  %6299 = vmatpush.msrb.mxu3 %v11973_v51  ;;  %v12294_v49 = vand.u32 4294901760, %v4522_v9  ;;  %v6416_v40 = vand.u32 4294901760, %v6415_v27 }
 0x70d   : > { %6393 = vmatpush.msra.mxu1 %v6392_v56  ;;  %6497 = vmatpush.msra.mxu2 %v12161_v25  ;;  %v4521_v56 = vld [vmem:[#allocation11 + $0x220] sm:$0xff]  ;;  %v14634_v4 = vand.u32 4294901760, %v12290_v30 }
 0x70e   : > { %v12269_v57 = vpop.f32.mrf.mxu0  ;;  %v12271_v0 = vpop.f32.mrf.mxu2  ;;  %6105 = vmatpush.msrb.mxu0 %v11980_v7  ;;  %6301 = vmatmul.f32.vlgmr.msrb.gmra.mxu3 %v12012_v14  ;;  %v6410_v7 = vand.u32 4294901760, %v6409_v20  ;;  %v12299_v14 = vsub.f32 %v4523_v33, %v12276_v34  ;;  %v6427_v33 = vsub.f32 %v12265_v10, %v14012_v39  ;;  %v12317_v20 = vsub.f32 %v4522_v9, %v12294_v49 }
 0x70f   : > { %14626 = vst [vmem:[#allocation131_spill] sm:$0xff] %v12269_v57  ;;  %v12279_v23 = vpop.f32.mrf.mxu1  ;;  %6399 = vmatpush.msra.mxu1 %v6398_v6  ;;  %6500 = vmatpush.msra.mxu2 %v12175_v5  ;;  %v12305_v6 = vand.u32 4294901760, %v4521_v56  ;;  %v6422_v9 = vand.u32 4294901760, %v6421_v8  ;;  %v6433_v50 = vsub.f32 %v12290_v30, %v14634_v4 }
 0x710   : > { %14627 = vst [vmem:[#allocation132_spill] sm:$0xff] %v12271_v0  ;;  %v12284_v51 = vpop.f32.mrf.mxu3  ;;  %6565 = vmatpush.msra.mxu3 %v12142_v55  ;;  %6108 = vmatpush.msrb.mxu0 %v11992_v1  ;;  %v6428_v8 = vand.u32 4294901760, %v6427_v33  ;;  %v14659_v0 = vld [vmem:[#allocation42_spill] sm:$0xff] }
 0x711   : > { %14628 = vst [vmem:[#allocation133_spill] sm:$0xff] %v12279_v23  ;;  %6405 = vmatpush.msra.mxu1 %v6404_v18  ;;  %6503 = vmatpush.msra.mxu2 %v12187_v47  ;;  %v4519_v18 = vld [vmem:[#allocation11 + $0x210] sm:$0xff]  ;;  %v12332_v1 = vsub.f32 %v4521_v56, %v12305_v6  ;;  %v12496_v3 = vand.u32 4294901760, %v14659_v0 }
 0x712   : > { %14629 = vst [vmem:[#allocation134_spill] sm:$0xff] %v12284_v51  ;;  %6567 = vmatpush.msra.mxu3 %v12148_v2  ;;  %6111 = vmatmul.f32.vlgmr.msrb.gmra.mxu0 %v12030_v63  ;;  %v12340_v44 = vand.u32 4294901760, %v4519_v18 }
 0x713   : > { %6171 = vmatmul.f32.gmra.mxu1 %v5925_v58  ;;  %6318 = vmatpush.msra.mxu0 %v12142_v55  ;;  %v12325_v58 = vand.u32 4294901760, %v4520_v45 }
 0x714   : > { %6411 = vmatpush.msra.mxu1 %v6410_v7  ;;  %6506 = vmatpush.msra.mxu2 %v12197_v46  ;;  %v12360_v56 = vsub.f32 %v4519_v18, %v12340_v44 }
 0x715   : > { %6569 = vmatpush.msra.mxu3 %v12163_v53  ;;  %6256 = vmatmul.f32.gmra.mxu2 %v12041_v19  ;;  %v12351_v4 = vsub.f32 %v4520_v45, %v12325_v58  ;;  %v14636_v45 = vand.u32 4294901760, %v12317_v20 }
 0x716   : > { %v12320_v63 = vpop.f32.mrf.mxu0  ;;  %v12322_v27 = vpop.f32.mrf.mxu2  ;;  %6320 = vmatpush.msra.mxu0 %v12148_v2  ;;  %6417 = vmatpush.msra.mxu1 %v6416_v40  ;;  %v14635_v40 = vand.u32 4294901760, %v12299_v14 }
 0x717   : > { %14630 = vst [vmem:[#allocation135_spill] sm:$0xff] %v12320_v63  ;;  %v12329_v39 = vpop.f32.mrf.mxu1  ;;  %6509 = vmatpush.msra.mxu2 %v12217_v22  ;;  %6571 = vmatpush.msra.mxu3 %v12177_v28  ;;  %v4544_v63 = vld [vmem:[#allocation11 + $0x2d8] sm:$0xff] }
 0x718   : > { %14631 = vst [vmem:[#allocation136_spill] sm:$0xff] %v12322_v27  ;;  %v12335_v7 = vpop.f32.mrf.mxu3  ;;  %v4518_v27 = vld [vmem:[#allocation11 + $0x208] sm:$0xff]  ;;  %6305 = vmatmul.f32.gmra.mxu3 %v12041_v19  ;;  %6322 = vmatpush.msra.mxu0 %v12163_v53  ;;  %v6434_v19 = vand.u32 4294901760, %v6433_v50 }
 0x719   : > { %14632 = vst [vmem:[#allocation137_spill] sm:$0xff] %v12329_v39  ;;  %v6439_v39 = vsub.f32 %v12299_v14, %v14635_v40  ;;  %6423 = vmatpush.msra.mxu1 %v6422_v9  ;;  %6512 = vmatpush.msra.mxu2 %v12235_v38  ;;  %v12355_v33 = vand.u32 4294901760, %v4518_v27  ;;  %v6445_v9 = vsub.f32 %v12317_v20, %v14636_v45  ;;  %v14641_v45 = vand.u32 4294901760, %v12332_v1 }
 0x71a   : > { %14633 = vst [vmem:[#allocation138_spill] sm:$0xff] %v12335_v7  ;;  %v4517_v7 = vld [vmem:[#allocation11 + $0x200] sm:$0xff]  ;;  %6573 = vmatpush.msra.mxu3 %v12192_v54  ;;  %6324 = vmatpush.msra.mxu0 %v12177_v28 }
 0x71b   : > { %6429 = vmatpush.msra.mxu1 %v6428_v8  ;;  %6515 = vmatpush.msra.mxu2 %v12255_v12  ;;  %v12366_v40 = vand.u32 4294901760, %v4517_v7  ;;  %v6440_v48 = vand.u32 4294901760, %v6439_v39  ;;  %v14639_v8 = vand.u32 4294901760, %v12095_v62  ;;  %v6451_v23 = vsub.f32 %v12332_v1, %v14641_v45 }
 0x71c   : > { %6575 = vmatpush.msra.mxu3 %v12201_v42  ;;  %6116 = vmatmul.f32.gmra.mxu0 %v12055_v13  ;;  %v12384_v13 = vsub.f32 %v4518_v27, %v12355_v33  ;;  %v14643_v27 = vand.u32 4294901760, %v12351_v4 }
 0x71d   : > { %6177 = vmatmul.f32.gmra.mxu1 %v14639_v8  ;;  %6326 = vmatpush.msra.mxu0 %v12192_v54  ;;  %v6446_v8 = vand.u32 4294901760, %v6445_v9  ;;  %v6452_v45 = vand.u32 4294901760, %v6451_v23 }
 0x71e   : > { %v12370_v32 = vpop.f32.mrf.mxu0  ;;  %v12372_v50 = vpop.f32.mrf.mxu2  ;;  %6435 = vmatpush.msra.mxu1 %v6434_v19  ;;  %6518 = vmatpush.msra.mxu2 %v12265_v10  ;;  %v6457_v19 = vsub.f32 %v12351_v4, %v14643_v27  ;;  %v4547_v27 = vld [vmem:[#allocation11 + $0x2f0] sm:$0xff] }
 0x71f   : > { %14637 = vst [vmem:[#allocation139_spill] sm:$0xff] %v12370_v32  ;;  %v12378_v35 = vpop.f32.mrf.mxu1  ;;  %6577 = vmatpush.msra.mxu3 %v12228_v29  ;;  %6260 = vmatmul.f32.gmra.mxu2 %v12073_v21 }
 0x720   : > { %14638 = vst [vmem:[#allocation140_spill] sm:$0xff] %v12372_v50  ;;  %v12387_v39 = vpop.f32.mrf.mxu3  ;;  %6328 = vmatpush.msra.mxu0 %v12201_v42  ;;  %6441 = vmatpush.msra.mxu1 %v6440_v48  ;;  %v6458_v23 = vand.u32 4294901760, %v6457_v19 }
 0x721   : > { %14640 = vst [vmem:[#allocation141_spill] sm:$0xff] %v12378_v35  ;;  %v12393_v35 = vsub.f32 %v4517_v7, %v12366_v40  ;;  %6521 = vmatpush.msra.mxu2 %v12290_v30  ;;  %6579 = vmatpush.msra.mxu3 %v12243_v41  ;;  %v14644_v7 = vand.u32 4294901760, %v12360_v56 }
 0x722   : > { %14642 = vst [vmem:[#allocation142_spill] sm:$0xff] %v12387_v39  ;;  %v4548_v39 = vld [vmem:[#allocation11 + $0x2f8] sm:$0xff]  ;;  %6309 = vmatmul.f32.gmra.mxu3 %v12073_v21  ;;  %6330 = vmatpush.msra.mxu0 %v12228_v29 }
 0x723   : > { %v6463_v48 = vsub.f32 %v12360_v56, %v14644_v7  ;;  %6447 = vmatpush.msra.mxu1 %v6446_v8  ;;  %6524 = vmatpush.msra.mxu2 %v12299_v14  ;;  %v12415_v50 = vand.u32 4294901760, %v4548_v39  ;;  %v14648_v7 = vand.u32 4294901760, %v12384_v13 }
 0x724   : > { %6581 = vmatpush.msra.mxu3 %v12261_v24  ;;  %6332 = vmatpush.msra.mxu0 %v12243_v41 }
 0x725   : > { %6453 = vmatpush.msra.mxu1 %v6452_v45  ;;  %6527 = vmatpush.msra.mxu2 %v12317_v20  ;;  %v6469_v9 = vsub.f32 %v12384_v13, %v14648_v7  ;;  %v6464_v19 = vand.u32 4294901760, %v6463_v48  ;;  %v14650_v45 = vand.u32 4294901760, %v12126_v61  ;;  %v14652_v7 = vld [vmem:[#allocation171_spill] sm:$0xff]  ;;  %v12440_v48 = vsub.f32 %v4548_v39, %v12415_v50 }
 0x726   : > { %v12411_v18 = vpop.f32.mrf.mxu0  ;;  %v12413_v21 = vpop.f32.mrf.mxu2  ;;  %6583 = vmatpush.msra.mxu3 %v12276_v34  ;;  %6121 = vmatmul.f32.gmra.mxu0 %v12095_v62  ;;  %v12437_v62 = vand.u32 4294901760, %v14652_v7 }
 0x727   : > { %14645 = vst [vmem:[#allocation143_spill] sm:$0xff] %v12411_v18  ;;  %v12418_v8 = vpop.f32.mrf.mxu1  ;;  %v12427_v18 = vand.u32 4294901760, %v4547_v27  ;;  %6183 = vmatmul.f32.gmra.mxu1 %v14650_v45  ;;  %6334 = vmatpush.msra.mxu0 %v12261_v24  ;;  %v6470_v45 = vand.u32 4294901760, %v6469_v9 }
 0x728   : > { %14646 = vst [vmem:[#allocation144_spill] sm:$0xff] %v12413_v21  ;;  %v12425_v32 = vpop.f32.mrf.mxu3  ;;  %v4546_v21 = vld [vmem:[#allocation11 + $0x2e8] sm:$0xff]  ;;  %6459 = vmatpush.msra.mxu1 %v6458_v23  ;;  %6530 = vmatpush.msra.mxu2 %v12332_v1  ;;  %v6350_v9 = vsub.f32 %v14652_v7, %v12437_v62 }
 0x729   : > { %14647 = vst [vmem:[#allocation145_spill] sm:$0xff] %v12418_v8  ;;  %v14651_v8 = vand.u32 4294901760, %v12393_v35  ;;  %6585 = vmatpush.msra.mxu3 %v12294_v49  ;;  %6264 = vmatmul.f32.gmra.mxu2 %v12104_v11  ;;  %v12444_v31 = vand.u32 4294901760, %v4546_v21  ;;  %v12448_v23 = vsub.f32 %v4547_v27, %v12427_v18  ;;  %v14013_v27 = vand.u32 4294901760, %v12440_v48 }
 0x72a   : > { %14649 = vst [vmem:[#allocation146_spill] sm:$0xff] %v12425_v32  ;;  %v4545_v32 = vld [vmem:[#allocation11 + $0x2e0] sm:$0xff]  ;;  %6336 = vmatpush.msra.mxu0 %v12276_v34  ;;  %6465 = vmatpush.msra.mxu1 %v6464_v19 }
 0x72b   : > { %v6475_v51 = vsub.f32 %v12393_v35, %v14651_v8  ;;  %6533 = vmatpush.msra.mxu2 %v12351_v4  ;;  %6587 = vmatpush.msra.mxu3 %v12305_v6  ;;  %v12452_v8 = vand.u32 4294901760, %v4545_v32  ;;  %v12467_v16 = vsub.f32 %v4546_v21, %v12444_v31  ;;  %v6351_v21 = vand.u32 4294901760, %v6350_v9 }
 0x72c   : > { %6313 = vmatmul.f32.gmra.mxu3 %v12104_v11  ;;  %6338 = vmatpush.msra.mxu0 %v12294_v49  ;;  %v4543_v11 = vld [vmem:[#allocation11 + $0x2d0] sm:$0xff] }
 0x72d   : > { %v6476_v39 = vand.u32 4294901760, %v6475_v51  ;;  %6471 = vmatpush.msra.mxu1 %v6470_v45  ;;  %6536 = vmatpush.msra.mxu2 %v12360_v56  ;;  %v12478_v45 = vsub.f32 %v4545_v32, %v12452_v8 }
 0x72e   : > { %v12458_v43 = vpop.f32.mrf.mxu0  ;;  %v12460_v19 = vpop.f32.mrf.mxu2  ;;  %6589 = vmatpush.msra.mxu3 %v12325_v58  ;;  %6340 = vmatpush.msra.mxu0 %v12305_v6 }
 0x72f   : > { %14653 = vst [vmem:[#allocation147_spill] sm:$0xff] %v12458_v43  ;;  %v12464_v51 = vpop.f32.mrf.mxu1  ;;  %6477 = vmatpush.msra.mxu1 %v6476_v39  ;;  %6539 = vmatpush.msra.mxu2 %v12384_v13  ;;  %v4542_v43 = vld [vmem:[#allocation11 + $0x2c8] sm:$0xff] }
 0x730   : > { %14654 = vst [vmem:[#allocation148_spill] sm:$0xff] %v12460_v19  ;;  %v12471_v7 = vpop.f32.mrf.mxu3  ;;  %v12474_v19 = vand.u32 4294901760, %v4544_v63  ;;  %6591 = vmatpush.msra.mxu3 %v12340_v44  ;;  %6126 = vmatmul.f32.gmra.mxu0 %v12126_v61  ;;  %v14658_v61 = vand.u32 4294901760, %v12448_v23  ;;  %v12504_v60 = vand.u32 4294901760, %v4542_v43 }
 0x731   : > { %14655 = vst [vmem:[#allocation149_spill] sm:$0xff] %v12464_v51  ;;  %v6819_v51 = vsub.f32 %v12440_v48, %v14013_v27  ;;  %6342 = vmatpush.msra.mxu0 %v12325_v58  ;;  %6479 = vmatmul.f32.vlgmr.msra.gmra.mxu1 %v12437_v62 }
 0x732   : > { %14656 = vst [vmem:[#allocation150_spill] sm:$0xff] %v12471_v7  ;;  %v12485_v7 = vand.u32 4294901760, %v4543_v11  ;;  %6542 = vmatpush.msra.mxu2 %v12393_v35  ;;  %6593 = vmatpush.msra.mxu3 %v12355_v33  ;;  %v6825_v32 = vsub.f32 %v12448_v23, %v14658_v61  ;;  %v12499_v27 = vsub.f32 %v4544_v63, %v12474_v19 }
 0x733   : > { %14657 = vst [vmem:[#allocation151_spill] sm:$0xff] %v12478_v45  ;;  %6703 = vmatpush.msrb.mxu1 %v12142_v55  ;;  %6344 = vmatpush.msra.mxu0 %v12340_v44  ;;  %v6820_v36 = vand.u32 4294901760, %v6819_v51  ;;  %v6352_v61 = vsub.f32 %v6350_v9, %v6351_v21  ;;  %v14664_v55 = vand.u32 4294901760, %v12467_v16 }
 0x734   : > { %14660 = vst [vmem:[#allocation152_spill] sm:$0xff] %v12499_v27  ;;  %6545 = vmatmul.f32.vlgmr.msra.gmra.mxu2 %v6350_v9  ;;  %6595 = vmatpush.msra.mxu3 %v12366_v40  ;;  %v12512_v63 = vsub.f32 %v4543_v11, %v12485_v7  ;;  %v4540_v9 = vld [vmem:[#allocation11 + $0x2b8] sm:$0xff]  ;;  %v6826_v51 = vand.u32 4294901760, %v6825_v32  ;;  %v6358_v11 = vsub.f32 %v14659_v0, %v12496_v3  ;;  %v4538_v32 = vld [vmem:[#allocation11 + $0x2a8] sm:$0xff] }
 0x735   : > { %6705 = vmatpush.msrb.mxu1 %v12148_v2  ;;  %6752 = vmatpush.msrb.mxu2 %v12415_v50  ;;  %v6831_v39 = vsub.f32 %v12467_v16, %v14664_v55  ;;  %v14667_v55 = vand.u32 4294901760, %v12478_v45  ;;  %v6353_v0 = vand.u32 4294901760, %v6352_v61  ;;  %v12539_v2 = vand.u32 4294901760, %v4540_v9 }
 0x736   : > { %v12507_v26 = vpop.f32.mrf.mxu0  ;;  %v12509_v57 = vpop.f32.mrf.mxu2  ;;  %14663 = vst [vmem:[#allocation155_spill] sm:$0xff] %v12512_v63  ;;  %6346 = vmatpush.msra.mxu0 %v12355_v33  ;;  %6599 = vmatmul.f32.vlgmr.msra.gmra.mxu3 %v6351_v21  ;;  %v4539_v21 = vld [vmem:[#allocation11 + $0x2b0] sm:$0xff] }
 0x737   : > { %14661 = vst [vmem:[#allocation153_spill] sm:$0xff] %v12507_v26  ;;  %v12519_v59 = vpop.f32.mrf.mxu1  ;;  %6707 = vmatpush.msrb.mxu1 %v12163_v53  ;;  %6754 = vmatpush.msrb.mxu2 %v12427_v18  ;;  %v12535_v26 = vsub.f32 %v4542_v43, %v12504_v60  ;;  %v6832_v53 = vand.u32 4294901760, %v6831_v39  ;;  %v6359_v43 = vand.u32 4294901760, %v6358_v11  ;;  %v12549_v61 = vand.u32 4294901760, %v4539_v21 }
 0x738   : > { %14662 = vst [vmem:[#allocation154_spill] sm:$0xff] %v12509_v57  ;;  %v12527_v57 = vpop.f32.mrf.mxu3  ;;  %6821 = vmatpush.msrb.mxu3 %v6820_v36  ;;  %6348 = vmatpush.msra.mxu0 %v12366_v40  ;;  %v14668_v36 = vand.u32 4294901760, %v12499_v27 }
 0x739   : > { %14665 = vst [vmem:[#allocation156_spill] sm:$0xff] %v12519_v59  ;;  %v6837_v59 = vsub.f32 %v12478_v45, %v14667_v55  ;;  %6709 = vmatpush.msrb.mxu1 %v12177_v28  ;;  %6756 = vmatpush.msrb.mxu2 %v12444_v31  ;;  %v14669_v28 = vand.u32 4294901760, %v12161_v25  ;;  %v12568_v25 = vsub.f32 %v4540_v9, %v12539_v2 }
 0x73a   : > { %14666 = vst [vmem:[#allocation157_spill] sm:$0xff] %v12527_v57  ;;  %v12544_v57 = vsub.f32 %v4541_v52, %v12521_v37  ;;  %6827 = vmatpush.msrb.mxu3 %v6826_v51  ;;  %6354 = vmatmul.f32.vlgmr.msra.gmra.mxu0 %v6353_v0  ;;  %v6843_v55 = vsub.f32 %v12499_v27, %v14668_v36  ;;  %v14670_v52 = vand.u32 4294901760, %v12512_v63  ;;  %v14671_v0 = vld [vmem:[#allocation25_spill] sm:$0xff] }
 0x73b   : > { %6483 = vmatmul.f32.gmra.mxu1 %v12496_v3  ;;  %6624 = vmatpush.msrb.mxu0 %v14669_v28  ;;  %v6838_v17 = vand.u32 4294901760, %v6837_v59  ;;  %v12561_v36 = vand.u32 4294901760, %v14671_v0  ;;  %v4537_v59 = vld [vmem:[#allocation11 + $0x2a0] sm:$0xff]  ;;  %v9131_v28 = vld [vmem:[#allocation2 + $0x8] sm:$0xff]  ;;  %v12581_v45 = vsub.f32 %v4539_v21, %v12549_v61 }
 0x73c   : > { %6711 = vmatpush.msrb.mxu1 %v12192_v54  ;;  %6758 = vmatpush.msrb.mxu2 %v12452_v8  ;;  %v6849_v51 = vsub.f32 %v12512_v63, %v14670_v52  ;;  %9053 = vtanh.f32 %v9131_v28  ;;  %v12573_v52 = vand.u32 4294901760, %v4538_v32  ;;  %v14675_v63 = vand.u32 4294901760, %v12175_v5  ;;  %v4536_v5 = vld [vmem:[#allocation11 + $0x298] sm:$0xff] }
 0x73d   : > { %6833 = vmatpush.msrb.mxu3 %v6832_v53  ;;  %6550 = vmatmul.f32.gmra.mxu2 %v6358_v11  ;;  %14677 = vst [vmem:[#allocation162_spill] sm:$0xff] %v12581_v45  ;;  %v14678_v53 = vand.u32 4294901760, %v12535_v26  ;;  %v12587_v54 = vand.u32 4294901760, %v4537_v59 }
 0x73e   : > { %v12563_v15 = vpop.f32.mrf.mxu0  ;;  %v12565_v27 = vpop.f32.mrf.mxu2  ;;  %6628 = vmatpush.msrb.mxu0 %v14675_v63  ;;  %6713 = vmatpush.msrb.mxu1 %v12201_v42  ;;  %v14679_v42 = vand.u32 4294901760, %v12187_v47  ;;  %v6850_v63 = vand.u32 4294901760, %v6849_v51  ;;  %v14681_v47 = vand.u32 4294901760, %v12197_v46  ;;  %v14682_v46 = vand.u32 4294901760, %v12568_v25 }
 0x73f   : > { %14672 = vst [vmem:[#allocation158_spill] sm:$0xff] %v12563_v15  ;;  %v12571_v39 = vpop.f32.mrf.mxu1  ;;  %v6360_v15 = vsub.f32 %v6358_v11, %v6359_v43  ;;  %6760 = vmatpush.msrb.mxu2 %v12474_v19  ;;  %6839 = vmatpush.msrb.mxu3 %v6838_v17  ;;  %v6855_v28 = vsub.f32 %v12535_v26, %v14678_v53  ;;  %v14680_v17 = vand.u32 4294901760, %v12544_v57 }
 0x740   : > { %14673 = vst [vmem:[#allocation159_spill] sm:$0xff] %v12565_v27  ;;  %v6844_v27 = vand.u32 4294901760, %v6843_v55  ;;  %v12578_v9 = vpop.f32.mrf.mxu3  ;;  %6605 = vmatmul.f32.gmra.mxu3 %v6359_v43  ;;  %6632 = vmatpush.msrb.mxu0 %v14679_v42  ;;  %v6366_v11 = vsub.f32 %v14671_v0, %v12561_v36  ;;  %v12600_v53 = vsub.f32 %v4538_v32, %v12573_v52  ;;  %v4535_v43 = vld [vmem:[#allocation11 + $0x290] sm:$0xff]  ;;  %v12605_v42 = vand.u32 4294901760, %v4536_v5  ;;  %v4534_v32 = vld [vmem:[#allocation11 + $0x288] sm:$0xff] }
 0x741   : > { %14674 = vst [vmem:[#allocation160_spill] sm:$0xff] %v12571_v39  ;;  %6715 = vmatpush.msrb.mxu1 %v12228_v29  ;;  %6762 = vmatpush.msrb.mxu2 %v12485_v7  ;;  %v6861_v55 = vsub.f32 %v12544_v57, %v14680_v17  ;;  %v6361_v51 = vand.u32 4294901760, %v6360_v15  ;;  %v6856_v21 = vand.u32 4294901760, %v6855_v28  ;;  %v12610_v17 = vsub.f32 %v4537_v59, %v12587_v54 }
 0x742   : > { %14676 = vst [vmem:[#allocation161_spill] sm:$0xff] %v12578_v9  ;;  %6845 = vmatpush.msrb.mxu3 %v6844_v27  ;;  %6636 = vmatpush.msrb.mxu0 %v14681_v47  ;;  %v9054_v29 = vpop.eup %9053  ;;  %v6367_v27 = vand.u32 4294901760, %v6366_v11  ;;  %v6867_v15 = vsub.f32 %v12568_v25, %v14682_v46  ;;  %v12619_v39 = vand.u32 4294901760, %v4535_v43  ;;  %v14687_v46 = vand.u32 4294901760, %v12581_v45 }
 0x743   : > { %6717 = vmatpush.msrb.mxu1 %v12243_v41  ;;  %6764 = vmatpush.msrb.mxu2 %v12504_v60  ;;  %v14685_v41 = vand.u32 4294901760, %v12217_v22  ;;  %v6862_v59 = vand.u32 4294901760, %v6861_v55  ;;  %v12632_v9 = vand.u32 4294901760, %v9054_v29  ;;  %v12639_v55 = vand.u32 4294901760, %v4534_v32 }
 0x744   : > { %6851 = vmatpush.msrb.mxu3 %v6850_v63  ;;  %6362 = vmatmul.f32.gmra.mxu0 %v6361_v51  ;;  %v4533_v51 = vld [vmem:[#allocation11 + $0x280] sm:$0xff]  ;;  %v6868_v28 = vand.u32 4294901760, %v6867_v15 }
 0x745   : > { %6487 = vmatmul.f32.gmra.mxu1 %v12561_v36  ;;  %6640 = vmatpush.msrb.mxu0 %v14685_v41  ;;  %v14029_v41 = vand.u32 4294901760, %v12610_v17 }
 0x746   : > { %v12615_v47 = vpop.f32.mrf.mxu0  ;;  %v12617_v0 = vpop.f32.mrf.mxu2  ;;  %6719 = vmatpush.msrb.mxu1 %v12261_v24  ;;  %6766 = vmatpush.msrb.mxu2 %v12521_v37  ;;  %v14689_v24 = vand.u32 4294901760, %v12235_v38 }
 0x747   : > { %14683 = vst [vmem:[#allocation163_spill] sm:$0xff] %v12615_v47  ;;  %v12625_v63 = vpop.f32.mrf.mxu1  ;;  %v12635_v47 = vsub.f32 %v4536_v5, %v12605_v42  ;;  %6857 = vmatpush.msrb.mxu3 %v6856_v21  ;;  %6555 = vmatmul.f32.gmra.mxu2 %v6366_v11  ;;  %v12648_v5 = vand.u32 4294901760, %v4533_v51  ;;  %v14691_v21 = vand.u32 4294901760, %v12600_v53 }
 0x748   : > { %14684 = vst [vmem:[#allocation70_spill] sm:$0xff] %v12617_v0  ;;  %v6873_v0 = vsub.f32 %v12581_v45, %v14687_v46  ;;  %v12637_v22 = vpop.f32.mrf.mxu3  ;;  %6644 = vmatpush.msrb.mxu0 %v14689_v24  ;;  %6721 = vmatpush.msrb.mxu1 %v12276_v34  ;;  %v6368_v46 = vsub.f32 %v6366_v11, %v6367_v27  ;;  %v14690_v45 = vld [vmem:[#allocation172_spill] sm:$0xff]  ;;  %v14692_v34 = vand.u32 4294901760, %v12255_v12  ;;  %v14693_v12 = vand.u32 4294901760, %v12265_v10 }
 0x749   : > { %14686 = vst [vmem:[#allocation68_spill] sm:$0xff] %v12625_v63  ;;  %v12646_v63 = vsub.f32 %v4535_v43, %v12619_v39  ;;  %6768 = vmatpush.msrb.mxu2 %v12539_v2  ;;  %6863 = vmatpush.msrb.mxu3 %v6862_v59  ;;  %v6879_v38 = vsub.f32 %v12600_v53, %v14691_v21  ;;  %v14023_v15 = vand.u32 4294901760, %v12635_v47 }
 0x74a   : > { %14688 = vst [vmem:[#allocation164_spill] sm:$0xff] %v12637_v22  ;;  %v12651_v22 = vand.u32 4294901760, %v14690_v45  ;;  %6611 = vmatmul.f32.gmra.mxu3 %v6367_v27  ;;  %6648 = vmatpush.msrb.mxu0 %v14692_v34  ;;  %v6874_v11 = vand.u32 4294901760, %v6873_v0  ;;  %v6374_v43 = vsub.f32 %v9054_v29, %v12632_v9  ;;  %v12662_v24 = vsub.f32 %v4534_v32, %v12639_v55 }
 0x74b   : > { %6723 = vmatpush.msrb.mxu1 %v12294_v49  ;;  %6770 = vmatpush.msrb.mxu2 %v12549_v61  ;;  %v6885_v59 = vsub.f32 %v12610_v17, %v14029_v41  ;;  %v6369_v0 = vand.u32 4294901760, %v6368_v46  ;;  %v14022_v29 = vand.u32 4294901760, %v12646_v63  ;;  %v12673_v27 = vsub.f32 %v4533_v51, %v12648_v5 }
 0x74c   : > { %6869 = vmatpush.msrb.mxu3 %v6868_v28  ;;  %6652 = vmatpush.msrb.mxu0 %v14693_v12  ;;  %v6880_v49 = vand.u32 4294901760, %v6879_v38  ;;  %v6375_v10 = vand.u32 4294901760, %v6374_v43  ;;  %v6891_v28 = vsub.f32 %v12635_v47, %v14023_v15  ;;  %v14028_v51 = vand.u32 4294901760, %v12662_v24 }
 0x74d   : > { %6725 = vmatpush.msrb.mxu1 %v12305_v6  ;;  %6772 = vmatpush.msrb.mxu2 %v12573_v52  ;;  %v12689_v46 = vsub.f32 %v14690_v45, %v12651_v22  ;;  %v14694_v6 = vand.u32 4294901760, %v12290_v30  ;;  %v6886_v38 = vand.u32 4294901760, %v6885_v59  ;;  %v14695_v45 = vand.u32 4294901760, %v12299_v14 }
 0x74e   : > { %v12675_v32 = vpop.f32.mrf.mxu0  ;;  %v12677_v21 = vpop.f32.mrf.mxu2  ;;  %6875 = vmatpush.msrb.mxu3 %v6874_v11  ;;  %6370 = vmatmul.f32.gmra.mxu0 %v6369_v0  ;;  %v6897_v11 = vsub.f32 %v12646_v63, %v14022_v29  ;;  %v14026_v0 = vand.u32 4294901760, %v12673_v27  ;;  %v6892_v30 = vand.u32 4294901760, %v6891_v28  ;;  %v14696_v29 = vld [vmem:[#allocation51_spill] sm:$0xff]  ;;  %v14697_v14 = vand.u32 4294901760, %v12317_v20 }
 0x74f   : > { %v12681_v34 = vpop.f32.mrf.mxu1  ;;  %6491 = vmatmul.f32.gmra.mxu1 %v12632_v9  ;;  %6656 = vmatpush.msrb.mxu0 %v14694_v6  ;;  %v6376_v6 = vsub.f32 %v6374_v43, %v6375_v10  ;;  %v14027_v59 = vand.u32 4294901760, %v12689_v46  ;;  %v12711_v15 = vand.u32 4294901760, %v14696_v29 }
 0x750   : > { %v12691_v12 = vpop.f32.mrf.mxu3  ;;  %6727 = vmatpush.msrb.mxu1 %v12325_v58  ;;  %6774 = vmatpush.msrb.mxu2 %v12587_v54  ;;  %v6903_v58 = vsub.f32 %v12662_v24, %v14028_v51  ;;  %v14730_v51 = vld [vmem:[#allocation162_spill] sm:$0xff] }
 0x751   : > { %6881 = vmatpush.msrb.mxu3 %v6880_v49  ;;  %6560 = vmatmul.f32.gmra.mxu2 %v6374_v43  ;;  %v6898_v49 = vand.u32 4294901760, %v6897_v11  ;;  %v6377_v20 = vand.u32 4294901760, %v6376_v6  ;;  %v14731_v41 = vand.u32 4294901760, %v14730_v51 }
 0x752   : > { %6660 = vmatpush.msrb.mxu0 %v14695_v45  ;;  %6729 = vmatpush.msrb.mxu1 %v12340_v44  ;;  %v6909_v44 = vsub.f32 %v12673_v27, %v14026_v0  ;;  %v6904_v11 = vand.u32 4294901760, %v6903_v58  ;;  %v6786_v45 = vsub.f32 %v12689_v46, %v14027_v59  ;;  %v14726_v0 = vand.u32 4294901760, %v12568_v25  ;;  %v4561_v59 = vld [vmem:[#allocation11 + $0x360] sm:$0xff] }
 0x753   : > { %6776 = vmatpush.msrb.mxu2 %v12605_v42  ;;  %6887 = vmatpush.msrb.mxu3 %v6886_v38 }
 0x754   : > { %6617 = vmatmul.f32.gmra.mxu3 %v6375_v10  ;;  %6664 = vmatpush.msrb.mxu0 %v14697_v14  ;;  %v14698_v10 = vand.u32 4294901760, %v12332_v1  ;;  %v6910_v1 = vand.u32 4294901760, %v6909_v44  ;;  %v6787_v6 = vand.u32 4294901760, %v6786_v45  ;;  %v14703_v44 = vld [vmem:[#allocation28_spill] sm:$0xff] }
 0x755   : > { %6731 = vmatpush.msrb.mxu1 %v12355_v33  ;;  %6778 = vmatpush.msrb.mxu2 %v12619_v39  ;;  %v12737_v33 = vsub.f32 %v14696_v29, %v12711_v15 }
 0x756   : > { %v12718_v43 = vpop.f32.mrf.mxu0  ;;  %v12720_v28 = vpop.f32.mrf.mxu2  ;;  %6893 = vmatpush.msrb.mxu3 %v6892_v30  ;;  %6668 = vmatpush.msrb.mxu0 %v14698_v10  ;;  %v14699_v30 = vand.u32 4294901760, %v12351_v4  ;;  %v14702_v4 = vand.u32 4294901760, %v12440_v48  ;;  %v12755_v10 = vand.u32 4294901760, %v14703_v44 }
 0x757   : > { %v12724_v38 = vpop.f32.mrf.mxu1  ;;  %6733 = vmatpush.msrb.mxu1 %v12366_v40  ;;  %6780 = vmatpush.msrb.mxu2 %v12639_v55  ;;  %v14700_v40 = vand.u32 4294901760, %v12360_v56  ;;  %v14024_v29 = vand.u32 4294901760, %v12737_v33  ;;  %v9132_v56 = vld [vmem:[#allocation2 + $0x20] sm:$0xff] }
 0x758   : > { %v12731_v14 = vpop.f32.mrf.mxu3  ;;  %6899 = vmatpush.msrb.mxu3 %v6898_v49  ;;  %6378 = vmatmul.f32.gmra.mxu0 %v6377_v20  ;;  %9055 = vtanh.f32 %v9132_v56 }
 0x759   : > { %6672 = vmatpush.msrb.mxu0 %v14699_v30  ;;  %6735 = vmatmul.f32.vlgmr.msrb.gmra.mxu1 %v12437_v62  ;;  %v6794_v30 = vsub.f32 %v12737_v33, %v14024_v29 }
 0x75a   : > { %6782 = vmatpush.msrb.mxu2 %v12648_v5  ;;  %6905 = vmatpush.msrb.mxu3 %v6904_v11  ;;  %v14705_v11 = vand.u32 4294901760, %v12384_v13  ;;  %v14709_v13 = vand.u32 4294901760, %v12467_v16 }
 0x75b   : > { %6999 = vmatpush.msra.mxu1 %v12415_v50  ;;  %6676 = vmatpush.msrb.mxu0 %v14700_v40  ;;  %v12778_v40 = vsub.f32 %v14703_v44, %v12755_v10 }
 0x75c   : > { %6788 = vmatmul.f32.vlgmr.msrb.gmra.mxu2 %v6787_v6  ;;  %6911 = vmatpush.msrb.mxu3 %v6910_v1  ;;  %v14707_v1 = vand.u32 4294901760, %v12448_v23  ;;  %v14708_v6 = vand.u32 4294901760, %v12393_v35 }
 0x75d   : > { %7001 = vmatpush.msra.mxu1 %v12427_v18  ;;  %7058 = vmatpush.msra.mxu2 %v14702_v4  ;;  %v14710_v4 = vld [vmem:[#allocation151_spill] sm:$0xff] }
 0x75e   : > { %v12747_v58 = vpop.f32.mrf.mxu0  ;;  %v12749_v49 = vpop.f32.mrf.mxu2  ;;  %6680 = vmatpush.msrb.mxu0 %v14705_v11  ;;  %6913 = vmatmul.f32.vlgmr.msrb.gmra.mxu3 %v12651_v22  ;;  %v14711_v56 = vand.u32 4294901760, %v14710_v4 }
 0x75f   : > { %14701 = vst [vmem:[#allocation165_spill] sm:$0xff] %v12749_v49  ;;  %v12757_v20 = vpop.f32.mrf.mxu1  ;;  %7003 = vmatpush.msra.mxu1 %v12444_v31  ;;  %7062 = vmatpush.msra.mxu2 %v14707_v1  ;;  %v9056_v35 = vpop.eup %9055 }
 0x760   : > { %14704 = vst [vmem:[#allocation69_spill] sm:$0xff] %v12757_v20  ;;  %v12762_v45 = vpop.f32.mrf.mxu3  ;;  %7137 = vmatpush.msra.mxu3 %v12415_v50  ;;  %6684 = vmatpush.msrb.mxu0 %v14708_v6  ;;  %v6795_v50 = vand.u32 4294901760, %v6794_v30  ;;  %v12799_v44 = vand.u32 4294901760, %v9056_v35  ;;  %v14715_v30 = vld [vmem:[#allocation152_spill] sm:$0xff] }
 0x761   : > { %14706 = vst [vmem:[#allocation73_spill] sm:$0xff] %v12762_v45  ;;  %7005 = vmatpush.msra.mxu1 %v12452_v8  ;;  %7066 = vmatpush.msra.mxu2 %v14709_v13  ;;  %v14716_v6 = vand.u32 4294901760, %v14715_v30  ;;  %v14746_v20 = vld [vmem:[#allocation80_spill] sm:$0xff] }
 0x762   : > { %7139 = vmatpush.msra.mxu3 %v12427_v18  ;;  %6686 = vmatmul.f32.vlgmr.msrb.gmra.mxu0 %v12437_v62  ;;  %v14025_v18 = vand.u32 4294901760, %v12778_v40 }
 0x763   : > { %6739 = vmatmul.f32.gmra.mxu1 %v12496_v3  ;;  %6931 = vmatpush.msra.mxu0 %v12440_v48 }
 0x764   : > { %7007 = vmatpush.msra.mxu1 %v12474_v19  ;;  %7070 = vmatpush.msra.mxu2 %v14711_v56  ;;  %v14720_v56 = vld [vmem:[#allocation53_spill] sm:$0xff] }
 0x765   : > { %7141 = vmatpush.msra.mxu3 %v12444_v31  ;;  %6796 = vmatmul.f32.gmra.mxu2 %v6795_v50  ;;  %v14717_v31 = vld [vmem:[#allocation155_spill] sm:$0xff]  ;;  %v14719_v50 = vld [vmem:[#allocation77_spill] sm:$0xff] }
 0x766   : > { %v12787_v11 = vpop.f32.mrf.mxu0  ;;  %v12789_v1 = vpop.f32.mrf.mxu2  ;;  %6934 = vmatpush.msra.mxu0 %v12448_v23  ;;  %7009 = vmatpush.msra.mxu1 %v12485_v7  ;;  %v14718_v13 = vand.u32 4294901760, %v14717_v31  ;;  %v6802_v23 = vsub.f32 %v12778_v40, %v14025_v18  ;;  %v4745_v29 = vadd.f32 %v14720_v56, %v14719_v50  ;;  %v4564_v18 = vld [vmem:[#allocation11 + $0x378] sm:$0xff] }
 0x767   : > { %14712 = vst [vmem:[#allocation166_spill] sm:$0xff] %v12787_v11  ;;  %v12793_v62 = vpop.f32.mrf.mxu1  ;;  %7074 = vmatpush.msra.mxu2 %v14716_v6  ;;  %7143 = vmatpush.msra.mxu3 %v12452_v8  ;;  %v12820_v8 = vsub.f32 %v9056_v35, %v12799_v44  ;;  %v14722_v6 = vld [vmem:[#allocation34_spill] sm:$0xff] }
 0x768   : > { %14713 = vst [vmem:[#allocation122_spill] sm:$0xff] %v12789_v1  ;;  %v12797_v48 = vpop.f32.mrf.mxu3  ;;  %6917 = vmatmul.f32.gmra.mxu3 %v12711_v15  ;;  %6937 = vmatpush.msra.mxu0 %v12467_v16  ;;  %v14721_v16 = vand.u32 4294901760, %v12535_v26 }
 0x769   : > { %14714 = vst [vmem:[#allocation175_spill] sm:$0xff] %v12797_v48  ;;  %7011 = vmatpush.msra.mxu1 %v12504_v60  ;;  %7078 = vmatpush.msra.mxu2 %v14718_v13  ;;  %v4811_v13 = vadd.f32 %v14722_v6, %v4745_v29  ;;  %v14724_v29 = vand.u32 4294901760, %v12544_v57  ;;  %v14725_v6 = vld [vmem:[#allocation45_spill] sm:$0xff]  ;;  %v4560_v48 = vld [vmem:[#allocation11 + $0x358] sm:$0xff] }
 0x76a   : > { %7145 = vmatpush.msra.mxu3 %v12474_v19  ;;  %6940 = vmatpush.msra.mxu0 %v14710_v4  ;;  %v6803_v4 = vand.u32 4294901760, %v6802_v23  ;;  %v4562_v23 = vld [vmem:[#allocation11 + $0x368] sm:$0xff] }
 0x76b   : > { %7013 = vmatpush.msra.mxu1 %v12521_v37  ;;  %7082 = vmatpush.msra.mxu2 %v14721_v16  ;;  %v12840_v16 = vand.u32 4294901760, %v4564_v18 }
 0x76c   : > { %7147 = vmatpush.msra.mxu3 %v12485_v7  ;;  %6690 = vmatmul.f32.gmra.mxu0 %v12496_v3  ;;  %v4563_v7 = vld [vmem:[#allocation11 + $0x370] sm:$0xff]  ;;  %v14030_v3 = vand.u32 4294901760, %v12820_v8 }
 0x76d   : > { %6743 = vmatmul.f32.gmra.mxu1 %v12561_v36  ;;  %6943 = vmatpush.msra.mxu0 %v14715_v30  ;;  %v4865_v30 = vadd.f32 %v14725_v6, %v4811_v13  ;;  %v14728_v13 = vld [vmem:[#allocation59_spill] sm:$0xff]  ;;  %v14729_v6 = vld [vmem:[#allocation54_spill] sm:$0xff] }
 0x76e   : > { %v12825_v50 = vpop.f32.mrf.mxu0  ;;  %v12827_v19 = vpop.f32.mrf.mxu2  ;;  %7015 = vmatpush.msra.mxu1 %v12539_v2  ;;  %7086 = vmatpush.msra.mxu2 %v14724_v29  ;;  %v12848_v29 = vand.u32 4294901760, %v4563_v7 }
 0x76f   : > { %v12831_v56 = vpop.f32.mrf.mxu1  ;;  %7149 = vmatpush.msra.mxu3 %v12504_v60  ;;  %6804 = vmatmul.f32.gmra.mxu2 %v6803_v4  ;;  %v14727_v60 = vld [vmem:[#allocation131_spill] sm:$0xff] }
 0x770   : > { %14723 = vst [vmem:[#allocation176_spill] sm:$0xff] %v12831_v56  ;;  %v12836_v35 = vpop.f32.mrf.mxu3  ;;  %6946 = vmatpush.msra.mxu0 %v14717_v31  ;;  %7017 = vmatpush.msra.mxu1 %v12549_v61  ;;  %v4952_v4 = vadd.f32 %v14727_v60, %v4865_v30  ;;  %v4749_v31 = vadd.f32 %v14729_v6, %v14728_v13  ;;  %v12864_v30 = vand.u32 4294901760, %v4562_v23  ;;  %v14734_v13 = vld [vmem:[#allocation79_spill] sm:$0xff] }
 0x771   : > { %7090 = vmatpush.msra.mxu2 %v14726_v0  ;;  %7151 = vmatpush.msra.mxu3 %v12521_v37  ;;  %v6810_v37 = vsub.f32 %v12820_v8, %v14030_v3  ;;  %v12862_v0 = vsub.f32 %v4564_v18, %v12840_v16  ;;  %v12877_v18 = vsub.f32 %v4563_v7, %v12848_v29  ;;  %v12879_v3 = vand.u32 4294901760, %v4561_v59 }
 0x772   : > { %6921 = vmatmul.f32.gmra.mxu3 %v12755_v10  ;;  %6949 = vmatpush.msra.mxu0 %v12535_v26  ;;  %v4816_v6 = vadd.f32 %v14734_v13, %v4749_v31 }
 0x773   : > { %7019 = vmatpush.msra.mxu1 %v12573_v52  ;;  %7094 = vmatpush.msra.mxu2 %v14731_v41  ;;  %14732 = vst [vmem:[#allocation177_spill] sm:$0xff] %v12862_v0  ;;  %v14735_v41 = vand.u32 4294901760, %v12600_v53  ;;  %v6811_v13 = vand.u32 4294901760, %v6810_v37  ;;  %v12903_v37 = vsub.f32 %v4561_v59, %v12879_v3  ;;  %v14749_v59 = vand.u32 4294901760, %v12862_v0 }
 0x774   : > { %7153 = vmatpush.msra.mxu3 %v12539_v2  ;;  %6952 = vmatpush.msra.mxu0 %v12544_v57  ;;  %14736 = vst [vmem:[#allocation20_spill] sm:$0xff] %v12877_v18  ;;  %v14738_v57 = vld [vmem:[#allocation129_spill] sm:$0xff] }
 0x775   : > { %7021 = vmatpush.msra.mxu1 %v12587_v54  ;;  %7098 = vmatpush.msra.mxu2 %v14735_v41  ;;  %v5001_v1 = vadd.f32 %v14738_v57, %v4952_v4  ;;  %v12892_v41 = vsub.f32 %v4562_v23, %v12864_v30  ;;  %v14741_v4 = vand.u32 4294901760, %v12610_v17  ;;  %14743 = vst [vmem:[#allocation37_spill] sm:$0xff] %v12903_v37  ;;  %v14744_v23 = vld [vmem:[#allocation132_spill] sm:$0xff] }
 0x776   : > { %v12868_v26 = vpop.f32.mrf.mxu0  ;;  %v12870_v60 = vpop.f32.mrf.mxu2  ;;  %7155 = vmatpush.msra.mxu3 %v12549_v61  ;;  %6694 = vmatmul.f32.gmra.mxu0 %v12561_v36  ;;  %v12897_v61 = vand.u32 4294901760, %v4560_v48  ;;  %v14742_v36 = vld [vmem:[#allocation60_spill] sm:$0xff] }
 0x777   : > { %14733 = vst [vmem:[#allocation178_spill] sm:$0xff] %v12870_v60  ;;  %v12881_v2 = vpop.f32.mrf.mxu1  ;;  %6747 = vmatmul.f32.gmra.mxu1 %v12632_v9  ;;  %6955 = vmatpush.msra.mxu0 %v12568_v25  ;;  %v4559_v60 = vld [vmem:[#allocation11 + $0x350] sm:$0xff]  ;;  %v4871_v57 = vadd.f32 %v14742_v36, %v4816_v6  ;;  %v14031_v25 = vand.u32 4294901760, %v12877_v18  ;;  %v5054_v7 = vadd.f32 %v14744_v23, %v5001_v1  ;;  %v14747_v36 = vld [vmem:[#allocation135_spill] sm:$0xff] }
 0x778   : > { %14737 = vst [vmem:[#allocation23_spill] sm:$0xff] %v12881_v2  ;;  %v12886_v31 = vpop.f32.mrf.mxu3  ;;  %7023 = vmatpush.msra.mxu1 %v12605_v42  ;;  %7102 = vmatpush.msra.mxu2 %v14741_v4  ;;  %v12908_v2 = vand.u32 4294901760, %v4559_v60  ;;  %v4558_v4 = vld [vmem:[#allocation11 + $0x348] sm:$0xff]  ;;  %v7253_v1 = vsub.f32 %v12862_v0, %v14749_v59  ;;  %v12923_v23 = vsub.f32 %v4560_v48, %v12897_v61 }
 0x779   : > { %14739 = vst [vmem:[#allocation26_spill] sm:$0xff] %v12886_v31  ;;  %7157 = vmatpush.msra.mxu3 %v12573_v52  ;;  %6812 = vmatmul.f32.gmra.mxu2 %v6811_v13  ;;  %v14745_v31 = vld [vmem:[#allocation123_spill] sm:$0xff]  ;;  %v4956_v52 = vadd.f32 %v14747_v36, %v4871_v57  ;;  %v14748_v13 = vand.u32 4294901760, %v12635_v47  ;;  %v14753_v36 = vld [vmem:[#allocation124_spill] sm:$0xff]  ;;  %v7259_v59 = vsub.f32 %v12877_v18, %v14031_v25  ;;  %v12937_v48 = vand.u32 4294901760, %v4558_v4 }
 0x77a   : > { %14740 = vst [vmem:[#allocation29_spill] sm:$0xff] %v12892_v41  ;;  %6958 = vmatpush.msra.mxu0 %v14730_v51  ;;  %7025 = vmatpush.msra.mxu1 %v12619_v39  ;;  %v4753_v6 = vadd.f32 %v14746_v20, %v14745_v31  ;;  %v4557_v20 = vld [vmem:[#allocation11 + $0x340] sm:$0xff]  ;;  %v14755_v51 = vld [vmem:[#allocation134_spill] sm:$0xff]  ;;  %v14759_v25 = vand.u32 4294901760, %v12662_v24 }
 0x77b   : > { %7106 = vmatpush.msra.mxu2 %v14748_v13  ;;  %7159 = vmatpush.msra.mxu3 %v12587_v54  ;;  %14750 = vst [vmem:[#allocation46_spill] sm:$0xff] %v12923_v23  ;;  %v14754_v13 = vand.u32 4294901760, %v12646_v63  ;;  %v5179_v45 = vadd.f32 %v14755_v51, %v5054_v7 }
 0x77c   : > { %6925 = vmatmul.f32.gmra.mxu3 %v12799_v44  ;;  %6961 = vmatpush.msra.mxu0 %v12600_v53  ;;  %v4821_v54 = vadd.f32 %v14753_v36, %v4753_v6  ;;  %v12943_v6 = vsub.f32 %v4559_v60, %v12908_v2  ;;  %v7254_v53 = vand.u32 4294901760, %v7253_v1  ;;  %v14762_v60 = vld [vmem:[#allocation147_spill] sm:$0xff]  ;;  %v14764_v1 = vand.u32 4294901760, %v12689_v46 }
 0x77d   : > { %7027 = vmatpush.msra.mxu1 %v12639_v55  ;;  %7110 = vmatpush.msra.mxu2 %v14754_v13  ;;  %v14758_v13 = vld [vmem:[#allocation133_spill] sm:$0xff]  ;;  %v5245_v56 = vadd.f32 %v14762_v60, %v5179_v45  ;;  %v12970_v45 = vsub.f32 %v4558_v4, %v12937_v48  ;;  %v14767_v60 = vld [vmem:[#allocation127_spill] sm:$0xff] }
 0x77e   : > { %v12925_v31 = vpop.f32.mrf.mxu0  ;;  %v12927_v57 = vpop.f32.mrf.mxu2  ;;  %7161 = vmatpush.msra.mxu3 %v12605_v42  ;;  %6964 = vmatpush.msra.mxu0 %v12610_v17  ;;  %14756 = vst [vmem:[#allocation74_spill] sm:$0xff] %v12943_v6  ;;  %v12954_v42 = vand.u32 4294901760, %v4557_v20  ;;  %v4556_v17 = vld [vmem:[#allocation11 + $0x338] sm:$0xff] }
 0x77f   : > { %14751 = vst [vmem:[#allocation63_spill] sm:$0xff] %v12925_v31  ;;  %7029 = vmatpush.msra.mxu1 %v12648_v5  ;;  %7114 = vmatpush.msra.mxu2 %v14759_v25  ;;  %v14760_v31 = vand.u32 4294901760, %v12892_v41  ;;  %v12956_v51 = vpop.f32.mrf.mxu1 }
 0x780   : > { %14752 = vst [vmem:[#allocation97_spill] sm:$0xff] %v12927_v57  ;;  %v12945_v36 = vpop.f32.mrf.mxu3  ;;  %v5005_v57 = vadd.f32 %v14758_v13, %v4956_v52  ;;  %7163 = vmatpush.msra.mxu3 %v12619_v39  ;;  %6698 = vmatmul.f32.gmra.mxu0 %v12632_v9  ;;  %v14763_v13 = vld [vmem:[#allocation126_spill] sm:$0xff]  ;;  %v4555_v39 = vld [vmem:[#allocation11 + $0x330] sm:$0xff]  ;;  %v14769_v52 = vand.u32 4294901760, %v12673_v27  ;;  %v12984_v49 = vsub.f32 %v4557_v20, %v12954_v42 }
 0x781   : > { %14757 = vst [vmem:[#allocation71_spill] sm:$0xff] %v12945_v36  ;;  %v7265_v7 = vsub.f32 %v12892_v41, %v14760_v31  ;;  %v4877_v25 = vadd.f32 %v14763_v13, %v4821_v54  ;;  %6967 = vmatpush.msra.mxu0 %v12635_v47  ;;  %7033 = vmatmul.f32.vlgmr.msra.gmra.mxu1 %v14764_v1  ;;  %v7260_v31 = vand.u32 4294901760, %v7259_v59  ;;  %v14765_v36 = vand.u32 4294901760, %v12903_v37  ;;  %v14768_v9 = vld [vmem:[#allocation125_spill] sm:$0xff]  ;;  %v14770_v59 = vld [vmem:[#allocation136_spill] sm:$0xff]  ;;  %v14771_v1 = vld [vmem:[#allocation139_spill] sm:$0xff] }
 0x782   : > { %14761 = vst [vmem:[#allocation72_spill] sm:$0xff] %v12956_v51  ;;  %v4757_v11 = vadd.f32 %v14768_v9, %v14767_v60  ;;  %7118 = vmatpush.msra.mxu2 %v14769_v52  ;;  %7165 = vmatpush.msra.mxu3 %v12639_v55  ;;  %v14032_v47 = vand.u32 4294901760, %v12943_v6  ;;  %v12978_v54 = vand.u32 4294901760, %v4556_v17  ;;  %v5062_v13 = vadd.f32 %v14770_v59, %v5005_v57  ;;  %v14772_v60 = vld [vmem:[#allocation145_spill] sm:$0xff] }
 0x783   : > { %v7271_v51 = vsub.f32 %v12903_v37, %v14765_v36  ;;  %14766 = vst [vmem:[#allocation81_spill] sm:$0xff] %v12970_v45  ;;  %v4960_v36 = vadd.f32 %v14771_v1, %v4877_v25  ;;  %7255 = vmatpush.msrb.mxu1 %v7254_v53  ;;  %6970 = vmatpush.msra.mxu0 %v12646_v63  ;;  %v7266_v4 = vand.u32 4294901760, %v7265_v7  ;;  %v14773_v55 = vand.u32 4294901760, %v12923_v23  ;;  %v4554_v25 = vld [vmem:[#allocation11 + $0x328] sm:$0xff]  ;;  %v14777_v1 = vld [vmem:[#allocation138_spill] sm:$0xff] }
 0x784   : > { %v5299_v9 = vadd.f32 %v14772_v60, %v5245_v56  ;;  %7120 = vmatmul.f32.vlgmr.msra.gmra.mxu2 %v12651_v22  ;;  %7167 = vmatpush.msra.mxu3 %v12648_v5  ;;  %v12992_v57 = vand.u32 4294901760, %v4555_v39  ;;  %v14776_v7 = vld [vmem:[#allocation128_spill] sm:$0xff]  ;;  %v7283_v5 = vsub.f32 %v12943_v6, %v14032_v47  ;;  %v5183_v60 = vadd.f32 %v14777_v1, %v5062_v13 }
 0x785   : > { %v7277_v52 = vsub.f32 %v12923_v23, %v14773_v55  ;;  %7261 = vmatpush.msrb.mxu1 %v7260_v31  ;;  %7365 = vmatpush.msrb.mxu2 %v12862_v0  ;;  %v7272_v63 = vand.u32 4294901760, %v7271_v51  ;;  %v4826_v59 = vadd.f32 %v14776_v7, %v4757_v11  ;;  %v13007_v31 = vsub.f32 %v4556_v17, %v12978_v54  ;;  %v4553_v51 = vld [vmem:[#allocation11 + $0x320] sm:$0xff]  ;;  %v14778_v55 = vld [vmem:[#allocation137_spill] sm:$0xff]  ;;  %v14780_v7 = vld [vmem:[#allocation148_spill] sm:$0xff] }
 0x786   : > { %v12996_v53 = vpop.f32.mrf.mxu0  ;;  %v12998_v56 = vpop.f32.mrf.mxu2  ;;  %6973 = vmatpush.msra.mxu0 %v12662_v24  ;;  %7169 = vmatmul.f32.vlgmr.msra.gmra.mxu3 %v12651_v22  ;;  %v5009_v20 = vadd.f32 %v14778_v55, %v4960_v36  ;;  %v13013_v24 = vand.u32 4294901760, %v4554_v25  ;;  %v13021_v13 = vsub.f32 %v4555_v39, %v12992_v57  ;;  %v14781_v36 = vld [vmem:[#allocation153_spill] sm:$0xff]  ;;  %v14782_v1 = vand.u32 4294901760, %v12970_v45  ;;  %v14783_v11 = vld [vmem:[#allocation130_spill] sm:$0xff]  ;;  %v14801_v0 = vld [vmem:[#allocation68_spill] sm:$0xff] }
 0x787   : > { %14774 = vst [vmem:[#allocation82_spill] sm:$0xff] %v12996_v53  ;;  %7267 = vmatpush.msrb.mxu1 %v7266_v4  ;;  %7368 = vmatpush.msrb.mxu2 %v12877_v18  ;;  %v7278_v17 = vand.u32 4294901760, %v7277_v52  ;;  %v5250_v4 = vadd.f32 %v14781_v36, %v5183_v60  ;;  %v13028_v47 = vand.u32 4294901760, %v4553_v51  ;;  %v7284_v39 = vand.u32 4294901760, %v7283_v5  ;;  %v14788_v53 = vld [vmem:[#allocation143_spill] sm:$0xff]  ;;  %v14789_v5 = vld [vmem:[#allocation150_spill] sm:$0xff] }
 0x788   : > { %14775 = vst [vmem:[#allocation85_spill] sm:$0xff] %v12998_v56  ;;  %v13015_v22 = vpop.f32.mrf.mxu3  ;;  %v5386_v56 = vadd.f32 %v14780_v7, %v5299_v9  ;;  %7433 = vmatpush.msrb.mxu3 %v12840_v16  ;;  %6976 = vmatpush.msra.mxu0 %v12673_v27  ;;  %v7289_v55 = vsub.f32 %v12970_v45, %v14782_v1  ;;  %v4552_v9 = vld [vmem:[#allocation11 + $0x318] sm:$0xff]  ;;  %v13030_v7 = vpop.f32.mrf.mxu1  ;;  %v14785_v36 = vand.u32 4294901760, %v12737_v33  ;;  %v14786_v1 = vand.u32 4294901760, %v12984_v49 }
 0x789   : > { %14779 = vst [vmem:[#allocation86_spill] sm:$0xff] %v13015_v22  ;;  %7273 = vmatpush.msrb.mxu1 %v7272_v63  ;;  %7371 = vmatpush.msrb.mxu2 %v12892_v41  ;;  %v4883_v27 = vadd.f32 %v14783_v11, %v4826_v59  ;;  %v14784_v63 = vld [vmem:[#allocation140_spill] sm:$0xff]  ;;  %v13044_v59 = vsub.f32 %v4554_v25, %v13013_v24  ;;  %v4551_v11 = vld [vmem:[#allocation11 + $0x310] sm:$0xff] }
 0x78a   : > { %7435 = vmatpush.msrb.mxu3 %v12848_v29  ;;  %6979 = vmatmul.f32.vlgmr.msra.gmra.mxu0 %v12689_v46  ;;  %v5070_v60 = vadd.f32 %v14784_v63, %v5009_v20  ;;  %v7295_v22 = vsub.f32 %v12984_v49, %v14786_v1  ;;  %v5435_v41 = vadd.f32 %v14789_v5, %v5386_v56  ;;  %v13050_v63 = vand.u32 4294901760, %v4552_v9  ;;  %v14793_v5 = vld [vmem:[#allocation142_spill] sm:$0xff] }
 0x78b   : > { %7039 = vmatmul.f32.gmra.mxu1 %v14785_v36  ;;  %7186 = vmatpush.msrb.mxu0 %v12840_v16  ;;  %14787 = vst [vmem:[#allocation75_spill] sm:$0xff] %v13044_v59  ;;  %v4964_v46 = vadd.f32 %v14788_v53, %v4883_v27  ;;  %v14790_v36 = vld [vmem:[#allocation149_spill] sm:$0xff]  ;;  %v7290_v25 = vand.u32 4294901760, %v7289_v55  ;;  %v13056_v1 = vsub.f32 %v4553_v51, %v13028_v47  ;;  %v14792_v56 = vand.u32 4294901760, %v13007_v31 }
 0x78c   : > { %7279 = vmatpush.msrb.mxu1 %v7278_v17  ;;  %7374 = vmatpush.msrb.mxu2 %v12903_v37  ;;  %v5305_v52 = vadd.f32 %v14790_v36, %v5250_v4  ;;  %v5488_v53 = vadd.f32 %v12675_v32, %v5435_v41  ;;  %v13063_v27 = vand.u32 4294901760, %v4551_v11  ;;  %v4550_v4 = vld [vmem:[#allocation11 + $0x308] sm:$0xff]  ;;  %v5187_v36 = vadd.f32 %v14793_v5, %v5070_v60 }
 0x78d   : > { %7437 = vmatpush.msrb.mxu3 %v12864_v30  ;;  %7124 = vmatmul.f32.gmra.mxu2 %v12711_v15  ;;  %14791 = vst [vmem:[#allocation78_spill] sm:$0xff] %v13056_v1  ;;  %v7301_v17 = vsub.f32 %v13007_v31, %v14792_v56  ;;  %v7296_v51 = vand.u32 4294901760, %v7295_v22  ;;  %v14796_v56 = vand.u32 4294901760, %v13021_v13  ;;  %v13080_v5 = vsub.f32 %v4552_v9, %v13050_v63  ;;  %v4549_v22 = vld [vmem:[#allocation11 + $0x300] sm:$0xff] }
 0x78e   : > { %7188 = vmatpush.msrb.mxu0 %v12848_v29  ;;  %7285 = vmatpush.msrb.mxu1 %v7284_v39  ;;  %v14795_v39 = vld [vmem:[#allocation141_spill] sm:$0xff]  ;;  %v14807_v37 = vand.u32 4294901760, %v12778_v40 }
 0x78f   : > { %7377 = vmatpush.msrb.mxu2 %v12923_v23  ;;  %7439 = vmatpush.msrb.mxu3 %v12879_v3  ;;  %v13069_v32 = vpop.f32.mrf.mxu0  ;;  %v13071_v41 = vpop.f32.mrf.mxu2  ;;  %v5013_v20 = vadd.f32 %v14795_v39, %v4964_v46  ;;  %v7307_v60 = vsub.f32 %v13021_v13, %v14796_v56  ;;  %14797 = vst [vmem:[#allocation90_spill] sm:$0xff] %v13080_v5  ;;  %v14798_v23 = vld [vmem:[#allocation154_spill] sm:$0xff]  ;;  %v13085_v46 = vand.u32 4294901760, %v4550_v4  ;;  %v7302_v9 = vand.u32 4294901760, %v7301_v17 }
 0x790   : > { %14794 = vst [vmem:[#allocation89_spill] sm:$0xff] %v13071_v41  ;;  %7173 = vmatmul.f32.gmra.mxu3 %v12711_v15  ;;  %7190 = vmatpush.msrb.mxu0 %v12864_v30  ;;  %v5390_v55 = vadd.f32 %v14798_v23, %v5305_v52  ;;  %v14800_v39 = vld [vmem:[#allocation158_spill] sm:$0xff]  ;;  %v5613_v41 = vadd.f32 %v14801_v0, %v5488_v53  ;;  %v14803_v52 = vand.u32 4294901760, %v13044_v59  ;;  %v13100_v56 = vand.u32 4294901760, %v4549_v22  ;;  %v14805_v0 = vld [vmem:[#allocation144_spill] sm:$0xff] }
 0x791   : > { %7291 = vmatpush.msrb.mxu1 %v7290_v25  ;;  %7380 = vmatpush.msrb.mxu2 %v12943_v6  ;;  %14799 = vst [vmem:[#allocation83_spill] sm:$0xff] %v13085_v46  ;;  %v13087_v15 = vpop.f32.mrf.mxu3  ;;  %v5255_v18 = vadd.f32 %v14800_v39, %v5187_v36  ;;  %v13094_v23 = vsub.f32 %v4551_v11, %v13063_v27  ;;  %v13102_v36 = vpop.f32.mrf.mxu1  ;;  %v7308_v17 = vand.u32 4294901760, %v7307_v60  ;;  %v14040_v11 = vand.u32 4294901760, %v13080_v5 }
 0x792   : > { %7441 = vmatpush.msrb.mxu3 %v12897_v61  ;;  %7192 = vmatpush.msrb.mxu0 %v12879_v3  ;;  %v7313_v25 = vsub.f32 %v13044_v59, %v14803_v52  ;;  %14804 = vst [vmem:[#allocation87_spill] sm:$0xff] %v13100_v56  ;;  %v5078_v53 = vadd.f32 %v14805_v0, %v5013_v20  ;;  %v14808_v52 = vand.u32 4294901760, %v13056_v1  ;;  %v14810_v0 = vld [vmem:[#allocation156_spill] sm:$0xff] }
 0x793   : > { %14802 = vst [vmem:[#allocation84_spill] sm:$0xff] %v13094_v23  ;;  %7297 = vmatpush.msrb.mxu1 %v7296_v51  ;;  %7383 = vmatpush.msrb.mxu2 %v12970_v45  ;;  %v14806_v51 = vld [vmem:[#allocation157_spill] sm:$0xff]  ;;  %v13116_v20 = vsub.f32 %v4550_v4, %v13085_v46  ;;  %v5311_v6 = vadd.f32 %v14810_v0, %v5255_v18  ;;  %v14812_v18 = vld [vmem:[#allocation146_spill] sm:$0xff] }
 0x794   : > { %7443 = vmatpush.msrb.mxu3 %v12908_v2  ;;  %6984 = vmatmul.f32.gmra.mxu0 %v12737_v33  ;;  %v5439_v39 = vadd.f32 %v14806_v51, %v5390_v55  ;;  %v7319_v45 = vsub.f32 %v13056_v1, %v14808_v52  ;;  %v5679_v33 = vadd.f32 %v12677_v21, %v5613_v41  ;;  %v14041_v55 = vand.u32 4294901760, %v13094_v23 }
 0x795   : > { %7045 = vmatmul.f32.gmra.mxu1 %v14807_v37  ;;  %7194 = vmatpush.msrb.mxu0 %v12897_v61  ;;  %14809 = vst [vmem:[#allocation88_spill] sm:$0xff] %v13116_v20  ;;  %v7314_v60 = vand.u32 4294901760, %v7313_v25  ;;  %v13126_v51 = vsub.f32 %v4549_v22, %v13100_v56  ;;  %v7325_v21 = vsub.f32 %v13080_v5, %v14040_v11  ;;  %v14043_v41 = vand.u32 4294901760, %v13116_v20 }
 0x796   : > { %7303 = vmatpush.msrb.mxu1 %v7302_v9  ;;  %7386 = vmatpush.msrb.mxu2 %v12984_v49  ;;  %v5496_v37 = vadd.f32 %v12718_v43, %v5439_v39  ;;  %v5191_v4 = vadd.f32 %v14812_v18, %v5078_v53  ;;  %v7320_v43 = vand.u32 4294901760, %v7319_v45  ;;  %v4580_v9 = vld [vmem:[#allocation11 + $0x3f8] sm:$0xff]  ;;  %v14813_v39 = vld [vmem:[#allocation159_spill] sm:$0xff]  ;;  %v5733_v52 = vadd.f32 %v12691_v12, %v5679_v33 }
 0x797   : > { %7445 = vmatpush.msrb.mxu3 %v12937_v48  ;;  %7128 = vmatmul.f32.gmra.mxu2 %v12755_v10  ;;  %14811 = vst [vmem:[#allocation93_spill] sm:$0xff] %v13126_v51  ;;  %v7331_v53 = vsub.f32 %v13094_v23, %v14041_v55  ;;  %v14814_v45 = vld [vmem:[#allocation163_spill] sm:$0xff]  ;;  %v13156_v33 = vand.u32 4294901760, %v4580_v9  ;;  %v14820_v55 = vld [vmem:[#allocation160_spill] sm:$0xff] }
 0x798   : > { %7196 = vmatpush.msrb.mxu0 %v12908_v2  ;;  %7309 = vmatpush.msrb.mxu1 %v7308_v17  ;;  %v13138_v22 = vpop.f32.mrf.mxu2  ;;  %v5394_v17 = vadd.f32 %v14813_v39, %v5311_v6  ;;  %v5260_v0 = vadd.f32 %v14814_v45, %v5191_v4  ;;  %v5617_v18 = vadd.f32 %v12681_v34, %v5496_v37  ;;  %v4579_v6 = vld [vmem:[#allocation11 + $0x3f0] sm:$0xff] }
 0x799   : > { %7389 = vmatpush.msrb.mxu2 %v13007_v31  ;;  %7447 = vmatpush.msrb.mxu3 %v12954_v42  ;;  %v13136_v25 = vpop.f32.mrf.mxu0  ;;  %v5820_v12 = vadd.f32 %v12825_v50, %v5733_v52  ;;  %14815 = vst [vmem:[#allocation94_spill] sm:$0xff] %v13156_v33  ;;  %v7337_v34 = vsub.f32 %v13116_v20, %v14043_v41  ;;  %v7332_v50 = vand.u32 4294901760, %v7331_v53  ;;  %v14817_v52 = vld [vmem:[#allocation173_spill] sm:$0xff]  ;;  %v13170_v45 = vand.u32 4294901760, %v4579_v6 }
 0x79a   : > { %7177 = vmatmul.f32.gmra.mxu3 %v12755_v10  ;;  %7198 = vmatpush.msrb.mxu0 %v12937_v48  ;;  %v7326_v10 = vand.u32 4294901760, %v7325_v21  ;;  %v13162_v37 = vpop.f32.mrf.mxu1  ;;  %v13168_v21 = vand.u32 4294901760, %v14817_v52  ;;  %v5317_v11 = vadd.f32 %v14820_v55, %v5260_v0  ;;  %v14821_v41 = vand.u32 4294901760, %v12820_v8  ;;  %v4577_v55 = vld [vmem:[#allocation11 + $0x3e0] sm:$0xff] }
 0x79b   : > { %7315 = vmatpush.msrb.mxu1 %v7314_v60  ;;  %7392 = vmatpush.msrb.mxu2 %v13021_v13  ;;  %v13151_v39 = vpop.f32.mrf.mxu3  ;;  %v14816_v60 = vld [vmem:[#allocation161_spill] sm:$0xff]  ;;  %14819 = vst [vmem:[#allocation92_spill] sm:$0xff] %v13170_v45  ;;  %v5869_v53 = vadd.f32 %v12793_v62, %v5820_v12 }
 0x79c   : > { %7449 = vmatpush.msrb.mxu3 %v12978_v54  ;;  %7200 = vmatpush.msrb.mxu0 %v12954_v42  ;;  %v5443_v4 = vadd.f32 %v14816_v60, %v5394_v17  ;;  %14818 = vst [vmem:[#allocation91_spill] sm:$0xff] %v13168_v21  ;;  %v14822_v17 = vand.u32 4294901760, %v13126_v51  ;;  %v13183_v60 = vsub.f32 %v4580_v9, %v13156_v33 }
 0x79d   : > { %7321 = vmatpush.msrb.mxu1 %v7320_v43  ;;  %7395 = vmatpush.msrb.mxu2 %v13044_v59  ;;  %v4578_v43 = vld [vmem:[#allocation11 + $0x3e8] sm:$0xff]  ;;  %v5684_v59 = vadd.f32 %v12720_v28, %v5617_v18  ;;  %v13193_v62 = vsub.f32 %v14817_v52, %v13168_v21  ;;  %v13196_v9 = vsub.f32 %v4579_v6, %v13170_v45  ;;  %v14826_v18 = vld [vmem:[#allocation70_spill] sm:$0xff] }
 0x79e   : > { %7451 = vmatpush.msrb.mxu3 %v12992_v57  ;;  %6989 = vmatmul.f32.gmra.mxu0 %v12778_v40  ;;  %v7343_v40 = vsub.f32 %v13126_v51, %v14822_v17  ;;  %14823 = vst [vmem:[#allocation98_spill] sm:$0xff] %v13183_v60  ;;  %v5504_v28 = vadd.f32 %v12747_v58, %v5443_v4  ;;  %v13188_v0 = vand.u32 4294901760, %v4578_v43  ;;  %v4576_v4 = vld [vmem:[#allocation11 + $0x3d8] sm:$0xff] }
 0x79f   : > { %7051 = vmatmul.f32.gmra.mxu1 %v14821_v41  ;;  %7202 = vmatpush.msrb.mxu0 %v12978_v54  ;;  %v7338_v41 = vand.u32 4294901760, %v7337_v34  ;;  %14825 = vst [vmem:[#allocation95_spill] sm:$0xff] %v13196_v9  ;;  %v5398_v12 = vadd.f32 %v14826_v18, %v5317_v11  ;;  %v5739_v58 = vadd.f32 %v12731_v14, %v5684_v59  ;;  %v13202_v34 = vand.u32 4294901760, %v4577_v55 }
 0x7a0   : > { %7327 = vmatpush.msrb.mxu1 %v7326_v10  ;;  %7398 = vmatpush.msrb.mxu2 %v13056_v1  ;;  %14824 = vst [vmem:[#allocation101_spill] sm:$0xff] %v13188_v0  ;;  %v7344_v10 = vand.u32 4294901760, %v7343_v40  ;;  %v5922_v52 = vadd.f32 %v12827_v19, %v5869_v53  ;;  %v14048_v14 = vand.u32 4294901760, %v13183_v60  ;;  %v5621_v59 = vadd.f32 %v12724_v38, %v5504_v28  ;;  %v4575_v40 = vld [vmem:[#allocation11 + $0x3d0] sm:$0xff]  ;;  %v14828_v38 = vld [vmem:[#allocation164_spill] sm:$0xff] }
 0x7a1   : > { %7453 = vmatpush.msrb.mxu3 %v13013_v24  ;;  %7132 = vmatmul.f32.gmra.mxu2 %v12799_v44  ;;  %v5824_v11 = vadd.f32 %v12868_v26, %v5739_v58  ;;  %v13216_v6 = vsub.f32 %v4578_v43, %v13188_v0  ;;  %v13223_v19 = vand.u32 4294901760, %v4576_v4  ;;  %v5447_v53 = vadd.f32 %v14828_v38, %v5398_v12  ;;  %v14831_v58 = vld [vmem:[#allocation61_spill] sm:$0xff]  ;;  %v14834_v1 = vld [vmem:[#allocation176_spill] sm:$0xff] }
 0x7a2   : > { %7204 = vmatpush.msrb.mxu0 %v12992_v57  ;;  %7333 = vmatpush.msrb.mxu1 %v7332_v50  ;;  %v13206_v17 = vpop.f32.mrf.mxu2  ;;  %v7219_v26 = vand.u32 4294901760, %v13193_v62  ;;  %v13229_v43 = vsub.f32 %v4577_v55, %v13202_v34  ;;  %v7687_v12 = vsub.f32 %v13183_v60, %v14048_v14  ;;  %v13242_v38 = vand.u32 4294901760, %v4575_v40  ;;  %v14832_v55 = vld [vmem:[#allocation165_spill] sm:$0xff] }
 0x7a3   : > { %7401 = vmatpush.msrb.mxu2 %v13080_v5  ;;  %7455 = vmatpush.msrb.mxu3 %v13028_v47  ;;  %v13204_v50 = vpop.f32.mrf.mxu0  ;;  %14827 = vst [vmem:[#allocation96_spill] sm:$0xff] %v13216_v6  ;;  %v14835_v14 = vand.u32 4294901760, %v13196_v9 }
 0x7a4   : > { %7181 = vmatmul.f32.gmra.mxu3 %v12799_v44  ;;  %7206 = vmatpush.msrb.mxu0 %v13013_v24  ;;  %14829 = vst [vmem:[#allocation106_spill] sm:$0xff] %v13229_v43  ;;  %v13231_v28 = vpop.f32.mrf.mxu1  ;;  %v4574_v44 = vld [vmem:[#allocation11 + $0x3c8] sm:$0xff] }
 0x7a5   : > { %7339 = vmatpush.msrb.mxu1 %v7338_v41  ;;  %7404 = vmatpush.msrb.mxu2 %v13094_v23  ;;  %v13218_v18 = vpop.f32.mrf.mxu3  ;;  %14830 = vst [vmem:[#allocation107_spill] sm:$0xff] %v13231_v28  ;;  %v6047_v41 = vadd.f32 %v12836_v35, %v5922_v52  ;;  %v14833_v23 = vld [vmem:[#allocation166_spill] sm:$0xff]  ;;  %v5873_v35 = vadd.f32 %v14834_v1, %v5824_v11  ;;  %v4573_v1 = vld [vmem:[#allocation11 + $0x3c0] sm:$0xff] }
 0x7a6   : > { %7457 = vmatpush.msrb.mxu3 %v13050_v63  ;;  %7208 = vmatpush.msrb.mxu0 %v13028_v47  ;;  %v5512_v5 = vadd.f32 %v14833_v23, %v5447_v53  ;;  %v13257_v23 = vsub.f32 %v4576_v4, %v13223_v19  ;;  %v13262_v53 = vand.u32 4294901760, %v4574_v44 }
 0x7a7   : > { %7345 = vmatpush.msrb.mxu1 %v7344_v10  ;;  %7407 = vmatpush.msrb.mxu2 %v13116_v20  ;;  %v13240_v10 = vand.u32 4294901760, %v14831_v58  ;;  %v5689_v20 = vadd.f32 %v14832_v55, %v5621_v59  ;;  %v6113_v52 = vadd.f32 %v13069_v32, %v6047_v41  ;;  %v7693_v59 = vsub.f32 %v13196_v9, %v14835_v14  ;;  %v4572_v9 = vld [vmem:[#allocation11 + $0x3b8] sm:$0xff] }
 0x7a8   : > { %7459 = vmatpush.msrb.mxu3 %v13063_v27  ;;  %6994 = vmatmul.f32.gmra.mxu0 %v12820_v8  ;;  %v7688_v32 = vand.u32 4294901760, %v7687_v12  ;;  %v7220_v41 = vsub.f32 %v13193_v62, %v7219_v26  ;;  %v13272_v14 = vsub.f32 %v4575_v40, %v13242_v38  ;;  %v14837_v8 = vld [vmem:[#allocation69_spill] sm:$0xff]  ;;  %v14840_v40 = vld [vmem:[#allocation178_spill] sm:$0xff] }
 0x7a9   : > { %7210 = vmatpush.msrb.mxu0 %v13050_v63  ;;  %7347 = vmatmul.f32.vlgmr.msrb.gmra.mxu1 %v13168_v21  ;;  %v13269_v4 = vsub.f32 %v14831_v58, %v13240_v10  ;;  %v5625_v11 = vadd.f32 %v14837_v8, %v5512_v5  ;;  %v5930_v21 = vadd.f32 %v14840_v40, %v5873_v35  ;;  %v7694_v5 = vand.u32 4294901760, %v7693_v59  ;;  %v4571_v8 = vld [vmem:[#allocation11 + $0x3b0] sm:$0xff] }
 0x7aa   : > { %7410 = vmatpush.msrb.mxu2 %v13126_v51  ;;  %7461 = vmatpush.msrb.mxu3 %v13085_v46  ;;  %v14838_v51 = vand.u32 4294901760, %v13216_v6  ;;  %v13298_v35 = vsub.f32 %v4574_v44, %v13262_v53 }
 0x7ab   : > { %7571 = vmatpush.msra.mxu1 %v12840_v16  ;;  %7212 = vmatpush.msrb.mxu0 %v13063_v27  ;;  %v14836_v16 = vld [vmem:[#allocation73_spill] sm:$0xff] }
 0x7ac   : > { %7413 = vmatmul.f32.vlgmr.msrb.gmra.mxu2 %v13193_v62  ;;  %7463 = vmatpush.msrb.mxu3 %v13100_v56  ;;  %v5745_v55 = vadd.f32 %v14836_v16, %v5689_v20  ;;  %v7699_v12 = vsub.f32 %v13216_v6, %v14838_v51  ;;  %v13281_v62 = vand.u32 4294901760, %v4573_v1  ;;  %v13285_v60 = vpop.f32.mrf.mxu2  ;;  %v14841_v16 = vld [vmem:[#allocation63_spill] sm:$0xff]  ;;  %v14842_v6 = vand.u32 4294901760, %v13229_v43  ;;  %v14846_v20 = vld [vmem:[#allocation26_spill] sm:$0xff] }
 0x7ad   : > { %7573 = vmatpush.msra.mxu1 %v12848_v29  ;;  %7620 = vmatpush.msra.mxu2 %v13156_v33  ;;  %v13283_v58 = vpop.f32.mrf.mxu0  ;;  %14839 = vst [vmem:[#allocation102_spill] sm:$0xff] %v13285_v60  ;;  %v6167_v29 = vadd.f32 %v13030_v7, %v6113_v52  ;;  %v7221_v7 = vand.u32 4294901760, %v7220_v41  ;;  %v7227_v52 = vand.u32 4294901760, %v13269_v4  ;;  %v6051_v59 = vadd.f32 %v14846_v20, %v5930_v21  ;;  %v4569_v20 = vld [vmem:[#allocation11 + $0x3a0] sm:$0xff] }
 0x7ae   : > { %7214 = vmatpush.msrb.mxu0 %v13085_v46  ;;  %7467 = vmatmul.f32.vlgmr.msrb.gmra.mxu3 %v7219_v26  ;;  %v5828_v51 = vadd.f32 %v14841_v16, %v5745_v55  ;;  %v7705_v33 = vsub.f32 %v13229_v43, %v14842_v6  ;;  %v7700_v6 = vand.u32 4294901760, %v7699_v12  ;;  %v14844_v55 = vld [vmem:[#allocation76_spill] sm:$0xff]  ;;  %v13313_v40 = vsub.f32 %v4573_v1, %v13281_v62  ;;  %v6480_v41 = vpop.f32.mrf.mxu1  ;;  %v14847_v43 = vld [vmem:[#allocation89_spill] sm:$0xff]  ;;  %v14850_v1 = vld [vmem:[#allocation23_spill] sm:$0xff] }
 0x7af   : > { %7575 = vmatpush.msra.mxu1 %v12864_v30  ;;  %7622 = vmatpush.msra.mxu2 %v13170_v45  ;;  %v13300_v26 = vpop.f32.mrf.mxu3  ;;  %v13305_v30 = vand.u32 4294901760, %v4572_v9  ;;  %v13310_v44 = vand.u32 4294901760, %v14844_v55  ;;  %v9133_v16 = vld [vmem:[#allocation2 + $0x28] sm:$0xff]  ;;  %v6254_v45 = vadd.f32 %v14847_v43, %v6167_v29  ;;  %v14851_v46 = vld [vmem:[#allocation177_spill] sm:$0xff]  ;;  %v14068_v21 = vand.u32 4294901760, %v13298_v35 }
 0x7b0   : > { %14843 = vst [vmem:[#allocation104_spill] sm:$0xff] %v13300_v26  ;;  %7689 = vmatpush.msra.mxu3 %v7688_v32  ;;  %7216 = vmatpush.msrb.mxu0 %v13100_v56  ;;  %v13315_v32 = vand.u32 4294901760, %v4571_v8  ;;  %9057 = vtanh.f32 %v9133_v16  ;;  %v14849_v26 = vld [vmem:[#allocation122_spill] sm:$0xff]  ;;  %v5877_v56 = vadd.f32 %v14850_v1, %v5828_v51  ;;  %v14852_v28 = vand.u32 4294901760, %v14851_v46 }
 0x7b1   : > { %7577 = vmatpush.msra.mxu1 %v12879_v3  ;;  %7624 = vmatpush.msra.mxu2 %v13188_v0  ;;  %14845 = vst [vmem:[#allocation110_spill] sm:$0xff] %v13313_v40  ;;  %v14848_v3 = vand.u32 4294901760, %v13257_v23  ;;  %v4570_v0 = vld [vmem:[#allocation11 + $0x3a8] sm:$0xff]  ;;  %v5694_v60 = vadd.f32 %v14849_v26, %v5625_v11  ;;  %v7706_v16 = vand.u32 4294901760, %v7705_v33  ;;  %v6118_v43 = vadd.f32 %v13136_v25, %v6051_v59  ;;  %v14856_v59 = vld [vmem:[#allocation175_spill] sm:$0xff] }
 0x7b2   : > { %7695 = vmatpush.msra.mxu3 %v7694_v5  ;;  %7222 = vmatmul.f32.vlgmr.msrb.gmra.mxu0 %v7221_v7  ;;  %v14853_v29 = vand.u32 4294901760, %v13272_v14  ;;  %v13335_v5 = vsub.f32 %v4572_v9, %v13305_v30  ;;  %v14069_v46 = vand.u32 4294901760, %v13313_v40  ;;  %v13339_v33 = vand.u32 4294901760, %v4570_v0 }
 0x7b3   : > { %v7711_v12 = vsub.f32 %v13257_v23, %v14848_v3  ;;  %7351 = vmatmul.f32.gmra.mxu1 %v13240_v10  ;;  %7492 = vmatpush.msra.mxu0 %v14852_v28  ;;  %v6303_v25 = vadd.f32 %v13087_v15, %v6254_v45  ;;  %v14854_v28 = vld [vmem:[#allocation20_spill] sm:$0xff]  ;;  %v7228_v26 = vsub.f32 %v13269_v4, %v7227_v52  ;;  %v14857_v3 = vld [vmem:[#allocation97_spill] sm:$0xff]  ;;  %v13359_v45 = vand.u32 4294901760, %v4569_v20 }
 0x7b4   : > { %7579 = vmatpush.msra.mxu1 %v12897_v61  ;;  %7626 = vmatpush.msra.mxu2 %v13202_v34  ;;  %v7717_v11 = vsub.f32 %v13272_v14, %v14853_v29  ;;  %v13342_v61 = vsub.f32 %v4571_v8, %v13315_v32  ;;  %v14855_v51 = vand.u32 4294901760, %v14854_v28  ;;  %v13351_v7 = vsub.f32 %v14844_v55, %v13310_v44  ;;  %v14858_v55 = vld [vmem:[#allocation29_spill] sm:$0xff] }
 0x7b5   : > { %7701 = vmatpush.msra.mxu3 %v7700_v6  ;;  %7418 = vmatmul.f32.gmra.mxu2 %v13269_v4  ;;  %v7712_v9 = vand.u32 4294901760, %v7711_v12  ;;  %v5751_v6 = vadd.f32 %v14856_v59, %v5694_v60  ;;  %v5938_v1 = vadd.f32 %v14857_v3, %v5877_v56  ;;  %v7723_v15 = vsub.f32 %v13298_v35, %v14068_v21 }
 0x7b6   : > { %7496 = vmatpush.msra.mxu0 %v14855_v51  ;;  %7581 = vmatpush.msra.mxu1 %v12908_v2  ;;  %v4568_v2 = vld [vmem:[#allocation11 + $0x398] sm:$0xff]  ;;  %v13361_v12 = vpop.eup %9057  ;;  %v14859_v29 = vand.u32 4294901760, %v14858_v55  ;;  %v6173_v56 = vadd.f32 %v13102_v36, %v6118_v43  ;;  %v7718_v60 = vand.u32 4294901760, %v7717_v11  ;;  %v7729_v3 = vsub.f32 %v13313_v40, %v14069_v46  ;;  %v4567_v36 = vld [vmem:[#allocation11 + $0x390] sm:$0xff] }
 0x7b7   : > { %7628 = vmatpush.msra.mxu2 %v13223_v19  ;;  %7707 = vmatpush.msra.mxu3 %v7706_v16  ;;  %v6355_v8 = vpop.f32.mrf.mxu0  ;;  %v6546_v4 = vpop.f32.mrf.mxu2  ;;  %v7734_v16 = vand.u32 4294901760, %v13335_v5  ;;  %v14860_v51 = vld [vmem:[#allocation82_spill] sm:$0xff]  ;;  %v13375_v55 = vsub.f32 %v4570_v0, %v13339_v33  ;;  %v14861_v11 = vld [vmem:[#allocation37_spill] sm:$0xff]  ;;  %v7724_v0 = vand.u32 4294901760, %v7723_v15  ;;  %v13386_v46 = vand.u32 4294901760, %v13361_v12  ;;  %v14864_v15 = vld [vmem:[#allocation72_spill] sm:$0xff] }
 0x7b8   : > { %7473 = vmatmul.f32.gmra.mxu3 %v7227_v52  ;;  %7500 = vmatpush.msra.mxu0 %v14859_v29  ;;  %v6356_v28 = vadd.f32 %v6355_v8, %v6303_v25  ;;  %v5832_v59 = vadd.f32 %v14860_v51, %v5751_v6  ;;  %v14862_v25 = vand.u32 4294901760, %v14861_v11  ;;  %v7229_v6 = vand.u32 4294901760, %v7228_v26  ;;  %v14863_v51 = vld [vmem:[#allocation71_spill] sm:$0xff]  ;;  %v4566_v11 = vld [vmem:[#allocation11 + $0x388] sm:$0xff]  ;;  %v6484_v26 = vpop.f32.mrf.mxu1 }
 0x7b9   : > { %7583 = vmatpush.msra.mxu1 %v12937_v48  ;;  %7630 = vmatpush.msra.mxu2 %v13242_v38  ;;  %v6600_v43 = vpop.f32.mrf.mxu3  ;;  %v7235_v48 = vand.u32 4294901760, %v13351_v7  ;;  %v13380_v8 = vand.u32 4294901760, %v4568_v2  ;;  %v6055_v21 = vadd.f32 %v14863_v51, %v5938_v1  ;;  %v14865_v51 = vld [vmem:[#allocation46_spill] sm:$0xff]  ;;  %v7730_v52 = vand.u32 4294901760, %v7729_v3 }
 0x7ba   : > { %7713 = vmatpush.msra.mxu3 %v7712_v9  ;;  %7504 = vmatpush.msra.mxu0 %v14862_v25  ;;  %v6481_v29 = vadd.f32 %v6480_v41, %v6356_v28  ;;  %v13389_v9 = vsub.f32 %v4569_v20, %v13359_v45  ;;  %v6258_v25 = vadd.f32 %v13138_v22, %v6173_v56  ;;  %v14866_v20 = vand.u32 4294901760, %v14865_v51  ;;  %v14868_v3 = vld [vmem:[#allocation174_spill] sm:$0xff] }
 0x7bb   : > { %7585 = vmatpush.msra.mxu1 %v12954_v42  ;;  %7632 = vmatpush.msra.mxu2 %v13262_v53  ;;  %v7735_v41 = vsub.f32 %v13335_v5, %v7734_v16  ;;  %v13395_v42 = vand.u32 4294901760, %v4567_v36  ;;  %v5881_v28 = vadd.f32 %v14864_v15, %v5832_v59  ;;  %v14867_v40 = vand.u32 4294901760, %v13342_v61 }
 0x7bc   : > { %7719 = vmatpush.msra.mxu3 %v7718_v60  ;;  %7230 = vmatmul.f32.gmra.mxu0 %v7229_v6  ;;  %v6547_v1 = vadd.f32 %v6546_v4, %v6481_v29  ;;  %v7746_v56 = vand.u32 4294901760, %v13375_v55  ;;  %v4565_v60 = vld [vmem:[#allocation11 + $0x380] sm:$0xff]  ;;  %v6123_v4 = vadd.f32 %v13204_v50, %v6055_v21  ;;  %v13409_v59 = vsub.f32 %v4568_v2, %v13380_v8  ;;  %v14869_v50 = vld [vmem:[#allocation74_spill] sm:$0xff] }
 0x7bd   : > { %7355 = vmatmul.f32.gmra.mxu1 %v13310_v44  ;;  %7508 = vmatpush.msra.mxu0 %v14866_v20  ;;  %v7741_v22 = vsub.f32 %v13342_v61, %v14867_v40  ;;  %v13411_v6 = vand.u32 4294901760, %v4566_v11  ;;  %v13416_v15 = vand.u32 4294901760, %v14868_v3  ;;  %v7236_v40 = vsub.f32 %v13351_v7, %v7235_v48 }
 0x7be   : > { %7587 = vmatpush.msra.mxu1 %v12978_v54  ;;  %7634 = vmatpush.msra.mxu2 %v13281_v62  ;;  %v13413_v29 = vadd.f32 %v6600_v43, %v6547_v1  ;;  %v7752_v54 = vand.u32 4294901760, %v13389_v9  ;;  %v6307_v51 = vadd.f32 %v13151_v39, %v6258_v25  ;;  %v14870_v21 = vand.u32 4294901760, %v14869_v50 }
 0x7bf   : > { %7725 = vmatpush.msra.mxu3 %v7724_v0  ;;  %7423 = vmatmul.f32.gmra.mxu2 %v13351_v7  ;;  %v7736_v2 = vand.u32 4294901760, %v7735_v41  ;;  %v13426_v43 = vsub.f32 %v4567_v36, %v13395_v42  ;;  %v13428_v1 = vand.u32 4294901760, %v4565_v60  ;;  %v14871_v0 = vld [vmem:[#allocation85_spill] sm:$0xff]  ;;  %v7742_v7 = vand.u32 4294901760, %v7741_v22 }
 0x7c0   : > { %7512 = vmatpush.msra.mxu0 %v14870_v21  ;;  %7589 = vmatpush.msra.mxu1 %v12992_v57  ;;  %v5946_v20 = vadd.f32 %v14871_v0, %v5881_v28  ;;  %v7747_v39 = vsub.f32 %v13375_v55, %v7746_v56  ;;  %v7242_v25 = vsub.f32 %v13361_v12, %v13386_v46  ;;  %v6551_v41 = vpop.f32.mrf.mxu2  ;;  %v14872_v36 = vld [vmem:[#allocation81_spill] sm:$0xff]  ;;  %v7758_v28 = vand.u32 4294901760, %v13409_v59 }
 0x7c1   : > { %7636 = vmatpush.msra.mxu2 %v13305_v30  ;;  %7731 = vmatpush.msra.mxu3 %v7730_v52  ;;  %v6363_v57 = vpop.f32.mrf.mxu0  ;;  %v14873_v50 = vand.u32 4294901760, %v14872_v36  ;;  %v6179_v21 = vadd.f32 %v13162_v37, %v6123_v4  ;;  %v13442_v52 = vsub.f32 %v4566_v11, %v13411_v6  ;;  %v7753_v12 = vsub.f32 %v13389_v9, %v7752_v54 }
 0x7c2   : > { %7479 = vmatmul.f32.gmra.mxu3 %v7235_v48  ;;  %v6364_v22 = vadd.f32 %v6363_v57, %v6307_v51  ;;  %7591 = vmatpush.msra.mxu1 %v13013_v24  ;;  %v14874_v0 = vand.u32 4294901760, %v12984_v49  ;;  %v7237_v37 = vand.u32 4294901760, %v7236_v40  ;;  %v7764_v4 = vand.u32 4294901760, %v13426_v43  ;;  %v14875_v57 = vld [vmem:[#allocation86_spill] sm:$0xff]  ;;  %v6488_v49 = vpop.f32.mrf.mxu1 }
 0x7c3   : > { %7516 = vmatpush.msra.mxu0 %v14873_v50  ;;  %7638 = vmatpush.msra.mxu2 %v13315_v32  ;;  %v6606_v48 = vpop.f32.mrf.mxu3  ;;  %v13453_v11 = vsub.f32 %v4565_v60, %v13428_v1  ;;  %v6059_v24 = vadd.f32 %v14875_v57, %v5946_v20  ;;  %v7748_v36 = vand.u32 4294901760, %v7747_v39  ;;  %v7243_v50 = vand.u32 4294901760, %v7242_v25  ;;  %v14881_v57 = vld [vmem:[#allocation107_spill] sm:$0xff] }
 0x7c4   : > { %7737 = vmatpush.msra.mxu3 %v7736_v2  ;;  %v6485_v51 = vadd.f32 %v6484_v26, %v6364_v22  ;;  %7593 = vmatpush.msra.mxu1 %v13028_v47  ;;  %v13460_v2 = vsub.f32 %v14868_v3, %v13416_v15  ;;  %v6262_v40 = vadd.f32 %v13206_v17, %v6179_v21  ;;  %v7770_v60 = vand.u32 4294901760, %v13442_v52 }
 0x7c5   : > { %7520 = vmatpush.msra.mxu0 %v14874_v0  ;;  %7640 = vmatpush.msra.mxu2 %v13339_v33  ;;  %v7759_v26 = vsub.f32 %v13409_v59, %v7758_v28  ;;  %v14876_v20 = vand.u32 4294901760, %v13007_v31  ;;  %v7754_v39 = vand.u32 4294901760, %v7753_v12  ;;  %v6128_v17 = vadd.f32 %v13283_v58, %v6059_v24 }
 0x7c6   : > { %7743 = vmatpush.msra.mxu3 %v7742_v7  ;;  %7238 = vmatmul.f32.gmra.mxu0 %v7237_v37  ;;  %v6552_v47 = vadd.f32 %v6551_v41, %v6485_v51  ;;  %v7765_v3 = vsub.f32 %v13426_v43, %v7764_v4  ;;  %v7776_v7 = vand.u32 4294901760, %v13453_v11  ;;  %v7653_v31 = vand.u32 4294901760, %v13460_v2 }
 0x7c7   : > { %7359 = vmatmul.f32.gmra.mxu1 %v13386_v46  ;;  %7524 = vmatpush.msra.mxu0 %v14876_v20  ;;  %v6311_v41 = vadd.f32 %v13218_v18, %v6262_v40  ;;  %v7760_v58 = vand.u32 4294901760, %v7759_v26  ;;  %v7244_v22 = vsub.f32 %v7242_v25, %v7243_v50  ;;  %v7771_v12 = vsub.f32 %v13442_v52, %v7770_v60  ;;  %v14879_v18 = vld [vmem:[#allocation75_spill] sm:$0xff] }
 0x7c8   : > { %7595 = vmatpush.msra.mxu1 %v13050_v63  ;;  %7642 = vmatpush.msra.mxu2 %v13359_v45  ;;  %v13477_v21 = vadd.f32 %v6606_v48, %v6552_v47  ;;  %v14877_v63 = vand.u32 4294901760, %v13021_v13  ;;  %v14878_v48 = vld [vmem:[#allocation43_spill] sm:$0xff]  ;;  %v14880_v13 = vand.u32 4294901760, %v14879_v18  ;;  %v7766_v24 = vand.u32 4294901760, %v7765_v3  ;;  %v14883_v47 = vld [vmem:[#allocation78_spill] sm:$0xff] }
 0x7c9   : > { %7749 = vmatpush.msra.mxu3 %v7748_v36  ;;  %7428 = vmatmul.f32.gmra.mxu2 %v7242_v25  ;;  %v13489_v0 = vand.u32 4294901760, %v14878_v48  ;;  %v7777_v25 = vsub.f32 %v13453_v11, %v7776_v7  ;;  %v14882_v40 = vld [vmem:[#allocation83_spill] sm:$0xff]  ;;  %v14884_v20 = vand.u32 4294901760, %v14883_v47  ;;  %v14891_v47 = vld [vmem:[#allocation84_spill] sm:$0xff] }
 0x7ca   : > { %7528 = vmatpush.msra.mxu0 %v14877_v63  ;;  %7597 = vmatpush.msra.mxu1 %v13063_v27  ;;  %v6556_v51 = vpop.f32.mrf.mxu2  ;;  %v6185_v27 = vadd.f32 %v14881_v57, %v6128_v17  ;;  %v7654_v17 = vsub.f32 %v13460_v2, %v7653_v31  ;;  %v14885_v63 = vld [vmem:[#allocation87_spill] sm:$0xff] }
 0x7cb   : > { %7644 = vmatpush.msra.mxu2 %v13380_v8  ;;  %7755 = vmatpush.msra.mxu3 %v7754_v39  ;;  %v6371_v37 = vpop.f32.mrf.mxu0  ;;  %v7772_v39 = vand.u32 4294901760, %v7771_v12 }
 0x7cc   : > { %7485 = vmatmul.f32.gmra.mxu3 %v7243_v50  ;;  %7532 = vmatpush.msra.mxu0 %v14880_v13  ;;  %v6372_v36 = vadd.f32 %v6371_v37, %v6311_v41  ;;  %v7245_v50 = vand.u32 4294901760, %v7244_v22  ;;  %v13508_v41 = vsub.f32 %v14878_v48, %v13489_v0  ;;  %v6492_v37 = vpop.f32.mrf.mxu1  ;;  %v7778_v22 = vand.u32 4294901760, %v7777_v25  ;;  %v14887_v13 = vld [vmem:[#allocation90_spill] sm:$0xff]  ;;  %v14894_v25 = vld [vmem:[#allocation92_spill] sm:$0xff] }
 0x7cd   : > { %7599 = vmatpush.msra.mxu1 %v14882_v40  ;;  %7646 = vmatpush.msra.mxu2 %v13395_v42  ;;  %v6612_v26 = vpop.f32.mrf.mxu3  ;;  %v14888_v57 = vand.u32 4294901760, %v14887_v13  ;;  %v14889_v40 = vld [vmem:[#allocation91_spill] sm:$0xff]  ;;  %v14890_v48 = vld [vmem:[#allocation94_spill] sm:$0xff] }
 0x7ce   : > { %7761 = vmatpush.msra.mxu3 %v7760_v58  ;;  %7536 = vmatpush.msra.mxu0 %v14884_v20  ;;  %v6489_v3 = vadd.f32 %v6488_v49, %v6372_v36  ;;  %v14886_v58 = vld [vmem:[#allocation102_spill] sm:$0xff]  ;;  %v7655_v49 = vand.u32 4294901760, %v7654_v17  ;;  %v14892_v20 = vand.u32 4294901760, %v14891_v47 }
 0x7cf   : > { %7601 = vmatpush.msra.mxu1 %v14885_v63  ;;  %7648 = vmatpush.msra.mxu2 %v13411_v6  ;;  %v6266_v18 = vadd.f32 %v14886_v58, %v6185_v27  ;;  %v7661_v27 = vand.u32 4294901760, %v13508_v41  ;;  %v9134_v58 = vld [vmem:[#allocation2 + $0x38] sm:$0xff] }
 0x7d0   : > { %7767 = vmatpush.msra.mxu3 %v7766_v24  ;;  %7246 = vmatmul.f32.gmra.mxu0 %v7245_v50  ;;  %v6557_v12 = vadd.f32 %v6556_v51, %v6489_v3  ;;  %v14893_v24 = vld [vmem:[#allocation104_spill] sm:$0xff]  ;;  %v14895_v50 = vld [vmem:[#allocation98_spill] sm:$0xff]  ;;  %9059 = vtanh.f32 %v9134_v58 }
 0x7d1   : > { %7540 = vmatpush.msra.mxu0 %v14888_v57  ;;  %7603 = vmatmul.f32.vlgmr.msra.gmra.mxu1 %v14889_v40  ;;  %v6315_v51 = vadd.f32 %v14893_v24, %v6266_v18  ;;  %v14896_v3 = vand.u32 4294901760, %v14895_v50  ;;  %v14900_v57 = vld [vmem:[#allocation101_spill] sm:$0xff]  ;;  %v7662_v47 = vsub.f32 %v13508_v41, %v7661_v27 }
 0x7d2   : > { %7650 = vmatpush.msra.mxu2 %v13428_v1  ;;  %7773 = vmatpush.msra.mxu3 %v7772_v39  ;;  %v13515_v36 = vadd.f32 %v6612_v26, %v6557_v12  ;;  %v14897_v39 = vld [vmem:[#allocation31_spill] sm:$0xff]  ;;  %v14898_v12 = vld [vmem:[#allocation88_spill] sm:$0xff]  ;;  %v14903_v24 = vld [vmem:[#allocation93_spill] sm:$0xff] }
 0x7d3   : > { %7867 = vmatpush.msrb.mxu1 %v14890_v48  ;;  %7544 = vmatpush.msra.mxu0 %v14892_v20  ;;  %v13526_v17 = vand.u32 4294901760, %v14897_v39  ;;  %v14899_v13 = vand.u32 4294901760, %v14898_v12  ;;  %v14905_v12 = vld [vmem:[#allocation96_spill] sm:$0xff] }
 0x7d4   : > { %7656 = vmatmul.f32.vlgmr.msra.gmra.mxu2 %v7655_v49  ;;  %7779 = vmatpush.msra.mxu3 %v7778_v22  ;;  %v6561_v63 = vpop.f32.mrf.mxu2  ;;  %v14901_v22 = vld [vmem:[#allocation95_spill] sm:$0xff] }
 0x7d5   : > { %7869 = vmatpush.msrb.mxu1 %v14894_v25  ;;  %7926 = vmatpush.msrb.mxu2 %v14896_v3  ;;  %v6379_v26 = vpop.f32.mrf.mxu0  ;;  %v14902_v49 = vand.u32 4294901760, %v14901_v22  ;;  %v14904_v3 = vand.u32 4294901760, %v14903_v24 }
 0x7d6   : > { %7548 = vmatpush.msra.mxu0 %v14899_v13  ;;  %7781 = vmatmul.f32.vlgmr.msra.gmra.mxu3 %v13416_v15  ;;  %v6380_v18 = vadd.f32 %v6379_v26, %v6315_v51  ;;  %v14906_v51 = vand.u32 4294901760, %v14905_v12  ;;  %v13545_v26 = vsub.f32 %v14897_v39, %v13526_v17  ;;  %v6736_v13 = vpop.f32.mrf.mxu1 }
 0x7d7   : > { %7871 = vmatpush.msrb.mxu1 %v14900_v57  ;;  %7930 = vmatpush.msrb.mxu2 %v14902_v49  ;;  %v6618_v20 = vpop.f32.mrf.mxu3 }
 0x7d8   : > { %8005 = vmatpush.msrb.mxu3 %v14890_v48  ;;  %7552 = vmatpush.msra.mxu0 %v14904_v3  ;;  %v6493_v58 = vadd.f32 %v6492_v37, %v6380_v18  ;;  %v7663_v37 = vand.u32 4294901760, %v7662_v47  ;;  %v9060_v48 = vpop.eup %9059  ;;  %v14907_v18 = vld [vmem:[#allocation106_spill] sm:$0xff] }
 0x7d9   : > { %7873 = vmatpush.msrb.mxu1 %v13202_v34  ;;  %7934 = vmatpush.msrb.mxu2 %v14906_v51  ;;  %v14908_v24 = vand.u32 4294901760, %v14907_v18 }
 0x7da   : > { %8007 = vmatpush.msrb.mxu3 %v14894_v25  ;;  %7554 = vmatmul.f32.vlgmr.msra.gmra.mxu0 %v14889_v40  ;;  %v6562_v49 = vadd.f32 %v6561_v63, %v6493_v58  ;;  %v7669_v25 = vand.u32 4294901760, %v13545_v26  ;;  %v13560_v40 = vand.u32 4294901760, %v9060_v48  ;;  %v14911_v58 = vand.u32 4294901760, %v13298_v35 }
 0x7db   : > { %7607 = vmatmul.f32.gmra.mxu1 %v13240_v10  ;;  %7799 = vmatpush.msrb.mxu0 %v14895_v50  ;;  %v14909_v50 = vand.u32 4294901760, %v13257_v23 }
 0x7dc   : > { %7875 = vmatpush.msrb.mxu1 %v13223_v19  ;;  %7938 = vmatpush.msrb.mxu2 %v14908_v24  ;;  %v13554_v3 = vadd.f32 %v6618_v20, %v6562_v49  ;;  %v7670_v47 = vsub.f32 %v13545_v26, %v7669_v25 }
 0x7dd   : > { %8009 = vmatpush.msrb.mxu3 %v14900_v57  ;;  %7664 = vmatmul.f32.gmra.mxu2 %v7663_v37 }
 0x7de   : > { %7802 = vmatpush.msrb.mxu0 %v14901_v22  ;;  %7877 = vmatpush.msrb.mxu1 %v13242_v38  ;;  %v14910_v22 = vand.u32 4294901760, %v13272_v14 }
 0x7df   : > { %7942 = vmatpush.msrb.mxu2 %v14909_v50  ;;  %8011 = vmatpush.msrb.mxu3 %v13202_v34  ;;  %v6687_v39 = vpop.f32.mrf.mxu0  ;;  %v6789_v63 = vpop.f32.mrf.mxu2 }
 0x7e0   : > { %7785 = vmatmul.f32.gmra.mxu3 %v13489_v0  ;;  %7805 = vmatpush.msrb.mxu0 %v14905_v12  ;;  %v6688_v57 = vadd.f32 %v6687_v39, %v13413_v29  ;;  %v13580_v29 = vsub.f32 %v9060_v48, %v13560_v40  ;;  %v6740_v12 = vpop.f32.mrf.mxu1  ;;  %v14914_v48 = vand.u32 4294901760, %v13342_v61 }
 0x7e1   : > { %7879 = vmatpush.msrb.mxu1 %v13262_v53  ;;  %7946 = vmatpush.msrb.mxu2 %v14910_v22  ;;  %v6914_v20 = vpop.f32.mrf.mxu3 }
 0x7e2   : > { %8013 = vmatpush.msrb.mxu3 %v13223_v19  ;;  %7808 = vmatpush.msrb.mxu0 %v14907_v18  ;;  %v6737_v34 = vadd.f32 %v6736_v13, %v6688_v57  ;;  %v7671_v19 = vand.u32 4294901760, %v7670_v47  ;;  %v14912_v13 = vld [vmem:[#allocation110_spill] sm:$0xff] }
 0x7e3   : > { %7881 = vmatpush.msrb.mxu1 %v13281_v62  ;;  %7950 = vmatpush.msrb.mxu2 %v14911_v58  ;;  %v14913_v49 = vand.u32 4294901760, %v14912_v13 }
 0x7e4   : > { %8015 = vmatpush.msrb.mxu3 %v13242_v38  ;;  %7558 = vmatmul.f32.gmra.mxu0 %v13240_v10  ;;  %v6790_v51 = vadd.f32 %v6789_v63, %v6737_v34  ;;  %v7677_v38 = vand.u32 4294901760, %v13580_v29 }
 0x7e5   : > { %7611 = vmatmul.f32.gmra.mxu1 %v13310_v44  ;;  %7811 = vmatpush.msrb.mxu0 %v13257_v23 }
 0x7e6   : > { %7883 = vmatpush.msrb.mxu1 %v13305_v30  ;;  %7954 = vmatpush.msrb.mxu2 %v14913_v49  ;;  %v13589_v37 = vadd.f32 %v6914_v20, %v6790_v51 }
 0x7e7   : > { %8017 = vmatpush.msrb.mxu3 %v13262_v53  ;;  %7672 = vmatmul.f32.gmra.mxu2 %v7671_v19 }
 0x7e8   : > { %7814 = vmatpush.msrb.mxu0 %v13272_v14  ;;  %7885 = vmatpush.msrb.mxu1 %v13315_v32  ;;  %v6797_v23 = vpop.f32.mrf.mxu2  ;;  %v7678_v14 = vsub.f32 %v13580_v29, %v7677_v38 }
 0x7e9   : > { %7958 = vmatpush.msrb.mxu2 %v7734_v16  ;;  %8019 = vmatpush.msrb.mxu3 %v13281_v62  ;;  %v6691_v10 = vpop.f32.mrf.mxu0 }
 0x7ea   : > { %7789 = vmatmul.f32.gmra.mxu3 %v13526_v17  ;;  %7817 = vmatpush.msrb.mxu0 %v13298_v35  ;;  %v6692_v53 = vadd.f32 %v6691_v10, %v13477_v21  ;;  %v6744_v35 = vpop.f32.mrf.mxu1  ;;  %v7679_v18 = vand.u32 4294901760, %v7678_v14 }
 0x7eb   : > { %7887 = vmatpush.msrb.mxu1 %v13339_v33  ;;  %7962 = vmatpush.msrb.mxu2 %v14914_v48  ;;  %v6918_v16 = vpop.f32.mrf.mxu3 }
 0x7ec   : > { %8021 = vmatpush.msrb.mxu3 %v13305_v30  ;;  %7820 = vmatpush.msrb.mxu0 %v14912_v13  ;;  %v6741_v62 = vadd.f32 %v6740_v12, %v6692_v53 }
 0x7ed   : > { %7889 = vmatpush.msrb.mxu1 %v13359_v45  ;;  %7966 = vmatpush.msrb.mxu2 %v7746_v56 }
 0x7ee   : > { %8023 = vmatpush.msrb.mxu3 %v13315_v32  ;;  %7562 = vmatmul.f32.gmra.mxu0 %v13310_v44  ;;  %v6798_v21 = vadd.f32 %v6797_v23, %v6741_v62 }
 0x7ef   : > { %7615 = vmatmul.f32.gmra.mxu1 %v13386_v46  ;;  %7823 = vmatpush.msrb.mxu0 %v13335_v5 }
 0x7f0   : > { %7891 = vmatpush.msrb.mxu1 %v13380_v8  ;;  %7970 = vmatpush.msrb.mxu2 %v7752_v54  ;;  %v13619_v30 = vadd.f32 %v6918_v16, %v6798_v21 }
 0x7f1   : > { %8025 = vmatpush.msrb.mxu3 %v13339_v33  ;;  %7680 = vmatmul.f32.gmra.mxu2 %v7679_v18 }
 0x7f2   : > { %7826 = vmatpush.msrb.mxu0 %v13342_v61  ;;  %7893 = vmatpush.msrb.mxu1 %v13395_v42  ;;  %v6805_v32 = vpop.f32.mrf.mxu2 }
 0x7f3   : > { %7974 = vmatpush.msrb.mxu2 %v7758_v28  ;;  %8027 = vmatpush.msrb.mxu3 %v13359_v45  ;;  %v6695_v44 = vpop.f32.mrf.mxu0 }
 0x7f4   : > { %7793 = vmatmul.f32.gmra.mxu3 %v13560_v40  ;;  %7829 = vmatpush.msrb.mxu0 %v13375_v55  ;;  %v6696_v5 = vadd.f32 %v6695_v44, %v13515_v36  ;;  %v6748_v45 = vpop.f32.mrf.mxu1 }
 0x7f5   : > { %7895 = vmatpush.msrb.mxu1 %v13411_v6  ;;  %7978 = vmatpush.msrb.mxu2 %v7764_v4  ;;  %v6922_v33 = vpop.f32.mrf.mxu3 }
 0x7f6   : > { %8029 = vmatpush.msrb.mxu3 %v13380_v8  ;;  %7832 = vmatpush.msrb.mxu0 %v13389_v9  ;;  %v6745_v61 = vadd.f32 %v6744_v35, %v6696_v5 }
 0x7f7   : > { %7897 = vmatpush.msrb.mxu1 %v13428_v1  ;;  %7982 = vmatpush.msrb.mxu2 %v7770_v60 }
 0x7f8   : > { %8031 = vmatpush.msrb.mxu3 %v13395_v42  ;;  %7566 = vmatmul.f32.gmra.mxu0 %v13386_v46  ;;  %v6806_v55 = vadd.f32 %v6805_v32, %v6745_v61 }
 0x7f9   : > { %7835 = vmatpush.msrb.mxu0 %v13409_v59  ;;  %7901 = vmatmul.f32.vlgmr.msrb.gmra.mxu1 %v7653_v31 }
 0x7fa   : > { %7986 = vmatpush.msrb.mxu2 %v7776_v7  ;;  %8033 = vmatpush.msrb.mxu3 %v13411_v6  ;;  %v6923_v8 = vadd.f32 %v6922_v33, %v6806_v55 }
 0x7fb   : > { %7838 = vmatpush.msrb.mxu0 %v13426_v43  ;;  %7988 = vmatmul.f32.vlgmr.msrb.gmra.mxu2 %v13416_v15 }
 0x7fc   : > { %8035 = vmatpush.msrb.mxu3 %v13428_v1  ;;  %v6813_v9 = vpop.f32.mrf.mxu2 }
 0x7fd   : > { %7841 = vmatpush.msrb.mxu0 %v13442_v52  ;;  %8037 = vmatmul.f32.vlgmr.msrb.gmra.mxu3 %v13416_v15  ;;  %v6699_v46 = vpop.f32.mrf.mxu0 }
 0x7fe   : > { %v6700_v42 = vadd.f32 %v6699_v46, %v13554_v3  ;;  %v7034_v6 = vpop.f32.mrf.mxu1 }
 0x7ff   : > { %7844 = vmatpush.msrb.mxu0 %v13453_v11  ;;  %v6926_v56 = vpop.f32.mrf.mxu3 }
 0x800   : > { %7847 = vmatmul.f32.vlgmr.msrb.gmra.mxu0 %v13460_v2  ;;  %v6749_v59 = vadd.f32 %v6748_v45, %v6700_v42 }
 0x801   : > { %7907 = vmatmul.f32.gmra.mxu1 %v7661_v27 }
 0x802   : > { %v6814_v54 = vadd.f32 %v6813_v9, %v6749_v59 }
 0x803   : > { %7992 = vmatmul.f32.gmra.mxu2 %v13489_v0 }
 0x804   : > { %v6927_v43 = vadd.f32 %v6926_v56, %v6814_v54 }
 0x805   : > { %8041 = vmatmul.f32.gmra.mxu3 %v13489_v0 }
 0x807   : > { %v6980_v15 = vpop.f32.mrf.mxu0  ;;  %v7121_v1 = vpop.f32.mrf.mxu2 }
 0x808   : > { %7852 = vmatmul.f32.gmra.mxu0 %v13508_v41  ;;  %v6981_v28 = vadd.f32 %v6980_v15, %v13589_v37  ;;  %v7040_v11 = vpop.f32.mrf.mxu1 }
 0x809   : > { %7913 = vmatmul.f32.gmra.mxu1 %v7669_v25  ;;  %v7170_v52 = vpop.f32.mrf.mxu3 }
 0x80a   : > { %v7035_v4 = vadd.f32 %v7034_v6, %v6981_v28 }
 0x80b   : > { %7996 = vmatmul.f32.gmra.mxu2 %v13526_v17 }
 0x80c   : > { %v7122_v2 = vadd.f32 %v7121_v1, %v7035_v4 }
 0x80d   : > { %8045 = vmatmul.f32.gmra.mxu3 %v13526_v17 }
 0x80e   : > { %v7171_v60 = vadd.f32 %v7170_v52, %v7122_v2 }
 0x810   : > { %7857 = vmatmul.f32.gmra.mxu0 %v13545_v26  ;;  %v7125_v31 = vpop.f32.mrf.mxu2 }
 0x811   : > { %7919 = vmatmul.f32.gmra.mxu1 %v7677_v38  ;;  %v6985_v7 = vpop.f32.mrf.mxu0 }
 0x812   : > { %v6986_v0 = vadd.f32 %v6985_v7, %v13619_v30  ;;  %v7046_v27 = vpop.f32.mrf.mxu1 }
 0x813   : > { %8000 = vmatmul.f32.gmra.mxu2 %v13560_v40  ;;  %v7174_v41 = vpop.f32.mrf.mxu3 }
 0x814   : > { %v7041_v36 = vadd.f32 %v7040_v11, %v6986_v0 }
 0x815   : > { %8049 = vmatmul.f32.gmra.mxu3 %v13560_v40 }
 0x816   : > { %v7126_v24 = vadd.f32 %v7125_v31, %v7041_v36 }
 0x818   : > { %7862 = vmatmul.f32.gmra.mxu0 %v13580_v29  ;;  %v7175_v17 = vadd.f32 %v7174_v41, %v7126_v24 }
 0x81a   : > { %v7129_v26 = vpop.f32.mrf.mxu2 }
 0x81b   : > { %v6990_v3 = vpop.f32.mrf.mxu0 }
 0x81c   : > { %v6991_v25 = vadd.f32 %v6990_v3, %v6923_v8  ;;  %v7052_v63 = vpop.f32.mrf.mxu1 }
 0x81d   : > { %v7178_v50 = vpop.f32.mrf.mxu3 }
 0x81e   : > { %v7047_v39 = vadd.f32 %v7046_v27, %v6991_v25 }
 0x820   : > { %v7130_v57 = vadd.f32 %v7129_v26, %v7047_v39 }
 0x822   : > { %v7179_v22 = vadd.f32 %v7178_v50, %v7130_v57 }
 0x824   : > { %v7133_v20 = vpop.f32.mrf.mxu2 }
 0x825   : > { %v6995_v47 = vpop.f32.mrf.mxu0 }
 0x826   : > { %v6996_v34 = vadd.f32 %v6995_v47, %v6927_v43  ;;  %v7348_v51 = vpop.f32.mrf.mxu1 }
 0x827   : > { %v7182_v58 = vpop.f32.mrf.mxu3 }
 0x828   : > { %v7053_v12 = vadd.f32 %v7052_v63, %v6996_v34 }
 0x82a   : > { %v7134_v40 = vadd.f32 %v7133_v20, %v7053_v12 }
 0x82c   : > { %v7183_v19 = vadd.f32 %v7182_v58, %v7134_v40 }
 0x82f   : > { %v7223_v13 = vpop.f32.mrf.mxu0  ;;  %v7414_v49 = vpop.f32.mrf.mxu2 }
 0x830   : > { %v7352_v37 = vpop.f32.mrf.mxu1  ;;  %v7224_v55 = vadd.f32 %v7223_v13, %v7171_v60 }
 0x831   : > { %v7468_v29 = vpop.f32.mrf.mxu3 }
 0x832   : > { %v7349_v9 = vadd.f32 %v7348_v51, %v7224_v55 }
 0x834   : > { %v7415_v42 = vadd.f32 %v7414_v49, %v7349_v9 }
 0x836   : > { %v7469_v43 = vadd.f32 %v7468_v29, %v7415_v42 }
 0x838   : > { %v7419_v10 = vpop.f32.mrf.mxu2 }
 0x839   : > { %v7231_v38 = vpop.f32.mrf.mxu0 }
 0x83a   : > { %v7356_v53 = vpop.f32.mrf.mxu1  ;;  %v7232_v56 = vadd.f32 %v7231_v38, %v7175_v17 }
 0x83b   : > { %v7474_v23 = vpop.f32.mrf.mxu3 }
 0x83c   : > { %v7353_v15 = vadd.f32 %v7352_v37, %v7232_v56 }
 0x83e   : > { %v7420_v52 = vadd.f32 %v7419_v10, %v7353_v15 }
 0x840   : > { %v7475_v31 = vadd.f32 %v7474_v23, %v7420_v52 }
 0x842   : > { %v7424_v14 = vpop.f32.mrf.mxu2 }
 0x843   : > { %v7239_v48 = vpop.f32.mrf.mxu0 }
 0x844   : > { %v7360_v62 = vpop.f32.mrf.mxu1  ;;  %v7240_v4 = vadd.f32 %v7239_v48, %v7179_v22 }
 0x845   : > { %v7480_v16 = vpop.f32.mrf.mxu3 }
 0x846   : > { %v7357_v0 = vadd.f32 %v7356_v53, %v7240_v4 }
 0x848   : > { %v7425_v24 = vadd.f32 %v7424_v14, %v7357_v0 }
 0x84a   : > { %v7481_v50 = vadd.f32 %v7480_v16, %v7425_v24 }
 0x84c   : > { %v7429_v21 = vpop.f32.mrf.mxu2 }
 0x84d   : > { %v7247_v35 = vpop.f32.mrf.mxu0 }
 0x84e   : > { %v7604_v30 = vpop.f32.mrf.mxu1  ;;  %v7248_v17 = vadd.f32 %v7247_v35, %v7183_v19 }
 0x84f   : > { %v7486_v18 = vpop.f32.mrf.mxu3 }
 0x850   : > { %v7361_v39 = vadd.f32 %v7360_v62, %v7248_v17 }
 0x852   : > { %v7430_v58 = vadd.f32 %v7429_v21, %v7361_v39 }
 0x854   : > { %v7487_v29 = vadd.f32 %v7486_v18, %v7430_v58 }
 0x857   : > { %v7555_v44 = vpop.f32.mrf.mxu0  ;;  %v7657_v32 = vpop.f32.mrf.mxu2 }
 0x858   : > { %v7608_v33 = vpop.f32.mrf.mxu1  ;;  %v7556_v28 = vadd.f32 %v7555_v44, %v7469_v43 }
 0x859   : > { %v7782_v5 = vpop.f32.mrf.mxu3 }
 0x85a   : > { %v7605_v11 = vadd.f32 %v7604_v30, %v7556_v28 }
 0x85c   : > { %v7658_v41 = vadd.f32 %v7657_v32, %v7605_v11 }
 0x85e   : > { %v7783_v3 = vadd.f32 %v7782_v5, %v7658_v41 }
 0x860   : > { %v7665_v61 = vpop.f32.mrf.mxu2 }
 0x861   : > { %v7559_v45 = vpop.f32.mrf.mxu0 }
 0x862   : > { %v7612_v46 = vpop.f32.mrf.mxu1  ;;  %v7560_v36 = vadd.f32 %v7559_v45, %v7475_v31 }
 0x863   : > { %v7786_v8 = vpop.f32.mrf.mxu3 }
 0x864   : > { %v7609_v26 = vadd.f32 %v7608_v33, %v7560_v36 }
 0x866   : > { %v7666_v22 = vadd.f32 %v7665_v61, %v7609_v26 }
 0x868   : > { %v7787_v40 = vadd.f32 %v7786_v8, %v7666_v22 }
 0x86a   : > { %v7673_v59 = vpop.f32.mrf.mxu2 }
 0x86b   : > { %v7563_v6 = vpop.f32.mrf.mxu0 }
 0x86c   : > { %v7616_v1 = vpop.f32.mrf.mxu1  ;;  %v7564_v47 = vadd.f32 %v7563_v6, %v7481_v50 }
 0x86d   : > { %v7790_v54 = vpop.f32.mrf.mxu3 }
 0x86e   : > { %v7613_v13 = vadd.f32 %v7612_v46, %v7564_v47 }
 0x870   : > { %v7674_v10 = vadd.f32 %v7673_v59, %v7613_v13 }
 0x872   : > { %v7791_v16 = vadd.f32 %v7790_v54, %v7674_v10 }
 0x874   : > { %v7681_v2 = vpop.f32.mrf.mxu2 }
 0x875   : > { %v7567_v7 = vpop.f32.mrf.mxu0 }
 0x876   : > { %v7902_v27 = vpop.f32.mrf.mxu1  ;;  %v7568_v23 = vadd.f32 %v7567_v7, %v7487_v29 }
 0x877   : > { %v7794_v60 = vpop.f32.mrf.mxu3 }
 0x878   : > { %v7617_v62 = vadd.f32 %v7616_v1, %v7568_v23 }
 0x87a   : > { %v7682_v18 = vadd.f32 %v7681_v2, %v7617_v62 }
 0x87c   : > { %v7795_v45 = vadd.f32 %v7794_v60, %v7682_v18 }
 0x87d   : > { %v7848_v25 = vpop.f32.mrf.mxu0 }
 0x87e   : > { %v7849_v63 = vadd.f32 %v7848_v25, %v7783_v3  ;;  %v7989_v57 = vpop.f32.mrf.mxu2  ;;  %v7908_v51 = vpop.f32.mrf.mxu1 }
 0x880   : > { %v7903_v20 = vadd.f32 %v7902_v27, %v7849_v63  ;;  %v8038_v34 = vpop.f32.mrf.mxu3 }
 0x882   : > { %v7990_v12 = vadd.f32 %v7989_v57, %v7903_v20 }
 0x884   : > { %v8039_v49 = vadd.f32 %v8038_v34, %v7990_v12 }
 0x885   : > { %v7853_v19 = vpop.f32.mrf.mxu0 }
 0x886   : > { %8053 = vst [vmem:[%s9539_s15] sm:$0xff] %v8039_v49  ;;  %v7854_v37 = vadd.f32 %v7853_v19, %v7787_v40  ;;  %v7993_v38 = vpop.f32.mrf.mxu2  ;;  %v7914_v21 = vpop.f32.mrf.mxu1 }
 0x888   : > { %v7909_v53 = vadd.f32 %v7908_v51, %v7854_v37  ;;  %v8042_v48 = vpop.f32.mrf.mxu3 }
 0x88a   : > { %v7994_v14 = vadd.f32 %v7993_v38, %v7909_v53 }
 0x88c   : > { %v8043_v35 = vadd.f32 %v8042_v48, %v7994_v14 }
 0x88d   : > { %v7858_v30 = vpop.f32.mrf.mxu0 }
 0x88e   : > { %8054 = vst [vmem:[%s9539_s15 + $0x8] sm:$0xff] %v8043_v35  ;;  %v7859_v44 = vadd.f32 %v7858_v30, %v7791_v16  ;;  %v7997_v32 = vpop.f32.mrf.mxu2  ;;  %v7920_v9 = vpop.f32.mrf.mxu1 }
 0x890   : > { %v7915_v5 = vadd.f32 %v7914_v21, %v7859_v44  ;;  %v8046_v33 = vpop.f32.mrf.mxu3 }
 0x892   : > { %v7998_v61 = vadd.f32 %v7997_v32, %v7915_v5 }
 0x894   : > { %v8047_v55 = vadd.f32 %v8046_v33, %v7998_v61 }
 0x895   : > { %v7863_v8 = vpop.f32.mrf.mxu0 }
 0x896   : > { %8055 = vst [vmem:[%s9539_s15 + $0x10] sm:$0xff] %v8047_v55  ;;  %v7864_v46 = vadd.f32 %v7863_v8, %v7795_v45  ;;  %v8001_v56 = vpop.f32.mrf.mxu2 }
 0x898   : > { %v7921_v42 = vadd.f32 %v7920_v9, %v7864_v46  ;;  %v8050_v6 = vpop.f32.mrf.mxu3 }
 0x89a   : > { %v8002_v59 = vadd.f32 %v8001_v56, %v7921_v42 }
 0x89c   : > { %v8051_v54 = vadd.f32 %v8050_v6, %v8002_v59 }
 0x89e   : > { %8056 = vst [vmem:[%s9539_s15 + $0x18] sm:$0xff] %v8051_v54 }
 0x89f   : > { %9282 = shalt.err (!%p9279_p3)
}
 0x8a0   : > { %s9358_s19 = smov 128   ;;  %s9359_s15 = smov 8  }
 0x8a1   : > { %8892 = dma.vmem_to_hbm [thread:$0]  (%p9485_p0), %s8072_s14, 512, %s8074_s20, %s8058_s24, %s9358_s19, %s9358_s19, %s9359_s15  }
 0x8a2 PF: > { %p8919_p5 = scmp.ge.s32.totalorder %s9345_s26, 2  ;;  %s8088_s12 = sand.u32 1, %s9325_s21  }
 0x8a3   : > { %s8089_s28 = scalar_lea.sflag [#allocation7], %s8088_s12 }
 0x8a4   : > { %p8909_p7 = pnand %p8919_p5, %p9444_p6 }
 0x8a6   : > { %p8910_p2 = pneg %p8909_p7 }
 0x8a8   : > { %9320 = dma.done.wait (%p8910_p2), %s8089_s28, 512  }
 0x8a9   : > { %9322 = vsyncadd (%p8910_p2), %s8089_s28, 4294966784  ;;  %s24_s26 = sadd.s32 1, %s9345_s26   ;;  %s14915_s18 = sld [smem:[#allocation18_spill]] }
 0x8aa   : > { %p21_p8 = scmp.ge.s32.totalorder %s24_s26, 5   ;;  %s14916_s21 = smov %s9329_s22 }
 0x8ab   : > { %s14917_s22 = smov %s9333_s23  ;;  %s14918_s23 = smov %s9501_s30 }
 0x8ac   : > { %s14919_s24 = smov %s9341_s25  ;;  %23 = sbr.rel (!%p21_p8) target bundleno = 12 (0xc), region = 116 }
 0x8af   : > { %s14920_s25 = smov %s14915_s18 }
 0x8b1   :  { %8095 = vsyncpa [#allocation6], 1 }
 0x8b2   :  { %8097 = vsyncpa [#allocation6 + $0x1], 1 }
 0x8b3   :  { %8098 = vsyncpa [#allocation9], 1 }
 0x8b4   :  { %8099 = vsyncpa [#allocation12], 1 }
 0x8b5   :  { %8100 = vsyncpa [#allocation7], 1 }
 0x8b6   :  { %8102 = vsyncpa [#allocation7 + $0x1], 1 }

</bundles_post_ra>
